<compile_context>
chip_gen: v7x
topology: tpu7x:2x2x1
jax: 0.10.0
libtpu: 0.0.40
codegen_flags: <defaults>
</compile_context>

<pallas_src>
import functools

import jax
import jax.numpy as jnp
from jax.experimental import pallas as pl
from jax.experimental.pallas import tpu as pltpu


# ----------------------------------------------------------------------------
# Fused Pallas kernel: full 5-layer generator for one image
# ----------------------------------------------------------------------------
def _singan_fused_kernel(x_ref, w_ref, scale_ref, bias_ref, wf_ref, bf_ref,
                         out_ref, pad_ref, patch_ref,
                         *, H, W, cin, mid, n_mid):
    # x_ref    : (1, H, W, cin)       f32   one image, NHWC
    # w_ref    : (n_mid, 9*mid, mid)  bf16  im2col weights of the conv+BN blocks
    # scale_ref: (n_mid, mid)         f32   folded BN scale
    # bias_ref : (n_mid, mid)         f32   folded BN bias (incl. conv bias)
    # wf_ref   : (cin, 9*mid)         bf16  final conv weight, channel-major
    # bf_ref   : (cin, 1)             f32   final conv bias
    # out_ref  : (1, cin, H*W)        f32   output, channel-major (lane-dense store)
    # pad_ref  : (H+2, W+2, mid)      f32   zero-padded activation (VMEM scratch)
    # patch_ref: (H*W, 9*mid)         bf16  im2col patch (VMEM scratch)
    hw = H * W

    # Zero the padded buffer once per image: the 1-pixel border ring stays zero
    # for every layer, and channels cin..mid of the interior stay zero for the
    # first (channel-padded) layer.
    pad_ref[...] = jnp.zeros_like(pad_ref)
    pad_ref[1:H + 1, 1:W + 1, 0:cin] = x_ref[0].astype(pad_ref.dtype)

    def build_patch():
        # patch[y*W + x, tap*mid + c] = pad[y+dy, x+dx, c],  tap = dy*3 + dx
        for tap in range(9):
            dy, dx = tap // 3, tap % 3
            slab = pad_ref[dy:dy + H, dx:dx + W, :]            # (H, W, mid)
            patch_ref[:, tap * mid:(tap + 1) * mid] = (
                slab.reshape(hw, mid).astype(patch_ref.dtype))

    # 4 x (conv3x3 -> folded-BN affine -> LeakyReLU), all VMEM resident.
    # Accumulator is pixel-major (H*W, mid) so the reshape to/from the padded
    # buffer is layout-preserving (sublane collapse/split only).
    for layer in range(n_mid):
        build_patch()
        acc = jnp.dot(patch_ref[...], w_ref[layer],
                      preferred_element_type=jnp.float32)       # (H*W, mid) f32
        acc = acc * scale_ref[layer:layer + 1, :] + bias_ref[layer:layer + 1, :]
        acc = jnp.where(acc > 0, acc, 0.01 * acc)               # LeakyReLU(0.01)
        pad_ref[1:H + 1, 1:W + 1, :] = acc.reshape(H, W, mid).astype(pad_ref.dtype)

    # Final conv3x3 -> +bias -> tanh, channel-major so the output store has
    # H*W lanes instead of `cin` lanes.
    build_patch()
    out_cm = jax.lax.dot_general(
        wf_ref[...], patch_ref[...],
        dimension_numbers=(((1,), (1,)), ((), ())),             # A @ B^T on the MXU
        preferred_element_type=jnp.float32)                     # (cin, H*W) f32
    out_cm = jnp.tanh(out_cm + bf_ref[...])
    out_ref[0] = out_cm.astype(out_ref.dtype)


def singan_generator_model(packed, x_nchw):
    """Runs the fused 5-layer generator model. x and result are NCHW float32."""
    w_mid, scale_mid, bias_mid, w_fin, b_fin = packed
    N, cin, H, W = x_nchw.shape
    n_mid, K, mid = w_mid.shape
    assert K == 9 * mid and w_fin.shape == (cin, K)

    x_nhwc = jnp.transpose(x_nchw, (0, 2, 3, 1))                # (N, H, W, cin)
    kernel = functools.partial(_singan_fused_kernel,
                               H=H, W=W, cin=cin, mid=mid, n_mid=n_mid)
    out = pl.pallas_call(
        kernel,
        out_shape=jax.ShapeDtypeStruct((N, cin, H * W), jnp.float32),
        grid=(N,),
        in_specs=[
            pl.BlockSpec((1, H, W, cin), lambda n: (n, 0, 0, 0)),
            pl.BlockSpec((n_mid, K, mid), lambda n: (0, 0, 0)),
            pl.BlockSpec((n_mid, mid), lambda n: (0, 0)),
            pl.BlockSpec((n_mid, mid), lambda n: (0, 0)),
            pl.BlockSpec((cin, K), lambda n: (0, 0)),
            pl.BlockSpec((cin, 1), lambda n: (0, 0)),
        ],
        out_specs=pl.BlockSpec((1, cin, H * W), lambda n: (n, 0, 0)),
        scratch_shapes=[
            pltpu.VMEM((H + 2, W + 2, mid), jnp.float32),       # padded activation
            pltpu.VMEM((H * W, K), w_mid.dtype),                # im2col patch (bf16)
        ],
        compiler_params=pltpu.CompilerParams(
            dimension_semantics=("parallel",),                  # v7x: one image per TC
        ),
    )(x_nhwc, w_mid, scale_mid, bias_mid, w_fin, b_fin)
    return out.reshape(N, cin, H, W)                            # NCHW, like PyTorch


def generator_forward(packed, noise, pre_output=None):
    """Generator.forward semantics (NCHW tensors)."""
    x = noise if pre_output is None else noise + pre_output
    out = singan_generator_model(packed, x)
    if pre_output is not None:
        out = out + pre_output
    return out


# ----------------------------------------------------------------------------
# Parameter construction (deterministic, synthetic) + packing for the kernel
# ----------------------------------------------------------------------------
def _fold_bn(conv_b, gamma, beta, mean, var, eps=1e-5):
    scale = gamma / jnp.sqrt(var + eps)
    bias = scale * (conv_b - mean) + beta
    return scale, bias


def make_generator_params(key, in_channels, middle_channels, n_mid_layers=4):
    """Raw parameters: per mid layer (w_hwio, folded scale, folded bias); final (w_hwio, b)."""
    mid_layers = []
    cin = in_channels
    for i in range(n_mid_layers):
        k = jax.random.fold_in(key, i)
        kw, kb, kg, kbe, km, kv = jax.random.split(k, 6)
        w = 0.05 * jax.random.normal(kw, (3, 3, cin, middle_channels), jnp.float32)
        conv_b = 0.05 * jax.random.normal(kb, (middle_channels,), jnp.float32)
        gamma = 1.0 + 0.05 * jax.random.normal(kg, (middle_channels,), jnp.float32)
        beta = 0.05 * jax.random.normal(kbe, (middle_channels,), jnp.float32)
        mean = 0.05 * jax.random.normal(km, (middle_channels,), jnp.float32)
        var = 1.0 + 0.1 * jax.random.uniform(kv, (middle_channels,), jnp.float32)
        scale, bias = _fold_bn(conv_b, gamma, beta, mean, var)
        mid_layers.append((w, scale, bias))
        cin = middle_channels

    k = jax.random.fold_in(key, 100)
    kw, kb = jax.random.split(k, 2)
    w_fin = 0.05 * jax.random.normal(kw, (3, 3, middle_channels, in_channels), jnp.float32)
    b_fin = 0.05 * jax.random.normal(kb, (in_channels,), jnp.float32)
    return {"mid": mid_layers, "final": (w_fin, b_fin)}


def pack_generator_params(params, compute_dtype=jnp.bfloat16):
    """Pack raw params into the kernel's im2col layout (bf16 MXU operands)."""
    mid = params["mid"][0][0].shape[-1]
    w_stack, s_stack, b_stack = [], [], []
    for (w, scale, bias) in params["mid"]:
        cin_l = w.shape[2]
        if cin_l < mid:  # zero-pad input channels so every layer has K = 9*mid (exact)
            w = jnp.pad(w, ((0, 0), (0, 0), (0, mid - cin_l), (0, 0)))
        w_stack.append(w.reshape(9 * mid, mid))        # row index = tap*mid + c
        s_stack.append(scale)
        b_stack.append(bias)
    w_mid = jnp.stack(w_stack).astype(compute_dtype)            # (L, 9*mid, mid)
    scale_mid = jnp.stack(s_stack).astype(jnp.float32)          # (L, mid)
    bias_mid = jnp.stack(b_stack).astype(jnp.float32)           # (L, mid)

    w_fin, b_fin = params["final"]
    cout = w_fin.shape[-1]
    w_fin_cm = w_fin.reshape(9 * mid, cout).T.astype(compute_dtype)   # (cout, 9*mid)
    b_fin_col = b_fin.reshape(cout, 1).astype(jnp.float32)            # (cout, 1)
    return (w_mid, scale_mid, bias_mid, w_fin_cm, b_fin_col)


# ----------------------------------------------------------------------------
# Pure-JAX reference (same bf16 cast points, f32 accumulation) for validation
# ----------------------------------------------------------------------------
def generator_reference(raw_params, noise, pre_output=None):
    x = noise if pre_output is None else noise + pre_output     # NCHW
    h = jnp.transpose(x, (0, 2, 3, 1))                          # NHWC f32
    for (w_hwio, scale, bias) in raw_params["mid"]:
        y = jax.lax.conv_general_dilated(
            h.astype(jnp.bfloat16), w_hwio.astype(jnp.bfloat16),
            window_strides=(1, 1), padding="SAME",
            dimension_numbers=("NHWC", "HWIO", "NHWC"),
            preferred_element_type=jnp.float32)
        y = y * scale + bias
        h = jnp.where(y > 0, y, 0.01 * y)
    w_hwio, b = raw_params["final"]
    y = jax.lax.conv_general_dilated(
        h.astype(jnp.bfloat16), w_hwio.astype(jnp.bfloat16),
        window_strides=(1, 1), padding="SAME",
        dimension_numbers=("NHWC", "HWIO", "NHWC"),
        preferred_element_type=jnp.float32)
    y = jnp.tanh(y + b)
    out = jnp.transpose(y, (0, 3, 1, 2))                        # NCHW
    if pre_output is not None:
        out = out + pre_output
    return out


if __name__ == "__main__":
    # PyTorch NCHW input [N, C, H, W] = [2, 4, 16, 16], middle_channels = 32.
    N, C, H, W = 2, 4, 16, 16
    MID = 32

    key = jax.random.PRNGKey(0)
    k_noise, k_pre, k_params = jax.random.split(key, 3)
    noise = jax.random.normal(k_noise, (N, C, H, W), jnp.float32)
    pre_output = jax.random.normal(k_pre, (N, C, H, W), jnp.float32)

    raw = make_generator_params(k_params, in_channels=C, middle_channels=MID)
    packed = pack_generator_params(raw)

    gen = jax.jit(generator_forward)

    # Path with pre_output: model(noise + pre_output) + pre_output
    out = jax.block_until_ready(gen(packed, noise, pre_output))
    assert out.shape == (N, C, H, W), out.shape
    ref = jax.block_until_ready(generator_reference(raw, noise, pre_output))
    err = float(jnp.max(jnp.abs(out - ref)))
    assert err < 2e-2, f"max abs error vs reference: {err}"

    # Path without pre_output: model(noise)
    out2 = jax.block_until_ready(gen(packed, noise, None))
    assert out2.shape == (N, C, H, W), out2.shape
    ref2 = jax.block_until_ready(generator_reference(raw, noise, None))
    err2 = float(jnp.max(jnp.abs(out2 - ref2)))
    assert err2 < 2e-2, f"max abs error vs reference (no pre_output): {err2}"

    print("KERNEL_OK")
</pallas_src>

<mosaic_0001>
module attributes {stable_mosaic.version = 11 : i64} {
  func.func @_singan_fused_kernel(%arg0: i32, %arg1: memref<1x16x16x4xf32, #tpu.memory_space<vmem>>, %arg2: memref<4x288x32xbf16, #tpu.memory_space<vmem>>, %arg3: memref<4x32xf32, #tpu.memory_space<vmem>>, %arg4: memref<4x32xf32, #tpu.memory_space<vmem>>, %arg5: memref<4x288xbf16, #tpu.memory_space<vmem>>, %arg6: memref<4x1xf32, #tpu.memory_space<vmem>>, %arg7: memref<1x4x256xf32, #tpu.memory_space<vmem>>, %arg8: memref<18x18x32xf32, #tpu.memory_space<vmem>>, %arg9: memref<256x288xbf16, #tpu.memory_space<vmem>>) attributes {dimension_semantics = [#tpu.dimension_semantics<parallel>], iteration_bounds = array<i64: 2>, scalar_prefetch = 0 : i64, scratch_operands = 2 : i64, tpu.core_type = #tpu.core_type<tc>, window_params = [{transform_indices = @transform_0, window_bounds = array<i64: 1, 16, 16, 4>}, {pipeline_mode = #tpu.pipeline_mode<synchronous>, transform_indices = @transform_1, window_bounds = array<i64: 4, 288, 32>}, {pipeline_mode = #tpu.pipeline_mode<synchronous>, transform_indices = @transform_2, window_bounds = array<i64: 4, 32>}, {pipeline_mode = #tpu.pipeline_mode<synchronous>, transform_indices = @transform_3, window_bounds = array<i64: 4, 32>}, {pipeline_mode = #tpu.pipeline_mode<synchronous>, transform_indices = @transform_4, window_bounds = array<i64: 4, 288>}, {pipeline_mode = #tpu.pipeline_mode<synchronous>, transform_indices = @transform_5, window_bounds = array<i64: 4, 1>}, {transform_indices = @transform_6, window_bounds = array<i64: 1, 4, 256>}]} {
    %cst = arith.constant 0.000000e+00 : f32
    %0 = vector.broadcast %cst : f32 to vector<18x18x32xf32>
    %c0 = arith.constant 0 : index
    %c0_0 = arith.constant 0 : index
    %c0_1 = arith.constant 0 : index
    %1 = vector.load %arg8[%c0, %c0_0, %c0_1] : memref<18x18x32xf32, #tpu.memory_space<vmem>>, vector<18x18x32xf32>
    tpu.vector_store %arg8[%c0, %c0_0, %c0_1], %0 {strides = array<i32>} : memref<18x18x32xf32, #tpu.memory_space<vmem>>, vector<18x18x32xf32>,
    %c0_2 = arith.constant 0 : index
    %c0_3 = arith.constant 0 : index
    %c0_4 = arith.constant 0 : index
    %c0_5 = arith.constant 0 : index
    %2 = vector.load %arg1[%c0_2, %c0_3, %c0_4, %c0_5] : memref<1x16x16x4xf32, #tpu.memory_space<vmem>>, vector<1x16x16x4xf32>
    %3 = vector.shape_cast %2 : vector<1x16x16x4xf32> to vector<16x16x4xf32>
    %c1 = arith.constant 1 : index
    %c1_6 = arith.constant 1 : index
    %c0_7 = arith.constant 0 : index
    %4 = vector.load %arg8[%c1, %c1_6, %c0_7] : memref<18x18x32xf32, #tpu.memory_space<vmem>>, vector<16x16x4xf32>
    tpu.vector_store %arg8[%c1, %c1_6, %c0_7], %3 {strides = array<i32>} : memref<18x18x32xf32, #tpu.memory_space<vmem>>, vector<16x16x4xf32>,
    %c0_8 = arith.constant 0 : index
    %c0_9 = arith.constant 0 : index
    %c0_10 = arith.constant 0 : index
    %5 = vector.load %arg8[%c0_8, %c0_9, %c0_10] : memref<18x18x32xf32, #tpu.memory_space<vmem>>, vector<16x16x32xf32>
    %6 = vector.shape_cast %5 : vector<16x16x32xf32> to vector<256x32xf32>
    %7 = arith.truncf %6 : vector<256x32xf32> to vector<256x32xbf16>
    %c0_11 = arith.constant 0 : index
    %c0_12 = arith.constant 0 : index
    %8 = vector.load %arg9[%c0_11, %c0_12] : memref<256x288xbf16, #tpu.memory_space<vmem>>, vector<256x32xbf16>
    tpu.vector_store %arg9[%c0_11, %c0_12], %7 {strides = array<i32>} : memref<256x288xbf16, #tpu.memory_space<vmem>>, vector<256x32xbf16>,
    %c0_13 = arith.constant 0 : index
    %c1_14 = arith.constant 1 : index
    %c0_15 = arith.constant 0 : index
    %9 = vector.load %arg8[%c0_13, %c1_14, %c0_15] : memref<18x18x32xf32, #tpu.memory_space<vmem>>, vector<16x16x32xf32>
    %10 = vector.shape_cast %9 : vector<16x16x32xf32> to vector<256x32xf32>
    %11 = arith.truncf %10 : vector<256x32xf32> to vector<256x32xbf16>
    %c0_16 = arith.constant 0 : index
    %c32 = arith.constant 32 : index
    %12 = vector.load %arg9[%c0_16, %c32] : memref<256x288xbf16, #tpu.memory_space<vmem>>, vector<256x32xbf16>
    tpu.vector_store %arg9[%c0_16, %c32], %11 {strides = array<i32>} : memref<256x288xbf16, #tpu.memory_space<vmem>>, vector<256x32xbf16>,
    %c0_17 = arith.constant 0 : index
    %c2 = arith.constant 2 : index
    %c0_18 = arith.constant 0 : index
    %13 = vector.load %arg8[%c0_17, %c2, %c0_18] : memref<18x18x32xf32, #tpu.memory_space<vmem>>, vector<16x16x32xf32>
    %14 = vector.shape_cast %13 : vector<16x16x32xf32> to vector<256x32xf32>
    %15 = arith.truncf %14 : vector<256x32xf32> to vector<256x32xbf16>
    %c0_19 = arith.constant 0 : index
    %c64 = arith.constant 64 : index
    %16 = vector.load %arg9[%c0_19, %c64] : memref<256x288xbf16, #tpu.memory_space<vmem>>, vector<256x32xbf16>
    tpu.vector_store %arg9[%c0_19, %c64], %15 {strides = array<i32>} : memref<256x288xbf16, #tpu.memory_space<vmem>>, vector<256x32xbf16>,
    %c1_20 = arith.constant 1 : index
    %c0_21 = arith.constant 0 : index
    %c0_22 = arith.constant 0 : index
    %17 = vector.load %arg8[%c1_20, %c0_21, %c0_22] : memref<18x18x32xf32, #tpu.memory_space<vmem>>, vector<16x16x32xf32>
    %18 = vector.shape_cast %17 : vector<16x16x32xf32> to vector<256x32xf32>
    %19 = arith.truncf %18 : vector<256x32xf32> to vector<256x32xbf16>
    %c0_23 = arith.constant 0 : index
    %c96 = arith.constant 96 : index
    %20 = vector.load %arg9[%c0_23, %c96] : memref<256x288xbf16, #tpu.memory_space<vmem>>, vector<256x32xbf16>
    tpu.vector_store %arg9[%c0_23, %c96], %19 {strides = array<i32>} : memref<256x288xbf16, #tpu.memory_space<vmem>>, vector<256x32xbf16>,
    %c1_24 = arith.constant 1 : index
    %c1_25 = arith.constant 1 : index
    %c0_26 = arith.constant 0 : index
    %21 = vector.load %arg8[%c1_24, %c1_25, %c0_26] : memref<18x18x32xf32, #tpu.memory_space<vmem>>, vector<16x16x32xf32>
    %22 = vector.shape_cast %21 : vector<16x16x32xf32> to vector<256x32xf32>
    %23 = arith.truncf %22 : vector<256x32xf32> to vector<256x32xbf16>
    %c0_27 = arith.constant 0 : index
    %c128 = arith.constant 128 : index
    %24 = vector.load %arg9[%c0_27, %c128] : memref<256x288xbf16, #tpu.memory_space<vmem>>, vector<256x32xbf16>
    tpu.vector_store %arg9[%c0_27, %c128], %23 {strides = array<i32>} : memref<256x288xbf16, #tpu.memory_space<vmem>>, vector<256x32xbf16>,
    %c1_28 = arith.constant 1 : index
    %c2_29 = arith.constant 2 : index
    %c0_30 = arith.constant 0 : index
    %25 = vector.load %arg8[%c1_28, %c2_29, %c0_30] : memref<18x18x32xf32, #tpu.memory_space<vmem>>, vector<16x16x32xf32>
    %26 = vector.shape_cast %25 : vector<16x16x32xf32> to vector<256x32xf32>
    %27 = arith.truncf %26 : vector<256x32xf32> to vector<256x32xbf16>
    %c0_31 = arith.constant 0 : index
    %c160 = arith.constant 160 : index
    %28 = vector.load %arg9[%c0_31, %c160] : memref<256x288xbf16, #tpu.memory_space<vmem>>, vector<256x32xbf16>
    tpu.vector_store %arg9[%c0_31, %c160], %27 {strides = array<i32>} : memref<256x288xbf16, #tpu.memory_space<vmem>>, vector<256x32xbf16>,
    %c2_32 = arith.constant 2 : index
    %c0_33 = arith.constant 0 : index
    %c0_34 = arith.constant 0 : index
    %29 = vector.load %arg8[%c2_32, %c0_33, %c0_34] : memref<18x18x32xf32, #tpu.memory_space<vmem>>, vector<16x16x32xf32>
    %30 = vector.shape_cast %29 : vector<16x16x32xf32> to vector<256x32xf32>
    %31 = arith.truncf %30 : vector<256x32xf32> to vector<256x32xbf16>
    %c0_35 = arith.constant 0 : index
    %c192 = arith.constant 192 : index
    %32 = vector.load %arg9[%c0_35, %c192] : memref<256x288xbf16, #tpu.memory_space<vmem>>, vector<256x32xbf16>
    tpu.vector_store %arg9[%c0_35, %c192], %31 {strides = array<i32>} : memref<256x288xbf16, #tpu.memory_space<vmem>>, vector<256x32xbf16>,
    %c2_36 = arith.constant 2 : index
    %c1_37 = arith.constant 1 : index
    %c0_38 = arith.constant 0 : index
    %33 = vector.load %arg8[%c2_36, %c1_37, %c0_38] : memref<18x18x32xf32, #tpu.memory_space<vmem>>, vector<16x16x32xf32>
    %34 = vector.shape_cast %33 : vector<16x16x32xf32> to vector<256x32xf32>
    %35 = arith.truncf %34 : vector<256x32xf32> to vector<256x32xbf16>
    %c0_39 = arith.constant 0 : index
    %c224 = arith.constant 224 : index
    %36 = vector.load %arg9[%c0_39, %c224] : memref<256x288xbf16, #tpu.memory_space<vmem>>, vector<256x32xbf16>
    tpu.vector_store %arg9[%c0_39, %c224], %35 {strides = array<i32>} : memref<256x288xbf16, #tpu.memory_space<vmem>>, vector<256x32xbf16>,
    %c2_40 = arith.constant 2 : index
    %c2_41 = arith.constant 2 : index
    %c0_42 = arith.constant 0 : index
    %37 = vector.load %arg8[%c2_40, %c2_41, %c0_42] : memref<18x18x32xf32, #tpu.memory_space<vmem>>, vector<16x16x32xf32>
    %38 = vector.shape_cast %37 : vector<16x16x32xf32> to vector<256x32xf32>
    %39 = arith.truncf %38 : vector<256x32xf32> to vector<256x32xbf16>
    %c0_43 = arith.constant 0 : index
    %c256 = arith.constant 256 : index
    %40 = vector.load %arg9[%c0_43, %c256] : memref<256x288xbf16, #tpu.memory_space<vmem>>, vector<256x32xbf16>
    tpu.vector_store %arg9[%c0_43, %c256], %39 {strides = array<i32>} : memref<256x288xbf16, #tpu.memory_space<vmem>>, vector<256x32xbf16>,
    %c0_44 = arith.constant 0 : index
    %c0_45 = arith.constant 0 : index
    %41 = vector.load %arg9[%c0_44, %c0_45] : memref<256x288xbf16, #tpu.memory_space<vmem>>, vector<256x288xbf16>
    %c0_46 = arith.constant 0 : index
    %c0_47 = arith.constant 0 : index
    %c0_48 = arith.constant 0 : index
    %42 = vector.load %arg2[%c0_46, %c0_47, %c0_48] : memref<4x288x32xbf16, #tpu.memory_space<vmem>>, vector<1x288x32xbf16>
    %43 = vector.shape_cast %42 : vector<1x288x32xbf16> to vector<288x32xbf16>
    %cst_49 = arith.constant dense<0.000000e+00> : vector<256x32xf32>
    %44 = tpu.matmul %41, %43, %cst_49 {dimension_numbers = #tpu.dot_dimension_numbers<[1], [0], [0], [1], [0, 0, 1, 1], [], []>} : vector<256x288xbf16>, vector<288x32xbf16>, vector<256x32xf32> -> vector<256x32xf32>
    %c0_50 = arith.constant 0 : index
    %c0_51 = arith.constant 0 : index
    %45 = vector.load %arg3[%c0_50, %c0_51] : memref<4x32xf32, #tpu.memory_space<vmem>>, vector<1x32xf32>
    %46 = vector.broadcast %45 : vector<1x32xf32> to vector<256x32xf32>
    %47 = arith.mulf %44, %46 : vector<256x32xf32>
    %c0_52 = arith.constant 0 : index
    %c0_53 = arith.constant 0 : index
    %48 = vector.load %arg4[%c0_52, %c0_53] : memref<4x32xf32, #tpu.memory_space<vmem>>, vector<1x32xf32>
    %49 = vector.broadcast %48 : vector<1x32xf32> to vector<256x32xf32>
    %50 = arith.addf %47, %49 : vector<256x32xf32>
    %cst_54 = arith.constant 0.000000e+00 : f32
    %51 = vector.broadcast %cst_54 : f32 to vector<256x32xf32>
    %52 = arith.cmpf ogt, %50, %51 : vector<256x32xf32>
    %cst_55 = arith.constant 0.00999999977 : f32
    %53 = vector.broadcast %cst_55 : f32 to vector<256x32xf32>
    %54 = arith.mulf %53, %50 : vector<256x32xf32>
    %55 = arith.select %52, %50, %54 : vector<256x32xi1>, vector<256x32xf32>
    %56 = vector.shape_cast %55 : vector<256x32xf32> to vector<16x16x32xf32>
    %c1_56 = arith.constant 1 : index
    %c1_57 = arith.constant 1 : index
    %c0_58 = arith.constant 0 : index
    %57 = vector.load %arg8[%c1_56, %c1_57, %c0_58] : memref<18x18x32xf32, #tpu.memory_space<vmem>>, vector<16x16x32xf32>
    tpu.vector_store %arg8[%c1_56, %c1_57, %c0_58], %56 {strides = array<i32>} : memref<18x18x32xf32, #tpu.memory_space<vmem>>, vector<16x16x32xf32>,
    %c0_59 = arith.constant 0 : index
    %c0_60 = arith.constant 0 : index
    %c0_61 = arith.constant 0 : index
    %58 = vector.load %arg8[%c0_59, %c0_60, %c0_61] : memref<18x18x32xf32, #tpu.memory_space<vmem>>, vector<16x16x32xf32>
    %59 = vector.shape_cast %58 : vector<16x16x32xf32> to vector<256x32xf32>
    %60 = arith.truncf %59 : vector<256x32xf32> to vector<256x32xbf16>
    %c0_62 = arith.constant 0 : index
    %c0_63 = arith.constant 0 : index
    %61 = vector.load %arg9[%c0_62, %c0_63] : memref<256x288xbf16, #tpu.memory_space<vmem>>, vector<256x32xbf16>
    tpu.vector_store %arg9[%c0_62, %c0_63], %60 {strides = array<i32>} : memref<256x288xbf16, #tpu.memory_space<vmem>>, vector<256x32xbf16>,
    %c0_64 = arith.constant 0 : index
    %c1_65 = arith.constant 1 : index
    %c0_66 = arith.constant 0 : index
    %62 = vector.load %arg8[%c0_64, %c1_65, %c0_66] : memref<18x18x32xf32, #tpu.memory_space<vmem>>, vector<16x16x32xf32>
    %63 = vector.shape_cast %62 : vector<16x16x32xf32> to vector<256x32xf32>
    %64 = arith.truncf %63 : vector<256x32xf32> to vector<256x32xbf16>
    %c0_67 = arith.constant 0 : index
    %c32_68 = arith.constant 32 : index
    %65 = vector.load %arg9[%c0_67, %c32_68] : memref<256x288xbf16, #tpu.memory_space<vmem>>, vector<256x32xbf16>
    tpu.vector_store %arg9[%c0_67, %c32_68], %64 {strides = array<i32>} : memref<256x288xbf16, #tpu.memory_space<vmem>>, vector<256x32xbf16>,
    %c0_69 = arith.constant 0 : index
    %c2_70 = arith.constant 2 : index
    %c0_71 = arith.constant 0 : index
    %66 = vector.load %arg8[%c0_69, %c2_70, %c0_71] : memref<18x18x32xf32, #tpu.memory_space<vmem>>, vector<16x16x32xf32>
    %67 = vector.shape_cast %66 : vector<16x16x32xf32> to vector<256x32xf32>
    %68 = arith.truncf %67 : vector<256x32xf32> to vector<256x32xbf16>
    %c0_72 = arith.constant 0 : index
    %c64_73 = arith.constant 64 : index
    %69 = vector.load %arg9[%c0_72, %c64_73] : memref<256x288xbf16, #tpu.memory_space<vmem>>, vector<256x32xbf16>
    tpu.vector_store %arg9[%c0_72, %c64_73], %68 {strides = array<i32>} : memref<256x288xbf16, #tpu.memory_space<vmem>>, vector<256x32xbf16>,
    %c1_74 = arith.constant 1 : index
    %c0_75 = arith.constant 0 : index
    %c0_76 = arith.constant 0 : index
    %70 = vector.load %arg8[%c1_74, %c0_75, %c0_76] : memref<18x18x32xf32, #tpu.memory_space<vmem>>, vector<16x16x32xf32>
    %71 = vector.shape_cast %70 : vector<16x16x32xf32> to vector<256x32xf32>
    %72 = arith.truncf %71 : vector<256x32xf32> to vector<256x32xbf16>
    %c0_77 = arith.constant 0 : index
    %c96_78 = arith.constant 96 : index
    %73 = vector.load %arg9[%c0_77, %c96_78] : memref<256x288xbf16, #tpu.memory_space<vmem>>, vector<256x32xbf16>
    tpu.vector_store %arg9[%c0_77, %c96_78], %72 {strides = array<i32>} : memref<256x288xbf16, #tpu.memory_space<vmem>>, vector<256x32xbf16>,
    %c1_79 = arith.constant 1 : index
    %c1_80 = arith.constant 1 : index
    %c0_81 = arith.constant 0 : index
    %74 = vector.load %arg8[%c1_79, %c1_80, %c0_81] : memref<18x18x32xf32, #tpu.memory_space<vmem>>, vector<16x16x32xf32>
    %75 = vector.shape_cast %74 : vector<16x16x32xf32> to vector<256x32xf32>
    %76 = arith.truncf %75 : vector<256x32xf32> to vector<256x32xbf16>
    %c0_82 = arith.constant 0 : index
    %c128_83 = arith.constant 128 : index
    %77 = vector.load %arg9[%c0_82, %c128_83] : memref<256x288xbf16, #tpu.memory_space<vmem>>, vector<256x32xbf16>
    tpu.vector_store %arg9[%c0_82, %c128_83], %76 {strides = array<i32>} : memref<256x288xbf16, #tpu.memory_space<vmem>>, vector<256x32xbf16>,
    %c1_84 = arith.constant 1 : index
    %c2_85 = arith.constant 2 : index
    %c0_86 = arith.constant 0 : index
    %78 = vector.load %arg8[%c1_84, %c2_85, %c0_86] : memref<18x18x32xf32, #tpu.memory_space<vmem>>, vector<16x16x32xf32>
    %79 = vector.shape_cast %78 : vector<16x16x32xf32> to vector<256x32xf32>
    %80 = arith.truncf %79 : vector<256x32xf32> to vector<256x32xbf16>
    %c0_87 = arith.constant 0 : index
    %c160_88 = arith.constant 160 : index
    %81 = vector.load %arg9[%c0_87, %c160_88] : memref<256x288xbf16, #tpu.memory_space<vmem>>, vector<256x32xbf16>
    tpu.vector_store %arg9[%c0_87, %c160_88], %80 {strides = array<i32>} : memref<256x288xbf16, #tpu.memory_space<vmem>>, vector<256x32xbf16>,
    %c2_89 = arith.constant 2 : index
    %c0_90 = arith.constant 0 : index
    %c0_91 = arith.constant 0 : index
    %82 = vector.load %arg8[%c2_89, %c0_90, %c0_91] : memref<18x18x32xf32, #tpu.memory_space<vmem>>, vector<16x16x32xf32>
    %83 = vector.shape_cast %82 : vector<16x16x32xf32> to vector<256x32xf32>
    %84 = arith.truncf %83 : vector<256x32xf32> to vector<256x32xbf16>
    %c0_92 = arith.constant 0 : index
    %c192_93 = arith.constant 192 : index
    %85 = vector.load %arg9[%c0_92, %c192_93] : memref<256x288xbf16, #tpu.memory_space<vmem>>, vector<256x32xbf16>
    tpu.vector_store %arg9[%c0_92, %c192_93], %84 {strides = array<i32>} : memref<256x288xbf16, #tpu.memory_space<vmem>>, vector<256x32xbf16>,
    %c2_94 = arith.constant 2 : index
    %c1_95 = arith.constant 1 : index
    %c0_96 = arith.constant 0 : index
    %86 = vector.load %arg8[%c2_94, %c1_95, %c0_96] : memref<18x18x32xf32, #tpu.memory_space<vmem>>, vector<16x16x32xf32>
    %87 = vector.shape_cast %86 : vector<16x16x32xf32> to vector<256x32xf32>
    %88 = arith.truncf %87 : vector<256x32xf32> to vector<256x32xbf16>
    %c0_97 = arith.constant 0 : index
    %c224_98 = arith.constant 224 : index
    %89 = vector.load %arg9[%c0_97, %c224_98] : memref<256x288xbf16, #tpu.memory_space<vmem>>, vector<256x32xbf16>
    tpu.vector_store %arg9[%c0_97, %c224_98], %88 {strides = array<i32>} : memref<256x288xbf16, #tpu.memory_space<vmem>>, vector<256x32xbf16>,
    %c2_99 = arith.constant 2 : index
    %c2_100 = arith.constant 2 : index
    %c0_101 = arith.constant 0 : index
    %90 = vector.load %arg8[%c2_99, %c2_100, %c0_101] : memref<18x18x32xf32, #tpu.memory_space<vmem>>, vector<16x16x32xf32>
    %91 = vector.shape_cast %90 : vector<16x16x32xf32> to vector<256x32xf32>
    %92 = arith.truncf %91 : vector<256x32xf32> to vector<256x32xbf16>
    %c0_102 = arith.constant 0 : index
    %c256_103 = arith.constant 256 : index
    %93 = vector.load %arg9[%c0_102, %c256_103] : memref<256x288xbf16, #tpu.memory_space<vmem>>, vector<256x32xbf16>
    tpu.vector_store %arg9[%c0_102, %c256_103], %92 {strides = array<i32>} : memref<256x288xbf16, #tpu.memory_space<vmem>>, vector<256x32xbf16>,
    %c0_104 = arith.constant 0 : index
    %c0_105 = arith.constant 0 : index
    %94 = vector.load %arg9[%c0_104, %c0_105] : memref<256x288xbf16, #tpu.memory_space<vmem>>, vector<256x288xbf16>
    %c1_106 = arith.constant 1 : index
    %c0_107 = arith.constant 0 : index
    %c0_108 = arith.constant 0 : index
    %95 = vector.load %arg2[%c1_106, %c0_107, %c0_108] : memref<4x288x32xbf16, #tpu.memory_space<vmem>>, vector<1x288x32xbf16>
    %96 = vector.shape_cast %95 : vector<1x288x32xbf16> to vector<288x32xbf16>
    %cst_109 = arith.constant dense<0.000000e+00> : vector<256x32xf32>
    %97 = tpu.matmul %94, %96, %cst_109 {dimension_numbers = #tpu.dot_dimension_numbers<[1], [0], [0], [1], [0, 0, 1, 1], [], []>} : vector<256x288xbf16>, vector<288x32xbf16>, vector<256x32xf32> -> vector<256x32xf32>
    %c1_110 = arith.constant 1 : index
    %c0_111 = arith.constant 0 : index
    %98 = vector.load %arg3[%c1_110, %c0_111] : memref<4x32xf32, #tpu.memory_space<vmem>>, vector<1x32xf32>
    %99 = vector.broadcast %98 : vector<1x32xf32> to vector<256x32xf32>
    %100 = arith.mulf %97, %99 : vector<256x32xf32>
    %c1_112 = arith.constant 1 : index
    %c0_113 = arith.constant 0 : index
    %101 = vector.load %arg4[%c1_112, %c0_113] : memref<4x32xf32, #tpu.memory_space<vmem>>, vector<1x32xf32>
    %102 = vector.broadcast %101 : vector<1x32xf32> to vector<256x32xf32>
    %103 = arith.addf %100, %102 : vector<256x32xf32>
    %cst_114 = arith.constant 0.000000e+00 : f32
    %104 = vector.broadcast %cst_114 : f32 to vector<256x32xf32>
    %105 = arith.cmpf ogt, %103, %104 : vector<256x32xf32>
    %cst_115 = arith.constant 0.00999999977 : f32
    %106 = vector.broadcast %cst_115 : f32 to vector<256x32xf32>
    %107 = arith.mulf %106, %103 : vector<256x32xf32>
    %108 = arith.select %105, %103, %107 : vector<256x32xi1>, vector<256x32xf32>
    %109 = vector.shape_cast %108 : vector<256x32xf32> to vector<16x16x32xf32>
    %c1_116 = arith.constant 1 : index
    %c1_117 = arith.constant 1 : index
    %c0_118 = arith.constant 0 : index
    %110 = vector.load %arg8[%c1_116, %c1_117, %c0_118] : memref<18x18x32xf32, #tpu.memory_space<vmem>>, vector<16x16x32xf32>
    tpu.vector_store %arg8[%c1_116, %c1_117, %c0_118], %109 {strides = array<i32>} : memref<18x18x32xf32, #tpu.memory_space<vmem>>, vector<16x16x32xf32>,
    %c0_119 = arith.constant 0 : index
    %c0_120 = arith.constant 0 : index
    %c0_121 = arith.constant 0 : index
    %111 = vector.load %arg8[%c0_119, %c0_120, %c0_121] : memref<18x18x32xf32, #tpu.memory_space<vmem>>, vector<16x16x32xf32>
    %112 = vector.shape_cast %111 : vector<16x16x32xf32> to vector<256x32xf32>
    %113 = arith.truncf %112 : vector<256x32xf32> to vector<256x32xbf16>
    %c0_122 = arith.constant 0 : index
    %c0_123 = arith.constant 0 : index
    %114 = vector.load %arg9[%c0_122, %c0_123] : memref<256x288xbf16, #tpu.memory_space<vmem>>, vector<256x32xbf16>
    tpu.vector_store %arg9[%c0_122, %c0_123], %113 {strides = array<i32>} : memref<256x288xbf16, #tpu.memory_space<vmem>>, vector<256x32xbf16>,
    %c0_124 = arith.constant 0 : index
    %c1_125 = arith.constant 1 : index
    %c0_126 = arith.constant 0 : index
    %115 = vector.load %arg8[%c0_124, %c1_125, %c0_126] : memref<18x18x32xf32, #tpu.memory_space<vmem>>, vector<16x16x32xf32>
    %116 = vector.shape_cast %115 : vector<16x16x32xf32> to vector<256x32xf32>
    %117 = arith.truncf %116 : vector<256x32xf32> to vector<256x32xbf16>
    %c0_127 = arith.constant 0 : index
    %c32_128 = arith.constant 32 : index
    %118 = vector.load %arg9[%c0_127, %c32_128] : memref<256x288xbf16, #tpu.memory_space<vmem>>, vector<256x32xbf16>
    tpu.vector_store %arg9[%c0_127, %c32_128], %117 {strides = array<i32>} : memref<256x288xbf16, #tpu.memory_space<vmem>>, vector<256x32xbf16>,
    %c0_129 = arith.constant 0 : index
    %c2_130 = arith.constant 2 : index
    %c0_131 = arith.constant 0 : index
    %119 = vector.load %arg8[%c0_129, %c2_130, %c0_131] : memref<18x18x32xf32, #tpu.memory_space<vmem>>, vector<16x16x32xf32>
    %120 = vector.shape_cast %119 : vector<16x16x32xf32> to vector<256x32xf32>
    %121 = arith.truncf %120 : vector<256x32xf32> to vector<256x32xbf16>
    %c0_132 = arith.constant 0 : index
    %c64_133 = arith.constant 64 : index
    %122 = vector.load %arg9[%c0_132, %c64_133] : memref<256x288xbf16, #tpu.memory_space<vmem>>, vector<256x32xbf16>
    tpu.vector_store %arg9[%c0_132, %c64_133], %121 {strides = array<i32>} : memref<256x288xbf16, #tpu.memory_space<vmem>>, vector<256x32xbf16>,
    %c1_134 = arith.constant 1 : index
    %c0_135 = arith.constant 0 : index
    %c0_136 = arith.constant 0 : index
    %123 = vector.load %arg8[%c1_134, %c0_135, %c0_136] : memref<18x18x32xf32, #tpu.memory_space<vmem>>, vector<16x16x32xf32>
    %124 = vector.shape_cast %123 : vector<16x16x32xf32> to vector<256x32xf32>
    %125 = arith.truncf %124 : vector<256x32xf32> to vector<256x32xbf16>
    %c0_137 = arith.constant 0 : index
    %c96_138 = arith.constant 96 : index
    %126 = vector.load %arg9[%c0_137, %c96_138] : memref<256x288xbf16, #tpu.memory_space<vmem>>, vector<256x32xbf16>
    tpu.vector_store %arg9[%c0_137, %c96_138], %125 {strides = array<i32>} : memref<256x288xbf16, #tpu.memory_space<vmem>>, vector<256x32xbf16>,
    %c1_139 = arith.constant 1 : index
    %c1_140 = arith.constant 1 : index
    %c0_141 = arith.constant 0 : index
    %127 = vector.load %arg8[%c1_139, %c1_140, %c0_141] : memref<18x18x32xf32, #tpu.memory_space<vmem>>, vector<16x16x32xf32>
    %128 = vector.shape_cast %127 : vector<16x16x32xf32> to vector<256x32xf32>
    %129 = arith.truncf %128 : vector<256x32xf32> to vector<256x32xbf16>
    %c0_142 = arith.constant 0 : index
    %c128_143 = arith.constant 128 : index
    %130 = vector.load %arg9[%c0_142, %c128_143] : memref<256x288xbf16, #tpu.memory_space<vmem>>, vector<256x32xbf16>
    tpu.vector_store %arg9[%c0_142, %c128_143], %129 {strides = array<i32>} : memref<256x288xbf16, #tpu.memory_space<vmem>>, vector<256x32xbf16>,
    %c1_144 = arith.constant 1 : index
    %c2_145 = arith.constant 2 : index
    %c0_146 = arith.constant 0 : index
    %131 = vector.load %arg8[%c1_144, %c2_145, %c0_146] : memref<18x18x32xf32, #tpu.memory_space<vmem>>, vector<16x16x32xf32>
    %132 = vector.shape_cast %131 : vector<16x16x32xf32> to vector<256x32xf32>
    %133 = arith.truncf %132 : vector<256x32xf32> to vector<256x32xbf16>
    %c0_147 = arith.constant 0 : index
    %c160_148 = arith.constant 160 : index
    %134 = vector.load %arg9[%c0_147, %c160_148] : memref<256x288xbf16, #tpu.memory_space<vmem>>, vector<256x32xbf16>
    tpu.vector_store %arg9[%c0_147, %c160_148], %133 {strides = array<i32>} : memref<256x288xbf16, #tpu.memory_space<vmem>>, vector<256x32xbf16>,
    %c2_149 = arith.constant 2 : index
    %c0_150 = arith.constant 0 : index
    %c0_151 = arith.constant 0 : index
    %135 = vector.load %arg8[%c2_149, %c0_150, %c0_151] : memref<18x18x32xf32, #tpu.memory_space<vmem>>, vector<16x16x32xf32>
    %136 = vector.shape_cast %135 : vector<16x16x32xf32> to vector<256x32xf32>
    %137 = arith.truncf %136 : vector<256x32xf32> to vector<256x32xbf16>
    %c0_152 = arith.constant 0 : index
    %c192_153 = arith.constant 192 : index
    %138 = vector.load %arg9[%c0_152, %c192_153] : memref<256x288xbf16, #tpu.memory_space<vmem>>, vector<256x32xbf16>
    tpu.vector_store %arg9[%c0_152, %c192_153], %137 {strides = array<i32>} : memref<256x288xbf16, #tpu.memory_space<vmem>>, vector<256x32xbf16>,
    %c2_154 = arith.constant 2 : index
    %c1_155 = arith.constant 1 : index
    %c0_156 = arith.constant 0 : index
    %139 = vector.load %arg8[%c2_154, %c1_155, %c0_156] : memref<18x18x32xf32, #tpu.memory_space<vmem>>, vector<16x16x32xf32>
    %140 = vector.shape_cast %139 : vector<16x16x32xf32> to vector<256x32xf32>
    %141 = arith.truncf %140 : vector<256x32xf32> to vector<256x32xbf16>
    %c0_157 = arith.constant 0 : index
    %c224_158 = arith.constant 224 : index
    %142 = vector.load %arg9[%c0_157, %c224_158] : memref<256x288xbf16, #tpu.memory_space<vmem>>, vector<256x32xbf16>
    tpu.vector_store %arg9[%c0_157, %c224_158], %141 {strides = array<i32>} : memref<256x288xbf16, #tpu.memory_space<vmem>>, vector<256x32xbf16>,
    %c2_159 = arith.constant 2 : index
    %c2_160 = arith.constant 2 : index
    %c0_161 = arith.constant 0 : index
    %143 = vector.load %arg8[%c2_159, %c2_160, %c0_161] : memref<18x18x32xf32, #tpu.memory_space<vmem>>, vector<16x16x32xf32>
    %144 = vector.shape_cast %143 : vector<16x16x32xf32> to vector<256x32xf32>
    %145 = arith.truncf %144 : vector<256x32xf32> to vector<256x32xbf16>
    %c0_162 = arith.constant 0 : index
    %c256_163 = arith.constant 256 : index
    %146 = vector.load %arg9[%c0_162, %c256_163] : memref<256x288xbf16, #tpu.memory_space<vmem>>, vector<256x32xbf16>
    tpu.vector_store %arg9[%c0_162, %c256_163], %145 {strides = array<i32>} : memref<256x288xbf16, #tpu.memory_space<vmem>>, vector<256x32xbf16>,
    %c0_164 = arith.constant 0 : index
    %c0_165 = arith.constant 0 : index
    %147 = vector.load %arg9[%c0_164, %c0_165] : memref<256x288xbf16, #tpu.memory_space<vmem>>, vector<256x288xbf16>
    %c2_166 = arith.constant 2 : index
    %c0_167 = arith.constant 0 : index
    %c0_168 = arith.constant 0 : index
    %148 = vector.load %arg2[%c2_166, %c0_167, %c0_168] : memref<4x288x32xbf16, #tpu.memory_space<vmem>>, vector<1x288x32xbf16>
    %149 = vector.shape_cast %148 : vector<1x288x32xbf16> to vector<288x32xbf16>
    %cst_169 = arith.constant dense<0.000000e+00> : vector<256x32xf32>
    %150 = tpu.matmul %147, %149, %cst_169 {dimension_numbers = #tpu.dot_dimension_numbers<[1], [0], [0], [1], [0, 0, 1, 1], [], []>} : vector<256x288xbf16>, vector<288x32xbf16>, vector<256x32xf32> -> vector<256x32xf32>
    %c2_170 = arith.constant 2 : index
    %c0_171 = arith.constant 0 : index
    %151 = vector.load %arg3[%c2_170, %c0_171] : memref<4x32xf32, #tpu.memory_space<vmem>>, vector<1x32xf32>
    %152 = vector.broadcast %151 : vector<1x32xf32> to vector<256x32xf32>
    %153 = arith.mulf %150, %152 : vector<256x32xf32>
    %c2_172 = arith.constant 2 : index
    %c0_173 = arith.constant 0 : index
    %154 = vector.load %arg4[%c2_172, %c0_173] : memref<4x32xf32, #tpu.memory_space<vmem>>, vector<1x32xf32>
    %155 = vector.broadcast %154 : vector<1x32xf32> to vector<256x32xf32>
    %156 = arith.addf %153, %155 : vector<256x32xf32>
    %cst_174 = arith.constant 0.000000e+00 : f32
    %157 = vector.broadcast %cst_174 : f32 to vector<256x32xf32>
    %158 = arith.cmpf ogt, %156, %157 : vector<256x32xf32>
    %cst_175 = arith.constant 0.00999999977 : f32
    %159 = vector.broadcast %cst_175 : f32 to vector<256x32xf32>
    %160 = arith.mulf %159, %156 : vector<256x32xf32>
    %161 = arith.select %158, %156, %160 : vector<256x32xi1>, vector<256x32xf32>
    %162 = vector.shape_cast %161 : vector<256x32xf32> to vector<16x16x32xf32>
    %c1_176 = arith.constant 1 : index
    %c1_177 = arith.constant 1 : index
    %c0_178 = arith.constant 0 : index
    %163 = vector.load %arg8[%c1_176, %c1_177, %c0_178] : memref<18x18x32xf32, #tpu.memory_space<vmem>>, vector<16x16x32xf32>
    tpu.vector_store %arg8[%c1_176, %c1_177, %c0_178], %162 {strides = array<i32>} : memref<18x18x32xf32, #tpu.memory_space<vmem>>, vector<16x16x32xf32>,
    %c0_179 = arith.constant 0 : index
    %c0_180 = arith.constant 0 : index
    %c0_181 = arith.constant 0 : index
    %164 = vector.load %arg8[%c0_179, %c0_180, %c0_181] : memref<18x18x32xf32, #tpu.memory_space<vmem>>, vector<16x16x32xf32>
    %165 = vector.shape_cast %164 : vector<16x16x32xf32> to vector<256x32xf32>
    %166 = arith.truncf %165 : vector<256x32xf32> to vector<256x32xbf16>
    %c0_182 = arith.constant 0 : index
    %c0_183 = arith.constant 0 : index
    %167 = vector.load %arg9[%c0_182, %c0_183] : memref<256x288xbf16, #tpu.memory_space<vmem>>, vector<256x32xbf16>
    tpu.vector_store %arg9[%c0_182, %c0_183], %166 {strides = array<i32>} : memref<256x288xbf16, #tpu.memory_space<vmem>>, vector<256x32xbf16>,
    %c0_184 = arith.constant 0 : index
    %c1_185 = arith.constant 1 : index
    %c0_186 = arith.constant 0 : index
    %168 = vector.load %arg8[%c0_184, %c1_185, %c0_186] : memref<18x18x32xf32, #tpu.memory_space<vmem>>, vector<16x16x32xf32>
    %169 = vector.shape_cast %168 : vector<16x16x32xf32> to vector<256x32xf32>
    %170 = arith.truncf %169 : vector<256x32xf32> to vector<256x32xbf16>
    %c0_187 = arith.constant 0 : index
    %c32_188 = arith.constant 32 : index
    %171 = vector.load %arg9[%c0_187, %c32_188] : memref<256x288xbf16, #tpu.memory_space<vmem>>, vector<256x32xbf16>
    tpu.vector_store %arg9[%c0_187, %c32_188], %170 {strides = array<i32>} : memref<256x288xbf16, #tpu.memory_space<vmem>>, vector<256x32xbf16>,
    %c0_189 = arith.constant 0 : index
    %c2_190 = arith.constant 2 : index
    %c0_191 = arith.constant 0 : index
    %172 = vector.load %arg8[%c0_189, %c2_190, %c0_191] : memref<18x18x32xf32, #tpu.memory_space<vmem>>, vector<16x16x32xf32>
    %173 = vector.shape_cast %172 : vector<16x16x32xf32> to vector<256x32xf32>
    %174 = arith.truncf %173 : vector<256x32xf32> to vector<256x32xbf16>
    %c0_192 = arith.constant 0 : index
    %c64_193 = arith.constant 64 : index
    %175 = vector.load %arg9[%c0_192, %c64_193] : memref<256x288xbf16, #tpu.memory_space<vmem>>, vector<256x32xbf16>
    tpu.vector_store %arg9[%c0_192, %c64_193], %174 {strides = array<i32>} : memref<256x288xbf16, #tpu.memory_space<vmem>>, vector<256x32xbf16>,
    %c1_194 = arith.constant 1 : index
    %c0_195 = arith.constant 0 : index
    %c0_196 = arith.constant 0 : index
    %176 = vector.load %arg8[%c1_194, %c0_195, %c0_196] : memref<18x18x32xf32, #tpu.memory_space<vmem>>, vector<16x16x32xf32>
    %177 = vector.shape_cast %176 : vector<16x16x32xf32> to vector<256x32xf32>
    %178 = arith.truncf %177 : vector<256x32xf32> to vector<256x32xbf16>
    %c0_197 = arith.constant 0 : index
    %c96_198 = arith.constant 96 : index
    %179 = vector.load %arg9[%c0_197, %c96_198] : memref<256x288xbf16, #tpu.memory_space<vmem>>, vector<256x32xbf16>
    tpu.vector_store %arg9[%c0_197, %c96_198], %178 {strides = array<i32>} : memref<256x288xbf16, #tpu.memory_space<vmem>>, vector<256x32xbf16>,
    %c1_199 = arith.constant 1 : index
    %c1_200 = arith.constant 1 : index
    %c0_201 = arith.constant 0 : index
    %180 = vector.load %arg8[%c1_199, %c1_200, %c0_201] : memref<18x18x32xf32, #tpu.memory_space<vmem>>, vector<16x16x32xf32>
    %181 = vector.shape_cast %180 : vector<16x16x32xf32> to vector<256x32xf32>
    %182 = arith.truncf %181 : vector<256x32xf32> to vector<256x32xbf16>
    %c0_202 = arith.constant 0 : index
    %c128_203 = arith.constant 128 : index
    %183 = vector.load %arg9[%c0_202, %c128_203] : memref<256x288xbf16, #tpu.memory_space<vmem>>, vector<256x32xbf16>
    tpu.vector_store %arg9[%c0_202, %c128_203], %182 {strides = array<i32>} : memref<256x288xbf16, #tpu.memory_space<vmem>>, vector<256x32xbf16>,
    %c1_204 = arith.constant 1 : index
    %c2_205 = arith.constant 2 : index
    %c0_206 = arith.constant 0 : index
    %184 = vector.load %arg8[%c1_204, %c2_205, %c0_206] : memref<18x18x32xf32, #tpu.memory_space<vmem>>, vector<16x16x32xf32>
    %185 = vector.shape_cast %184 : vector<16x16x32xf32> to vector<256x32xf32>
    %186 = arith.truncf %185 : vector<256x32xf32> to vector<256x32xbf16>
    %c0_207 = arith.constant 0 : index
    %c160_208 = arith.constant 160 : index
    %187 = vector.load %arg9[%c0_207, %c160_208] : memref<256x288xbf16, #tpu.memory_space<vmem>>, vector<256x32xbf16>
    tpu.vector_store %arg9[%c0_207, %c160_208], %186 {strides = array<i32>} : memref<256x288xbf16, #tpu.memory_space<vmem>>, vector<256x32xbf16>,
    %c2_209 = arith.constant 2 : index
    %c0_210 = arith.constant 0 : index
    %c0_211 = arith.constant 0 : index
    %188 = vector.load %arg8[%c2_209, %c0_210, %c0_211] : memref<18x18x32xf32, #tpu.memory_space<vmem>>, vector<16x16x32xf32>
    %189 = vector.shape_cast %188 : vector<16x16x32xf32> to vector<256x32xf32>
    %190 = arith.truncf %189 : vector<256x32xf32> to vector<256x32xbf16>
    %c0_212 = arith.constant 0 : index
    %c192_213 = arith.constant 192 : index
    %191 = vector.load %arg9[%c0_212, %c192_213] : memref<256x288xbf16, #tpu.memory_space<vmem>>, vector<256x32xbf16>
    tpu.vector_store %arg9[%c0_212, %c192_213], %190 {strides = array<i32>} : memref<256x288xbf16, #tpu.memory_space<vmem>>, vector<256x32xbf16>,
    %c2_214 = arith.constant 2 : index
    %c1_215 = arith.constant 1 : index
    %c0_216 = arith.constant 0 : index
    %192 = vector.load %arg8[%c2_214, %c1_215, %c0_216] : memref<18x18x32xf32, #tpu.memory_space<vmem>>, vector<16x16x32xf32>
    %193 = vector.shape_cast %192 : vector<16x16x32xf32> to vector<256x32xf32>
    %194 = arith.truncf %193 : vector<256x32xf32> to vector<256x32xbf16>
    %c0_217 = arith.constant 0 : index
    %c224_218 = arith.constant 224 : index
    %195 = vector.load %arg9[%c0_217, %c224_218] : memref<256x288xbf16, #tpu.memory_space<vmem>>, vector<256x32xbf16>
    tpu.vector_store %arg9[%c0_217, %c224_218], %194 {strides = array<i32>} : memref<256x288xbf16, #tpu.memory_space<vmem>>, vector<256x32xbf16>,
    %c2_219 = arith.constant 2 : index
    %c2_220 = arith.constant 2 : index
    %c0_221 = arith.constant 0 : index
    %196 = vector.load %arg8[%c2_219, %c2_220, %c0_221] : memref<18x18x32xf32, #tpu.memory_space<vmem>>, vector<16x16x32xf32>
    %197 = vector.shape_cast %196 : vector<16x16x32xf32> to vector<256x32xf32>
    %198 = arith.truncf %197 : vector<256x32xf32> to vector<256x32xbf16>
    %c0_222 = arith.constant 0 : index
    %c256_223 = arith.constant 256 : index
    %199 = vector.load %arg9[%c0_222, %c256_223] : memref<256x288xbf16, #tpu.memory_space<vmem>>, vector<256x32xbf16>
    tpu.vector_store %arg9[%c0_222, %c256_223], %198 {strides = array<i32>} : memref<256x288xbf16, #tpu.memory_space<vmem>>, vector<256x32xbf16>,
    %c0_224 = arith.constant 0 : index
    %c0_225 = arith.constant 0 : index
    %200 = vector.load %arg9[%c0_224, %c0_225] : memref<256x288xbf16, #tpu.memory_space<vmem>>, vector<256x288xbf16>
    %c3 = arith.constant 3 : index
    %c0_226 = arith.constant 0 : index
    %c0_227 = arith.constant 0 : index
    %201 = vector.load %arg2[%c3, %c0_226, %c0_227] : memref<4x288x32xbf16, #tpu.memory_space<vmem>>, vector<1x288x32xbf16>
    %202 = vector.shape_cast %201 : vector<1x288x32xbf16> to vector<288x32xbf16>
    %cst_228 = arith.constant dense<0.000000e+00> : vector<256x32xf32>
    %203 = tpu.matmul %200, %202, %cst_228 {dimension_numbers = #tpu.dot_dimension_numbers<[1], [0], [0], [1], [0, 0, 1, 1], [], []>} : vector<256x288xbf16>, vector<288x32xbf16>, vector<256x32xf32> -> vector<256x32xf32>
    %c3_229 = arith.constant 3 : index
    %c0_230 = arith.constant 0 : index
    %204 = vector.load %arg3[%c3_229, %c0_230] : memref<4x32xf32, #tpu.memory_space<vmem>>, vector<1x32xf32>
    %205 = vector.broadcast %204 : vector<1x32xf32> to vector<256x32xf32>
    %206 = arith.mulf %203, %205 : vector<256x32xf32>
    %c3_231 = arith.constant 3 : index
    %c0_232 = arith.constant 0 : index
    %207 = vector.load %arg4[%c3_231, %c0_232] : memref<4x32xf32, #tpu.memory_space<vmem>>, vector<1x32xf32>
    %208 = vector.broadcast %207 : vector<1x32xf32> to vector<256x32xf32>
    %209 = arith.addf %206, %208 : vector<256x32xf32>
    %cst_233 = arith.constant 0.000000e+00 : f32
    %210 = vector.broadcast %cst_233 : f32 to vector<256x32xf32>
    %211 = arith.cmpf ogt, %209, %210 : vector<256x32xf32>
    %cst_234 = arith.constant 0.00999999977 : f32
    %212 = vector.broadcast %cst_234 : f32 to vector<256x32xf32>
    %213 = arith.mulf %212, %209 : vector<256x32xf32>
    %214 = arith.select %211, %209, %213 : vector<256x32xi1>, vector<256x32xf32>
    %215 = vector.shape_cast %214 : vector<256x32xf32> to vector<16x16x32xf32>
    %c1_235 = arith.constant 1 : index
    %c1_236 = arith.constant 1 : index
    %c0_237 = arith.constant 0 : index
    %216 = vector.load %arg8[%c1_235, %c1_236, %c0_237] : memref<18x18x32xf32, #tpu.memory_space<vmem>>, vector<16x16x32xf32>
    tpu.vector_store %arg8[%c1_235, %c1_236, %c0_237], %215 {strides = array<i32>} : memref<18x18x32xf32, #tpu.memory_space<vmem>>, vector<16x16x32xf32>,
    %c0_238 = arith.constant 0 : index
    %c0_239 = arith.constant 0 : index
    %c0_240 = arith.constant 0 : index
    %217 = vector.load %arg8[%c0_238, %c0_239, %c0_240] : memref<18x18x32xf32, #tpu.memory_space<vmem>>, vector<16x16x32xf32>
    %218 = vector.shape_cast %217 : vector<16x16x32xf32> to vector<256x32xf32>
    %219 = arith.truncf %218 : vector<256x32xf32> to vector<256x32xbf16>
    %c0_241 = arith.constant 0 : index
    %c0_242 = arith.constant 0 : index
    %220 = vector.load %arg9[%c0_241, %c0_242] : memref<256x288xbf16, #tpu.memory_space<vmem>>, vector<256x32xbf16>
    tpu.vector_store %arg9[%c0_241, %c0_242], %219 {strides = array<i32>} : memref<256x288xbf16, #tpu.memory_space<vmem>>, vector<256x32xbf16>,
    %c0_243 = arith.constant 0 : index
    %c1_244 = arith.constant 1 : index
    %c0_245 = arith.constant 0 : index
    %221 = vector.load %arg8[%c0_243, %c1_244, %c0_245] : memref<18x18x32xf32, #tpu.memory_space<vmem>>, vector<16x16x32xf32>
    %222 = vector.shape_cast %221 : vector<16x16x32xf32> to vector<256x32xf32>
    %223 = arith.truncf %222 : vector<256x32xf32> to vector<256x32xbf16>
    %c0_246 = arith.constant 0 : index
    %c32_247 = arith.constant 32 : index
    %224 = vector.load %arg9[%c0_246, %c32_247] : memref<256x288xbf16, #tpu.memory_space<vmem>>, vector<256x32xbf16>
    tpu.vector_store %arg9[%c0_246, %c32_247], %223 {strides = array<i32>} : memref<256x288xbf16, #tpu.memory_space<vmem>>, vector<256x32xbf16>,
    %c0_248 = arith.constant 0 : index
    %c2_249 = arith.constant 2 : index
    %c0_250 = arith.constant 0 : index
    %225 = vector.load %arg8[%c0_248, %c2_249, %c0_250] : memref<18x18x32xf32, #tpu.memory_space<vmem>>, vector<16x16x32xf32>
    %226 = vector.shape_cast %225 : vector<16x16x32xf32> to vector<256x32xf32>
    %227 = arith.truncf %226 : vector<256x32xf32> to vector<256x32xbf16>
    %c0_251 = arith.constant 0 : index
    %c64_252 = arith.constant 64 : index
    %228 = vector.load %arg9[%c0_251, %c64_252] : memref<256x288xbf16, #tpu.memory_space<vmem>>, vector<256x32xbf16>
    tpu.vector_store %arg9[%c0_251, %c64_252], %227 {strides = array<i32>} : memref<256x288xbf16, #tpu.memory_space<vmem>>, vector<256x32xbf16>,
    %c1_253 = arith.constant 1 : index
    %c0_254 = arith.constant 0 : index
    %c0_255 = arith.constant 0 : index
    %229 = vector.load %arg8[%c1_253, %c0_254, %c0_255] : memref<18x18x32xf32, #tpu.memory_space<vmem>>, vector<16x16x32xf32>
    %230 = vector.shape_cast %229 : vector<16x16x32xf32> to vector<256x32xf32>
    %231 = arith.truncf %230 : vector<256x32xf32> to vector<256x32xbf16>
    %c0_256 = arith.constant 0 : index
    %c96_257 = arith.constant 96 : index
    %232 = vector.load %arg9[%c0_256, %c96_257] : memref<256x288xbf16, #tpu.memory_space<vmem>>, vector<256x32xbf16>
    tpu.vector_store %arg9[%c0_256, %c96_257], %231 {strides = array<i32>} : memref<256x288xbf16, #tpu.memory_space<vmem>>, vector<256x32xbf16>,
    %c1_258 = arith.constant 1 : index
    %c1_259 = arith.constant 1 : index
    %c0_260 = arith.constant 0 : index
    %233 = vector.load %arg8[%c1_258, %c1_259, %c0_260] : memref<18x18x32xf32, #tpu.memory_space<vmem>>, vector<16x16x32xf32>
    %234 = vector.shape_cast %233 : vector<16x16x32xf32> to vector<256x32xf32>
    %235 = arith.truncf %234 : vector<256x32xf32> to vector<256x32xbf16>
    %c0_261 = arith.constant 0 : index
    %c128_262 = arith.constant 128 : index
    %236 = vector.load %arg9[%c0_261, %c128_262] : memref<256x288xbf16, #tpu.memory_space<vmem>>, vector<256x32xbf16>
    tpu.vector_store %arg9[%c0_261, %c128_262], %235 {strides = array<i32>} : memref<256x288xbf16, #tpu.memory_space<vmem>>, vector<256x32xbf16>,
    %c1_263 = arith.constant 1 : index
    %c2_264 = arith.constant 2 : index
    %c0_265 = arith.constant 0 : index
    %237 = vector.load %arg8[%c1_263, %c2_264, %c0_265] : memref<18x18x32xf32, #tpu.memory_space<vmem>>, vector<16x16x32xf32>
    %238 = vector.shape_cast %237 : vector<16x16x32xf32> to vector<256x32xf32>
    %239 = arith.truncf %238 : vector<256x32xf32> to vector<256x32xbf16>
    %c0_266 = arith.constant 0 : index
    %c160_267 = arith.constant 160 : index
    %240 = vector.load %arg9[%c0_266, %c160_267] : memref<256x288xbf16, #tpu.memory_space<vmem>>, vector<256x32xbf16>
    tpu.vector_store %arg9[%c0_266, %c160_267], %239 {strides = array<i32>} : memref<256x288xbf16, #tpu.memory_space<vmem>>, vector<256x32xbf16>,
    %c2_268 = arith.constant 2 : index
    %c0_269 = arith.constant 0 : index
    %c0_270 = arith.constant 0 : index
    %241 = vector.load %arg8[%c2_268, %c0_269, %c0_270] : memref<18x18x32xf32, #tpu.memory_space<vmem>>, vector<16x16x32xf32>
    %242 = vector.shape_cast %241 : vector<16x16x32xf32> to vector<256x32xf32>
    %243 = arith.truncf %242 : vector<256x32xf32> to vector<256x32xbf16>
    %c0_271 = arith.constant 0 : index
    %c192_272 = arith.constant 192 : index
    %244 = vector.load %arg9[%c0_271, %c192_272] : memref<256x288xbf16, #tpu.memory_space<vmem>>, vector<256x32xbf16>
    tpu.vector_store %arg9[%c0_271, %c192_272], %243 {strides = array<i32>} : memref<256x288xbf16, #tpu.memory_space<vmem>>, vector<256x32xbf16>,
    %c2_273 = arith.constant 2 : index
    %c1_274 = arith.constant 1 : index
    %c0_275 = arith.constant 0 : index
    %245 = vector.load %arg8[%c2_273, %c1_274, %c0_275] : memref<18x18x32xf32, #tpu.memory_space<vmem>>, vector<16x16x32xf32>
    %246 = vector.shape_cast %245 : vector<16x16x32xf32> to vector<256x32xf32>
    %247 = arith.truncf %246 : vector<256x32xf32> to vector<256x32xbf16>
    %c0_276 = arith.constant 0 : index
    %c224_277 = arith.constant 224 : index
    %248 = vector.load %arg9[%c0_276, %c224_277] : memref<256x288xbf16, #tpu.memory_space<vmem>>, vector<256x32xbf16>
    tpu.vector_store %arg9[%c0_276, %c224_277], %247 {strides = array<i32>} : memref<256x288xbf16, #tpu.memory_space<vmem>>, vector<256x32xbf16>,
    %c2_278 = arith.constant 2 : index
    %c2_279 = arith.constant 2 : index
    %c0_280 = arith.constant 0 : index
    %249 = vector.load %arg8[%c2_278, %c2_279, %c0_280] : memref<18x18x32xf32, #tpu.memory_space<vmem>>, vector<16x16x32xf32>
    %250 = vector.shape_cast %249 : vector<16x16x32xf32> to vector<256x32xf32>
    %251 = arith.truncf %250 : vector<256x32xf32> to vector<256x32xbf16>
    %c0_281 = arith.constant 0 : index
    %c256_282 = arith.constant 256 : index
    %252 = vector.load %arg9[%c0_281, %c256_282] : memref<256x288xbf16, #tpu.memory_space<vmem>>, vector<256x32xbf16>
    tpu.vector_store %arg9[%c0_281, %c256_282], %251 {strides = array<i32>} : memref<256x288xbf16, #tpu.memory_space<vmem>>, vector<256x32xbf16>,
    %c0_283 = arith.constant 0 : index
    %c0_284 = arith.constant 0 : index
    %253 = vector.load %arg5[%c0_283, %c0_284] : memref<4x288xbf16, #tpu.memory_space<vmem>>, vector<4x288xbf16>
    %c0_285 = arith.constant 0 : index
    %c0_286 = arith.constant 0 : index
    %254 = vector.load %arg9[%c0_285, %c0_286] : memref<256x288xbf16, #tpu.memory_space<vmem>>, vector<256x288xbf16>
    %cst_287 = arith.constant dense<0.000000e+00> : vector<4x256xf32>
    %255 = tpu.matmul %253, %254, %cst_287 {dimension_numbers = #tpu.dot_dimension_numbers<[1], [1], [0], [0], [0, 0, 1, 0], [], []>} : vector<4x288xbf16>, vector<256x288xbf16>, vector<4x256xf32> -> vector<4x256xf32>
    %c0_288 = arith.constant 0 : index
    %c0_289 = arith.constant 0 : index
    %256 = vector.load %arg6[%c0_288, %c0_289] : memref<4x1xf32, #tpu.memory_space<vmem>>, vector<4x1xf32>
    %257 = vector.broadcast %256 : vector<4x1xf32> to vector<4x256xf32>
    %258 = arith.addf %255, %257 : vector<4x256xf32>
    %259 = math.tanh %258 : vector<4x256xf32>
    %c0_290 = arith.constant 0 : index
    %c0_291 = arith.constant 0 : index
    %c0_292 = arith.constant 0 : index
    %260 = vector.load %arg7[%c0_290, %c0_291, %c0_292] : memref<1x4x256xf32, #tpu.memory_space<vmem>>, vector<1x4x256xf32>
    %261 = vector.shape_cast %260 : vector<1x4x256xf32> to vector<4x256xf32>
    %262 = vector.shape_cast %259 : vector<4x256xf32> to vector<1x4x256xf32>
    tpu.vector_store %arg7[%c0_290, %c0_291, %c0_292], %262 {strides = array<i32>} : memref<1x4x256xf32, #tpu.memory_space<vmem>>, vector<1x4x256xf32>,
    return
  }
  func.func @transform_0(%arg0: i32) -> (i32, i32, i32, i32) {
    %c0_i32 = arith.constant 0 : i32
    %c0_i32_0 = arith.constant 0 : i32
    %c0_i32_1 = arith.constant 0 : i32
    %c0_i32_2 = arith.constant 0 : i32
    return %arg0, %c0_i32, %c0_i32_0, %c0_i32_1 : i32, i32, i32, i32
  }
  func.func @transform_1(%arg0: i32) -> (i32, i32, i32) {
    %c0_i32 = arith.constant 0 : i32
    %c0_i32_0 = arith.constant 0 : i32
    %c0_i32_1 = arith.constant 0 : i32
    %c0_i32_2 = arith.constant 0 : i32
    return %c0_i32, %c0_i32_0, %c0_i32_1 : i32, i32, i32
  }
  func.func @transform_2(%arg0: i32) -> (i32, i32) {
    %c0_i32 = arith.constant 0 : i32
    %c0_i32_0 = arith.constant 0 : i32
    %c0_i32_1 = arith.constant 0 : i32
    return %c0_i32, %c0_i32_0 : i32, i32
  }
  func.func @transform_3(%arg0: i32) -> (i32, i32) {
    %c0_i32 = arith.constant 0 : i32
    %c0_i32_0 = arith.constant 0 : i32
    %c0_i32_1 = arith.constant 0 : i32
    return %c0_i32, %c0_i32_0 : i32, i32
  }
  func.func @transform_4(%arg0: i32) -> (i32, i32) {
    %c0_i32 = arith.constant 0 : i32
    %c0_i32_0 = arith.constant 0 : i32
    %c0_i32_1 = arith.constant 0 : i32
    return %c0_i32, %c0_i32_0 : i32, i32
  }
  func.func @transform_5(%arg0: i32) -> (i32, i32) {
    %c0_i32 = arith.constant 0 : i32
    %c0_i32_0 = arith.constant 0 : i32
    %c0_i32_1 = arith.constant 0 : i32
    return %c0_i32, %c0_i32_0 : i32, i32
  }
  func.func @transform_6(%arg0: i32) -> (i32, i32, i32) {
    %c0_i32 = arith.constant 0 : i32
    %c0_i32_0 = arith.constant 0 : i32
    %c0_i32_1 = arith.constant 0 : i32
    return %arg0, %c0_i32, %c0_i32_0 : i32, i32, i32
  }
}

</mosaic_0001>

<bundles_post_ra>
// kernel: generator_forward.1
= control target key start
LH: loop header
LB: loop body
LE: loop exit
PB: predicated region body
PF: predicated region fallthrough
CT: control target
= control target key end

     0   :  { %s9622_s21 = smov 0   ;;  %s12286_s0 = inlined_call_operand.vmem [shape: f32[2,16,16,4], index: 0, kind: input, shape index: {}]   ;;  %s12287_s1 = inlined_call_operand.vmem [shape: bf16[4,288,32], index: 1, kind: input, shape index: {}]   ;;  %s12288_s2 = inlined_call_operand.vmem [shape: f32[4,32], index: 2, kind: input, shape index: {}]   ;;  %s12289_s3 = inlined_call_operand.vmem [shape: f32[4,32], index: 3, kind: input, shape index: {}]   ;;  %s12290_s4 = inlined_call_operand.vmem [shape: bf16[4,288], index: 4, kind: input, shape index: {}]   ;;  %s12291_s5 = inlined_call_operand.vmem [shape: f32[4,1], index: 5, kind: input, shape index: {}]   ;;  %s12292_s6 = inlined_call_operand.vmem [shape: f32[2,4,256], index: 6, kind: output, shape index: {}]  }
   0x1 LB: > { %s8507_s22 = sadd.s32 4294967295, %s9579_s21   ;;  %p8511_p0 = scmp.ge.s32.totalorder %s9579_s21, 1  ;;  %s9579_s21 = sphi %s9622_s21, %s16_s21  }
   0x2   : > { %p212_p1 = scmp.lt.s32.totalorder %s9579_s21, 3 }
   0x4   : > { %p213_p2 = pnand %p8511_p0, %p212_p1 }
   0x5   : > { %vm253_vm0 = vcmask (!%p213_p2), 261120   ;;  %vm256_vm1 = vcmask (!%p213_p2), 254976   ;;  %v9581_v0 = vmov (!%p213_p2), 0.0   ;;  %p242_p3 = scmp.lt.s32.totalorder (!%p213_p2), %s8507_s22, 1  ;;  %v9486_v1 = vld [vmem:[%s12287_s1 + $0x40] sm:$0xff] (!%p213_p2)   ;;  %vm342_vm2 = vcmask (!%p213_p2), 31744  }
   0x6   : > { %216 = sbr.rel (%p213_p2) target bundleno = 2117 (0x845), region = 44  ;;  %254 = vst.msk [vmem:[#allocation2] sm:$0xff] (!%p213_p2), %vm253_vm0, %v9581_v0  ;;  %255 = vst.msk [vmem:[#allocation2 + $0x8] sm:$0xff] (!%p213_p2), %vm253_vm0, %v9581_v0  ;;  %v9487_v2 = vld [vmem:[%s12287_s1] sm:$0xff] (!%p213_p2)   ;;  %8773 = vmatprep.subr.bf16.mxu0 (!%p213_p2), %v9486_v1  ;;  %v9488_v3 = vld [vmem:[%s12287_s1 + $0x48] sm:$0xff] (!%p213_p2)   ;;  %s9582_s13 = smov (!%p213_p2), 32  }
   0x7   : > { %257 = vst.msk [vmem:[#allocation2 + $0x10] sm:$0x3] (!%p213_p2), %vm256_vm1, %v9581_v0  ;;  %260 = vst.msk [vmem:[#allocation2 + $0x28] sm:$0x3] (!%p213_p2), %vm256_vm1, %v9581_v0  ;;  %8774 = vmatpush3.bf16.msra.mxu0 (!%p213_p2), %v9487_v2  ;;  %v9489_v4 = vld [vmem:[%s12287_s1 + $0x8] sm:$0xff] (!%p213_p2)   ;;  %v9490_v5 = vld [vmem:[%s12287_s1 + $0x50] sm:$0xff] (!%p213_p2)  }
   0x8   : > { %258 = vst.msk [vmem:[#allocation2 + $0x18] sm:$0xff] (!%p213_p2), %vm253_vm0, %v9581_v0  ;;  %259 = vst.msk [vmem:[#allocation2 + $0x20] sm:$0xff] (!%p213_p2), %vm253_vm0, %v9581_v0  ;;  %8775 = vmatprep.subr.bf16.mxu0 (!%p213_p2), %v9488_v3  ;;  %s9583_s14 = smov (!%p213_p2), 64   ;;  %s9584_s15 = smov (!%p213_p2), 96   ;;  %vm551_vm3 = vcmask (!%p213_p2), 523520   ;;  %vm680_vm4 = vcmask (!%p213_p2), 785920  }
   0x9   : > { %261 = vst.msk [vmem:[#allocation2 + $0x30] sm:$0xff] (!%p213_p2), %vm253_vm0, %v9581_v0  ;;  %262 = vst.msk [vmem:[#allocation2 + $0x38] sm:$0xff] (!%p213_p2), %vm253_vm0, %v9581_v0  ;;  %vm809_vm5 = vcmask (!%p213_p2), 1048320  }
   0xa   : > { %263 = vst.msk [vmem:[#allocation2 + $0x40] sm:$0x3] (!%p213_p2), %vm256_vm1, %v9581_v0  ;;  %266 = vst.msk [vmem:[#allocation2 + $0x58] sm:$0x3] (!%p213_p2), %vm256_vm1, %v9581_v0 }
   0xb   : > { %264 = vst.msk [vmem:[#allocation2 + $0x48] sm:$0xff] (!%p213_p2), %vm253_vm0, %v9581_v0  ;;  %265 = vst.msk [vmem:[#allocation2 + $0x50] sm:$0xff] (!%p213_p2), %vm253_vm0, %v9581_v0  ;;  %8776 = vmatpush3.bf16.msra.mxu0 (!%p213_p2), %v9489_v4 }
   0xc   : > { %267 = vst.msk [vmem:[#allocation2 + $0x60] sm:$0xff] (!%p213_p2), %vm253_vm0, %v9581_v0  ;;  %268 = vst.msk [vmem:[#allocation2 + $0x68] sm:$0xff] (!%p213_p2), %vm253_vm0, %v9581_v0  ;;  %8777 = vmatprep.subr.bf16.mxu0 (!%p213_p2), %v9490_v5 }
   0xd   : > { %269 = vst.msk [vmem:[#allocation2 + $0x70] sm:$0x3] %vm256_vm1, %v9581_v0  ;;  %272 = vst.msk [vmem:[#allocation2 + $0x88] sm:$0x3] %vm256_vm1, %v9581_v0  ;;  %s12294_s22 = smov (!%p242_p3, %s8507_s22), 1  ;;  %v439_v9 = vld [vmem:[#allocation2 + $0x1] sm:$0xff] }
   0xe   : > { %270 = vst.msk [vmem:[#allocation2 + $0x78] sm:$0xff] %vm253_vm0, %v9581_v0  ;;  %271 = vst.msk [vmem:[#allocation2 + $0x80] sm:$0xff] %vm253_vm0, %v9581_v0  ;;  %s8771_s29 = sshll.u32 %s12294_s22, 8  ;;  %v440_v10 = vld [vmem:[#allocation2 + $0x9] sm:$0xff] }
   0xf   : > { %273 = vst.msk [vmem:[#allocation2 + $0x90] sm:$0xff] %vm253_vm0, %v9581_v0  ;;  %274 = vst.msk [vmem:[#allocation2 + $0x98] sm:$0xff] %vm253_vm0, %v9581_v0  ;;  %s9706_s10 = scalar_lea.vmem %s12286_s0, %s8771_s29  ;;  %v568_v11 = vld [vmem:[#allocation2 + $0x2] sm:$0xff]  ;;  %v471_v12 = vpack.c.bf16 %v440_v10, %v439_v9  ;;  %v569_v13 = vld [vmem:[#allocation2 + $0xa] sm:$0xff] }
  0x10   : > { %275 = vst.msk [vmem:[#allocation2 + $0xa0] sm:$0x3] %vm256_vm1, %v9581_v0  ;;  %278 = vst.msk [vmem:[#allocation2 + $0xb8] sm:$0x3] %vm256_vm1, %v9581_v0  ;;  %v309_v6 = vld [vmem:[%s9706_s10] sm:$0xff]  ;;  %v310_v7 = vld [vmem:[%s9706_s10 + $0x8] sm:$0xff]  ;;  %v600_v16 = vpack.c.bf16 %v569_v13, %v568_v11 }
  0x11   : > { %276 = vst.msk [vmem:[#allocation2 + $0xa8] sm:$0xff] %vm253_vm0, %v9581_v0  ;;  %277 = vst.msk [vmem:[#allocation2 + $0xb0] sm:$0xff] %vm253_vm0, %v9581_v0  ;;  %v311_v8 = vld [vmem:[%s9706_s10 + $0x10] sm:$0xff]  ;;  %v312_v14 = vld [vmem:[%s9706_s10 + $0x18] sm:$0xff]  ;;  %503 = vrot.lane.b32.xlu0 %v471_v12, %s9582_s13 }
  0x12   : > { %279 = vst.msk [vmem:[#allocation2 + $0xc0] sm:$0xff] %vm253_vm0, %v9581_v0  ;;  %280 = vst.msk [vmem:[#allocation2 + $0xc8] sm:$0xff] %vm253_vm0, %v9581_v0  ;;  %v313_v15 = vld [vmem:[%s9706_s10 + $0x20] sm:$0xff]  ;;  %v314_v17 = vld [vmem:[%s9706_s10 + $0x28] sm:$0xff]  ;;  %632 = vrot.lane.b32.xlu1 %v600_v16, %s9583_s14 }
  0x13   : > { %281 = vst.msk [vmem:[#allocation2 + $0xd0] sm:$0x3] %vm256_vm1, %v9581_v0  ;;  %284 = vst.msk [vmem:[#allocation2 + $0xe8] sm:$0x3] %vm256_vm1, %v9581_v0  ;;  %v315_v18 = vld [vmem:[%s9706_s10 + $0x30] sm:$0xff]  ;;  %v316_v19 = vld [vmem:[%s9706_s10 + $0x38] sm:$0xff] }
  0x14   : > { %282 = vst.msk [vmem:[#allocation2 + $0xd8] sm:$0xff] %vm253_vm0, %v9581_v0  ;;  %283 = vst.msk [vmem:[#allocation2 + $0xe0] sm:$0xff] %vm253_vm0, %v9581_v0  ;;  %v317_v20 = vld [vmem:[%s9706_s10 + $0x40] sm:$0xff]  ;;  %v318_v21 = vld [vmem:[%s9706_s10 + $0x48] sm:$0xff] }
  0x15   : > { %285 = vst.msk [vmem:[#allocation2 + $0xf0] sm:$0xff] %vm253_vm0, %v9581_v0  ;;  %286 = vst.msk [vmem:[#allocation2 + $0xf8] sm:$0xff] %vm253_vm0, %v9581_v0  ;;  %v319_v22 = vld [vmem:[%s9706_s10 + $0x50] sm:$0xff]  ;;  %v320_v23 = vld [vmem:[%s9706_s10 + $0x58] sm:$0xff] }
  0x16   : > { %287 = vst.msk [vmem:[#allocation2 + $0x100] sm:$0x3] %vm256_vm1, %v9581_v0  ;;  %290 = vst.msk [vmem:[#allocation2 + $0x118] sm:$0x3] %vm256_vm1, %v9581_v0  ;;  %v321_v24 = vld [vmem:[%s9706_s10 + $0x60] sm:$0xff]  ;;  %v322_v25 = vld [vmem:[%s9706_s10 + $0x68] sm:$0xff] }
  0x17   : > { %288 = vst.msk [vmem:[#allocation2 + $0x108] sm:$0xff] %vm253_vm0, %v9581_v0  ;;  %289 = vst.msk [vmem:[#allocation2 + $0x110] sm:$0xff] %vm253_vm0, %v9581_v0  ;;  %v323_v26 = vld [vmem:[%s9706_s10 + $0x70] sm:$0xff]  ;;  %v324_v27 = vld [vmem:[%s9706_s10 + $0x78] sm:$0xff] }
  0x18   : > { %291 = vst.msk [vmem:[#allocation2 + $0x120] sm:$0xff] %vm253_vm0, %v9581_v0  ;;  %292 = vst.msk [vmem:[#allocation2 + $0x128] sm:$0xff] %vm253_vm0, %v9581_v0  ;;  %v325_v28 = vld [vmem:[%s9706_s10 + $0x80] sm:$0xff]  ;;  %v326_v29 = vld [vmem:[%s9706_s10 + $0x88] sm:$0xff] }
  0x19   : > { %293 = vst.msk [vmem:[#allocation2 + $0x130] sm:$0x3] %vm256_vm1, %v9581_v0  ;;  %296 = vst.msk [vmem:[#allocation2 + $0x148] sm:$0x3] %vm256_vm1, %v9581_v0  ;;  %v327_v30 = vld [vmem:[%s9706_s10 + $0x90] sm:$0xff]  ;;  %v328_v31 = vld [vmem:[%s9706_s10 + $0x98] sm:$0xff] }
  0x1a   : > { %294 = vst.msk [vmem:[#allocation2 + $0x138] sm:$0xff] %vm253_vm0, %v9581_v0  ;;  %295 = vst.msk [vmem:[#allocation2 + $0x140] sm:$0xff] %vm253_vm0, %v9581_v0 }
  0x1b   : > { %297 = vst.msk [vmem:[#allocation2 + $0x150] sm:$0xff] %vm253_vm0, %v9581_v0  ;;  %298 = vst.msk [vmem:[#allocation2 + $0x158] sm:$0xff] %vm253_vm0, %v9581_v0 }
  0x1c   : > { %299 = vst.msk [vmem:[#allocation2 + $0x160] sm:$0x3] %vm256_vm1, %v9581_v0  ;;  %302 = vst.msk [vmem:[#allocation2 + $0x178] sm:$0x3] %vm256_vm1, %v9581_v0 }
  0x1d   : > { %300 = vst.msk [vmem:[#allocation2 + $0x168] sm:$0xff] %vm253_vm0, %v9581_v0  ;;  %301 = vst.msk [vmem:[#allocation2 + $0x170] sm:$0xff] %vm253_vm0, %v9581_v0 }
  0x1e   : > { %303 = vst.msk [vmem:[#allocation2 + $0x180] sm:$0xff] %vm253_vm0, %v9581_v0  ;;  %304 = vst.msk [vmem:[#allocation2 + $0x188] sm:$0xff] %vm253_vm0, %v9581_v0 }
  0x1f   : > { %305 = vst.msk [vmem:[#allocation2 + $0x190] sm:$0x3] %vm256_vm1, %v9581_v0  ;;  %308 = vst.msk [vmem:[#allocation2 + $0x1a8] sm:$0x3] %vm256_vm1, %v9581_v0 }
  0x20   : > { %306 = vst.msk [vmem:[#allocation2 + $0x198] sm:$0xff] %vm253_vm0, %v9581_v0  ;;  %307 = vst.msk [vmem:[#allocation2 + $0x1a0] sm:$0xff] %vm253_vm0, %v9581_v0 }
  0x21   : > { %343 = vst.msk [vmem:[#allocation2 + $0x19] sm:$0xff] %vm342_vm2, %v309_v6  ;;  %344 = vst.msk [vmem:[#allocation2 + $0x21] sm:$0xff] %vm342_vm2, %v310_v7 }
  0x22   : > { %345 = vst.msk [vmem:[#allocation2 + $0x31] sm:$0xff] %vm342_vm2, %v311_v8  ;;  %346 = vst.msk [vmem:[#allocation2 + $0x39] sm:$0xff] %vm342_vm2, %v312_v14 }
  0x23   : > { %347 = vst.msk [vmem:[#allocation2 + $0x49] sm:$0xff] %vm342_vm2, %v313_v15  ;;  %348 = vst.msk [vmem:[#allocation2 + $0x51] sm:$0xff] %vm342_vm2, %v314_v17 }
  0x24   : > { %349 = vst.msk [vmem:[#allocation2 + $0x61] sm:$0xff] %vm342_vm2, %v315_v18  ;;  %350 = vst.msk [vmem:[#allocation2 + $0x69] sm:$0xff] %vm342_vm2, %v316_v19  ;;  %v9491_v18 = vld [vmem:[%s12287_s1 + $0x10] sm:$0xff]   ;;  %v9492_v19 = vld [vmem:[%s12287_s1 + $0x58] sm:$0xff]  }
  0x25   : > { %351 = vst.msk [vmem:[#allocation2 + $0x79] sm:$0xff] %vm342_vm2, %v317_v20  ;;  %352 = vst.msk [vmem:[#allocation2 + $0x81] sm:$0xff] %vm342_vm2, %v318_v21  ;;  %v329_v20 = vld [vmem:[%s9706_s10 + $0xa0] sm:$0xff]  ;;  %v330_v21 = vld [vmem:[%s9706_s10 + $0xa8] sm:$0xff]  ;;  %8778 = vmatpush3.bf16.msra.mxu0 %v9491_v18 }
  0x26   : > { %353 = vst.msk [vmem:[#allocation2 + $0x91] sm:$0xff] %vm342_vm2, %v319_v22  ;;  %354 = vst.msk [vmem:[#allocation2 + $0x99] sm:$0xff] %vm342_vm2, %v320_v23  ;;  %v9493_v22 = vld [vmem:[%s12287_s1 + $0x18] sm:$0xff]   ;;  %8779 = vmatprep.subr.bf16.mxu0 %v9492_v19 }
  0x27   : > { %355 = vst.msk [vmem:[#allocation2 + $0xa9] sm:$0xff] %vm342_vm2, %v321_v24  ;;  %356 = vst.msk [vmem:[#allocation2 + $0xb1] sm:$0xff] %vm342_vm2, %v322_v25  ;;  %v376_v24 = vld [vmem:[#allocation2 + $0x8] sm:$0xff]  ;;  %v375_v25 = vld [vmem:[#allocation2] sm:$0xff] }
  0x28   : > { %357 = vst.msk [vmem:[#allocation2 + $0xc1] sm:$0xff] %vm342_vm2, %v323_v26  ;;  %358 = vst.msk [vmem:[#allocation2 + $0xc9] sm:$0xff] %vm342_vm2, %v324_v27  ;;  %v890_v32 = vld [vmem:[#allocation2 + $0x1a] sm:$0xff]  ;;  %v891_v33 = vld [vmem:[#allocation2 + $0x22] sm:$0xff]  ;;  %v407_v26 = vpack.c.bf16 %v376_v24, %v375_v25 }
  0x29   : > { %359 = vst.msk [vmem:[#allocation2 + $0xd9] sm:$0xff] %vm342_vm2, %v325_v28  ;;  %v1019_v34 = vld [vmem:[#allocation2 + $0x30] sm:$0xff]  ;;  %360 = vst.msk [vmem:[#allocation2 + $0xe1] sm:$0xff] %vm342_vm2, %v326_v29  ;;  %v9753_v35 = vpack.c.bf16 %v891_v33, %v890_v32  ;;  %v697_v37 = vld [vmem:[#allocation2 + $0x18] sm:$0xff]  ;;  %8780 = vmatpush3.bf16.msra.mxu0 %v9493_v22 }
  0x2a   : > { %361 = vst.msk [vmem:[#allocation2 + $0xf1] sm:$0xff] %vm342_vm2, %v327_v30  ;;  %362 = vst.msk [vmem:[#allocation2 + $0xf9] sm:$0xff] %vm342_vm2, %v328_v31  ;;  %v1147_v36 = vld [vmem:[#allocation2 + $0x31] sm:$0xff]  ;;  %v698_v38 = vld [vmem:[#allocation2 + $0x20] sm:$0xff] }
  0x2b   : > { %v1020_v39 = vld [vmem:[#allocation2 + $0x38] sm:$0xff]  ;;  %v729_v41 = vpack.c.bf16 %v698_v38, %v697_v37  ;;  %954 = vrot.lane.b32.xlu0 %v9753_v35, %s9582_s13  ;;  %v442_v47 = vld [vmem:[#allocation2 + $0x21] sm:$0xff]  ;;  %v1022_v51 = vld [vmem:[#allocation2 + $0x50] sm:$0xff]  ;;  %363 = vst.msk [vmem:[#allocation2 + $0x109] sm:$0xff] %vm342_vm2, %v329_v20 }
  0x2c   : > { %v1148_v40 = vld [vmem:[#allocation2 + $0x39] sm:$0xff]  ;;  %v9757_v43 = vpack.c.bf16 %v1020_v39, %v1019_v34  ;;  %v1021_v50 = vld [vmem:[#allocation2 + $0x48] sm:$0xff]  ;;  %v1150_v54 = vld [vmem:[#allocation2 + $0x51] sm:$0xff]  ;;  %364 = vst.msk [vmem:[#allocation2 + $0x111] sm:$0xff] %vm342_vm2, %v330_v21 }
  0x2d   : > { %v892_v42 = vld [vmem:[#allocation2 + $0x32] sm:$0xff]  ;;  %v9759_v44 = vpack.c.bf16 %v1148_v40, %v1147_v36  ;;  %v893_v45 = vld [vmem:[#allocation2 + $0x3a] sm:$0xff]  ;;  %v1149_v52 = vld [vmem:[#allocation2 + $0x49] sm:$0xff]  ;;  %424 = vst.msk [vmem:[#allocation3 + $0x18] sm:$0xff] %vm253_vm0, %v729_v41  ;;  %v9766_v53 = vpack.c.bf16 %v1022_v51, %v1021_v50 }
  0x2e   : > { %v441_v46 = vld [vmem:[#allocation2 + $0x19] sm:$0xff]  ;;  %v9761_v48 = vpack.c.bf16 %v893_v45, %v892_v42  ;;  %1083 = vrot.lane.b32.xlu1 %v9757_v43, %s9583_s14  ;;  %v894_v55 = vld [vmem:[#allocation2 + $0x4a] sm:$0xff]  ;;  %425 = vst.msk [vmem:[#allocation3 + $0x30] sm:$0xff] %vm253_vm0, %v9757_v43  ;;  %v9772_v57 = vpack.c.bf16 %v1150_v54, %v1149_v52  ;;  %v1151_v59 = vld [vmem:[#allocation2 + $0x61] sm:$0xff] }
  0x2f   : > { %v472_v49 = vpack.c.bf16 %v442_v47, %v441_v46  ;;  %v895_v56 = vld [vmem:[#allocation2 + $0x52] sm:$0xff]  ;;  %875 = vst.msk [vmem:[#allocation3 + $0x20] sm:$0xff] %vm253_vm0, %v9759_v44  ;;  %1211 = vrot.lane.b32.xlu0 %v9759_v44, %s9584_s15  ;;  %v1152_v60 = vld [vmem:[#allocation2 + $0x69] sm:$0xff]  ;;  %426 = vst.msk [vmem:[#allocation3 + $0x48] sm:$0xff] %vm253_vm0, %v9766_v53 }
  0x30   : > { %v9774_v58 = vpack.c.bf16 %v895_v56, %v894_v55  ;;  %1323 = vst.msk [vmem:[#allocation3 + $0x10] sm:$0xff] %vm253_vm0, %v9761_v48  ;;  %v896_v61 = vld [vmem:[#allocation2 + $0x62] sm:$0xff]  ;;  %v897_v62 = vld [vmem:[#allocation2 + $0x6a] sm:$0xff]  ;;  %v9783_v63 = vpack.c.bf16 %v1152_v60, %v1151_v59  ;;  %v1153_v1 = vld [vmem:[#allocation2 + $0x79] sm:$0xff] }
  0x31   : > { %874 = vst.msk [vmem:[#allocation3 + $0x8] sm:$0xff] %vm253_vm0, %v472_v49  ;;  %v9785_v0 = vpack.c.bf16 %v897_v62, %v896_v61  ;;  %876 = vst.msk [vmem:[#allocation3 + $0x38] sm:$0xff] %vm253_vm0, %v9772_v57  ;;  %v1154_v2 = vld [vmem:[#allocation2 + $0x81] sm:$0xff]  ;;  %v1155_v7 = vld [vmem:[#allocation2 + $0x91] sm:$0xff] }
  0x32   : > { %1324 = vst.msk [vmem:[#allocation3 + $0x28] sm:$0xff] %vm253_vm0, %v9774_v58  ;;  %761 = vrot.lane.b32.xlu1 %v729_v41, %s9584_s15  ;;  %v898_v3 = vld [vmem:[#allocation2 + $0x7a] sm:$0xff]  ;;  %v899_v4 = vld [vmem:[#allocation2 + $0x82] sm:$0xff]  ;;  %v9792_v5 = vpack.c.bf16 %v1154_v2, %v1153_v1  ;;  %877 = vst.msk [vmem:[#allocation3 + $0x50] sm:$0xff] %vm253_vm0, %v9783_v63 }
  0x33   : > { %v9794_v6 = vpack.c.bf16 %v899_v4, %v898_v3  ;;  %1325 = vst.msk [vmem:[#allocation3 + $0x40] sm:$0xff] %vm253_vm0, %v9785_v0  ;;  %956 = vrot.lane.b32.xlu0 %v9761_v48, %s9582_s13  ;;  %v1156_v8 = vld [vmem:[#allocation2 + $0x99] sm:$0xff]  ;;  %v902_v13 = vld [vmem:[#allocation2 + $0xaa] sm:$0xff]  ;;  %423 = vst.msk [vmem:[#allocation3] sm:$0xff] %vm253_vm0, %v407_v26 }
  0x34   : > { %v900_v9 = vld [vmem:[#allocation2 + $0x92] sm:$0xff]  ;;  %v901_v10 = vld [vmem:[#allocation2 + $0x9a] sm:$0xff]  ;;  %v9802_v11 = vpack.c.bf16 %v1156_v8, %v1155_v7  ;;  %878 = vst.msk [vmem:[#allocation3 + $0x68] sm:$0xff] %vm253_vm0, %v9792_v5  ;;  %v1024_v17 = vld [vmem:[#allocation2 + $0x68] sm:$0xff] }
  0x35   : > { %v9804_v12 = vpack.c.bf16 %v901_v10, %v900_v9  ;;  %1326 = vst.msk [vmem:[#allocation3 + $0x58] sm:$0xff] %vm253_vm0, %v9794_v6  ;;  %v903_v14 = vld [vmem:[#allocation2 + $0xb2] sm:$0xff]  ;;  %v1023_v16 = vld [vmem:[#allocation2 + $0x60] sm:$0xff]  ;;  %v9496_v29 = vld [vmem:[%s12287_s1 + $0x68] sm:$0xff]  }
  0x36   : > { %505 = vrot.lane.b32.xlu1 %v472_v49, %s9582_s13  ;;  %v9811_v15 = vpack.c.bf16 %v903_v14, %v902_v13  ;;  %879 = vst.msk [vmem:[#allocation3 + $0x80] sm:$0xff] %vm253_vm0, %v9802_v11  ;;  %v9842_v23 = vpack.c.bf16 %v1024_v17, %v1023_v16  ;;  %v9494_v27 = vld [vmem:[%s12287_s1 + $0x60] sm:$0xff]   ;;  %v331_v30 = vld [vmem:[%s9706_s10 + $0xb0] sm:$0xff]  ;;  %v9497_v32 = vld [vmem:[%s12287_s1 + $0x28] sm:$0xff]  }
  0x37   : > { %1327 = vst.msk [vmem:[#allocation3 + $0x70] sm:$0xff] %vm253_vm0, %v9804_v12  ;;  %1085 = vrot.lane.b32.xlu0 %v9766_v53, %s9583_s14  ;;  %v9495_v28 = vld [vmem:[%s12287_s1 + $0x20] sm:$0xff]   ;;  %8781 = vmatprep.subr.bf16.mxu0 %v9494_v27  ;;  %v1165_v31 = vld [vmem:[#allocation2 + $0x109] sm:$0xff]  ;;  %v1025_v34 = vld [vmem:[#allocation2 + $0x78] sm:$0xff] }
  0x38   : > { %1328 = vst.msk [vmem:[#allocation3 + $0x88] sm:$0xff] %vm253_vm0, %v9811_v15  ;;  %v9498_v33 = vld [vmem:[%s12287_s1 + $0x70] sm:$0xff]   ;;  %8782 = vmatpush3.bf16.msra.mxu0 %v9495_v28  ;;  %v332_v40 = vld [vmem:[%s9706_s10 + $0xb8] sm:$0xff]  ;;  %v1026_v41 = vld [vmem:[#allocation2 + $0x80] sm:$0xff] }
  0x39   : > { %365 = vst.msk [vmem:[#allocation2 + $0x121] sm:$0xff] %vm342_vm2, %v331_v30  ;;  %v910_v36 = vld [vmem:[#allocation2 + $0x10a] sm:$0xff]  ;;  %v911_v37 = vld [vmem:[#allocation2 + $0x112] sm:$0xff]  ;;  %8783 = vmatprep.subr.bf16.mxu0 %v9496_v29  ;;  %366 = vst.msk [vmem:[#allocation2 + $0x129] sm:$0xff] %vm342_vm2, %v332_v40 }
  0x3a   : > { %634 = vrot.lane.b32.xlu1 %v9753_v35, %s9583_s14  ;;  %v1166_v35 = vld [vmem:[#allocation2 + $0x111] sm:$0xff]  ;;  %v9872_v39 = vpack.c.bf16 %v911_v37, %v910_v36  ;;  %v9500_v42 = vld [vmem:[%s12287_s1 + $0x80] sm:$0xff]   ;;  %v9503_v47 = vld [vmem:[%s12287_s1 + $0x88] sm:$0xff]  }
  0x3b   : > { %1213 = vrot.lane.b32.xlu0 %v9772_v57, %s9584_s15  ;;  %v9870_v38 = vpack.c.bf16 %v1166_v35, %v1165_v31  ;;  %v9501_v45 = vld [vmem:[%s12287_s1 + $0x78] sm:$0xff]   ;;  %9311 = vmatprep.subr.bf16.mxu1 %v9500_v42  ;;  %v1341_v49 = vld [vmem:[#allocation3 + $0x10] sm:$0xff]  ;;  %v334_v51 = vld [vmem:[%s9706_s10 + $0xc8] sm:$0xff] }
  0x3c   : > { %1332 = vst.msk [vmem:[#allocation3 + $0xe8] sm:$0xff] %vm253_vm0, %v9872_v39  ;;  %8784 = vmatpush3.bf16.msra.mxu0 %v9497_v32  ;;  %v9502_v46 = vld [vmem:[%s12287_s1 + $0x38] sm:$0xff]   ;;  %9312 = vmatpush3.bf16.msra.mxu1 %v9500_v42  ;;  %v333_v50 = vld [vmem:[%s9706_s10 + $0xc0] sm:$0xff]  ;;  %v335_v52 = vld [vmem:[%s9706_s10 + $0xd0] sm:$0xff] }
  0x3d   : > { %884 = vst.msk [vmem:[#allocation3 + $0xf8] sm:$0xff] %vm253_vm0, %v9870_v38  ;;  %8785 = vmatprep.subr.bf16.mxu0 %v9498_v33  ;;  %9313 = vmatprep.subr.bf16.mxu1 %v9503_v47  ;;  %v1344_v59 = vld [vmem:[#allocation3 + $0x28] sm:$0xff]  ;;  %v1347_v60 = vld [vmem:[#allocation3 + $0x40] sm:$0xff]  ;;  %v337_v62 = vld [vmem:[%s9706_s10 + $0xe0] sm:$0xff] }
  0x3e   : > { %763 = vrot.lane.b32.xlu1 %v9757_v43, %s9584_s15  ;;  %v9499_v43 = vld [vmem:[%s12287_s1 + $0x30] sm:$0xff]   ;;  %367 = vst.msk [vmem:[#allocation2 + $0x139] sm:$0xff] %vm342_vm2, %v333_v50  ;;  %368 = vst.msk [vmem:[#allocation2 + $0x141] sm:$0xff] %vm342_vm2, %v334_v51  ;;  %9315 = vmatprep.mubr.msk.bf16.mxu1 %vm253_vm0, %v1341_v49  ;;  %v338_v1 = vld [vmem:[%s9706_s10 + $0xe8] sm:$0xff] }
  0x3f   : > { %958 = vrot.lane.b32.xlu0 %v9774_v58, %s9582_s13  ;;  %369 = vst.msk [vmem:[#allocation2 + $0x151] sm:$0xff] %vm342_vm2, %v335_v52  ;;  %v383_v2 = vld [vmem:[#allocation2 + $0x60] sm:$0xff]  ;;  %v1027_v3 = vld [vmem:[#allocation2 + $0x90] sm:$0xff]  ;;  %v1028_v4 = vld [vmem:[#allocation2 + $0x98] sm:$0xff] }
  0x40   : > { %8786 = vmatpush3.bf16.msra.mxu0 %v9499_v43  ;;  %v1168_v54 = vld [vmem:[#allocation2 + $0x129] sm:$0xff]  ;;  %9314 = vmatpush3.bf16.msra.mxu1 %v9503_v47  ;;  %371 = vst.msk [vmem:[#allocation2 + $0x169] sm:$0xff] %vm342_vm2, %v337_v62  ;;  %372 = vst.msk [vmem:[#allocation2 + $0x171] sm:$0xff] %vm342_vm2, %v338_v1  ;;  %v340_v9 = vld [vmem:[%s9706_s10 + $0xf8] sm:$0xff]  ;;  %v9941_v21 = vpack.c.bf16 %v1028_v4, %v1027_v3 }
  0x41   : > { %8787 = vmatprep.subr.bf16.mxu0 %v9501_v45  ;;  %v912_v55 = vld [vmem:[#allocation2 + $0x122] sm:$0xff]  ;;  %v339_v8 = vld [vmem:[%s9706_s10 + $0xf0] sm:$0xff]  ;;  %374 = vst.msk [vmem:[#allocation2 + $0x189] sm:$0xff] %vm342_vm2, %v340_v9  ;;  %v385_v10 = vld [vmem:[#allocation2 + $0x78] sm:$0xff] }
  0x42   : > { %507 = vrot.lane.b32.xlu1 %v9759_v44, %s9582_s13  ;;  %v9890_v44 = vpack.c.bf16 %v1026_v41, %v1025_v34  ;;  %v384_v7 = vld [vmem:[#allocation2 + $0x68] sm:$0xff]  ;;  %373 = vst.msk [vmem:[#allocation2 + $0x181] sm:$0xff] %vm342_vm2, %v339_v8  ;;  %v386_v13 = vld [vmem:[#allocation2 + $0x80] sm:$0xff]  ;;  %v388_v62 = vld [vmem:[#allocation2 + $0x98] sm:$0xff] }
  0x43   : > { %1087 = vrot.lane.b32.xlu0 %v9842_v23, %s9583_s14  ;;  %9316 = vmatmul.mubr.msk.bf16.vlgmr.msra.gmra.mrb[0].mxu1 %vm253_vm0, %v1344_v59  ;;  %v412_v17 = vpack.c.bf16 %v386_v13, %v385_v10  ;;  %v1350_v27 = vld [vmem:[#allocation3 + $0x58] sm:$0xff]  ;;  %v1353_v49 = vld [vmem:[#allocation3 + $0x70] sm:$0xff]  ;;  %v1356_v1 = vld [vmem:[#allocation3 + $0x88] sm:$0xff] }
  0x44   : > { %8788 = vmatpush3.bf16.msra.mxu0 %v9502_v46  ;;  %9319 = vmatprep.mubr.msk.bf16.mxu1 %vm253_vm0, %v1347_v60  ;;  %v387_v60 = vld [vmem:[#allocation2 + $0x90] sm:$0xff]  ;;  %v1287_v8 = vld [vmem:[#allocation2 + $0xc2] sm:$0xff]  ;;  %v1289_v10 = vld [vmem:[#allocation2 + $0xda] sm:$0xff] }
  0x45   : > { %v1041_v14 = vld [vmem:[#allocation2 + $0x138] sm:$0xff]  ;;  %v1042_v18 = vld [vmem:[#allocation2 + $0x140] sm:$0xff]  ;;  %428 = vst.msk [vmem:[#allocation3 + $0x78] sm:$0xff] %vm253_vm0, %v412_v17  ;;  %v1157_v3 = vld [vmem:[#allocation2 + $0xa9] sm:$0xff] }
  0x46   : > { %636 = vrot.lane.b32.xlu1 %v9761_v48, %s9583_s14  ;;  %v1167_v48 = vld [vmem:[#allocation2 + $0x121] sm:$0xff]  ;;  %v1169_v16 = vld [vmem:[#allocation2 + $0x139] sm:$0xff]  ;;  %v9943_v22 = vpack.c.bf16 %v1042_v18, %v1041_v14  ;;  %v1043_v25 = vld [vmem:[#allocation2 + $0x150] sm:$0xff] }
  0x47   : > { %1215 = vrot.lane.b32.xlu0 %v9783_v63, %s9584_s15  ;;  %v9913_v56 = vpack.c.bf16 %v1168_v54, %v1167_v48  ;;  %v1170_v19 = vld [vmem:[#allocation2 + $0x141] sm:$0xff]  ;;  %v1171_v30 = vld [vmem:[#allocation2 + $0x151] sm:$0xff]  ;;  %v1173_v41 = vld [vmem:[#allocation2 + $0x169] sm:$0xff] }
  0x48   : > { %v914_v20 = vld [vmem:[#allocation2 + $0x13a] sm:$0xff]  ;;  %v9945_v24 = vpack.c.bf16 %v1170_v19, %v1169_v16  ;;  %v1045_v35 = vld [vmem:[#allocation2 + $0x168] sm:$0xff]  ;;  %v1046_v36 = vld [vmem:[#allocation2 + $0x170] sm:$0xff]  ;;  %436 = vst.msk [vmem:[#allocation3 + $0x138] sm:$0xff] %vm253_vm0, %v9943_v22 }
  0x49   : > { %885 = vst.msk [vmem:[#allocation3 + $0x110] sm:$0xff] %vm253_vm0, %v9913_v56  ;;  %v9962_v40 = vpack.c.bf16 %v1046_v36, %v1045_v35  ;;  %v1174_v42 = vld [vmem:[#allocation2 + $0x171] sm:$0xff]  ;;  %v1175_v47 = vld [vmem:[#allocation2 + $0x181] sm:$0xff]  ;;  %v1176_v48 = vld [vmem:[#allocation2 + $0x189] sm:$0xff] }
  0x4a   : > { %765 = vrot.lane.b32.xlu1 %v9766_v53, %s9584_s15  ;;  %v336_v53 = vld [vmem:[%s9706_s10 + $0xd8] sm:$0xff]  ;;  %886 = vst.msk [vmem:[#allocation3 + $0x128] sm:$0xff] %vm253_vm0, %v9945_v24  ;;  %v918_v43 = vld [vmem:[#allocation2 + $0x16a] sm:$0xff]  ;;  %v9983_v50 = vpack.c.bf16 %v1176_v48, %v1175_v47  ;;  %v920_v51 = vld [vmem:[#allocation2 + $0x182] sm:$0xff] }
  0x4b   : > { %960 = vrot.lane.b32.xlu0 %v9785_v0, %s9582_s13  ;;  %370 = vst.msk [vmem:[#allocation2 + $0x159] sm:$0xff] %vm342_vm2, %v336_v53  ;;  %v919_v45 = vld [vmem:[#allocation2 + $0x172] sm:$0xff]  ;;  %9320 = vmatmul.mubr.msk.bf16.gmra.mrb[4].mxu1 %vm253_vm0, %v1350_v27  ;;  %v921_v52 = vld [vmem:[#allocation2 + $0x18a] sm:$0xff]  ;;  %v1290_v13 = vld [vmem:[#allocation2 + $0xe2] sm:$0xff] }
  0x4c   : > { %v9975_v46 = vpack.c.bf16 %v919_v45, %v918_v43  ;;  %438 = vst.msk [vmem:[#allocation3 + $0x168] sm:$0xff] %vm253_vm0, %v9962_v40  ;;  %9323 = vmatprep.mubr.msk.bf16.mxu1 %vm253_vm0, %v1353_v49  ;;  %v1029_v53 = vld [vmem:[#allocation2 + $0xa8] sm:$0xff]  ;;  %v1030_v54 = vld [vmem:[#allocation2 + $0xb0] sm:$0xff]  ;;  %889 = vst.msk [vmem:[#allocation3 + $0x170] sm:$0xff] %vm253_vm0, %v9983_v50  ;;  %v1314_v14 = vpack.c.bf16 %v1290_v13, %v1289_v10 }
  0x4d   : > { %v1158_v4 = vld [vmem:[#allocation2 + $0xb1] sm:$0xff]  ;;  %v1031_v16 = vld [vmem:[#allocation2 + $0xc0] sm:$0xff]  ;;  %v1032_v17 = vld [vmem:[#allocation2 + $0xc8] sm:$0xff] }
  0x4e   : > { %509 = vrot.lane.b32.xlu1 %v9772_v57, %s9582_s13  ;;  %v913_v57 = vld [vmem:[#allocation2 + $0x12a] sm:$0xff]  ;;  %1336 = vst.msk [vmem:[#allocation3 + $0x148] sm:$0xff] %vm253_vm0, %v9975_v46  ;;  %v840_v18 = vld [vmem:[#allocation2 + $0xc1] sm:$0xff]  ;;  %1330 = vst.msk [vmem:[#allocation3 + $0xb8] sm:$0xff] %vm253_vm0, %v1314_v14  ;;  %v1057_v27 = vpack.c.bf16 %v1032_v17, %v1031_v16 }
  0x4f   : > { %1089 = vrot.lane.b32.xlu0 %v9890_v44, %s9583_s14  ;;  %v9918_v61 = vpack.c.bf16 %v913_v57, %v912_v55  ;;  %v9988_v55 = vpack.c.bf16 %v921_v52, %v920_v51  ;;  %v839_v57 = vld [vmem:[#allocation2 + $0xb1] sm:$0xff]  ;;  %v1034_v36 = vld [vmem:[#allocation2 + $0xe0] sm:$0xff]  ;;  %v392_v47 = vld [vmem:[#allocation2 + $0xc8] sm:$0xff] }
  0x50   : > { %v1288_v9 = vld [vmem:[#allocation2 + $0xca] sm:$0xff]  ;;  %v1033_v35 = vld [vmem:[#allocation2 + $0xd8] sm:$0xff]  ;;  %v391_v45 = vld [vmem:[#allocation2 + $0xc0] sm:$0xff] }
  0x51   : > { %1333 = vst.msk [vmem:[#allocation3 + $0x100] sm:$0xff] %vm253_vm0, %v9918_v61  ;;  %1337 = vst.msk [vmem:[#allocation3 + $0x160] sm:$0xff] %vm253_vm0, %v9988_v55  ;;  %v415_v48 = vpack.c.bf16 %v392_v47, %v391_v45  ;;  %v1161_v49 = vld [vmem:[#allocation2 + $0xd9] sm:$0xff]  ;;  %v1162_v51 = vld [vmem:[#allocation2 + $0xe1] sm:$0xff] }
  0x52   : > { %638 = vrot.lane.b32.xlu1 %v9774_v58, %s9583_s14  ;;  %v411_v58 = vpack.c.bf16 %v384_v7, %v383_v2  ;;  %v1044_v26 = vld [vmem:[#allocation2 + $0x158] sm:$0xff]  ;;  %v413_v2 = vpack.c.bf16 %v388_v62, %v387_v60  ;;  %v1056_v7 = vpack.c.bf16 %v1030_v54, %v1029_v53  ;;  %v907_v53 = vld [vmem:[#allocation2 + $0xe2] sm:$0xff]  ;;  %v1186_v54 = vpack.c.bf16 %v1162_v51, %v1161_v49  ;;  %v1035_v60 = vld [vmem:[#allocation2 + $0xf0] sm:$0xff] }
  0x53   : > { %1217 = vrot.lane.b32.xlu0 %v9792_v5, %s9584_s15  ;;  %v9950_v29 = vpack.c.bf16 %v1044_v26, %v1043_v25  ;;  %v1172_v31 = vld [vmem:[#allocation2 + $0x159] sm:$0xff]  ;;  %9324 = vmatmul.mubr.msk.bf16.gmra.mrb[8].mxu1 %vm253_vm0, %v1356_v1  ;;  %v1159_v26 = vld [vmem:[#allocation2 + $0xc1] sm:$0xff]  ;;  %431 = vst.msk [vmem:[#allocation3 + $0xc0] sm:$0xff] %vm253_vm0, %v415_v48 }
  0x54   : > { %427 = vst.msk [vmem:[#allocation3 + $0x60] sm:$0xff] %vm253_vm0, %v411_v58  ;;  %v916_v32 = vld [vmem:[#allocation2 + $0x152] sm:$0xff]  ;;  %v9954_v33 = vpack.c.bf16 %v1172_v31, %v1171_v30  ;;  %v917_v34 = vld [vmem:[#allocation2 + $0x15a] sm:$0xff]  ;;  %429 = vst.msk [vmem:[#allocation3 + $0x90] sm:$0xff] %vm253_vm0, %v413_v2  ;;  %v1313_v58 = vpack.c.bf16 %v1288_v9, %v1287_v8 }
  0x55   : > { %v9960_v37 = vpack.c.bf16 %v917_v34, %v916_v32  ;;  %437 = vst.msk [vmem:[#allocation3 + $0x150] sm:$0xff] %vm253_vm0, %v9950_v29  ;;  %v904_v31 = vld [vmem:[#allocation2 + $0xc2] sm:$0xff]  ;;  %v905_v32 = vld [vmem:[#allocation2 + $0xca] sm:$0xff]  ;;  %v906_v52 = vld [vmem:[#allocation2 + $0xda] sm:$0xff] }
  0x56   : > { %767 = vrot.lane.b32.xlu1 %v9842_v23, %s9584_s15  ;;  %v915_v23 = vld [vmem:[#allocation2 + $0x142] sm:$0xff]  ;;  %887 = vst.msk [vmem:[#allocation3 + $0x140] sm:$0xff] %vm253_vm0, %v9954_v33  ;;  %1329 = vst.msk [vmem:[#allocation3 + $0xa0] sm:$0xff] %vm253_vm0, %v1313_v58  ;;  %v1036_v62 = vld [vmem:[#allocation2 + $0xf8] sm:$0xff]  ;;  %v930_v1 = vpack.c.bf16 %v907_v53, %v906_v52 }
  0x57   : > { %962 = vrot.lane.b32.xlu0 %v9794_v6, %s9582_s13  ;;  %v9948_v28 = vpack.c.bf16 %v915_v23, %v914_v20  ;;  %1335 = vst.msk [vmem:[#allocation3 + $0x130] sm:$0xff] %vm253_vm0, %v9960_v37  ;;  %v389_v20 = vld [vmem:[#allocation2 + $0xa8] sm:$0xff]  ;;  %v390_v23 = vld [vmem:[#allocation2 + $0xb0] sm:$0xff]  ;;  %v1164_v58 = vld [vmem:[#allocation2 + $0xf9] sm:$0xff] }
  0x58   : > { %v414_v25 = vpack.c.bf16 %v390_v23, %v389_v20  ;;  %v844_v2 = vld [vmem:[#allocation2 + $0xf1] sm:$0xff]  ;;  %v909_v17 = vld [vmem:[#allocation2 + $0xfa] sm:$0xff]  ;;  %v400_v51 = vld [vmem:[#allocation2 + $0x128] sm:$0xff] }
  0x59   : > { %1334 = vst.msk [vmem:[#allocation3 + $0x118] sm:$0xff] %vm253_vm0, %v9948_v28  ;;  %v1163_v9 = vld [vmem:[#allocation2 + $0xf1] sm:$0xff]  ;;  %v399_v49 = vld [vmem:[#allocation2 + $0x120] sm:$0xff] }
  0x5a   : > { %511 = vrot.lane.b32.xlu1 %v9783_v63, %s9582_s13  ;;  %v9970_v63 = vpack.c.bf16 %v1174_v42, %v1173_v41  ;;  %430 = vst.msk [vmem:[#allocation3 + $0xa8] sm:$0xff] %vm253_vm0, %v414_v25  ;;  %v929_v41 = vpack.c.bf16 %v905_v32, %v904_v31  ;;  %v843_v42 = vld [vmem:[#allocation2 + $0xe1] sm:$0xff]  ;;  %v1368_v13 = vld [vmem:[#allocation3 + $0xe8] sm:$0xff]  ;;  %v1187_v14 = vpack.c.bf16 %v1164_v58, %v1163_v9  ;;  %v395_v20 = vld [vmem:[#allocation2 + $0xf0] sm:$0xff] }
  0x5b   : > { %1091 = vrot.lane.b32.xlu0 %v9941_v21, %s9583_s14  ;;  %v908_v16 = vld [vmem:[#allocation2 + $0xf2] sm:$0xff]  ;;  %v1040_v31 = vld [vmem:[#allocation2 + $0x128] sm:$0xff]  ;;  %v419_v53 = vpack.c.bf16 %v400_v51, %v399_v49 }
  0x5c   : > { %888 = vst.msk [vmem:[#allocation3 + $0x158] sm:$0xff] %vm253_vm0, %v9970_v63  ;;  %v396_v23 = vld [vmem:[#allocation2 + $0xf8] sm:$0xff]  ;;  %v397_v32 = vld [vmem:[#allocation2 + $0x108] sm:$0xff] }
  0x5d   : > { %v1359_v30 = vld [vmem:[#allocation3 + $0xa0] sm:$0xff]  ;;  %v417_v25 = vpack.c.bf16 %v396_v23, %v395_v20  ;;  %435 = vst.msk [vmem:[#allocation3 + $0x120] sm:$0xff] %vm253_vm0, %v419_v53 }
  0x5e   : > { %640 = vrot.lane.b32.xlu1 %v9785_v0, %s9583_s14  ;;  %v838_v0 = vld [vmem:[#allocation2 + $0xa9] sm:$0xff]  ;;  %9327 = vmatprep.mubr.msk.bf16.mxu1 %vm253_vm0, %v1359_v30  ;;  %v1039_v30 = vld [vmem:[#allocation2 + $0x120] sm:$0xff] }
  0x5f   : > { %1219 = vrot.lane.b32.xlu0 %v9802_v11, %s9584_s15  ;;  %v864_v59 = vpack.c.bf16 %v839_v57, %v838_v0  ;;  %v1291_v0 = vld [vmem:[#allocation2 + $0xf2] sm:$0xff]  ;;  %v1292_v57 = vld [vmem:[#allocation2 + $0xfa] sm:$0xff]  ;;  %433 = vst.msk [vmem:[#allocation3 + $0xf0] sm:$0xff] %vm253_vm0, %v417_v25 }
  0x61   : > { %880 = vst.msk [vmem:[#allocation3 + $0x98] sm:$0xff] %vm253_vm0, %v864_v59  ;;  %v1315_v59 = vpack.c.bf16 %v1292_v57, %v1291_v0 }
  0x62   : > { %769 = vrot.lane.b32.xlu1 %v9890_v44, %s9584_s15  ;;  %v1184_v44 = vpack.c.bf16 %v1158_v4, %v1157_v3  ;;  %v845_v3 = vld [vmem:[#allocation2 + $0xf9] sm:$0xff] }
  0x63   : > { %964 = vrot.lane.b32.xlu0 %v9804_v12, %s9582_s13  ;;  %1331 = vst.msk [vmem:[#allocation3 + $0xd0] sm:$0xff] %vm253_vm0, %v1315_v59  ;;  %v867_v4 = vpack.c.bf16 %v845_v3, %v844_v2  ;;  %v1377_v3 = vld [vmem:[#allocation3 + $0x130] sm:$0xff] }
  0x65   : > { %883 = vst.msk [vmem:[#allocation3 + $0xe0] sm:$0xff] %vm253_vm0, %v867_v4 }
  0x66   : > { %513 = vrot.lane.b32.xlu1 %v9792_v5, %s9582_s13  ;;  %v841_v5 = vld [vmem:[#allocation2 + $0xc9] sm:$0xff] }
  0x67   : > { %1093 = vrot.lane.b32.xlu0 %v1056_v7, %s9583_s14  ;;  %v865_v19 = vpack.c.bf16 %v841_v5, %v840_v18  ;;  %v931_v18 = vpack.c.bf16 %v909_v17, %v908_v16  ;;  %v1037_v5 = vld [vmem:[#allocation2 + $0x108] sm:$0xff] }
  0x69   : > { %881 = vst.msk [vmem:[#allocation3 + $0xb0] sm:$0xff] %vm253_vm0, %v865_v19  ;;  %v1038_v19 = vld [vmem:[#allocation2 + $0x110] sm:$0xff] }
  0x6a   : > { %642 = vrot.lane.b32.xlu1 %v9794_v6, %s9583_s14  ;;  %v1160_v6 = vld [vmem:[#allocation2 + $0xc9] sm:$0xff]  ;;  %v1365_v10 = vld [vmem:[#allocation3 + $0xd0] sm:$0xff] }
  0x6b   : > { %1221 = vrot.lane.b32.xlu0 %v1184_v44, %s9584_s15  ;;  %v1185_v34 = vpack.c.bf16 %v1160_v6, %v1159_v26  ;;  %v1060_v26 = vpack.c.bf16 %v1038_v19, %v1037_v5  ;;  %v1048_v5 = vld [vmem:[#allocation2 + $0x188] sm:$0xff] }
  0x6e   : > { %771 = vrot.lane.b32.xlu1 %v9941_v21, %s9584_s15  ;;  %v1362_v21 = vld [vmem:[#allocation3 + $0xb8] sm:$0xff] }
  0x6f   : > { %966 = vrot.lane.b32.xlu0 %v9811_v15, %s9582_s13  ;;  %9328 = vmatmul.mubr.msk.bf16.gmra.mrb[12].mxu1 %vm253_vm0, %v1362_v21  ;;  %v398_v21 = vld [vmem:[#allocation2 + $0x110] sm:$0xff] }
  0x70   : > { %9331 = vmatprep.mubr.msk.bf16.mxu1 %vm253_vm0, %v1365_v10 }
  0x72   : > { %515 = vrot.lane.b32.xlu1 %v9802_v11, %s9582_s13  ;;  %v842_v11 = vld [vmem:[#allocation2 + $0xd9] sm:$0xff] }
  0x73   : > { %1095 = vrot.lane.b32.xlu0 %v1057_v27, %s9583_s14  ;;  %v866_v43 = vpack.c.bf16 %v843_v42, %v842_v11  ;;  %v1371_v11 = vld [vmem:[#allocation3 + $0x100] sm:$0xff] }
  0x75   : > { %882 = vst.msk [vmem:[#allocation3 + $0xc8] sm:$0xff] %vm253_vm0, %v866_v43  ;;  %v1374_v43 = vld [vmem:[#allocation3 + $0x118] sm:$0xff] }
  0x76   : > { %644 = vrot.lane.b32.xlu1 %v9804_v12, %s9583_s14  ;;  %v1058_v12 = vpack.c.bf16 %v1034_v36, %v1033_v35  ;;  %v418_v35 = vpack.c.bf16 %v398_v21, %v397_v32  ;;  %v1050_v32 = vld [vmem:[#allocation2 + $0x1a0] sm:$0xff] }
  0x77   : > { %1223 = vrot.lane.b32.xlu0 %v1185_v34, %s9584_s15  ;;  %9332 = vmatmul.mubr.msk.bf16.gmra.mrb[16].mxu1 %vm253_vm0, %v1368_v13  ;;  %v1305_v13 = vld [vmem:[#allocation2 + $0x19a] sm:$0xff] }
  0x78   : > { %434 = vst.msk [vmem:[#allocation3 + $0x108] sm:$0xff] %vm253_vm0, %v418_v35  ;;  %9335 = vmatprep.mubr.msk.bf16.mxu1 %vm253_vm0, %v1371_v11 }
  0x7a   : > { %773 = vrot.lane.b32.xlu1 %v1056_v7, %s9584_s15  ;;  %v393_v7 = vld [vmem:[#allocation2 + $0xd8] sm:$0xff] }
  0x7b   : > { %968 = vrot.lane.b32.xlu0 %v929_v41, %s9582_s13 }
  0x7e   : > { %517 = vrot.lane.b32.xlu1 %v1184_v44, %s9582_s13  ;;  %v394_v44 = vld [vmem:[#allocation2 + $0xe0] sm:$0xff] }
  0x7f   : > { %1097 = vrot.lane.b32.xlu0 %v1058_v12, %s9583_s14  ;;  %v416_v8 = vpack.c.bf16 %v394_v44, %v393_v7  ;;  %9336 = vmatmul.mubr.msk.bf16.gmra.mrb[20].mxu1 %vm253_vm0, %v1374_v43  ;;  %v1380_v7 = vld [vmem:[#allocation3 + $0x148] sm:$0xff] }
  0x80   : > { %9339 = vmatprep.mubr.msk.bf16.mxu1 %vm253_vm0, %v1377_v3 }
  0x81   : > { %432 = vst.msk [vmem:[#allocation3 + $0xd8] sm:$0xff] %vm253_vm0, %v416_v8 }
  0x82   : > { %646 = vrot.lane.b32.xlu1 %v9811_v15, %s9583_s14  ;;  %v1059_v15 = vpack.c.bf16 %v1036_v62, %v1035_v60 }
  0x83   : > { %1225 = vrot.lane.b32.xlu0 %v1186_v54, %s9584_s15  ;;  %v504_v6 = vpop.permute.xlu0 %503 }
  0x84   : > { %552 = vst.msk [vmem:[#allocation3] sm:$0xff] %vm551_vm3, %v504_v6 }
  0x86   : > { %775 = vrot.lane.b32.xlu1 %v1057_v27, %s9584_s15  ;;  %v633_v27 = vpop.permute.xlu1 %632 }
  0x87   : > { %970 = vrot.lane.b32.xlu0 %v930_v1, %s9582_s13  ;;  %681 = vst.msk [vmem:[#allocation3] sm:$0xff] %vm680_vm4, %v633_v27  ;;  %9340 = vmatmul.mubr.msk.bf16.gmra.mrb[24].mxu1 %vm253_vm0, %v1380_v7 }
  0x8a   : > { %519 = vrot.lane.b32.xlu1 %v1185_v34, %s9582_s13 }
  0x8b   : > { %1099 = vrot.lane.b32.xlu0 %v1059_v15, %s9583_s14 }
  0x8e   : > { %648 = vrot.lane.b32.xlu1 %v929_v41, %s9583_s14  ;;  %v1061_v41 = vpack.c.bf16 %v1040_v31, %v1039_v30  ;;  %v1049_v31 = vld [vmem:[#allocation2 + $0x198] sm:$0xff] }
  0x8f   : > { %1227 = vrot.lane.b32.xlu0 %v1187_v14, %s9584_s15 }
  0x92   : > { %777 = vrot.lane.b32.xlu1 %v1058_v12, %s9584_s15 }
  0x93   : > { %972 = vrot.lane.b32.xlu0 %v931_v18, %s9582_s13 }
  0x96   : > { %521 = vrot.lane.b32.xlu1 %v1186_v54, %s9582_s13 }
  0x97   : > { %1101 = vrot.lane.b32.xlu0 %v1060_v26, %s9583_s14 }
  0x9a   : > { %650 = vrot.lane.b32.xlu1 %v930_v1, %s9583_s14 }
  0x9b   : > { %1229 = vrot.lane.b32.xlu0 %v9870_v38, %s9584_s15 }
  0x9d   : > { %v955_v34 = vpop.permute.xlu0 %954 }
  0x9e   : > { %779 = vrot.lane.b32.xlu1 %v1059_v15, %s9584_s15  ;;  %1002 = vst.msk [vmem:[#allocation3 + $0x8] sm:$0xff] %vm551_vm3, %v955_v34 }
  0x9f   : > { %974 = vrot.lane.b32.xlu0 %v9872_v39, %s9582_s13 }
  0xa0   : > { %v1084_v36 = vpop.permute.xlu1 %1083 }
  0xa1   : > { %1131 = vst.msk [vmem:[#allocation3 + $0x8] sm:$0xff] %vm680_vm4, %v1084_v36  ;;  %v1212_v42 = vpop.permute.xlu0 %1211  ;;  %v1066_v36 = vpack.c.bf16 %v1050_v32, %v1049_v31 }
  0xa2   : > { %523 = vrot.lane.b32.xlu1 %v1187_v14, %s9582_s13  ;;  %1259 = vst.msk [vmem:[#allocation3 + $0x8] sm:$0xff] %vm809_vm5, %v1212_v42  ;;  %v1306_v14 = vld [vmem:[#allocation2 + $0x1a2] sm:$0xff] }
  0xa3   : > { %1103 = vrot.lane.b32.xlu0 %v1061_v41, %s9583_s14  ;;  %v1322_v17 = vpack.c.bf16 %v1306_v14, %v1305_v13 }
  0xa4   : > { %v762_v45 = vpop.permute.xlu1 %761 }
  0xa5   : > { %810 = vst.msk [vmem:[#allocation3] sm:$0xff] %vm809_vm5, %v762_v45  ;;  %v957_v47 = vpop.permute.xlu0 %956 }
  0xa6   : > { %652 = vrot.lane.b32.xlu1 %v931_v18, %s9583_s14  ;;  %1003 = vst.msk [vmem:[#allocation3 + $0x20] sm:$0xff] %vm551_vm3, %v957_v47 }
  0xa7   : > { %1231 = vrot.lane.b32.xlu0 %v9913_v56, %s9584_s15  ;;  %1338 = vst.msk [vmem:[#allocation3 + $0x178] sm:$0xff] %vm253_vm0, %v1322_v17 }
  0xa8   : > { %v506_v48 = vpop.permute.xlu1 %505 }
  0xa9   : > { %553 = vst.msk [vmem:[#allocation3 + $0x18] sm:$0xff] %vm551_vm3, %v506_v48  ;;  %v1086_v12 = vpop.permute.xlu0 %1085  ;;  %v1340_v52 = vld [vmem:[#allocation3 + $0x8] sm:$0xff] }
  0xaa   : > { %781 = vrot.lane.b32.xlu1 %v1060_v26, %s9584_s15  ;;  %1132 = vst.msk [vmem:[#allocation3 + $0x20] sm:$0xff] %vm680_vm4, %v1086_v12  ;;  %1611 = vmatprep.mubr.bf16.mxu0 %v1340_v52  ;;  %v1383_v26 = vld [vmem:[#allocation3 + $0x160] sm:$0xff] }
  0xab   : > { %976 = vrot.lane.b32.xlu0 %v9918_v61, %s9582_s13  ;;  %9343 = vmatprep.mubr.msk.bf16.mxu1 %vm253_vm0, %v1383_v26 }
  0xac   : > { %v635_v54 = vpop.permute.xlu1 %634  ;;  %v1339_v0 = vld [vmem:[#allocation3] sm:$0xff] }
  0xad   : > { %682 = vst.msk [vmem:[#allocation3 + $0x18] sm:$0xff] %vm680_vm4, %v635_v54  ;;  %1612 = vmatmul.mubr.bf16.vlgmr.msra.gmra.mrb[0].mxu0 %v1339_v0  ;;  %v1214_v57 = vpop.permute.xlu0 %1213 }
  0xae   : > { %525 = vrot.lane.b32.xlu1 %v9870_v38, %s9582_s13  ;;  %1260 = vst.msk [vmem:[#allocation3 + $0x20] sm:$0xff] %vm809_vm5, %v1214_v57 }
  0xaf   : > { %1105 = vrot.lane.b32.xlu0 %v9943_v22, %s9583_s14 }
  0xb0   : > { %v764_v59 = vpop.permute.xlu1 %763 }
  0xb1   : > { %811 = vst.msk [vmem:[#allocation3 + $0x18] sm:$0xff] %vm809_vm5, %v764_v59  ;;  %v959_v60 = vpop.permute.xlu0 %958 }
  0xb2   : > { %654 = vrot.lane.b32.xlu1 %v9872_v39, %s9583_s14  ;;  %1004 = vst.msk [vmem:[#allocation3 + $0x38] sm:$0xff] %vm551_vm3, %v959_v60 }
  0xb3   : > { %1233 = vrot.lane.b32.xlu0 %v9945_v24, %s9584_s15 }
  0xb4   : > { %v508_v62 = vpop.permute.xlu1 %507 }
  0xb5   : > { %554 = vst.msk [vmem:[#allocation3 + $0x30] sm:$0xff] %vm551_vm3, %v508_v62  ;;  %v1088_v38 = vpop.permute.xlu0 %1087  ;;  %v1343_v1 = vld [vmem:[#allocation3 + $0x20] sm:$0xff] }
  0xb6   : > { %783 = vrot.lane.b32.xlu1 %v1061_v41, %s9584_s15  ;;  %1133 = vst.msk [vmem:[#allocation3 + $0x38] sm:$0xff] %vm680_vm4, %v1088_v38  ;;  %1619 = vmatprep.mubr.bf16.mxu0 %v1343_v1  ;;  %v1178_v41 = vld [vmem:[#allocation2 + $0x1a1] sm:$0xff] }
  0xb7   : > { %978 = vrot.lane.b32.xlu0 %v9948_v28, %s9582_s13 }
  0xb8   : > { %v637_v2 = vpop.permute.xlu1 %636  ;;  %v1342_v39 = vld [vmem:[#allocation3 + $0x18] sm:$0xff] }
  0xb9   : > { %683 = vst.msk [vmem:[#allocation3 + $0x30] sm:$0xff] %vm680_vm4, %v637_v2  ;;  %1620 = vmatmul.mubr.bf16.gmra.mrb[4].mxu0 %v1342_v39  ;;  %v1216_v4 = vpop.permute.xlu0 %1215 }
  0xba   : > { %527 = vrot.lane.b32.xlu1 %v9913_v56, %s9582_s13  ;;  %1261 = vst.msk [vmem:[#allocation3 + $0x38] sm:$0xff] %vm809_vm5, %v1216_v4 }
  0xbb   : > { %1107 = vrot.lane.b32.xlu0 %v9950_v29, %s9583_s14 }
  0xbc   : > { %v766_v44 = vpop.permute.xlu1 %765 }
  0xbd   : > { %812 = vst.msk [vmem:[#allocation3 + $0x30] sm:$0xff] %vm809_vm5, %v766_v44  ;;  %v961_v8 = vpop.permute.xlu0 %960 }
  0xbe   : > { %656 = vrot.lane.b32.xlu1 %v9918_v61, %s9583_s14  ;;  %1005 = vst.msk [vmem:[#allocation3 + $0x50] sm:$0xff] %vm551_vm3, %v961_v8 }
  0xbf   : > { %1235 = vrot.lane.b32.xlu0 %v9954_v33, %s9584_s15 }
  0xc0   : > { %v510_v56 = vpop.permute.xlu1 %509 }
  0xc1   : > { %555 = vst.msk [vmem:[#allocation3 + $0x48] sm:$0xff] %vm551_vm3, %v510_v56  ;;  %v1090_v9 = vpop.permute.xlu0 %1089  ;;  %v1346_v58 = vld [vmem:[#allocation3 + $0x38] sm:$0xff] }
  0xc2   : > { %785 = vrot.lane.b32.xlu1 %v9943_v22, %s9584_s15  ;;  %1134 = vst.msk [vmem:[#allocation3 + $0x50] sm:$0xff] %vm680_vm4, %v1090_v9  ;;  %1627 = vmatprep.mubr.bf16.mxu0 %v1346_v58 }
  0xc3   : > { %980 = vrot.lane.b32.xlu0 %v9960_v37, %s9582_s13 }
  0xc4   : > { %v639_v15 = vpop.permute.xlu1 %638  ;;  %v1345_v61 = vld [vmem:[#allocation3 + $0x30] sm:$0xff] }
  0xc5   : > { %684 = vst.msk [vmem:[#allocation3 + $0x48] sm:$0xff] %vm680_vm4, %v639_v15  ;;  %1628 = vmatmul.mubr.bf16.gmra.mrb[8].mxu0 %v1345_v61  ;;  %v1218_v10 = vpop.permute.xlu0 %1217  ;;  %v2167_v61 = vld [vmem:[#allocation2 + $0x1] sm:$0xff] }
  0xc6   : > { %529 = vrot.lane.b32.xlu1 %v9945_v24, %s9582_s13  ;;  %1262 = vst.msk [vmem:[#allocation3 + $0x50] sm:$0xff] %vm809_vm5, %v1218_v10  ;;  %v1047_v24 = vld [vmem:[#allocation2 + $0x180] sm:$0xff]  ;;  %v2168_v10 = vld [vmem:[#allocation2 + $0x9] sm:$0xff] }
  0xc7   : > { %1109 = vrot.lane.b32.xlu0 %v9962_v40, %s9583_s14  ;;  %v1065_v25 = vpack.c.bf16 %v1048_v5, %v1047_v24 }
  0xc8   : > { %v768_v22 = vpop.permute.xlu1 %767 }
  0xc9   : > { %813 = vst.msk [vmem:[#allocation3 + $0x48] sm:$0xff] %vm809_vm5, %v768_v22  ;;  %v963_v16 = vpop.permute.xlu0 %962  ;;  %v2199_v22 = vpack.c.bf16 %v2168_v10, %v2167_v61 }
  0xca   : > { %658 = vrot.lane.b32.xlu1 %v9948_v28, %s9583_s14  ;;  %1006 = vst.msk [vmem:[#allocation3 + $0x68] sm:$0xff] %vm551_vm3, %v963_v16  ;;  %v2295_v16 = vld [vmem:[#allocation2 + $0x2] sm:$0xff] }
  0xcb   : > { %1237 = vrot.lane.b32.xlu0 %v9970_v63, %s9584_s15 }
  0xcc   : > { %v512_v18 = vpop.permute.xlu1 %511 }
  0xcd   : > { %556 = vst.msk [vmem:[#allocation3 + $0x60] sm:$0xff] %vm551_vm3, %v512_v18  ;;  %v1092_v19 = vpop.permute.xlu0 %1091  ;;  %v1349_v20 = vld [vmem:[#allocation3 + $0x50] sm:$0xff] }
  0xce   : > { %787 = vrot.lane.b32.xlu1 %v9950_v29, %s9584_s15  ;;  %1135 = vst.msk [vmem:[#allocation3 + $0x68] sm:$0xff] %vm680_vm4, %v1092_v19  ;;  %1635 = vmatprep.mubr.bf16.mxu0 %v1349_v20  ;;  %v1386_v29 = vld [vmem:[#allocation3 + $0x178] sm:$0xff] }
  0xcf   : > { %982 = vrot.lane.b32.xlu0 %v9975_v46, %s9582_s13  ;;  %9344 = vmatmul.mubr.msk.bf16.gmra.mrb[28].mxu1 %vm253_vm0, %v1386_v29  ;;  %3062 = vst.msk [vmem:[#allocation3 + $0x178] sm:$0xff] %vm253_vm0, %v1322_v17  ;;  %v2296_v17 = vld [vmem:[#allocation2 + $0xa] sm:$0xff] }
  0xd0   : > { %v641_v28 = vpop.permute.xlu1 %640  ;;  %v1348_v23 = vld [vmem:[#allocation3 + $0x48] sm:$0xff]  ;;  %v2327_v18 = vpack.c.bf16 %v2296_v17, %v2295_v16 }
  0xd1   : > { %685 = vst.msk [vmem:[#allocation3 + $0x60] sm:$0xff] %vm680_vm4, %v641_v28  ;;  %1636 = vmatmul.mubr.bf16.gmra.mrb[12].mxu0 %v1348_v23  ;;  %v1220_v6 = vpop.permute.xlu0 %1219 }
  0xd2   : > { %531 = vrot.lane.b32.xlu1 %v9954_v33, %s9582_s13  ;;  %1263 = vst.msk [vmem:[#allocation3 + $0x68] sm:$0xff] %vm809_vm5, %v1220_v6 }
  0xd3   : > { %1111 = vrot.lane.b32.xlu0 %v1065_v25, %s9583_s14 }
  0xd4   : > { %v770_v27 = vpop.permute.xlu1 %769 }
  0xd5   : > { %814 = vst.msk [vmem:[#allocation3 + $0x60] sm:$0xff] %vm809_vm5, %v770_v27  ;;  %v965_v30 = vpop.permute.xlu0 %964 }
  0xd6   : > { %660 = vrot.lane.b32.xlu1 %v9960_v37, %s9583_s14  ;;  %1007 = vst.msk [vmem:[#allocation3 + $0x80] sm:$0xff] %vm551_vm3, %v965_v30 }
  0xd7   : > { %1239 = vrot.lane.b32.xlu0 %v9983_v50, %s9584_s15  ;;  %v1177_v50 = vld [vmem:[#allocation2 + $0x199] sm:$0xff] }
  0xd8   : > { %v514_v33 = vpop.permute.xlu1 %513  ;;  %v1194_v42 = vpack.c.bf16 %v1178_v41, %v1177_v50 }
  0xd9   : > { %557 = vst.msk [vmem:[#allocation3 + $0x78] sm:$0xff] %vm551_vm3, %v514_v33  ;;  %v1094_v21 = vpop.permute.xlu0 %1093  ;;  %v1352_v34 = vld [vmem:[#allocation3 + $0x68] sm:$0xff] }
  0xda   : > { %789 = vrot.lane.b32.xlu1 %v9962_v40, %s9584_s15  ;;  %1136 = vst.msk [vmem:[#allocation3 + $0x80] sm:$0xff] %vm680_vm4, %v1094_v21  ;;  %1643 = vmatprep.mubr.bf16.mxu0 %v1352_v34 }
  0xdb   : > { %984 = vrot.lane.b32.xlu0 %v9988_v55, %s9582_s13 }
  0xdc   : > { %v643_v37 = vpop.permute.xlu1 %642  ;;  %v1351_v35 = vld [vmem:[#allocation3 + $0x60] sm:$0xff] }
  0xdd   : > { %686 = vst.msk [vmem:[#allocation3 + $0x78] sm:$0xff] %vm680_vm4, %v643_v37  ;;  %1644 = vmatmul.mubr.bf16.gmra.mrb[16].mxu0 %v1351_v35  ;;  %v1222_v40 = vpop.permute.xlu0 %1221 }
  0xde   : > { %533 = vrot.lane.b32.xlu1 %v9970_v63, %s9582_s13  ;;  %1264 = vst.msk [vmem:[#allocation3 + $0x80] sm:$0xff] %vm809_vm5, %v1222_v40 }
  0xdf   : > { %1113 = vrot.lane.b32.xlu0 %v1066_v36, %s9583_s14 }
  0xe0   : > { %v772_v11 = vpop.permute.xlu1 %771 }
  0xe1   : > { %815 = vst.msk [vmem:[#allocation3 + $0x78] sm:$0xff] %vm809_vm5, %v772_v11  ;;  %v967_v55 = vpop.permute.xlu0 %966 }
  0xe2   : > { %662 = vrot.lane.b32.xlu1 %v9975_v46, %s9583_s14  ;;  %1008 = vst.msk [vmem:[#allocation3 + $0x98] sm:$0xff] %vm551_vm3, %v967_v55 }
  0xe3   : > { %1241 = vrot.lane.b32.xlu0 %v1194_v42, %s9584_s15 }
  0xe4   : > { %v516_v43 = vpop.permute.xlu1 %515 }
  0xe5   : > { %558 = vst.msk [vmem:[#allocation3 + $0x90] sm:$0xff] %vm551_vm3, %v516_v43  ;;  %v1096_v63 = vpop.permute.xlu0 %1095  ;;  %v1355_v45 = vld [vmem:[#allocation3 + $0x80] sm:$0xff] }
  0xe6   : > { %791 = vrot.lane.b32.xlu1 %v1065_v25, %s9584_s15  ;;  %1137 = vst.msk [vmem:[#allocation3 + $0x98] sm:$0xff] %vm680_vm4, %v1096_v63  ;;  %1651 = vmatprep.mubr.bf16.mxu0 %v1355_v45  ;;  %v9504_v43 = vld [vmem:[%s12287_s1 + $0x110] sm:$0xff]  }
  0xe7   : > { %2837 = vrot.lane.b32.xlu0 %v1066_v36, %s9583_s14  ;;  %9347 = vmatprep.subr.bf16.mxu0 %v9504_v43 }
  0xe8   : > { %v645_v47 = vpop.permute.xlu1 %644  ;;  %v1354_v48 = vld [vmem:[#allocation3 + $0x78] sm:$0xff]  ;;  %9348 = vmatpush3.bf16.msra.mxu0 %v9504_v43 }
  0xe9   : > { %687 = vst.msk [vmem:[#allocation3 + $0x90] sm:$0xff] %vm680_vm4, %v645_v47  ;;  %1652 = vmatmul.mubr.bf16.gmra.mrb[20].mxu0 %v1354_v48  ;;  %v1224_v46 = vpop.permute.xlu0 %1223 }
  0xea   : > { %1265 = vst.msk [vmem:[#allocation3 + $0x98] sm:$0xff] %vm809_vm5, %v1224_v46  ;;  %2231 = vrot.lane.b32.xlu1 %v2199_v22, %s9582_s13 }
  0xec   : > { %v774_v49 = vpop.permute.xlu1 %773 }
  0xed   : > { %816 = vst.msk [vmem:[#allocation3 + $0x90] sm:$0xff] %vm809_vm5, %v774_v49  ;;  %v969_v51 = vpop.permute.xlu0 %968  ;;  %v9505_v49 = vld [vmem:[%s12287_s1 + $0x118] sm:$0xff]  }
  0xee   : > { %1009 = vst.msk [vmem:[#allocation3 + $0xb0] sm:$0xff] %vm551_vm3, %v969_v51  ;;  %2359 = vrot.lane.b32.xlu1 %v2327_v18, %s9583_s14  ;;  %9349 = vmatprep.subr.bf16.mxu0 %v9505_v49 }
  0xef   : > { %9350 = vmatpush3.bf16.msra.mxu0 %v9505_v49  ;;  %v9510_v49 = vld [vmem:[%s12287_s1 + $0xe0] sm:$0xff]  }
  0xf0   : > { %v518_v12 = vpop.permute.xlu1 %517 }
  0xf1   : > { %559 = vst.msk [vmem:[#allocation3 + $0xa8] sm:$0xff] %vm551_vm3, %v518_v12  ;;  %v1098_v52 = vpop.permute.xlu0 %1097  ;;  %v1358_v53 = vld [vmem:[#allocation3 + $0x98] sm:$0xff] }
  0xf2   : > { %1138 = vst.msk [vmem:[#allocation3 + $0xb0] sm:$0xff] %vm680_vm4, %v1098_v52  ;;  %1659 = vmatprep.mubr.bf16.mxu0 %v1358_v53 }
  0xf4   : > { %v647_v54 = vpop.permute.xlu1 %646  ;;  %v1357_v0 = vld [vmem:[#allocation3 + $0x90] sm:$0xff] }
  0xf5   : > { %688 = vst.msk [vmem:[#allocation3 + $0xa8] sm:$0xff] %vm680_vm4, %v647_v54  ;;  %1660 = vmatmul.mubr.bf16.gmra.mrb[24].mxu0 %v1357_v0  ;;  %v1226_v57 = vpop.permute.xlu0 %1225 }
  0xf6   : > { %1266 = vst.msk [vmem:[#allocation3 + $0xb0] sm:$0xff] %vm809_vm5, %v1226_v57 }
  0xf8   : > { %v776_v59 = vpop.permute.xlu1 %775 }
  0xf9   : > { %817 = vst.msk [vmem:[#allocation3 + $0xa8] sm:$0xff] %vm809_vm5, %v776_v59  ;;  %v971_v60 = vpop.permute.xlu0 %970 }
  0xfa   : > { %1010 = vst.msk [vmem:[#allocation3 + $0xc8] sm:$0xff] %vm551_vm3, %v971_v60 }
  0xfc   : > { %v520_v62 = vpop.permute.xlu1 %519 }
  0xfd   : > { %560 = vst.msk [vmem:[#allocation3 + $0xc0] sm:$0xff] %vm551_vm3, %v520_v62  ;;  %v1100_v38 = vpop.permute.xlu0 %1099  ;;  %v1361_v1 = vld [vmem:[#allocation3 + $0xb0] sm:$0xff] }
  0xfe   : > { %1139 = vst.msk [vmem:[#allocation3 + $0xc8] sm:$0xff] %vm680_vm4, %v1100_v38  ;;  %1667 = vmatprep.mubr.bf16.mxu0 %v1361_v1 }
 0x100   : > { %v649_v2 = vpop.permute.xlu1 %648  ;;  %v1360_v39 = vld [vmem:[#allocation3 + $0xa8] sm:$0xff] }
 0x101   : > { %689 = vst.msk [vmem:[#allocation3 + $0xc0] sm:$0xff] %vm680_vm4, %v649_v2  ;;  %1668 = vmatmul.mubr.bf16.gmra.mrb[28].mxu0 %v1360_v39  ;;  %v1228_v3 = vpop.permute.xlu0 %1227 }
 0x102   : > { %1267 = vst.msk [vmem:[#allocation3 + $0xc8] sm:$0xff] %vm809_vm5, %v1228_v3 }
 0x104   : > { %v778_v4 = vpop.permute.xlu1 %777 }
 0x105   : > { %818 = vst.msk [vmem:[#allocation3 + $0xc0] sm:$0xff] %vm809_vm5, %v778_v4  ;;  %v973_v7 = vpop.permute.xlu0 %972 }
 0x106   : > { %1011 = vst.msk [vmem:[#allocation3 + $0xe0] sm:$0xff] %vm551_vm3, %v973_v7 }
 0x108   : > { %v522_v44 = vpop.permute.xlu1 %521 }
 0x109   : > { %561 = vst.msk [vmem:[#allocation3 + $0xd8] sm:$0xff] %vm551_vm3, %v522_v44  ;;  %v1102_v8 = vpop.permute.xlu0 %1101  ;;  %v1364_v56 = vld [vmem:[#allocation3 + $0xc8] sm:$0xff] }
 0x10a   : > { %1140 = vst.msk [vmem:[#allocation3 + $0xe0] sm:$0xff] %vm680_vm4, %v1102_v8  ;;  %1675 = vmatprep.mubr.bf16.mxu0 %v1364_v56 }
 0x10c   : > { %v651_v9 = vpop.permute.xlu1 %650  ;;  %v1363_v58 = vld [vmem:[#allocation3 + $0xc0] sm:$0xff] }
 0x10d   : > { %690 = vst.msk [vmem:[#allocation3 + $0xd8] sm:$0xff] %vm680_vm4, %v651_v9  ;;  %1676 = vmatmul.mubr.bf16.gmra.mrb[32].mxu0 %v1363_v58  ;;  %v1230_v15 = vpop.permute.xlu0 %1229 }
 0x10e   : > { %1268 = vst.msk [vmem:[#allocation3 + $0xe0] sm:$0xff] %vm809_vm5, %v1230_v15 }
 0x110   : > { %v780_v13 = vpop.permute.xlu1 %779 }
 0x111   : > { %819 = vst.msk [vmem:[#allocation3 + $0xd8] sm:$0xff] %vm809_vm5, %v780_v13  ;;  %v975_v14 = vpop.permute.xlu0 %974 }
 0x112   : > { %1012 = vst.msk [vmem:[#allocation3 + $0xf8] sm:$0xff] %vm551_vm3, %v975_v14 }
 0x114   : > { %v524_v24 = vpop.permute.xlu1 %523 }
 0x115   : > { %562 = vst.msk [vmem:[#allocation3 + $0xf0] sm:$0xff] %vm551_vm3, %v524_v24  ;;  %v1104_v5 = vpop.permute.xlu0 %1103  ;;  %v1367_v19 = vld [vmem:[#allocation3 + $0xe0] sm:$0xff] }
 0x116   : > { %1141 = vst.msk [vmem:[#allocation3 + $0xf8] sm:$0xff] %vm680_vm4, %v1104_v5  ;;  %1683 = vmatprep.mubr.bf16.mxu0 %v1367_v19  ;;  %v10203_v21 = vpop.f32.mrb[0].mxu1 }
 0x117   : > { %v10206_v34 = vpop.f32.mrb[1].mxu1 }
 0x118   : > { %v653_v20 = vpop.permute.xlu1 %652  ;;  %v1366_v28 = vld [vmem:[#allocation3 + $0xd8] sm:$0xff]  ;;  %v10208_v35 = vpop.f32.mrb[2].mxu1 }
 0x119   : > { %691 = vst.msk [vmem:[#allocation3 + $0xf0] sm:$0xff] %vm680_vm4, %v653_v20  ;;  %1684 = vmatmul.mubr.bf16.gmra.mrb[36].mxu0 %v1366_v28  ;;  %v1232_v23 = vpop.permute.xlu0 %1231  ;;  %v10211_v36 = vpop.f32.mrb[3].mxu1 }
 0x11a   : > { %1269 = vst.msk [vmem:[#allocation3 + $0xf8] sm:$0xff] %vm809_vm5, %v1232_v23 }
 0x11c   : > { %v782_v25 = vpop.permute.xlu1 %781 }
 0x11d   : > { %820 = vst.msk [vmem:[#allocation3 + $0xf0] sm:$0xff] %vm809_vm5, %v782_v25  ;;  %v977_v26 = vpop.permute.xlu0 %976 }
 0x11e   : > { %1013 = vst.msk [vmem:[#allocation3 + $0x110] sm:$0xff] %vm551_vm3, %v977_v26  ;;  %v10215_v55 = vpop.f32.mrb[4].mxu1  ;;  %v9506_v26 = vld [vmem:[%s12287_s1 + $0xd0] sm:$0xff]  }
 0x11f   : > { %v10221_v63 = vpop.f32.mrb[5].mxu1  ;;  %8903 = vmatprep.subr.bf16.mxu1 %v9506_v26  ;;  %v9514_v26 = vld [vmem:[%s12287_s1 + $0xf0] sm:$0xff]  }
 0x120   : > { %v526_v6 = vpop.permute.xlu1 %525  ;;  %v10223_v47 = vpop.f32.mrb[6].mxu1 }
 0x121   : > { %563 = vst.msk [vmem:[#allocation3 + $0x108] sm:$0xff] %vm551_vm3, %v526_v6  ;;  %v1106_v29 = vpop.permute.xlu0 %1105  ;;  %v1370_v27 = vld [vmem:[#allocation3 + $0xf8] sm:$0xff]  ;;  %v10226_v48 = vpop.f32.mrb[7].mxu1  ;;  %v9507_v6 = vld [vmem:[%s12287_s1 + $0x90] sm:$0xff]  }
 0x122   : > { %1142 = vst.msk [vmem:[#allocation3 + $0x110] sm:$0xff] %vm680_vm4, %v1106_v29  ;;  %1691 = vmatprep.mubr.bf16.mxu0 %v1370_v27  ;;  %8904 = vmatpush3.bf16.msra.mxu1 %v9507_v6  ;;  %v9515_v6 = vld [vmem:[%s12287_s1 + $0xb0] sm:$0xff]  }
 0x124   : > { %v655_v30 = vpop.permute.xlu1 %654  ;;  %v1369_v33 = vld [vmem:[#allocation3 + $0xf0] sm:$0xff] }
 0x125   : > { %692 = vst.msk [vmem:[#allocation3 + $0x108] sm:$0xff] %vm680_vm4, %v655_v30  ;;  %1692 = vmatmul.mubr.bf16.gmra.mrb[40].mxu0 %v1369_v33  ;;  %v1234_v31 = vpop.permute.xlu0 %1233  ;;  %v9508_v33 = vld [vmem:[%s12287_s1 + $0xd8] sm:$0xff]  }
 0x126   : > { %1270 = vst.msk [vmem:[#allocation3 + $0x110] sm:$0xff] %vm809_vm5, %v1234_v31  ;;  %v10233_v52 = vpop.f32.mrb[8].mxu1  ;;  %v9509_v31 = vld [vmem:[%s12287_s1 + $0x98] sm:$0xff]   ;;  %8905 = vmatprep.subr.bf16.mxu1 %v9508_v33 }
 0x127   : > { %v10236_v53 = vpop.f32.mrb[9].mxu1  ;;  %8906 = vmatpush3.bf16.msra.mxu1 %v9509_v31 }
 0x128   : > { %v784_v32 = vpop.permute.xlu1 %783  ;;  %v10238_v57 = vpop.f32.mrb[10].mxu1  ;;  %8907 = vmatprep.subr.bf16.mxu1 %v9510_v49 }
 0x129   : > { %821 = vst.msk [vmem:[#allocation3 + $0x108] sm:$0xff] %vm809_vm5, %v784_v32  ;;  %v979_v37 = vpop.permute.xlu0 %978  ;;  %v10241_v59 = vpop.f32.mrb[11].mxu1 }
 0x12a   : > { %1014 = vst.msk [vmem:[#allocation3 + $0x128] sm:$0xff] %vm551_vm3, %v979_v37 }
 0x12c   : > { %v528_v50 = vpop.permute.xlu1 %527 }
 0x12d   : > { %564 = vst.msk [vmem:[#allocation3 + $0x120] sm:$0xff] %vm551_vm3, %v528_v50  ;;  %v1108_v41 = vpop.permute.xlu0 %1107  ;;  %v1373_v40 = vld [vmem:[#allocation3 + $0x110] sm:$0xff] }
 0x12e   : > { %1143 = vst.msk [vmem:[#allocation3 + $0x128] sm:$0xff] %vm680_vm4, %v1108_v41  ;;  %1699 = vmatprep.mubr.bf16.mxu0 %v1373_v40 }
 0x130   : > { %v657_v11 = vpop.permute.xlu1 %656  ;;  %v1372_v42 = vld [vmem:[#allocation3 + $0x108] sm:$0xff] }
 0x131   : > { %693 = vst.msk [vmem:[#allocation3 + $0x120] sm:$0xff] %vm680_vm4, %v657_v11  ;;  %1700 = vmatmul.mubr.bf16.gmra.mrb[44].mxu0 %v1372_v42  ;;  %v1236_v45 = vpop.permute.xlu0 %1235  ;;  %v10297_v42 = vld [vmem:[%s12288_s2] ss:$0 sm:$0xff] }
 0x132   : > { %1271 = vst.msk [vmem:[#allocation3 + $0x128] sm:$0xff] %vm809_vm5, %v1236_v45 }
 0x134   : > { %v786_v46 = vpop.permute.xlu1 %785 }
 0x135   : > { %822 = vst.msk [vmem:[#allocation3 + $0x120] sm:$0xff] %vm809_vm5, %v786_v46  ;;  %v981_v51 = vpop.permute.xlu0 %980  ;;  %v10303_v46 = vld [vmem:[%s12289_s3] ss:$0 sm:$0xff] }
 0x136   : > { %1015 = vst.msk [vmem:[#allocation3 + $0x140] sm:$0xff] %vm551_vm3, %v981_v51  ;;  %v9511_v51 = vld [vmem:[%s12287_s1 + $0xa0] sm:$0xff]  }
 0x137   : > { %8908 = vmatpush3.bf16.msra.mxu1 %v9511_v51 }
 0x138   : > { %v530_v12 = vpop.permute.xlu1 %529 }
 0x139   : > { %565 = vst.msk [vmem:[#allocation3 + $0x138] sm:$0xff] %vm551_vm3, %v530_v12  ;;  %v1110_v54 = vpop.permute.xlu0 %1109  ;;  %v1376_v0 = vld [vmem:[#allocation3 + $0x128] sm:$0xff] }
 0x13a   : > { %1144 = vst.msk [vmem:[#allocation3 + $0x140] sm:$0xff] %vm680_vm4, %v1110_v54  ;;  %1707 = vmatprep.mubr.bf16.mxu0 %v1376_v0 }
 0x13c   : > { %v659_v60 = vpop.permute.xlu1 %658  ;;  %v1375_v62 = vld [vmem:[#allocation3 + $0x120] sm:$0xff] }
 0x13d   : > { %694 = vst.msk [vmem:[#allocation3 + $0x138] sm:$0xff] %vm680_vm4, %v659_v60  ;;  %1708 = vmatmul.mubr.bf16.gmra.mrb[48].mxu0 %v1375_v62  ;;  %v1238_v38 = vpop.permute.xlu0 %1237  ;;  %v2103_v60 = vld [vmem:[#allocation2] sm:$0xff] }
 0x13e   : > { %1272 = vst.msk [vmem:[#allocation3 + $0x140] sm:$0xff] %vm809_vm5, %v1238_v38 }
 0x140   : > { %v788_v1 = vpop.permute.xlu1 %787 }
 0x141   : > { %823 = vst.msk [vmem:[#allocation3 + $0x138] sm:$0xff] %vm809_vm5, %v788_v1  ;;  %v983_v2 = vpop.permute.xlu0 %982  ;;  %v9513_v1 = vld [vmem:[%s12287_s1 + $0xa8] sm:$0xff]  }
 0x142   : > { %1016 = vst.msk [vmem:[#allocation3 + $0x158] sm:$0xff] %vm551_vm3, %v983_v2  ;;  %v10249_v8 = vpop.f32.mrb[12].mxu1  ;;  %v2104_v2 = vld [vmem:[#allocation2 + $0x8] sm:$0xff] }
 0x143   : > { %v10252_v56 = vpop.f32.mrb[13].mxu1 }
 0x144   : > { %v532_v39 = vpop.permute.xlu1 %531  ;;  %v10254_v58 = vpop.f32.mrb[14].mxu1 }
 0x145   : > { %566 = vst.msk [vmem:[#allocation3 + $0x150] sm:$0xff] %vm551_vm3, %v532_v39  ;;  %v1112_v3 = vpop.permute.xlu0 %1111  ;;  %v1379_v4 = vld [vmem:[#allocation3 + $0x140] sm:$0xff]  ;;  %v10257_v15 = vpop.f32.mrb[15].mxu1  ;;  %v2135_v39 = vpack.c.bf16 %v2104_v2, %v2103_v60 }
 0x146   : > { %1145 = vst.msk [vmem:[#allocation3 + $0x158] sm:$0xff] %vm680_vm4, %v1112_v3  ;;  %1715 = vmatprep.mubr.bf16.mxu0 %v1379_v4 }
 0x147   : > { %2151 = vst.msk [vmem:[#allocation3] sm:$0xff] %vm253_vm0, %v2135_v39 }
 0x148   : > { %v661_v7 = vpop.permute.xlu1 %660  ;;  %v1378_v44 = vld [vmem:[#allocation3 + $0x138] sm:$0xff] }
 0x149   : > { %695 = vst.msk [vmem:[#allocation3 + $0x150] sm:$0xff] %vm680_vm4, %v661_v7  ;;  %1716 = vmatmul.mubr.bf16.gmra.mrb[52].mxu0 %v1378_v44  ;;  %v1240_v9 = vpop.permute.xlu0 %1239 }
 0x14a   : > { %1273 = vst.msk [vmem:[#allocation3 + $0x158] sm:$0xff] %vm809_vm5, %v1240_v9  ;;  %v10266_v20 = vpop.f32.mrb[16].mxu1 }
 0x14b   : > { %v10268_v28 = vpop.f32.mrb[17].mxu1 }
 0x14c   : > { %v790_v61 = vpop.permute.xlu1 %789  ;;  %v10270_v23 = vpop.f32.mrb[18].mxu1 }
 0x14d   : > { %824 = vst.msk [vmem:[#allocation3 + $0x150] sm:$0xff] %vm809_vm5, %v790_v61  ;;  %v985_v10 = vpop.permute.xlu0 %984  ;;  %v10272_v25 = vpop.f32.mrb[19].mxu1 }
 0x14e   : > { %1017 = vst.msk [vmem:[#allocation3 + $0x170] sm:$0xff] %vm551_vm3, %v985_v10 }
 0x150   : > { %v534_v22 = vpop.permute.xlu1 %533 }
 0x151   : > { %567 = vst.msk [vmem:[#allocation3 + $0x168] sm:$0xff] %vm551_vm3, %v534_v22  ;;  %v1114_v13 = vpop.permute.xlu0 %1113  ;;  %v1382_v14 = vld [vmem:[#allocation3 + $0x158] sm:$0xff] }
 0x152   : > { %1146 = vst.msk [vmem:[#allocation3 + $0x170] sm:$0xff] %vm680_vm4, %v1114_v13  ;;  %1723 = vmatprep.mubr.bf16.mxu0 %v1382_v14  ;;  %v10280_v29 = vpop.f32.mrb[20].mxu1 }
 0x153   : > { %v10282_v27 = vpop.f32.mrb[21].mxu1 }
 0x154   : > { %v663_v16 = vpop.permute.xlu1 %662  ;;  %v1381_v17 = vld [vmem:[#allocation3 + $0x150] sm:$0xff]  ;;  %v10284_v30 = vpop.f32.mrb[22].mxu1 }
 0x155   : > { %696 = vst.msk [vmem:[#allocation3 + $0x168] sm:$0xff] %vm680_vm4, %v663_v16  ;;  %1724 = vmatmul.mubr.bf16.gmra.mrb[56].mxu0 %v1381_v17  ;;  %v1242_v18 = vpop.permute.xlu0 %1241  ;;  %v10292_v32 = vpop.f32.mrb[23].mxu1 }
 0x156   : > { %1274 = vst.msk [vmem:[#allocation3 + $0x170] sm:$0xff] %vm809_vm5, %v1242_v18 }
 0x158   : > { %v792_v24 = vpop.permute.xlu1 %791 }
 0x159   : > { %825 = vst.msk [vmem:[#allocation3 + $0x168] sm:$0xff] %vm809_vm5, %v792_v24 }
 0x15a   : > { %v10328_v18 = vpop.f32.mrb[24].mxu1 }
 0x15c   : > { %v2232_v0 = vpop.permute.xlu1 %2231 }
 0x15d   : > { %v1385_v5 = vld [vmem:[#allocation3 + $0x170] sm:$0xff]  ;;  %2279 = vst.msk [vmem:[#allocation3] sm:$0xff] %vm551_vm3, %v2232_v0 }
 0x15e   : > { %1731 = vmatprep.mubr.bf16.mxu0 %v1385_v5 }
 0x160   : > { %v1384_v19 = vld [vmem:[#allocation3 + $0x168] sm:$0xff]  ;;  %v2360_v9 = vpop.permute.xlu1 %2359 }
 0x161   : > { %1732 = vmatmul.mubr.bf16.gmra.mrb[60].mxu0 %v1384_v19  ;;  %2407 = vst.msk [vmem:[#allocation3] sm:$0xff] %vm680_vm4, %v2360_v9  ;;  %v10332_v19 = vpop.f32.mrb[25].mxu1  ;;  %v9517_v9 = vld [vmem:[%s12287_s1 + $0xb8] sm:$0xff]  }
 0x162   : > { %v10340_v33 = vpop.f32.mrb[26].mxu1 }
 0x180   : > { %v8789_v37 = vpop.f32.mrb[0].mxu0 }
 0x181   : > { %v8790_v50 = vpop.f32.mrb[1].mxu0 }
 0x182   : > { %v8791_v41 = vadd.f32 %v8790_v50, %v8789_v37  ;;  %v8792_v40 = vpop.f32.mrb[2].mxu0  ;;  %v10344_v37 = vpop.f32.mrb[27].mxu1 }
 0x183   : > { %v8793_v11 = vpop.f32.mrb[3].mxu0 }
 0x184   : > { %v8794_v43 = vadd.f32 %v8793_v11, %v8792_v40  ;;  %v1775_v45 = vadd.f32 %v8791_v41, %v10206_v34  ;;  %v9512_v34 = vld [vmem:[%s12287_s1 + $0xe8] sm:$0xff]  }
 0x185   : > { %8909 = vmatprep.subr.bf16.mxu1 %v9512_v34 }
 0x186   : > { %v1906_v12 = vmul.f32 %v10297_v42, %v1775_v45  ;;  %v1778_v54 = vadd.f32 %v8794_v43, %v10211_v36  ;;  %8910 = vmatpush3.bf16.msra.mxu1 %v9513_v1 }
 0x187   : > { %8911 = vmatprep.subr.bf16.mxu1 %v9514_v26 }
 0x188   : > { %v1943_v62 = vadd.f32 %v10303_v46, %v1906_v12  ;;  %v1907_v38 = vmul.f32 %v10297_v42, %v1778_v54 }
 0x18a   : > { %vm1975_vm6 = vcmp.gt.f32.partialorder %v1943_v62, 0.0  ;;  %v2007_v36 = vmul.f32 0.01, %v1943_v62  ;;  %v1944_v3 = vadd.f32 %v10303_v46, %v1907_v38  ;;  %8912 = vmatpush3.bf16.msra.mxu1 %v9515_v6  ;;  %v9520_v6 = vld [vmem:[%s12287_s1 + $0x108] sm:$0xff]  }
 0x18c   : > { %v2039_v4 = vsel %vm1975_vm6, %v1943_v62, %v2007_v36  ;;  %vm1976_vm7 = vcmp.gt.f32.partialorder %v1944_v3, 0.0  ;;  %v2008_v7 = vmul.f32 0.01, %v1944_v3  ;;  %v8795_v44 = vpop.f32.mrb[4].mxu0  ;;  %v9516_v36 = vld [vmem:[%s12287_s1 + $0xf8] sm:$0xff]  }
 0x18d   : > { %2071 = vst.msk [vmem:[#allocation2 + $0x19] sm:$0xff] %vm253_vm0, %v2039_v4  ;;  %v8796_v61 = vpop.f32.mrb[5].mxu0  ;;  %8913 = vmatprep.subr.bf16.mxu1 %v9516_v36 }
 0x18e   : > { %v2040_v10 = vsel %vm1976_vm7, %v1944_v3, %v2008_v7  ;;  %v8797_v22 = vadd.f32 %v8796_v61, %v8795_v44  ;;  %v8798_v13 = vpop.f32.mrb[6].mxu0  ;;  %8914 = vmatpush3.bf16.msra.mxu1 %v9517_v9 }
 0x18f   : > { %2072 = vst.msk [vmem:[#allocation2 + $0x21] sm:$0xff] %vm253_vm0, %v2040_v10  ;;  %v8799_v14 = vpop.f32.mrb[7].mxu0 }
 0x190   : > { %v1783_v16 = vadd.f32 %v10203_v21, %v8797_v22  ;;  %v8800_v17 = vadd.f32 %v8799_v14, %v8798_v13  ;;  %v9518_v14 = vld [vmem:[%s12287_s1 + $0x100] sm:$0xff]  }
 0x191   : > { %8915 = vmatprep.subr.bf16.mxu1 %v9518_v14 }
 0x192   : > { %v1908_v24 = vmul.f32 %v10297_v42, %v1783_v16  ;;  %v1786_v5 = vadd.f32 %v10208_v35, %v8800_v17 }
 0x194   : > { %v1945_v21 = vadd.f32 %v10303_v46, %v1908_v24  ;;  %v1909_v31 = vmul.f32 %v10297_v42, %v1786_v5  ;;  %v2423_v50 = vld [vmem:[#allocation2 + $0x18] sm:$0xff]  ;;  %v9519_v24 = vld [vmem:[%s12287_s1 + $0xc0] sm:$0xff]  }
 0x195   : > { %v2551_v12 = vld [vmem:[#allocation2 + $0x19] sm:$0xff]  ;;  %8916 = vmatpush3.bf16.msra.mxu1 %v9519_v24 }
 0x196   : > { %vm1977_vm8 = vcmp.gt.f32.partialorder %v1945_v21, 0.0  ;;  %v2009_v35 = vmul.f32 0.01, %v1945_v21  ;;  %v1946_v41 = vadd.f32 %v10303_v46, %v1909_v31  ;;  %v2615_v40 = vld [vmem:[#allocation2 + $0x1a] sm:$0xff]  ;;  %v2616_v11 = vld [vmem:[#allocation2 + $0x22] sm:$0xff]  ;;  %8917 = vmatprep.subr.bf16.mxu1 %v9520_v6 }
 0x197   : > { %v2424_v43 = vld [vmem:[#allocation2 + $0x20] sm:$0xff]  ;;  %v2647_v45 = vpack.c.bf16 %v2616_v11, %v2615_v40  ;;  %v2105_v38 = vld [vmem:[#allocation2 + $0x18] sm:$0xff] }
 0x198   : > { %v2455_v49 = vpack.c.bf16 %v2424_v43, %v2423_v50  ;;  %v2552_v51 = vld [vmem:[#allocation2 + $0x21] sm:$0xff]  ;;  %v2041_v0 = vsel %vm1977_vm8, %v1945_v21, %v2009_v35  ;;  %vm1978_vm9 = vcmp.gt.f32.partialorder %v1946_v41, 0.0  ;;  %v2010_v34 = vmul.f32 0.01, %v1946_v41  ;;  %v8801_v60 = vpop.f32.mrb[8].mxu0  ;;  %v2169_v44 = vld [vmem:[#allocation2 + $0x19] sm:$0xff] }
 0x199   : > { %v2106_v54 = vld [vmem:[#allocation2 + $0x20] sm:$0xff]  ;;  %2073 = vst.msk [vmem:[#allocation2 + $0x31] sm:$0xff] %vm253_vm0, %v2041_v0  ;;  %2679 = vrot.lane.b32.xlu0 %v2647_v45, %s9582_s13  ;;  %v8802_v1 = vpop.f32.mrb[9].mxu0  ;;  %v2583_v2 = vpack.c.bf16 %v2552_v51, %v2551_v12 }
 0x19a   : > { %v2170_v62 = vld [vmem:[#allocation2 + $0x21] sm:$0xff]  ;;  %2487 = vrot.lane.b32.xlu1 %v2455_v49, %s9584_s15  ;;  %v2136_v39 = vpack.c.bf16 %v2106_v54, %v2105_v38  ;;  %v2042_v3 = vsel %vm1978_vm9, %v1946_v41, %v2010_v34  ;;  %v8803_v4 = vadd.f32 %v8802_v1, %v8801_v60  ;;  %v8804_v7 = vpop.f32.mrb[10].mxu0 }
 0x19b   : > { %2074 = vst.msk [vmem:[#allocation2 + $0x39] sm:$0xff] %vm253_vm0, %v2042_v3  ;;  %v8805_v61 = vpop.f32.mrb[11].mxu0  ;;  %v2200_v10 = vpack.c.bf16 %v2170_v62, %v2169_v44  ;;  %2599 = vst.msk [vmem:[#allocation3 + $0x8] sm:$0xff] %vm253_vm0, %v2583_v2  ;;  %v9521_v34 = vld [vmem:[%s12287_s1 + $0xc8] sm:$0xff]  }
 0x19c   : > { %2152 = vst.msk [vmem:[#allocation3 + $0x18] sm:$0xff] %vm253_vm0, %v2136_v39  ;;  %v1791_v22 = vadd.f32 %v8803_v4, %v10221_v63  ;;  %v8806_v13 = vadd.f32 %v8805_v61, %v8804_v7  ;;  %8918 = vmatpush3.bf16.msra.mxu1 %v9521_v34 }
 0x19e   : > { %2233 = vrot.lane.b32.xlu1 %v2200_v10, %s9582_s13  ;;  %v1910_v16 = vmul.f32 %v10297_v42, %v1791_v22  ;;  %v1794_v17 = vadd.f32 %v8806_v13, %v10226_v48 }
 0x1a0   : > { %v1947_v5 = vadd.f32 %v10303_v46, %v1910_v16  ;;  %v1911_v63 = vmul.f32 %v10297_v42, %v1794_v17  ;;  %v2743_v26 = vld [vmem:[#allocation2 + $0x30] sm:$0xff] }
 0x1a1   : > { %v2107_v35 = vld [vmem:[#allocation2 + $0x30] sm:$0xff] }
 0x1a2   : > { %2361 = vrot.lane.b32.xlu1 %v2647_v45, %s9583_s14  ;;  %vm1979_vm10 = vcmp.gt.f32.partialorder %v1947_v5, 0.0  ;;  %v2011_v21 = vmul.f32 0.01, %v1947_v5  ;;  %v1948_v48 = vadd.f32 %v10303_v46, %v1911_v63  ;;  %v2744_v31 = vld [vmem:[#allocation2 + $0x38] sm:$0xff]  ;;  %v10389_v9 = vpop.f32.mrb[28].mxu1 }
 0x1a3   : > { %v2999_v50 = vld [vmem:[#allocation2 + $0x32] sm:$0xff]  ;;  %v2775_v40 = vpack.c.bf16 %v2744_v31, %v2743_v26  ;;  %v3000_v11 = vld [vmem:[#allocation2 + $0x3a] sm:$0xff]  ;;  %v10393_v22 = vpop.f32.mrb[29].mxu1 }
 0x1a4   : > { %v2553_v41 = vld [vmem:[#allocation2 + $0x31] sm:$0xff]  ;;  %v2554_v49 = vld [vmem:[#allocation2 + $0x39] sm:$0xff]  ;;  %v2043_v51 = vsel %vm1979_vm10, %v1947_v5, %v2011_v21  ;;  %vm1980_vm11 = vcmp.gt.f32.partialorder %v1948_v48, 0.0  ;;  %v2012_v45 = vmul.f32 0.01, %v1948_v48  ;;  %v8807_v12 = vpop.f32.mrb[12].mxu0  ;;  %v3031_v0 = vpack.c.bf16 %v3000_v11, %v2999_v50 }
 0x1a5   : > { %v2108_v43 = vld [vmem:[#allocation2 + $0x38] sm:$0xff]  ;;  %2075 = vst.msk [vmem:[#allocation2 + $0x49] sm:$0xff] %vm253_vm0, %v2043_v51  ;;  %v8808_v60 = vpop.f32.mrb[13].mxu0  ;;  %2807 = vrot.lane.b32.xlu0 %v2775_v40, %s9583_s14  ;;  %v2584_v38 = vpack.c.bf16 %v2554_v49, %v2553_v41  ;;  %v10395_v13 = vpop.f32.mrb[30].mxu1 }
 0x1a6   : > { %v2872_v54 = vld [vmem:[#allocation2 + $0x39] sm:$0xff]  ;;  %2489 = vrot.lane.b32.xlu1 %v2775_v40, %s9584_s15  ;;  %v2137_v62 = vpack.c.bf16 %v2108_v43, %v2107_v35  ;;  %v2044_v1 = vsel %vm1980_vm11, %v1948_v48, %v2012_v45  ;;  %v8809_v2 = vadd.f32 %v8808_v60, %v8807_v12  ;;  %v8810_v39 = vpop.f32.mrb[14].mxu0  ;;  %v2871_v36 = vld [vmem:[#allocation2 + $0x31] sm:$0xff]  ;;  %3047 = vst.msk [vmem:[#allocation3 + $0x10] sm:$0xff] %vm253_vm0, %v3031_v0 }
 0x1a7   : > { %2076 = vst.msk [vmem:[#allocation2 + $0x51] sm:$0xff] %vm253_vm0, %v2044_v1  ;;  %v8811_v3 = vpop.f32.mrb[15].mxu0  ;;  %v2903_v4 = vpack.c.bf16 %v2872_v54, %v2871_v36  ;;  %2600 = vst.msk [vmem:[#allocation3 + $0x20] sm:$0xff] %vm253_vm0, %v2584_v38 }
 0x1a8   : > { %2153 = vst.msk [vmem:[#allocation3 + $0x30] sm:$0xff] %vm253_vm0, %v2137_v62  ;;  %v1799_v7 = vadd.f32 %v10215_v55, %v8809_v2  ;;  %v8812_v44 = vadd.f32 %v8811_v3, %v8810_v39  ;;  %v10399_v55 = vpop.f32.mrb[31].mxu1 }
 0x1a9   : > { %2935 = vrot.lane.b32.xlu0 %v2903_v4, %s9584_s15 }
 0x1aa   : > { %2235 = vrot.lane.b32.xlu1 %v2903_v4, %s9582_s13  ;;  %v1912_v61 = vmul.f32 %v10297_v42, %v1799_v7  ;;  %v1802_v10 = vadd.f32 %v10223_v47, %v8812_v44 }
 0x1ac   : > { %v1949_v14 = vadd.f32 %v10303_v46, %v1912_v61  ;;  %v1913_v16 = vmul.f32 %v10297_v42, %v1802_v10  ;;  %v2745_v24 = vld [vmem:[#allocation2 + $0x48] sm:$0xff] }
 0x1ad   : > { %v3065_v17 = vld [vmem:[#allocation3 + $0x10] sm:$0xff]  ;;  %2681 = vrot.lane.b32.xlu0 %v3031_v0, %s9582_s13  ;;  %v2109_v6 = vld [vmem:[#allocation2 + $0x48] sm:$0xff] }
 0x1ae   : > { %2363 = vrot.lane.b32.xlu1 %v3031_v0, %s9583_s14  ;;  %vm1981_vm12 = vcmp.gt.f32.partialorder %v1949_v14, 0.0  ;;  %v2013_v5 = vmul.f32 0.01, %v1949_v14  ;;  %v1950_v47 = vadd.f32 %v10303_v46, %v1913_v16  ;;  %9351 = vmatprep.mubr.msk.bf16.mxu0 %vm253_vm0, %v3065_v17  ;;  %v2746_v63 = vld [vmem:[#allocation2 + $0x50] sm:$0xff] }
 0x1af   : > { %v3001_v26 = vld [vmem:[#allocation2 + $0x4a] sm:$0xff]  ;;  %v2776_v21 = vpack.c.bf16 %v2746_v63, %v2745_v24  ;;  %v3002_v48 = vld [vmem:[#allocation2 + $0x52] sm:$0xff] }
 0x1b0   : > { %v2110_v31 = vld [vmem:[#allocation2 + $0x50] sm:$0xff]  ;;  %v2045_v35 = vsel %vm1981_vm12, %v1949_v14, %v2013_v5  ;;  %vm1982_vm13 = vcmp.gt.f32.partialorder %v1950_v47, 0.0  ;;  %v2014_v41 = vmul.f32 0.01, %v1950_v47  ;;  %v8813_v40 = vpop.f32.mrb[16].mxu0  ;;  %v3032_v43 = vpack.c.bf16 %v3002_v48, %v3001_v26 }
 0x1b1   : > { %v2556_v50 = vld [vmem:[#allocation2 + $0x51] sm:$0xff]  ;;  %v2555_v49 = vld [vmem:[#allocation2 + $0x49] sm:$0xff]  ;;  %2077 = vst.msk [vmem:[#allocation2 + $0x61] sm:$0xff] %vm253_vm0, %v2045_v35  ;;  %v8814_v51 = vpop.f32.mrb[17].mxu0  ;;  %2809 = vrot.lane.b32.xlu0 %v2776_v21, %s9583_s14  ;;  %v2138_v45 = vpack.c.bf16 %v2110_v31, %v2109_v6 }
 0x1b2   : > { %v2874_v11 = vld [vmem:[#allocation2 + $0x51] sm:$0xff]  ;;  %2491 = vrot.lane.b32.xlu1 %v2776_v21, %s9584_s15  ;;  %v2585_v12 = vpack.c.bf16 %v2556_v50, %v2555_v49  ;;  %v2046_v54 = vsel %vm1982_vm13, %v1950_v47, %v2014_v41  ;;  %v8815_v0 = vadd.f32 %v8814_v51, %v8813_v40  ;;  %v8816_v34 = vpop.f32.mrb[18].mxu0  ;;  %v2873_v60 = vld [vmem:[#allocation2 + $0x49] sm:$0xff]  ;;  %3048 = vst.msk [vmem:[#allocation3 + $0x28] sm:$0xff] %vm253_vm0, %v3032_v43 }
 0x1b3   : > { %2078 = vst.msk [vmem:[#allocation2 + $0x69] sm:$0xff] %vm253_vm0, %v2046_v54  ;;  %v8817_v62 = vpop.f32.mrb[19].mxu0  ;;  %v2904_v38 = vpack.c.bf16 %v2874_v11, %v2873_v60  ;;  %2154 = vst.msk [vmem:[#allocation3 + $0x48] sm:$0xff] %vm253_vm0, %v2138_v45 }
 0x1b4   : > { %2601 = vst.msk [vmem:[#allocation3 + $0x38] sm:$0xff] %vm253_vm0, %v2585_v12  ;;  %v1807_v1 = vadd.f32 %v8815_v0, %v10236_v53  ;;  %v8818_v2 = vadd.f32 %v8817_v62, %v8816_v34 }
 0x1b5   : > { %2937 = vrot.lane.b32.xlu0 %v2904_v38, %s9584_s15 }
 0x1b6   : > { %2237 = vrot.lane.b32.xlu1 %v2904_v38, %s9582_s13  ;;  %v1914_v39 = vmul.f32 %v10297_v42, %v1807_v1  ;;  %v1810_v36 = vadd.f32 %v8818_v2, %v10241_v59 }
 0x1b8   : > { %v1951_v3 = vadd.f32 %v10303_v46, %v1914_v39  ;;  %v1915_v4 = vmul.f32 %v10297_v42, %v1810_v36  ;;  %v2747_v44 = vld [vmem:[#allocation2 + $0x60] sm:$0xff] }
 0x1b9   : > { %v3068_v7 = vld [vmem:[#allocation3 + $0x28] sm:$0xff]  ;;  %2683 = vrot.lane.b32.xlu0 %v3032_v43, %s9582_s13  ;;  %v2111_v16 = vld [vmem:[#allocation2 + $0x60] sm:$0xff] }
 0x1ba   : > { %2365 = vrot.lane.b32.xlu1 %v3032_v43, %s9583_s14  ;;  %vm1983_vm14 = vcmp.gt.f32.partialorder %v1951_v3, 0.0  ;;  %v2015_v53 = vmul.f32 0.01, %v1951_v3  ;;  %v1952_v61 = vadd.f32 %v10303_v46, %v1915_v4  ;;  %9352 = vmatmul.mubr.msk.bf16.vlgmr.msra.gmra.mrb[64].mxu0 %vm253_vm0, %v3068_v7  ;;  %v2748_v10 = vld [vmem:[#allocation2 + $0x68] sm:$0xff] }
 0x1bb   : > { %v3003_v14 = vld [vmem:[#allocation2 + $0x62] sm:$0xff]  ;;  %v2777_v59 = vpack.c.bf16 %v2748_v10, %v2747_v44  ;;  %v3004_v17 = vld [vmem:[#allocation2 + $0x6a] sm:$0xff] }
 0x1bc   : > { %v2112_v24 = vld [vmem:[#allocation2 + $0x68] sm:$0xff]  ;;  %v2047_v47 = vsel %vm1983_vm14, %v1951_v3, %v2015_v53  ;;  %vm1984_vm15 = vcmp.gt.f32.partialorder %v1952_v61, 0.0  ;;  %v2016_v63 = vmul.f32 0.01, %v1952_v61  ;;  %v8819_v26 = vpop.f32.mrb[20].mxu0  ;;  %v3033_v21 = vpack.c.bf16 %v3004_v17, %v3003_v14 }
 0x1bd   : > { %v2558_v5 = vld [vmem:[#allocation2 + $0x69] sm:$0xff]  ;;  %v2557_v48 = vld [vmem:[#allocation2 + $0x61] sm:$0xff]  ;;  %2079 = vst.msk [vmem:[#allocation2 + $0x79] sm:$0xff] %vm253_vm0, %v2047_v47  ;;  %v8820_v31 = vpop.f32.mrb[21].mxu0  ;;  %2811 = vrot.lane.b32.xlu0 %v2777_v59, %s9583_s14  ;;  %v2139_v50 = vpack.c.bf16 %v2112_v24, %v2111_v16 }
 0x1be   : > { %v2876_v6 = vld [vmem:[#allocation2 + $0x69] sm:$0xff]  ;;  %2493 = vrot.lane.b32.xlu1 %v2777_v59, %s9584_s15  ;;  %v2586_v35 = vpack.c.bf16 %v2558_v5, %v2557_v48  ;;  %v2048_v41 = vsel %vm1984_vm15, %v1952_v61, %v2016_v63  ;;  %v8821_v40 = vadd.f32 %v8820_v31, %v8819_v26  ;;  %v8822_v11 = vpop.f32.mrb[22].mxu0  ;;  %v2875_v43 = vld [vmem:[#allocation2 + $0x61] sm:$0xff]  ;;  %3049 = vst.msk [vmem:[#allocation3 + $0x40] sm:$0xff] %vm253_vm0, %v3033_v21 }
 0x1bf   : > { %2080 = vst.msk [vmem:[#allocation2 + $0x81] sm:$0xff] %vm253_vm0, %v2048_v41  ;;  %v8823_v49 = vpop.f32.mrb[23].mxu0  ;;  %v2905_v51 = vpack.c.bf16 %v2876_v6, %v2875_v43  ;;  %2155 = vst.msk [vmem:[#allocation3 + $0x60] sm:$0xff] %vm253_vm0, %v2139_v50 }
 0x1c0   : > { %2602 = vst.msk [vmem:[#allocation3 + $0x50] sm:$0xff] %vm253_vm0, %v2586_v35  ;;  %v1815_v45 = vadd.f32 %v10233_v52, %v8821_v40  ;;  %v8824_v12 = vadd.f32 %v8823_v49, %v8822_v11 }
 0x1c1   : > { %2939 = vrot.lane.b32.xlu0 %v2905_v51, %s9584_s15 }
 0x1c2   : > { %2239 = vrot.lane.b32.xlu1 %v2905_v51, %s9582_s13  ;;  %v1916_v54 = vmul.f32 %v10297_v42, %v1815_v45  ;;  %v1818_v0 = vadd.f32 %v10238_v57, %v8824_v12 }
 0x1c4   : > { %v1953_v34 = vadd.f32 %v10303_v46, %v1916_v54  ;;  %v1917_v60 = vmul.f32 %v10297_v42, %v1818_v0  ;;  %v2749_v38 = vld [vmem:[#allocation2 + $0x78] sm:$0xff] }
 0x1c5   : > { %v3071_v62 = vld [vmem:[#allocation3 + $0x40] sm:$0xff]  ;;  %2685 = vrot.lane.b32.xlu0 %v3033_v21, %s9582_s13  ;;  %v2113_v36 = vld [vmem:[#allocation2 + $0x78] sm:$0xff] }
 0x1c6   : > { %2367 = vrot.lane.b32.xlu1 %v3033_v21, %s9583_s14  ;;  %vm1985_vm1 = vcmp.gt.f32.partialorder %v1953_v34, 0.0  ;;  %v2017_v52 = vmul.f32 0.01, %v1953_v34  ;;  %v1954_v1 = vadd.f32 %v10303_v46, %v1917_v60  ;;  %9355 = vmatprep.mubr.msk.bf16.mxu0 %vm253_vm0, %v3071_v62  ;;  %v2750_v2 = vld [vmem:[#allocation2 + $0x80] sm:$0xff] }
 0x1c7   : > { %v3005_v39 = vld [vmem:[#allocation2 + $0x7a] sm:$0xff]  ;;  %v2778_v57 = vpack.c.bf16 %v2750_v2, %v2749_v38  ;;  %v3006_v3 = vld [vmem:[#allocation2 + $0x82] sm:$0xff] }
 0x1c8   : > { %v2114_v4 = vld [vmem:[#allocation2 + $0x80] sm:$0xff]  ;;  %v2049_v44 = vsel %vm1985_vm1, %v1953_v34, %v2017_v52  ;;  %vm1986_vm2 = vcmp.gt.f32.partialorder %v1954_v1, 0.0  ;;  %v2018_v53 = vmul.f32 0.01, %v1954_v1  ;;  %v8825_v61 = vpop.f32.mrb[24].mxu0  ;;  %v3034_v14 = vpack.c.bf16 %v3006_v3, %v3005_v39 }
 0x1c9   : > { %v2560_v7 = vld [vmem:[#allocation2 + $0x81] sm:$0xff]  ;;  %v2559_v16 = vld [vmem:[#allocation2 + $0x79] sm:$0xff]  ;;  %2081 = vst.msk [vmem:[#allocation2 + $0x91] sm:$0xff] %vm253_vm0, %v2049_v44  ;;  %v8826_v59 = vpop.f32.mrb[25].mxu0  ;;  %2813 = vrot.lane.b32.xlu0 %v2778_v57, %s9583_s14  ;;  %v2140_v17 = vpack.c.bf16 %v2114_v4, %v2113_v36 }
 0x1ca   : > { %v2878_v10 = vld [vmem:[#allocation2 + $0x81] sm:$0xff]  ;;  %2495 = vrot.lane.b32.xlu1 %v2778_v57, %s9584_s15  ;;  %v2587_v24 = vpack.c.bf16 %v2560_v7, %v2559_v16  ;;  %v2050_v5 = vsel %vm1986_vm2, %v1954_v1, %v2018_v53  ;;  %v8827_v47 = vadd.f32 %v8826_v59, %v8825_v61  ;;  %v8828_v63 = vpop.f32.mrb[26].mxu0  ;;  %v2877_v26 = vld [vmem:[#allocation2 + $0x79] sm:$0xff]  ;;  %3050 = vst.msk [vmem:[#allocation3 + $0x58] sm:$0xff] %vm253_vm0, %v3034_v14 }
 0x1cb   : > { %2082 = vst.msk [vmem:[#allocation2 + $0x99] sm:$0xff] %vm253_vm0, %v2050_v5  ;;  %v8829_v6 = vpop.f32.mrb[27].mxu0  ;;  %v2906_v21 = vpack.c.bf16 %v2878_v10, %v2877_v26  ;;  %2156 = vst.msk [vmem:[#allocation3 + $0x78] sm:$0xff] %vm253_vm0, %v2140_v17 }
 0x1cc   : > { %2603 = vst.msk [vmem:[#allocation3 + $0x68] sm:$0xff] %vm253_vm0, %v2587_v24  ;;  %v1823_v48 = vadd.f32 %v8827_v47, %v10252_v56  ;;  %v8830_v31 = vadd.f32 %v8829_v6, %v8828_v63 }
 0x1cd   : > { %2941 = vrot.lane.b32.xlu0 %v2906_v21, %s9584_s15 }
 0x1ce   : > { %2241 = vrot.lane.b32.xlu1 %v2906_v21, %s9582_s13  ;;  %v1918_v50 = vmul.f32 %v10297_v42, %v1823_v48  ;;  %v1826_v35 = vadd.f32 %v8830_v31, %v10257_v15 }
 0x1d0   : > { %v1955_v41 = vadd.f32 %v10303_v46, %v1918_v50  ;;  %v1919_v40 = vmul.f32 %v10297_v42, %v1826_v35  ;;  %v2751_v43 = vld [vmem:[#allocation2 + $0x90] sm:$0xff] }
 0x1d1   : > { %v3074_v11 = vld [vmem:[#allocation3 + $0x58] sm:$0xff]  ;;  %2687 = vrot.lane.b32.xlu0 %v3034_v14, %s9582_s13  ;;  %v2115_v12 = vld [vmem:[#allocation2 + $0x90] sm:$0xff] }
 0x1d2   : > { %2369 = vrot.lane.b32.xlu1 %v3034_v14, %s9583_s14  ;;  %vm1987_vm6 = vcmp.gt.f32.partialorder %v1955_v41, 0.0  ;;  %v2019_v56 = vmul.f32 0.01, %v1955_v41  ;;  %v1956_v49 = vadd.f32 %v10303_v46, %v1919_v40  ;;  %9356 = vmatmul.mubr.msk.bf16.gmra.mrb[68].mxu0 %vm253_vm0, %v3074_v11  ;;  %v2752_v51 = vld [vmem:[#allocation2 + $0x98] sm:$0xff] }
 0x1d3   : > { %v3007_v45 = vld [vmem:[#allocation2 + $0x92] sm:$0xff]  ;;  %v2779_v15 = vpack.c.bf16 %v2752_v51, %v2751_v43  ;;  %v3008_v54 = vld [vmem:[#allocation2 + $0x9a] sm:$0xff] }
 0x1d4   : > { %v2116_v0 = vld [vmem:[#allocation2 + $0x98] sm:$0xff]  ;;  %v2051_v60 = vsel %vm1987_vm6, %v1955_v41, %v2019_v56  ;;  %vm1988_vm7 = vcmp.gt.f32.partialorder %v1956_v49, 0.0  ;;  %v2020_v62 = vmul.f32 0.01, %v1956_v49  ;;  %v8831_v38 = vpop.f32.mrb[28].mxu0  ;;  %v3035_v1 = vpack.c.bf16 %v3008_v54, %v3007_v45 }
 0x1d5   : > { %v2562_v34 = vld [vmem:[#allocation2 + $0x99] sm:$0xff]  ;;  %v2561_v2 = vld [vmem:[#allocation2 + $0x91] sm:$0xff]  ;;  %2083 = vst.msk [vmem:[#allocation2 + $0xa9] sm:$0xff] %vm253_vm0, %v2051_v60  ;;  %v8832_v39 = vpop.f32.mrb[29].mxu0  ;;  %2815 = vrot.lane.b32.xlu0 %v2779_v15, %s9583_s14  ;;  %v2141_v36 = vpack.c.bf16 %v2116_v0, %v2115_v12 }
 0x1d6   : > { %v2880_v52 = vld [vmem:[#allocation2 + $0x99] sm:$0xff]  ;;  %2497 = vrot.lane.b32.xlu1 %v2779_v15, %s9584_s15  ;;  %v2588_v57 = vpack.c.bf16 %v2562_v34, %v2561_v2  ;;  %v2052_v3 = vsel %vm1988_vm7, %v1956_v49, %v2020_v62  ;;  %v8833_v4 = vadd.f32 %v8832_v39, %v8831_v38  ;;  %v8834_v7 = vpop.f32.mrb[30].mxu0  ;;  %v2879_v44 = vld [vmem:[#allocation2 + $0x91] sm:$0xff]  ;;  %3051 = vst.msk [vmem:[#allocation3 + $0x70] sm:$0xff] %vm253_vm0, %v3035_v1 }
 0x1d7   : > { %2084 = vst.msk [vmem:[#allocation2 + $0xb1] sm:$0xff] %vm253_vm0, %v2052_v3  ;;  %v8835_v53 = vpop.f32.mrb[31].mxu0  ;;  %v2907_v61 = vpack.c.bf16 %v2880_v52, %v2879_v44  ;;  %2157 = vst.msk [vmem:[#allocation3 + $0x90] sm:$0xff] %vm253_vm0, %v2141_v36 }
 0x1d8   : > { %2604 = vst.msk [vmem:[#allocation3 + $0x80] sm:$0xff] %vm253_vm0, %v2588_v57  ;;  %v1831_v10 = vadd.f32 %v10249_v8, %v8833_v4  ;;  %v8836_v14 = vadd.f32 %v8835_v53, %v8834_v7 }
 0x1d9   : > { %2943 = vrot.lane.b32.xlu0 %v2907_v61, %s9584_s15 }
 0x1da   : > { %2243 = vrot.lane.b32.xlu1 %v2907_v61, %s9582_s13  ;;  %v1920_v16 = vmul.f32 %v10297_v42, %v1831_v10  ;;  %v1834_v59 = vadd.f32 %v10254_v58, %v8836_v14 }
 0x1dc   : > { %v1957_v17 = vadd.f32 %v10303_v46, %v1920_v16  ;;  %v1921_v24 = vmul.f32 %v10297_v42, %v1834_v59  ;;  %v2753_v47 = vld [vmem:[#allocation2 + $0xa8] sm:$0xff] }
 0x1dd   : > { %v3077_v5 = vld [vmem:[#allocation3 + $0x70] sm:$0xff]  ;;  %2689 = vrot.lane.b32.xlu0 %v3035_v1, %s9582_s13  ;;  %v2117_v21 = vld [vmem:[#allocation2 + $0xa8] sm:$0xff] }
 0x1de   : > { %2371 = vrot.lane.b32.xlu1 %v3035_v1, %s9583_s14  ;;  %vm1989_vm8 = vcmp.gt.f32.partialorder %v1957_v17, 0.0  ;;  %v2021_v8 = vmul.f32 0.01, %v1957_v17  ;;  %v1958_v63 = vadd.f32 %v10303_v46, %v1921_v24  ;;  %9359 = vmatprep.mubr.msk.bf16.mxu0 %vm253_vm0, %v3077_v5  ;;  %v2754_v26 = vld [vmem:[#allocation2 + $0xb0] sm:$0xff] }
 0x1df   : > { %v3009_v6 = vld [vmem:[#allocation2 + $0xaa] sm:$0xff]  ;;  %v2780_v58 = vpack.c.bf16 %v2754_v26, %v2753_v47  ;;  %v3010_v48 = vld [vmem:[#allocation2 + $0xb2] sm:$0xff] }
 0x1e0   : > { %v2118_v31 = vld [vmem:[#allocation2 + $0xb0] sm:$0xff]  ;;  %v2053_v35 = vsel %vm1989_vm8, %v1957_v17, %v2021_v8  ;;  %vm1990_vm9 = vcmp.gt.f32.partialorder %v1958_v63, 0.0  ;;  %v2022_v41 = vmul.f32 0.01, %v1958_v63  ;;  %v8837_v40 = vpop.f32.mrb[32].mxu0  ;;  %v3036_v43 = vpack.c.bf16 %v3010_v48, %v3009_v6 }
 0x1e1   : > { %v2564_v50 = vld [vmem:[#allocation2 + $0xb1] sm:$0xff]  ;;  %v2563_v56 = vld [vmem:[#allocation2 + $0xa9] sm:$0xff]  ;;  %2085 = vst.msk [vmem:[#allocation2 + $0xc1] sm:$0xff] %vm253_vm0, %v2053_v35  ;;  %v8838_v49 = vpop.f32.mrb[33].mxu0  ;;  %2817 = vrot.lane.b32.xlu0 %v2780_v58, %s9583_s14  ;;  %v2142_v51 = vpack.c.bf16 %v2118_v31, %v2117_v21 }
 0x1e2   : > { %v2882_v11 = vld [vmem:[#allocation2 + $0xb1] sm:$0xff]  ;;  %2499 = vrot.lane.b32.xlu1 %v2780_v58, %s9584_s15  ;;  %v2589_v45 = vpack.c.bf16 %v2564_v50, %v2563_v56  ;;  %v2054_v12 = vsel %vm1990_vm9, %v1958_v63, %v2022_v41  ;;  %v8839_v15 = vadd.f32 %v8838_v49, %v8837_v40  ;;  %v8840_v54 = vpop.f32.mrb[34].mxu0  ;;  %v2881_v0 = vld [vmem:[#allocation2 + $0xa9] sm:$0xff]  ;;  %3052 = vst.msk [vmem:[#allocation3 + $0x88] sm:$0xff] %vm253_vm0, %v3036_v43 }
 0x1e3   : > { %2086 = vst.msk [vmem:[#allocation2 + $0xc9] sm:$0xff] %vm253_vm0, %v2054_v12  ;;  %v8841_v34 = vpop.f32.mrb[35].mxu0  ;;  %v2908_v60 = vpack.c.bf16 %v2882_v11, %v2881_v0  ;;  %2158 = vst.msk [vmem:[#allocation3 + $0xa8] sm:$0xff] %vm253_vm0, %v2142_v51 }
 0x1e4   : > { %2605 = vst.msk [vmem:[#allocation3 + $0x98] sm:$0xff] %vm253_vm0, %v2589_v45  ;;  %v1839_v62 = vadd.f32 %v8839_v15, %v10268_v28  ;;  %v8842_v38 = vadd.f32 %v8841_v34, %v8840_v54 }
 0x1e5   : > { %2945 = vrot.lane.b32.xlu0 %v2908_v60, %s9584_s15 }
 0x1e6   : > { %2245 = vrot.lane.b32.xlu1 %v2908_v60, %s9582_s13  ;;  %v1922_v52 = vmul.f32 %v10297_v42, %v1839_v62  ;;  %v1842_v1 = vadd.f32 %v8842_v38, %v10272_v25 }
 0x1e8   : > { %v1959_v2 = vadd.f32 %v10303_v46, %v1922_v52  ;;  %v1923_v39 = vmul.f32 %v10297_v42, %v1842_v1  ;;  %v2755_v57 = vld [vmem:[#allocation2 + $0xc0] sm:$0xff] }
 0x1e9   : > { %v3080_v36 = vld [vmem:[#allocation3 + $0x88] sm:$0xff]  ;;  %2691 = vrot.lane.b32.xlu0 %v3036_v43, %s9582_s13  ;;  %v2119_v44 = vld [vmem:[#allocation2 + $0xc0] sm:$0xff] }
 0x1ea   : > { %2373 = vrot.lane.b32.xlu1 %v3036_v43, %s9583_s14  ;;  %vm1991_vm10 = vcmp.gt.f32.partialorder %v1959_v2, 0.0  ;;  %v2023_v28 = vmul.f32 0.01, %v1959_v2  ;;  %v1960_v3 = vadd.f32 %v10303_v46, %v1923_v39  ;;  %9360 = vmatmul.mubr.msk.bf16.gmra.mrb[72].mxu0 %vm253_vm0, %v3080_v36  ;;  %v2756_v4 = vld [vmem:[#allocation2 + $0xc8] sm:$0xff] }
 0x1eb   : > { %v3011_v7 = vld [vmem:[#allocation2 + $0xc2] sm:$0xff]  ;;  %v2781_v25 = vpack.c.bf16 %v2756_v4, %v2755_v57  ;;  %v3012_v53 = vld [vmem:[#allocation2 + $0xca] sm:$0xff] }
 0x1ec   : > { %v2120_v61 = vld [vmem:[#allocation2 + $0xc8] sm:$0xff]  ;;  %v2055_v14 = vsel %vm1991_vm10, %v1959_v2, %v2023_v28  ;;  %vm1992_vm11 = vcmp.gt.f32.partialorder %v1960_v3, 0.0  ;;  %v2024_v16 = vmul.f32 0.01, %v1960_v3  ;;  %v8843_v59 = vpop.f32.mrb[36].mxu0  ;;  %v3037_v24 = vpack.c.bf16 %v3012_v53, %v3011_v7 }
 0x1ed   : > { %v2566_v10 = vld [vmem:[#allocation2 + $0xc9] sm:$0xff]  ;;  %v2565_v5 = vld [vmem:[#allocation2 + $0xc1] sm:$0xff]  ;;  %2087 = vst.msk [vmem:[#allocation2 + $0xd9] sm:$0xff] %vm253_vm0, %v2055_v14  ;;  %v8844_v47 = vpop.f32.mrb[37].mxu0  ;;  %2819 = vrot.lane.b32.xlu0 %v2781_v25, %s9583_s14  ;;  %v2143_v8 = vpack.c.bf16 %v2120_v61, %v2119_v44 }
 0x1ee   : > { %v2884_v17 = vld [vmem:[#allocation2 + $0xc9] sm:$0xff]  ;;  %2501 = vrot.lane.b32.xlu1 %v2781_v25, %s9584_s15  ;;  %v2590_v63 = vpack.c.bf16 %v2566_v10, %v2565_v5  ;;  %v2056_v26 = vsel %vm1992_vm11, %v1960_v3, %v2024_v16  ;;  %v8845_v6 = vadd.f32 %v8844_v47, %v8843_v59  ;;  %v8846_v21 = vpop.f32.mrb[38].mxu0  ;;  %v2883_v58 = vld [vmem:[#allocation2 + $0xc1] sm:$0xff]  ;;  %3053 = vst.msk [vmem:[#allocation3 + $0xa0] sm:$0xff] %vm253_vm0, %v3037_v24 }
 0x1ef   : > { %2088 = vst.msk [vmem:[#allocation2 + $0xe1] sm:$0xff] %vm253_vm0, %v2056_v26  ;;  %v8847_v48 = vpop.f32.mrb[39].mxu0  ;;  %v2909_v31 = vpack.c.bf16 %v2884_v17, %v2883_v58  ;;  %2159 = vst.msk [vmem:[#allocation3 + $0xc0] sm:$0xff] %vm253_vm0, %v2143_v8 }
 0x1f0   : > { %2606 = vst.msk [vmem:[#allocation3 + $0xb0] sm:$0xff] %vm253_vm0, %v2590_v63  ;;  %v1847_v50 = vadd.f32 %v10266_v20, %v8845_v6  ;;  %v8848_v35 = vadd.f32 %v8847_v48, %v8846_v21 }
 0x1f1   : > { %2947 = vrot.lane.b32.xlu0 %v2909_v31, %s9584_s15 }
 0x1f2   : > { %2247 = vrot.lane.b32.xlu1 %v2909_v31, %s9582_s13  ;;  %v1924_v41 = vmul.f32 %v10297_v42, %v1847_v50  ;;  %v1850_v40 = vadd.f32 %v10270_v23, %v8848_v35 }
 0x1f4   : > { %v1961_v11 = vadd.f32 %v10303_v46, %v1924_v41  ;;  %v1925_v43 = vmul.f32 %v10297_v42, %v1850_v40  ;;  %v2757_v49 = vld [vmem:[#allocation2 + $0xd8] sm:$0xff] }
 0x1f5   : > { %v3083_v56 = vld [vmem:[#allocation3 + $0xa0] sm:$0xff]  ;;  %2693 = vrot.lane.b32.xlu0 %v3037_v24, %s9582_s13  ;;  %v2121_v15 = vld [vmem:[#allocation2 + $0xd8] sm:$0xff] }
 0x1f6   : > { %2375 = vrot.lane.b32.xlu1 %v3037_v24, %s9583_s14  ;;  %vm1993_vm12 = vcmp.gt.f32.partialorder %v1961_v11, 0.0  ;;  %v2025_v20 = vmul.f32 0.01, %v1961_v11  ;;  %v1962_v51 = vadd.f32 %v10303_v46, %v1925_v43  ;;  %9363 = vmatprep.mubr.msk.bf16.mxu0 %vm253_vm0, %v3083_v56  ;;  %v2758_v45 = vld [vmem:[#allocation2 + $0xe0] sm:$0xff] }
 0x1f7   : > { %v3013_v12 = vld [vmem:[#allocation2 + $0xda] sm:$0xff]  ;;  %v2782_v23 = vpack.c.bf16 %v2758_v45, %v2757_v49  ;;  %v3014_v54 = vld [vmem:[#allocation2 + $0xe2] sm:$0xff] }
 0x1f8   : > { %v2122_v0 = vld [vmem:[#allocation2 + $0xe0] sm:$0xff]  ;;  %v2057_v60 = vsel %vm1993_vm12, %v1961_v11, %v2025_v20  ;;  %vm1994_vm13 = vcmp.gt.f32.partialorder %v1962_v51, 0.0  ;;  %v2026_v62 = vmul.f32 0.01, %v1962_v51  ;;  %v8849_v38 = vpop.f32.mrb[40].mxu0  ;;  %v3038_v1 = vpack.c.bf16 %v3014_v54, %v3013_v12 }
 0x1f9   : > { %v2568_v34 = vld [vmem:[#allocation2 + $0xe1] sm:$0xff]  ;;  %v2567_v2 = vld [vmem:[#allocation2 + $0xd9] sm:$0xff]  ;;  %2089 = vst.msk [vmem:[#allocation2 + $0xf1] sm:$0xff] %vm253_vm0, %v2057_v60  ;;  %v8850_v39 = vpop.f32.mrb[41].mxu0  ;;  %2821 = vrot.lane.b32.xlu0 %v2782_v23, %s9583_s14  ;;  %v2144_v36 = vpack.c.bf16 %v2122_v0, %v2121_v15 }
 0x1fa   : > { %v2886_v52 = vld [vmem:[#allocation2 + $0xe1] sm:$0xff]  ;;  %2503 = vrot.lane.b32.xlu1 %v2782_v23, %s9584_s15  ;;  %v2591_v57 = vpack.c.bf16 %v2568_v34, %v2567_v2  ;;  %v2058_v28 = vsel %vm1994_vm13, %v1962_v51, %v2026_v62  ;;  %v8851_v3 = vadd.f32 %v8850_v39, %v8849_v38  ;;  %v8852_v4 = vpop.f32.mrb[42].mxu0  ;;  %v2885_v7 = vld [vmem:[#allocation2 + $0xd9] sm:$0xff]  ;;  %3054 = vst.msk [vmem:[#allocation3 + $0xb8] sm:$0xff] %vm253_vm0, %v3038_v1 }
 0x1fb   : > { %2090 = vst.msk [vmem:[#allocation2 + $0xf9] sm:$0xff] %vm253_vm0, %v2058_v28  ;;  %v8853_v44 = vpop.f32.mrb[43].mxu0  ;;  %v2910_v25 = vpack.c.bf16 %v2886_v52, %v2885_v7  ;;  %2160 = vst.msk [vmem:[#allocation3 + $0xd8] sm:$0xff] %vm253_vm0, %v2144_v36  ;;  %v10546_v23 = vld [vmem:[%s12288_s2] ss:$0 sm:$0xff] }
 0x1fc   : > { %2607 = vst.msk [vmem:[#allocation3 + $0xc8] sm:$0xff] %vm253_vm0, %v2591_v57  ;;  %v1855_v53 = vadd.f32 %v8851_v3, %v10282_v27  ;;  %v8854_v61 = vadd.f32 %v8853_v44, %v8852_v4 }
 0x1fd   : > { %2949 = vrot.lane.b32.xlu0 %v2910_v25, %s9584_s15 }
 0x1fe   : > { %2249 = vrot.lane.b32.xlu1 %v2910_v25, %s9582_s13  ;;  %v1926_v10 = vmul.f32 %v10297_v42, %v1855_v53  ;;  %v1858_v14 = vadd.f32 %v8854_v61, %v10292_v32 }
 0x200   : > { %v1963_v16 = vadd.f32 %v10303_v46, %v1926_v10  ;;  %v1927_v59 = vmul.f32 %v10297_v42, %v1858_v14  ;;  %v2759_v24 = vld [vmem:[#allocation2 + $0xf0] sm:$0xff] }
 0x201   : > { %v3086_v17 = vld [vmem:[#allocation3 + $0xb8] sm:$0xff]  ;;  %2695 = vrot.lane.b32.xlu0 %v3038_v1, %s9582_s13  ;;  %v2123_v63 = vld [vmem:[#allocation2 + $0xf0] sm:$0xff] }
 0x202   : > { %2377 = vrot.lane.b32.xlu1 %v3038_v1, %s9583_s14  ;;  %vm1995_vm14 = vcmp.gt.f32.partialorder %v1963_v16, 0.0  ;;  %v2027_v27 = vmul.f32 0.01, %v1963_v16  ;;  %v1964_v5 = vadd.f32 %v10303_v46, %v1927_v59  ;;  %9364 = vmatmul.mubr.msk.bf16.gmra.mrb[76].mxu0 %vm253_vm0, %v3086_v17  ;;  %v2760_v47 = vld [vmem:[#allocation2 + $0xf8] sm:$0xff]  ;;  %v10534_v46 = vpop.permute.xlu0 %2837 }
 0x203   : > { %v3015_v8 = vld [vmem:[#allocation2 + $0xf2] sm:$0xff]  ;;  %v2783_v32 = vpack.c.bf16 %v2760_v47, %v2759_v24  ;;  %v3016_v26 = vld [vmem:[#allocation2 + $0xfa] sm:$0xff] }
 0x204   : > { %v2124_v6 = vld [vmem:[#allocation2 + $0xf8] sm:$0xff]  ;;  %v2059_v42 = vsel %vm1995_vm14, %v1963_v16, %v2027_v27  ;;  %vm1996_vm15 = vcmp.gt.f32.partialorder %v1964_v5, 0.0  ;;  %v2028_v58 = vmul.f32 0.01, %v1964_v5  ;;  %v8855_v48 = vpop.f32.mrb[44].mxu0  ;;  %v3039_v50 = vpack.c.bf16 %v3016_v26, %v3015_v8 }
 0x205   : > { %v2570_v21 = vld [vmem:[#allocation2 + $0xf9] sm:$0xff]  ;;  %v2569_v35 = vld [vmem:[#allocation2 + $0xf1] sm:$0xff]  ;;  %2091 = vst.msk [vmem:[#allocation2 + $0x109] sm:$0xff] %vm253_vm0, %v2059_v42  ;;  %v8856_v41 = vpop.f32.mrb[45].mxu0  ;;  %2823 = vrot.lane.b32.xlu0 %v2783_v32, %s9583_s14  ;;  %v2145_v40 = vpack.c.bf16 %v2124_v6, %v2123_v63 }
 0x206   : > { %v2888_v31 = vld [vmem:[#allocation2 + $0xf9] sm:$0xff]  ;;  %2505 = vrot.lane.b32.xlu1 %v2783_v32, %s9584_s15  ;;  %v2592_v11 = vpack.c.bf16 %v2570_v21, %v2569_v35  ;;  %v2060_v43 = vsel %vm1996_vm15, %v1964_v5, %v2028_v58  ;;  %v8857_v56 = vadd.f32 %v8856_v41, %v8855_v48  ;;  %v8858_v49 = vpop.f32.mrb[46].mxu0  ;;  %v2887_v20 = vld [vmem:[#allocation2 + $0xf1] sm:$0xff]  ;;  %3055 = vst.msk [vmem:[#allocation3 + $0xd0] sm:$0xff] %vm253_vm0, %v3039_v50 }
 0x207   : > { %2092 = vst.msk [vmem:[#allocation2 + $0x111] sm:$0xff] %vm253_vm0, %v2060_v43  ;;  %v8859_v51 = vpop.f32.mrb[47].mxu0  ;;  %v2911_v45 = vpack.c.bf16 %v2888_v31, %v2887_v20  ;;  %2161 = vst.msk [vmem:[#allocation3 + $0xf0] sm:$0xff] %vm253_vm0, %v2145_v40 }
 0x208   : > { %2608 = vst.msk [vmem:[#allocation3 + $0xe0] sm:$0xff] %vm253_vm0, %v2592_v11  ;;  %v1863_v12 = vadd.f32 %v10280_v29, %v8857_v56  ;;  %v8860_v15 = vadd.f32 %v8859_v51, %v8858_v49  ;;  %v10553_v29 = vld [vmem:[%s12289_s3] ss:$0 sm:$0xff] }
 0x209   : > { %2951 = vrot.lane.b32.xlu0 %v2911_v45, %s9584_s15 }
 0x20a   : > { %2251 = vrot.lane.b32.xlu1 %v2911_v45, %s9582_s13  ;;  %v1928_v54 = vmul.f32 %v10546_v23, %v1863_v12  ;;  %v1866_v0 = vadd.f32 %v10284_v30, %v8860_v15 }
 0x20b   : > { %v2680_v34 = vpop.permute.xlu0 %2679 }
 0x20c   : > { %v2488_v60 = vpop.permute.xlu1 %2487  ;;  %v1965_v62 = vadd.f32 %v10553_v29, %v1928_v54  ;;  %v1929_v38 = vmul.f32 %v10546_v23, %v1866_v0  ;;  %2727 = vst.msk [vmem:[#allocation3 + $0x8] sm:$0xff] %vm551_vm3, %v2680_v34  ;;  %v2761_v30 = vld [vmem:[#allocation2 + $0x108] sm:$0xff] }
 0x20d   : > { %2535 = vst.msk [vmem:[#allocation3] sm:$0xff] %vm809_vm5, %v2488_v60  ;;  %v3089_v52 = vld [vmem:[#allocation3 + $0xd0] sm:$0xff]  ;;  %2697 = vrot.lane.b32.xlu0 %v3039_v50, %s9582_s13  ;;  %v2889_v1 = vld [vmem:[#allocation2 + $0x109] sm:$0xff] }
 0x20e   : > { %2379 = vrot.lane.b32.xlu1 %v3039_v50, %s9583_s14  ;;  %vm1997_vm1 = vcmp.gt.f32.partialorder %v1965_v62, 0.0  ;;  %v2029_v2 = vmul.f32 0.01, %v1965_v62  ;;  %v1966_v39 = vadd.f32 %v10553_v29, %v1929_v38  ;;  %9367 = vmatprep.mubr.msk.bf16.mxu0 %vm253_vm0, %v3089_v52  ;;  %v2762_v36 = vld [vmem:[#allocation2 + $0x110] sm:$0xff] }
 0x20f   : > { %v2890_v57 = vld [vmem:[#allocation2 + $0x111] sm:$0xff]  ;;  %v2784_v4 = vpack.c.bf16 %v2762_v36, %v2761_v30 }
 0x210   : > { %v3017_v28 = vld [vmem:[#allocation2 + $0x10a] sm:$0xff]  ;;  %v2234_v3 = vpop.permute.xlu1 %2233  ;;  %v2912_v7 = vpack.c.bf16 %v2890_v57, %v2889_v1  ;;  %v3018_v44 = vld [vmem:[#allocation2 + $0x112] sm:$0xff]  ;;  %v2061_v25 = vsel %vm1997_vm1, %v1965_v62, %v2029_v2  ;;  %vm1998_vm2 = vcmp.gt.f32.partialorder %v1966_v39, 0.0  ;;  %v2030_v53 = vmul.f32 0.01, %v1966_v39  ;;  %v8861_v61 = vpop.f32.mrb[48].mxu0 }
 0x211   : > { %2280 = vst.msk [vmem:[#allocation3 + $0x18] sm:$0xff] %vm551_vm3, %v2234_v3  ;;  %v3040_v10 = vpack.c.bf16 %v3018_v44, %v3017_v28  ;;  %v8862_v14 = vpop.f32.mrb[49].mxu0  ;;  %2825 = vrot.lane.b32.xlu0 %v2784_v4, %s9583_s14 }
 0x212   : > { %2093 = vst.msk [vmem:[#allocation2 + $0x121] sm:$0xff] %vm253_vm0, %v2061_v25  ;;  %2507 = vrot.lane.b32.xlu1 %v2784_v4, %s9584_s15  ;;  %2162 = vst.msk [vmem:[#allocation3 + $0x108] sm:$0xff] %vm253_vm0, %v2784_v4  ;;  %v2062_v16 = vsel %vm1998_vm2, %v1966_v39, %v2030_v53  ;;  %v8863_v59 = vadd.f32 %v8862_v14, %v8861_v61  ;;  %v8864_v17 = vpop.f32.mrb[50].mxu0 }
 0x213   : > { %2609 = vst.msk [vmem:[#allocation3 + $0xf8] sm:$0xff] %vm253_vm0, %v2912_v7  ;;  %3056 = vst.msk [vmem:[#allocation3 + $0xe8] sm:$0xff] %vm253_vm0, %v3040_v10  ;;  %v8865_v27 = vpop.f32.mrb[51].mxu0 }
 0x214   : > { %2094 = vst.msk [vmem:[#allocation2 + $0x129] sm:$0xff] %vm253_vm0, %v2062_v16  ;;  %v2362_v24 = vpop.permute.xlu1 %2361  ;;  %v1871_v5 = vadd.f32 %v8863_v59, %v10332_v19  ;;  %v8866_v47 = vadd.f32 %v8865_v27, %v8864_v17  ;;  %v3063_v28 = vld [vmem:[#allocation3] sm:$0xff] }
 0x215   : > { %2408 = vst.msk [vmem:[#allocation3 + $0x18] sm:$0xff] %vm680_vm4, %v2362_v24  ;;  %2953 = vrot.lane.b32.xlu0 %v2912_v7, %s9584_s15 }
 0x216   : > { %2253 = vrot.lane.b32.xlu1 %v2912_v7, %s9582_s13  ;;  %v1930_v8 = vmul.f32 %v10546_v23, %v1871_v5  ;;  %v1874_v63 = vadd.f32 %v8866_v47, %v10344_v37 }
 0x217   : > { %v2808_v32 = vpop.permute.xlu0 %2807 }
 0x218   : > { %v2490_v26 = vpop.permute.xlu1 %2489  ;;  %v1967_v6 = vadd.f32 %v10553_v29, %v1930_v8  ;;  %v1931_v21 = vmul.f32 %v10546_v23, %v1874_v63  ;;  %2855 = vst.msk [vmem:[#allocation3 + $0x8] sm:$0xff] %vm680_vm4, %v2808_v32 }
 0x219   : > { %2536 = vst.msk [vmem:[#allocation3 + $0x18] sm:$0xff] %vm809_vm5, %v2490_v26  ;;  %2699 = vrot.lane.b32.xlu0 %v3040_v10, %s9582_s13  ;;  %v2763_v42 = vld [vmem:[#allocation2 + $0x120] sm:$0xff] }
 0x21a   : > { %v3092_v19 = vld [vmem:[#allocation3 + $0xe8] sm:$0xff]  ;;  %2381 = vrot.lane.b32.xlu1 %v3040_v10, %s9583_s14  ;;  %v2891_v58 = vld [vmem:[#allocation2 + $0x121] sm:$0xff]  ;;  %vm1999_vm6 = vcmp.gt.f32.partialorder %v1967_v6, 0.0  ;;  %v2031_v48 = vmul.f32 0.01, %v1967_v6  ;;  %v1968_v37 = vadd.f32 %v10553_v29, %v1931_v21 }
 0x21b   : > { %9368 = vmatmul.mubr.msk.bf16.gmra.mrb[80].mxu0 %vm253_vm0, %v3092_v19  ;;  %v2764_v31 = vld [vmem:[#allocation2 + $0x128] sm:$0xff]  ;;  %v2936_v41 = vpop.permute.xlu0 %2935 }
 0x21c   : > { %v2892_v50 = vld [vmem:[#allocation2 + $0x129] sm:$0xff]  ;;  %v2236_v40 = vpop.permute.xlu1 %2235  ;;  %v2785_v11 = vpack.c.bf16 %v2764_v31, %v2763_v42  ;;  %v2063_v49 = vsel %vm1999_vm6, %v1967_v6, %v2031_v48  ;;  %vm2000_vm7 = vcmp.gt.f32.partialorder %v1968_v37, 0.0  ;;  %v2032_v20 = vmul.f32 0.01, %v1968_v37  ;;  %2983 = vst.msk [vmem:[#allocation3 + $0x8] sm:$0xff] %vm809_vm5, %v2936_v41  ;;  %v8867_v51 = vpop.f32.mrb[52].mxu0 }
 0x21d   : > { %v3019_v35 = vld [vmem:[#allocation2 + $0x122] sm:$0xff]  ;;  %v2913_v43 = vpack.c.bf16 %v2892_v50, %v2891_v58  ;;  %v3020_v56 = vld [vmem:[#allocation2 + $0x12a] sm:$0xff]  ;;  %2281 = vst.msk [vmem:[#allocation3 + $0x30] sm:$0xff] %vm551_vm3, %v2236_v40  ;;  %v8868_v12 = vpop.f32.mrb[53].mxu0 }
 0x21e   : > { %v3041_v45 = vpack.c.bf16 %v3020_v56, %v3019_v35  ;;  %2095 = vst.msk [vmem:[#allocation2 + $0x139] sm:$0xff] %vm253_vm0, %v2063_v49  ;;  %2827 = vrot.lane.b32.xlu0 %v2785_v11, %s9583_s14  ;;  %2509 = vrot.lane.b32.xlu1 %v2785_v11, %s9584_s15  ;;  %2163 = vst.msk [vmem:[#allocation3 + $0x120] sm:$0xff] %vm253_vm0, %v2785_v11  ;;  %v2064_v15 = vsel %vm2000_vm7, %v1968_v37, %v2032_v20  ;;  %v8870_v0 = vpop.f32.mrb[54].mxu0 }
 0x21f   : > { %2610 = vst.msk [vmem:[#allocation3 + $0x110] sm:$0xff] %vm253_vm0, %v2913_v43  ;;  %v8869_v54 = vadd.f32 %v8868_v12, %v8867_v51  ;;  %2096 = vst.msk [vmem:[#allocation2 + $0x141] sm:$0xff] %vm253_vm0, %v2064_v15  ;;  %v8871_v34 = vpop.f32.mrb[55].mxu0  ;;  %v2682_v60 = vpop.permute.xlu0 %2681 }
 0x220   : > { %3057 = vst.msk [vmem:[#allocation3 + $0x100] sm:$0xff] %vm253_vm0, %v3041_v45  ;;  %v8872_v38 = vadd.f32 %v8871_v34, %v8870_v0  ;;  %v2364_v52 = vpop.permute.xlu1 %2363  ;;  %v3066_v40 = vld [vmem:[#allocation3 + $0x18] sm:$0xff] }
 0x221   : > { %v1879_v62 = vadd.f32 %v10328_v18, %v8869_v54  ;;  %2728 = vst.msk [vmem:[#allocation3 + $0x20] sm:$0xff] %vm551_vm3, %v2682_v60 }
 0x222   : > { %2409 = vst.msk [vmem:[#allocation3 + $0x30] sm:$0xff] %vm680_vm4, %v2364_v52  ;;  %2955 = vrot.lane.b32.xlu0 %v2913_v43, %s9584_s15  ;;  %2255 = vrot.lane.b32.xlu1 %v2913_v43, %s9582_s13  ;;  %v1882_v1 = vadd.f32 %v10340_v33, %v8872_v38 }
 0x223   : > { %v1932_v30 = vmul.f32 %v10546_v23, %v1879_v62  ;;  %v2810_v2 = vpop.permute.xlu0 %2809  ;;  %v3064_v39 = vld [vmem:[#allocation3 + $0x8] sm:$0xff] }
 0x224   : > { %v1933_v18 = vmul.f32 %v10546_v23, %v1882_v1  ;;  %2856 = vst.msk [vmem:[#allocation3 + $0x20] sm:$0xff] %vm680_vm4, %v2810_v2  ;;  %v2492_v57 = vpop.permute.xlu1 %2491  ;;  %3336 = vmatprep.mubr.bf16.mxu1 %v3064_v39 }
 0x225   : > { %v1969_v36 = vadd.f32 %v10553_v29, %v1932_v30  ;;  %2537 = vst.msk [vmem:[#allocation3 + $0x30] sm:$0xff] %vm809_vm5, %v2492_v57  ;;  %3337 = vmatmul.mubr.bf16.vlgmr.msra.gmra.mrb[32].mxu1 %v3063_v28  ;;  %v2765_v4 = vld [vmem:[#allocation2 + $0x138] sm:$0xff] }
 0x226   : > { %2701 = vrot.lane.b32.xlu0 %v3041_v45, %s9582_s13  ;;  %v2893_v7 = vld [vmem:[#allocation2 + $0x139] sm:$0xff]  ;;  %v1970_v44 = vadd.f32 %v10553_v29, %v1933_v18  ;;  %2383 = vrot.lane.b32.xlu1 %v3041_v45, %s9583_s14  ;;  %v2894_v53 = vld [vmem:[#allocation2 + $0x141] sm:$0xff] }
 0x227   : > { %v3095_v3 = vld [vmem:[#allocation3 + $0x100] sm:$0xff]  ;;  %vm2001_vm8 = vcmp.gt.f32.partialorder %v1969_v36, 0.0  ;;  %v2033_v33 = vmul.f32 0.01, %v1969_v36  ;;  %v2766_v25 = vld [vmem:[#allocation2 + $0x140] sm:$0xff]  ;;  %v2938_v10 = vpop.permute.xlu0 %2937  ;;  %v2914_v16 = vpack.c.bf16 %v2894_v53, %v2893_v7 }
 0x228   : > { %9371 = vmatprep.mubr.msk.bf16.mxu0 %vm253_vm0, %v3095_v3  ;;  %v3021_v61 = vld [vmem:[#allocation2 + $0x13a] sm:$0xff]  ;;  %v2786_v14 = vpack.c.bf16 %v2766_v25, %v2765_v4  ;;  %v3022_v59 = vld [vmem:[#allocation2 + $0x142] sm:$0xff]  ;;  %vm2002_vm9 = vcmp.gt.f32.partialorder %v1970_v44, 0.0  ;;  %v2034_v24 = vmul.f32 0.01, %v1970_v44  ;;  %2984 = vst.msk [vmem:[#allocation3 + $0x20] sm:$0xff] %vm809_vm5, %v2938_v10  ;;  %v2238_v27 = vpop.permute.xlu1 %2237 }
 0x229   : > { %v2065_v17 = vsel %vm2001_vm8, %v1969_v36, %v2033_v33  ;;  %v8873_v5 = vpop.f32.mrb[56].mxu0  ;;  %v3042_v47 = vpack.c.bf16 %v3022_v59, %v3021_v61  ;;  %2282 = vst.msk [vmem:[#allocation3 + $0x48] sm:$0xff] %vm551_vm3, %v2238_v27 }
 0x22a   : > { %2097 = vst.msk [vmem:[#allocation2 + $0x151] sm:$0xff] %vm253_vm0, %v2065_v17  ;;  %v8874_v8 = vpop.f32.mrb[57].mxu0  ;;  %2829 = vrot.lane.b32.xlu0 %v2786_v14, %s9583_s14  ;;  %2164 = vst.msk [vmem:[#allocation3 + $0x138] sm:$0xff] %vm253_vm0, %v2786_v14  ;;  %v2066_v63 = vsel %vm2002_vm9, %v1970_v44, %v2034_v24  ;;  %2511 = vrot.lane.b32.xlu1 %v2786_v14, %s9584_s15 }
 0x22b   : > { %2611 = vst.msk [vmem:[#allocation3 + $0x128] sm:$0xff] %vm253_vm0, %v2914_v16  ;;  %v8875_v32 = vadd.f32 %v8874_v8, %v8873_v5  ;;  %v8876_v26 = vpop.f32.mrb[58].mxu0  ;;  %3058 = vst.msk [vmem:[#allocation3 + $0x118] sm:$0xff] %vm253_vm0, %v3042_v47  ;;  %v2684_v21 = vpop.permute.xlu0 %2683 }
 0x22c   : > { %2098 = vst.msk [vmem:[#allocation2 + $0x159] sm:$0xff] %vm253_vm0, %v2066_v63  ;;  %v8877_v6 = vpop.f32.mrb[59].mxu0  ;;  %v2366_v58 = vpop.permute.xlu1 %2365  ;;  %v3069_v61 = vld [vmem:[#allocation3 + $0x30] sm:$0xff] }
 0x22d   : > { %v1887_v19 = vadd.f32 %v8875_v32, %v10393_v22  ;;  %v8878_v42 = vadd.f32 %v8877_v6, %v8876_v26  ;;  %2729 = vst.msk [vmem:[#allocation3 + $0x38] sm:$0xff] %vm551_vm3, %v2684_v21 }
 0x22e   : > { %2410 = vst.msk [vmem:[#allocation3 + $0x48] sm:$0xff] %vm680_vm4, %v2366_v58  ;;  %2957 = vrot.lane.b32.xlu0 %v2914_v16, %s9584_s15  ;;  %2257 = vrot.lane.b32.xlu1 %v2914_v16, %s9582_s13 }
 0x22f   : > { %v1934_v48 = vmul.f32 %v10546_v23, %v1887_v19  ;;  %v1890_v37 = vadd.f32 %v8878_v42, %v10399_v55  ;;  %v2812_v31 = vpop.permute.xlu0 %2811  ;;  %v3067_v50 = vld [vmem:[#allocation3 + $0x20] sm:$0xff] }
 0x230   : > { %2857 = vst.msk [vmem:[#allocation3 + $0x38] sm:$0xff] %vm680_vm4, %v2812_v31  ;;  %v2494_v41 = vpop.permute.xlu1 %2493  ;;  %3344 = vmatprep.mubr.bf16.mxu1 %v3067_v50 }
 0x231   : > { %v1971_v35 = vadd.f32 %v10553_v29, %v1934_v48  ;;  %v1935_v22 = vmul.f32 %v10546_v23, %v1890_v37  ;;  %2538 = vst.msk [vmem:[#allocation3 + $0x48] sm:$0xff] %vm809_vm5, %v2494_v41  ;;  %3345 = vmatmul.mubr.bf16.gmra.mrb[36].mxu1 %v3066_v40  ;;  %v2767_v55 = vld [vmem:[#allocation2 + $0x150] sm:$0xff] }
 0x232   : > { %v3098_v11 = vld [vmem:[#allocation3 + $0x118] sm:$0xff]  ;;  %2703 = vrot.lane.b32.xlu0 %v3042_v47, %s9582_s13  ;;  %v2895_v43 = vld [vmem:[#allocation2 + $0x151] sm:$0xff]  ;;  %2385 = vrot.lane.b32.xlu1 %v3042_v47, %s9583_s14 }
 0x233   : > { %vm2003_vm10 = vcmp.gt.f32.partialorder %v1971_v35, 0.0  ;;  %v2035_v56 = vmul.f32 0.01, %v1971_v35  ;;  %v1972_v49 = vadd.f32 %v10553_v29, %v1935_v22  ;;  %9372 = vmatmul.mubr.msk.bf16.gmra.mrb[84].mxu0 %vm253_vm0, %v3098_v11  ;;  %v2768_v20 = vld [vmem:[#allocation2 + $0x158] sm:$0xff]  ;;  %v2940_v12 = vpop.permute.xlu0 %2939 }
 0x234   : > { %v2896_v51 = vld [vmem:[#allocation2 + $0x159] sm:$0xff]  ;;  %v2787_v15 = vpack.c.bf16 %v2768_v20, %v2767_v55  ;;  %2985 = vst.msk [vmem:[#allocation3 + $0x38] sm:$0xff] %vm809_vm5, %v2940_v12  ;;  %v2240_v62 = vpop.permute.xlu1 %2239  ;;  %v8879_v38 = vpop.f32.mrb[60].mxu0 }
 0x235   : > { %v3023_v45 = vld [vmem:[#allocation2 + $0x152] sm:$0xff]  ;;  %v2915_v54 = vpack.c.bf16 %v2896_v51, %v2895_v43  ;;  %v3024_v0 = vld [vmem:[#allocation2 + $0x15a] sm:$0xff]  ;;  %v2067_v34 = vsel %vm2003_vm10, %v1971_v35, %v2035_v56  ;;  %vm2004_vm11 = vcmp.gt.f32.partialorder %v1972_v49, 0.0  ;;  %v2036_v60 = vmul.f32 0.01, %v1972_v49  ;;  %2283 = vst.msk [vmem:[#allocation3 + $0x60] sm:$0xff] %vm551_vm3, %v2240_v62 }
 0x236   : > { %v3043_v52 = vpack.c.bf16 %v3024_v0, %v3023_v45  ;;  %2099 = vst.msk [vmem:[#allocation2 + $0x169] sm:$0xff] %vm253_vm0, %v2067_v34  ;;  %v8880_v30 = vpop.f32.mrb[61].mxu0  ;;  %2831 = vrot.lane.b32.xlu0 %v2787_v15, %s9583_s14  ;;  %2165 = vst.msk [vmem:[#allocation3 + $0x150] sm:$0xff] %vm253_vm0, %v2787_v15  ;;  %2513 = vrot.lane.b32.xlu1 %v2787_v15, %s9584_s15  ;;  %v4754_v51 = vld [vmem:[#allocation2 + $0x19a] sm:$0xff]  ;;  %v4755_v45 = vld [vmem:[#allocation2 + $0x1a2] sm:$0xff] }
 0x237   : > { %2612 = vst.msk [vmem:[#allocation3 + $0x140] sm:$0xff] %vm253_vm0, %v2915_v54  ;;  %v2068_v1 = vsel %vm2004_vm11, %v1972_v49, %v2036_v60  ;;  %v8881_v2 = vadd.f32 %v8880_v30, %v8879_v38  ;;  %v8882_v39 = vpop.f32.mrb[62].mxu0  ;;  %v2686_v18 = vpop.permute.xlu0 %2685  ;;  %v4771_v12 = vpack.c.bf16 %v4755_v45, %v4754_v51  ;;  %v3110_v15 = vld [vmem:[#allocation3 + $0x178] sm:$0xff]  ;;  %v2901_v34 = vld [vmem:[#allocation2 + $0x199] sm:$0xff] }
 0x238   : > { %3059 = vst.msk [vmem:[#allocation3 + $0x130] sm:$0xff] %vm253_vm0, %v3043_v52  ;;  %2100 = vst.msk [vmem:[#allocation2 + $0x171] sm:$0xff] %vm253_vm0, %v2068_v1  ;;  %v8883_v36 = vpop.f32.mrb[63].mxu0  ;;  %v2368_v3 = vpop.permute.xlu1 %2367  ;;  %v3072_v37 = vld [vmem:[#allocation3 + $0x48] sm:$0xff]  ;;  %v2902_v60 = vld [vmem:[#allocation2 + $0x1a1] sm:$0xff] }
 0x239   : > { %v1895_v57 = vadd.f32 %v10389_v9, %v8881_v2  ;;  %v8884_v28 = vadd.f32 %v8883_v36, %v8882_v39  ;;  %2730 = vst.msk [vmem:[#allocation3 + $0x50] sm:$0xff] %vm551_vm3, %v2686_v18  ;;  %v2918_v2 = vpack.c.bf16 %v2902_v60, %v2901_v34 }
 0x23a   : > { %2411 = vst.msk [vmem:[#allocation3 + $0x60] sm:$0xff] %vm680_vm4, %v2368_v3  ;;  %2959 = vrot.lane.b32.xlu0 %v2915_v54, %s9584_s15  ;;  %2259 = vrot.lane.b32.xlu1 %v2915_v54, %s9582_s13 }
 0x23b   : > { %v1936_v4 = vmul.f32 %v10546_v23, %v1895_v57  ;;  %v1898_v7 = vadd.f32 %v10395_v13, %v8884_v28  ;;  %v2814_v33 = vpop.permute.xlu0 %2813  ;;  %v3070_v44 = vld [vmem:[#allocation3 + $0x38] sm:$0xff]  ;;  %4787 = vst.msk [vmem:[#allocation3 + $0x178] sm:$0xff] %vm253_vm0, %v4771_v12 }
 0x23c   : > { %2858 = vst.msk [vmem:[#allocation3 + $0x50] sm:$0xff] %vm680_vm4, %v2814_v33  ;;  %v2496_v53 = vpop.permute.xlu1 %2495  ;;  %3352 = vmatprep.mubr.bf16.mxu1 %v3070_v44 }
 0x23d   : > { %v1973_v25 = vadd.f32 %v10553_v29, %v1936_v4  ;;  %v1937_v9 = vmul.f32 %v10546_v23, %v1898_v7  ;;  %2539 = vst.msk [vmem:[#allocation3 + $0x60] sm:$0xff] %vm809_vm5, %v2496_v53  ;;  %3353 = vmatmul.mubr.bf16.gmra.mrb[40].mxu1 %v3069_v61  ;;  %v2769_v13 = vld [vmem:[#allocation2 + $0x168] sm:$0xff] }
 0x23e   : > { %2705 = vrot.lane.b32.xlu0 %v3043_v52, %s9582_s13  ;;  %v2897_v14 = vld [vmem:[#allocation2 + $0x169] sm:$0xff]  ;;  %2387 = vrot.lane.b32.xlu1 %v3043_v52, %s9583_s14 }
 0x23f   : > { %v3101_v10 = vld [vmem:[#allocation3 + $0x130] sm:$0xff]  ;;  %vm2005_vm12 = vcmp.gt.f32.partialorder %v1973_v25, 0.0  ;;  %v2037_v16 = vmul.f32 0.01, %v1973_v25  ;;  %v1974_v59 = vadd.f32 %v10553_v29, %v1937_v9  ;;  %v2770_v23 = vld [vmem:[#allocation2 + $0x170] sm:$0xff]  ;;  %v2942_v27 = vpop.permute.xlu0 %2941 }
 0x240   : > { %9375 = vmatprep.mubr.msk.bf16.mxu0 %vm253_vm0, %v3101_v10  ;;  %v2898_v17 = vld [vmem:[#allocation2 + $0x171] sm:$0xff]  ;;  %v2788_v5 = vpack.c.bf16 %v2770_v23, %v2769_v13  ;;  %2986 = vst.msk [vmem:[#allocation3 + $0x50] sm:$0xff] %vm809_vm5, %v2942_v27  ;;  %v2242_v26 = vpop.permute.xlu1 %2241 }
 0x241   : > { %v3025_v24 = vld [vmem:[#allocation2 + $0x16a] sm:$0xff]  ;;  %v2916_v47 = vpack.c.bf16 %v2898_v17, %v2897_v14  ;;  %v3026_v8 = vld [vmem:[#allocation2 + $0x172] sm:$0xff]  ;;  %v2069_v63 = vsel %vm2005_vm12, %v1973_v25, %v2037_v16  ;;  %vm2006_vm13 = vcmp.gt.f32.partialorder %v1974_v59, 0.0  ;;  %v2038_v32 = vmul.f32 0.01, %v1974_v59  ;;  %2284 = vst.msk [vmem:[#allocation3 + $0x78] sm:$0xff] %vm551_vm3, %v2242_v26 }
 0x242   : > { %v3044_v6 = vpack.c.bf16 %v3026_v8, %v3025_v24  ;;  %2101 = vst.msk [vmem:[#allocation2 + $0x181] sm:$0xff] %vm253_vm0, %v2069_v63  ;;  %2833 = vrot.lane.b32.xlu0 %v2788_v5, %s9583_s14  ;;  %2166 = vst.msk [vmem:[#allocation3 + $0x168] sm:$0xff] %vm253_vm0, %v2788_v5  ;;  %2515 = vrot.lane.b32.xlu1 %v2788_v5, %s9584_s15 }
 0x243   : > { %2613 = vst.msk [vmem:[#allocation3 + $0x158] sm:$0xff] %vm253_vm0, %v2916_v47  ;;  %v2070_v29 = vsel %vm2006_vm13, %v1974_v59, %v2038_v32  ;;  %v2688_v21 = vpop.permute.xlu0 %2687 }
 0x244   : > { %3060 = vst.msk [vmem:[#allocation3 + $0x148] sm:$0xff] %vm253_vm0, %v3044_v6  ;;  %2102 = vst.msk [vmem:[#allocation2 + $0x189] sm:$0xff] %vm253_vm0, %v2070_v29  ;;  %v2370_v19 = vpop.permute.xlu1 %2369  ;;  %v3075_v30 = vld [vmem:[#allocation3 + $0x60] sm:$0xff] }
 0x245   : > { %2731 = vst.msk [vmem:[#allocation3 + $0x68] sm:$0xff] %vm551_vm3, %v2688_v21 }
 0x246   : > { %2412 = vst.msk [vmem:[#allocation3 + $0x78] sm:$0xff] %vm680_vm4, %v2370_v19  ;;  %2961 = vrot.lane.b32.xlu0 %v2916_v47, %s9584_s15  ;;  %2261 = vrot.lane.b32.xlu1 %v2916_v47, %s9582_s13 }
 0x247   : > { %v2816_v42 = vpop.permute.xlu0 %2815  ;;  %v3073_v58 = vld [vmem:[#allocation3 + $0x50] sm:$0xff] }
 0x248   : > { %2859 = vst.msk [vmem:[#allocation3 + $0x68] sm:$0xff] %vm680_vm4, %v2816_v42  ;;  %v2498_v48 = vpop.permute.xlu1 %2497  ;;  %3360 = vmatprep.mubr.bf16.mxu1 %v3073_v58  ;;  %v3892_v58 = vld [vmem:[#allocation2 + $0x1] sm:$0xff] }
 0x249   : > { %2540 = vst.msk [vmem:[#allocation3 + $0x78] sm:$0xff] %vm809_vm5, %v2498_v48  ;;  %3361 = vmatmul.mubr.bf16.gmra.mrb[44].mxu1 %v3072_v37  ;;  %v2771_v50 = vld [vmem:[#allocation2 + $0x180] sm:$0xff]  ;;  %v3893_v48 = vld [vmem:[#allocation2 + $0x9] sm:$0xff] }
 0x24a   : > { %2707 = vrot.lane.b32.xlu0 %v3044_v6, %s9582_s13  ;;  %v2899_v35 = vld [vmem:[#allocation2 + $0x181] sm:$0xff]  ;;  %2389 = vrot.lane.b32.xlu1 %v3044_v6, %s9583_s14  ;;  %v3924_v37 = vpack.c.bf16 %v3893_v48, %v3892_v58 }
 0x24b   : > { %v3104_v31 = vld [vmem:[#allocation3 + $0x148] sm:$0xff]  ;;  %v2772_v22 = vld [vmem:[#allocation2 + $0x188] sm:$0xff]  ;;  %v2944_v11 = vpop.permute.xlu0 %2943 }
 0x24c   : > { %9376 = vmatmul.mubr.msk.bf16.gmra.mrb[88].mxu0 %vm253_vm0, %v3104_v31  ;;  %v2900_v41 = vld [vmem:[#allocation2 + $0x189] sm:$0xff]  ;;  %v2789_v55 = vpack.c.bf16 %v2772_v22, %v2771_v50  ;;  %2987 = vst.msk [vmem:[#allocation3 + $0x68] sm:$0xff] %vm809_vm5, %v2944_v11  ;;  %v2244_v49 = vpop.permute.xlu1 %2243  ;;  %v4499_v22 = vld [vmem:[#allocation2 + $0x1a0] sm:$0xff] }
 0x24d   : > { %v3027_v40 = vld [vmem:[#allocation2 + $0x182] sm:$0xff]  ;;  %v2917_v43 = vpack.c.bf16 %v2900_v41, %v2899_v35  ;;  %v3028_v56 = vld [vmem:[#allocation2 + $0x18a] sm:$0xff]  ;;  %2285 = vst.msk [vmem:[#allocation3 + $0x90] sm:$0xff] %vm551_vm3, %v2244_v49  ;;  %v4498_v35 = vld [vmem:[#allocation2 + $0x198] sm:$0xff] }
 0x24e   : > { %v3045_v20 = vpack.c.bf16 %v3028_v56, %v3027_v40  ;;  %2835 = vrot.lane.b32.xlu0 %v2789_v55, %s9583_s14  ;;  %2517 = vrot.lane.b32.xlu1 %v2789_v55, %s9584_s15  ;;  %v4515_v40 = vpack.c.bf16 %v4499_v22, %v4498_v35  ;;  %v4020_v11 = vld [vmem:[#allocation2 + $0x2] sm:$0xff]  ;;  %v4021_v55 = vld [vmem:[#allocation2 + $0xa] sm:$0xff] }
 0x24f   : > { %2614 = vst.msk [vmem:[#allocation3 + $0x170] sm:$0xff] %vm253_vm0, %v2917_v43  ;;  %v2690_v54 = vpop.permute.xlu0 %2689  ;;  %v4052_v56 = vpack.c.bf16 %v4021_v55, %v4020_v11  ;;  %v9526_v48 = vld [vmem:[%s12287_s1 + $0x168] sm:$0xff]  }
 0x250   : > { %3061 = vst.msk [vmem:[#allocation3 + $0x160] sm:$0xff] %vm253_vm0, %v3045_v20  ;;  %v2372_v0 = vpop.permute.xlu1 %2371  ;;  %v3078_v7 = vld [vmem:[#allocation3 + $0x78] sm:$0xff] }
 0x251   : > { %2732 = vst.msk [vmem:[#allocation3 + $0x80] sm:$0xff] %vm551_vm3, %v2690_v54 }
 0x252   : > { %2413 = vst.msk [vmem:[#allocation3 + $0x90] sm:$0xff] %vm680_vm4, %v2372_v0  ;;  %2963 = vrot.lane.b32.xlu0 %v2917_v43, %s9584_s15  ;;  %3956 = vrot.lane.b32.xlu1 %v3924_v37, %s9582_s13  ;;  %v9527_v37 = vld [vmem:[%s12287_s1 + $0x128] sm:$0xff]  }
 0x253   : > { %v2818_v62 = vpop.permute.xlu0 %2817  ;;  %v3076_v38 = vld [vmem:[#allocation3 + $0x68] sm:$0xff] }
 0x254   : > { %2860 = vst.msk [vmem:[#allocation3 + $0x80] sm:$0xff] %vm680_vm4, %v2818_v62  ;;  %v2500_v52 = vpop.permute.xlu1 %2499  ;;  %3368 = vmatprep.mubr.bf16.mxu1 %v3076_v38 }
 0x255   : > { %2541 = vst.msk [vmem:[#allocation3 + $0x90] sm:$0xff] %vm809_vm5, %v2500_v52  ;;  %3369 = vmatmul.mubr.bf16.gmra.mrb[48].mxu1 %v3075_v30 }
 0x256   : > { %2709 = vrot.lane.b32.xlu0 %v3045_v20, %s9582_s13  ;;  %4084 = vrot.lane.b32.xlu1 %v4052_v56, %s9583_s14 }
 0x257   : > { %v3107_v1 = vld [vmem:[#allocation3 + $0x160] sm:$0xff]  ;;  %v2946_v39 = vpop.permute.xlu0 %2945 }
 0x258   : > { %9379 = vmatprep.mubr.msk.bf16.mxu0 %vm253_vm0, %v3107_v1  ;;  %2988 = vst.msk [vmem:[#allocation3 + $0x80] sm:$0xff] %vm809_vm5, %v2946_v39  ;;  %v2246_v36 = vpop.permute.xlu1 %2245 }
 0x259   : > { %9380 = vmatmul.mubr.msk.bf16.gmra.mrb[92].mxu0 %vm253_vm0, %v3110_v15  ;;  %2286 = vst.msk [vmem:[#allocation3 + $0xa8] sm:$0xff] %vm551_vm3, %v2246_v36 }
 0x25a   : > { %2965 = vrot.lane.b32.xlu0 %v2918_v2, %s9584_s15 }
 0x25b   : > { %v2692_v18 = vpop.permute.xlu0 %2691 }
 0x25c   : > { %2733 = vst.msk [vmem:[#allocation3 + $0x98] sm:$0xff] %vm551_vm3, %v2692_v18  ;;  %v2374_v57 = vpop.permute.xlu1 %2373  ;;  %v3081_v13 = vld [vmem:[#allocation3 + $0x90] sm:$0xff] }
 0x25d   : > { %2414 = vst.msk [vmem:[#allocation3 + $0xa8] sm:$0xff] %vm680_vm4, %v2374_v57 }
 0x25e   : > { %4562 = vrot.lane.b32.xlu0 %v4515_v40, %s9583_s14 }
 0x25f   : > { %v2820_v28 = vpop.permute.xlu0 %2819  ;;  %v3079_v3 = vld [vmem:[#allocation3 + $0x80] sm:$0xff] }
 0x260   : > { %2861 = vst.msk [vmem:[#allocation3 + $0x98] sm:$0xff] %vm680_vm4, %v2820_v28  ;;  %v2502_v4 = vpop.permute.xlu1 %2501  ;;  %3376 = vmatprep.mubr.bf16.mxu1 %v3079_v3 }
 0x261   : > { %2542 = vst.msk [vmem:[#allocation3 + $0xa8] sm:$0xff] %vm809_vm5, %v2502_v4  ;;  %3377 = vmatmul.mubr.bf16.gmra.mrb[52].mxu1 %v3078_v7 }
 0x263   : > { %v2948_v33 = vpop.permute.xlu0 %2947 }
 0x264   : > { %2989 = vst.msk [vmem:[#allocation3 + $0x98] sm:$0xff] %vm809_vm5, %v2948_v33  ;;  %v2248_v44 = vpop.permute.xlu1 %2247 }
 0x265   : > { %2287 = vst.msk [vmem:[#allocation3 + $0xc0] sm:$0xff] %vm551_vm3, %v2248_v44 }
 0x267   : > { %v2694_v25 = vpop.permute.xlu0 %2693 }
 0x268   : > { %2734 = vst.msk [vmem:[#allocation3 + $0xb0] sm:$0xff] %vm551_vm3, %v2694_v25  ;;  %v2376_v9 = vpop.permute.xlu1 %2375  ;;  %v3084_v5 = vld [vmem:[#allocation3 + $0xa8] sm:$0xff]  ;;  %v10755_v25 = vld [vmem:[%s12287_s1 + $0x1a0] sm:$0xff]  }
 0x269   : > { %2415 = vst.msk [vmem:[#allocation3 + $0xc0] sm:$0xff] %vm680_vm4, %v2376_v9  ;;  %9383 = vmatprep.subr.bf16.mxu0 %v10755_v25 }
 0x26a   : > { %9384 = vmatpush3.bf16.msra.mxu0 %v10755_v25 }
 0x26b   : > { %v2822_v53 = vpop.permute.xlu0 %2821  ;;  %v3082_v61 = vld [vmem:[#allocation3 + $0x98] sm:$0xff] }
 0x26c   : > { %2862 = vst.msk [vmem:[#allocation3 + $0xb0] sm:$0xff] %vm680_vm4, %v2822_v53  ;;  %v2504_v10 = vpop.permute.xlu1 %2503  ;;  %3384 = vmatprep.mubr.bf16.mxu1 %v3082_v61  ;;  %v9523_v61 = vld [vmem:[%s12287_s1 + $0x1a8] sm:$0xff]  }
 0x26d   : > { %2543 = vst.msk [vmem:[#allocation3 + $0xc0] sm:$0xff] %vm809_vm5, %v2504_v10  ;;  %3385 = vmatmul.mubr.bf16.gmra.mrb[56].mxu1 %v3081_v13  ;;  %9385 = vmatprep.subr.bf16.mxu0 %v9523_v61 }
 0x26e   : > { %9386 = vmatpush3.bf16.msra.mxu0 %v9523_v61 }
 0x26f   : > { %v2950_v14 = vpop.permute.xlu0 %2949 }
 0x270   : > { %2990 = vst.msk [vmem:[#allocation3 + $0xb0] sm:$0xff] %vm809_vm5, %v2950_v14  ;;  %v2250_v16 = vpop.permute.xlu1 %2249 }
 0x271   : > { %2288 = vst.msk [vmem:[#allocation3 + $0xd8] sm:$0xff] %vm551_vm3, %v2250_v16 }
 0x273   : > { %v2696_v59 = vpop.permute.xlu0 %2695 }
 0x274   : > { %2735 = vst.msk [vmem:[#allocation3 + $0xc8] sm:$0xff] %vm551_vm3, %v2696_v59  ;;  %v2378_v23 = vpop.permute.xlu1 %2377  ;;  %v3087_v21 = vld [vmem:[#allocation3 + $0xc0] sm:$0xff] }
 0x275   : > { %2416 = vst.msk [vmem:[#allocation3 + $0xd8] sm:$0xff] %vm680_vm4, %v2378_v23 }
 0x277   : > { %v2824_v17 = vpop.permute.xlu0 %2823  ;;  %v3085_v24 = vld [vmem:[#allocation3 + $0xb0] sm:$0xff] }
 0x278   : > { %2863 = vst.msk [vmem:[#allocation3 + $0xc8] sm:$0xff] %vm680_vm4, %v2824_v17  ;;  %v2506_v27 = vpop.permute.xlu1 %2505  ;;  %3392 = vmatprep.mubr.bf16.mxu1 %v3085_v24  ;;  %v9524_v24 = vld [vmem:[%s12287_s1 + $0x160] sm:$0xff]  }
 0x279   : > { %2544 = vst.msk [vmem:[#allocation3 + $0xd8] sm:$0xff] %vm809_vm5, %v2506_v27  ;;  %3393 = vmatmul.mubr.bf16.gmra.mrb[60].mxu1 %v3084_v5  ;;  %v9525_v27 = vld [vmem:[%s12287_s1 + $0x120] sm:$0xff]   ;;  %9033 = vmatprep.subr.bf16.mxu1 %v9524_v24 }
 0x27a   : > { %9034 = vmatpush3.bf16.msra.mxu1 %v9525_v27 }
 0x27b   : > { %v2952_v47 = vpop.permute.xlu0 %2951  ;;  %9035 = vmatprep.subr.bf16.mxu1 %v9526_v48 }
 0x27c   : > { %2991 = vst.msk [vmem:[#allocation3 + $0xc8] sm:$0xff] %vm809_vm5, %v2952_v47  ;;  %v2252_v8 = vpop.permute.xlu1 %2251 }
 0x27d   : > { %2289 = vst.msk [vmem:[#allocation3 + $0xf0] sm:$0xff] %vm551_vm3, %v2252_v8 }
 0x27e   : > { %9036 = vmatpush3.bf16.msra.mxu1 %v9527_v37 }
 0x27f   : > { %v2698_v63 = vpop.permute.xlu0 %2697 }
 0x280   : > { %2736 = vst.msk [vmem:[#allocation3 + $0xe0] sm:$0xff] %vm551_vm3, %v2698_v63  ;;  %v2380_v32 = vpop.permute.xlu1 %2379  ;;  %v3090_v15 = vld [vmem:[#allocation3 + $0xd8] sm:$0xff] }
 0x281   : > { %2417 = vst.msk [vmem:[#allocation3 + $0xf0] sm:$0xff] %vm680_vm4, %v2380_v32 }
 0x283   : > { %v2826_v26 = vpop.permute.xlu0 %2825  ;;  %v3088_v6 = vld [vmem:[#allocation3 + $0xc8] sm:$0xff] }
 0x284   : > { %2864 = vst.msk [vmem:[#allocation3 + $0xe0] sm:$0xff] %vm680_vm4, %v2826_v26  ;;  %v2508_v29 = vpop.permute.xlu1 %2507  ;;  %3400 = vmatprep.mubr.bf16.mxu1 %v3088_v6 }
 0x285   : > { %2545 = vst.msk [vmem:[#allocation3 + $0xf0] sm:$0xff] %vm809_vm5, %v2508_v29  ;;  %3401 = vmatmul.mubr.bf16.gmra.mrb[64].mxu1 %v3087_v21 }
 0x287   : > { %v2954_v19 = vpop.permute.xlu0 %2953 }
 0x288   : > { %2992 = vst.msk [vmem:[#allocation3 + $0xe0] sm:$0xff] %vm809_vm5, %v2954_v19  ;;  %v2254_v42 = vpop.permute.xlu1 %2253 }
 0x289   : > { %2290 = vst.msk [vmem:[#allocation3 + $0x108] sm:$0xff] %vm551_vm3, %v2254_v42 }
 0x28b   : > { %v2700_v31 = vpop.permute.xlu0 %2699 }
 0x28c   : > { %2737 = vst.msk [vmem:[#allocation3 + $0xf8] sm:$0xff] %vm551_vm3, %v2700_v31  ;;  %v2382_v50 = vpop.permute.xlu1 %2381  ;;  %v3093_v30 = vld [vmem:[#allocation3 + $0xf0] sm:$0xff] }
 0x28d   : > { %2418 = vst.msk [vmem:[#allocation3 + $0x108] sm:$0xff] %vm680_vm4, %v2382_v50  ;;  %v10720_v41 = vpop.f32.mrb[64].mxu0 }
 0x28e   : > { %v10722_v43 = vpop.f32.mrb[65].mxu0 }
 0x28f   : > { %v10724_v49 = vpop.f32.mrb[66].mxu0  ;;  %v3091_v51 = vld [vmem:[#allocation3 + $0xe0] sm:$0xff] }
 0x290   : > { %v2828_v20 = vpop.permute.xlu0 %2827  ;;  %v10727_v45 = vpop.f32.mrb[67].mxu0  ;;  %3408 = vmatprep.mubr.bf16.mxu1 %v3091_v51 }
 0x291   : > { %2865 = vst.msk [vmem:[#allocation3 + $0xf8] sm:$0xff] %vm680_vm4, %v2828_v20  ;;  %v2510_v12 = vpop.permute.xlu1 %2509  ;;  %3409 = vmatmul.mubr.bf16.gmra.mrb[68].mxu1 %v3090_v15  ;;  %v9530_v15 = vld [vmem:[%s12287_s1 + $0x178] sm:$0xff]  }
 0x292   : > { %2546 = vst.msk [vmem:[#allocation3 + $0x108] sm:$0xff] %vm809_vm5, %v2510_v12  ;;  %v9529_v12 = vld [vmem:[%s12287_s1 + $0x130] sm:$0xff]  }
 0x294   : > { %v2956_v54 = vpop.permute.xlu0 %2955 }
 0x295   : > { %2993 = vst.msk [vmem:[#allocation3 + $0xf8] sm:$0xff] %vm809_vm5, %v2956_v54  ;;  %v2256_v0 = vpop.permute.xlu1 %2255  ;;  %v9531_v54 = vld [vmem:[%s12287_s1 + $0x138] sm:$0xff]  }
 0x296   : > { %2291 = vst.msk [vmem:[#allocation3 + $0x120] sm:$0xff] %vm551_vm3, %v2256_v0 }
 0x298   : > { %v2702_v34 = vpop.permute.xlu0 %2701 }
 0x299   : > { %2738 = vst.msk [vmem:[#allocation3 + $0x110] sm:$0xff] %vm551_vm3, %v2702_v34  ;;  %v2384_v60 = vpop.permute.xlu1 %2383  ;;  %v3096_v44 = vld [vmem:[#allocation3 + $0x108] sm:$0xff] }
 0x29a   : > { %2419 = vst.msk [vmem:[#allocation3 + $0x120] sm:$0xff] %vm680_vm4, %v2384_v60 }
 0x29c   : > { %v2830_v62 = vpop.permute.xlu0 %2829  ;;  %v3094_v38 = vld [vmem:[#allocation3 + $0xf8] sm:$0xff] }
 0x29d   : > { %2866 = vst.msk [vmem:[#allocation3 + $0x110] sm:$0xff] %vm680_vm4, %v2830_v62  ;;  %v2512_v52 = vpop.permute.xlu1 %2511  ;;  %3416 = vmatprep.mubr.bf16.mxu1 %v3094_v38  ;;  %v9532_v38 = vld [vmem:[%s12287_s1 + $0x180] sm:$0xff]  }
 0x29e   : > { %2547 = vst.msk [vmem:[#allocation3 + $0x120] sm:$0xff] %vm809_vm5, %v2512_v52  ;;  %3417 = vmatmul.mubr.bf16.gmra.mrb[72].mxu1 %v3093_v30  ;;  %v9533_v52 = vld [vmem:[%s12287_s1 + $0x140] sm:$0xff]  }
 0x2a0   : > { %v2958_v1 = vpop.permute.xlu0 %2957 }
 0x2a1   : > { %2994 = vst.msk [vmem:[#allocation3 + $0x110] sm:$0xff] %vm809_vm5, %v2958_v1  ;;  %v2258_v2 = vpop.permute.xlu1 %2257 }
 0x2a2   : > { %2292 = vst.msk [vmem:[#allocation3 + $0x138] sm:$0xff] %vm551_vm3, %v2258_v2 }
 0x2a4   : > { %v2704_v39 = vpop.permute.xlu0 %2703 }
 0x2a5   : > { %2739 = vst.msk [vmem:[#allocation3 + $0x128] sm:$0xff] %vm551_vm3, %v2704_v39  ;;  %v2386_v36 = vpop.permute.xlu1 %2385  ;;  %v10742_v18 = vpop.f32.mrb[68].mxu0  ;;  %v3099_v23 = vld [vmem:[#allocation3 + $0x120] sm:$0xff] }
 0x2a6   : > { %2420 = vst.msk [vmem:[#allocation3 + $0x138] sm:$0xff] %vm680_vm4, %v2386_v36  ;;  %v10744_v57 = vpop.f32.mrb[69].mxu0  ;;  %v10836_v36 = vld [vmem:[%s12288_s2 + $0x1] ss:$0 sm:$0xff] }
 0x2a7   : > { %v10746_v28 = vpop.f32.mrb[70].mxu0 }
 0x2a8   : > { %v2832_v3 = vpop.permute.xlu0 %2831  ;;  %v3097_v4 = vld [vmem:[#allocation3 + $0x110] sm:$0xff]  ;;  %v10748_v7 = vpop.f32.mrb[71].mxu0 }
 0x2a9   : > { %2867 = vst.msk [vmem:[#allocation3 + $0x128] sm:$0xff] %vm680_vm4, %v2832_v3  ;;  %v2514_v33 = vpop.permute.xlu1 %2513  ;;  %3424 = vmatprep.mubr.bf16.mxu1 %v3097_v4 }
 0x2aa   : > { %2548 = vst.msk [vmem:[#allocation3 + $0x138] sm:$0xff] %vm809_vm5, %v2514_v33  ;;  %3425 = vmatmul.mubr.bf16.gmra.mrb[76].mxu1 %v3096_v44  ;;  %v10842_v44 = vld [vmem:[%s12289_s3 + $0x1] ss:$0 sm:$0xff] }
 0x2ac   : > { %v2960_v9 = vpop.permute.xlu0 %2959 }
 0x2ad   : > { %2995 = vst.msk [vmem:[#allocation3 + $0x128] sm:$0xff] %vm809_vm5, %v2960_v9  ;;  %v2260_v53 = vpop.permute.xlu1 %2259 }
 0x2ae   : > { %2293 = vst.msk [vmem:[#allocation3 + $0x150] sm:$0xff] %vm551_vm3, %v2260_v53 }
 0x2b0   : > { %v2706_v10 = vpop.permute.xlu0 %2705 }
 0x2b1   : > { %2740 = vst.msk [vmem:[#allocation3 + $0x140] sm:$0xff] %vm551_vm3, %v2706_v10  ;;  %v2388_v13 = vpop.permute.xlu1 %2387  ;;  %v3102_v42 = vld [vmem:[#allocation3 + $0x138] sm:$0xff]  ;;  %v3828_v10 = vld [vmem:[#allocation2] sm:$0xff] }
 0x2b2   : > { %2421 = vst.msk [vmem:[#allocation3 + $0x150] sm:$0xff] %vm680_vm4, %v2388_v13  ;;  %v3829_v13 = vld [vmem:[#allocation2 + $0x8] sm:$0xff] }
 0x2b4   : > { %v2834_v14 = vpop.permute.xlu0 %2833  ;;  %v3100_v16 = vld [vmem:[#allocation3 + $0x128] sm:$0xff] }
 0x2b5   : > { %2868 = vst.msk [vmem:[#allocation3 + $0x140] sm:$0xff] %vm680_vm4, %v2834_v14  ;;  %v2516_v59 = vpop.permute.xlu1 %2515  ;;  %3432 = vmatprep.mubr.bf16.mxu1 %v3100_v16 }
 0x2b6   : > { %2549 = vst.msk [vmem:[#allocation3 + $0x150] sm:$0xff] %vm809_vm5, %v2516_v59  ;;  %3433 = vmatmul.mubr.bf16.gmra.mrb[80].mxu1 %v3099_v23  ;;  %v3860_v59 = vpack.c.bf16 %v3829_v13, %v3828_v10 }
 0x2b8   : > { %v2962_v17 = vpop.permute.xlu0 %2961  ;;  %3876 = vst.msk [vmem:[#allocation3] sm:$0xff] %vm253_vm0, %v3860_v59 }
 0x2b9   : > { %2996 = vst.msk [vmem:[#allocation3 + $0x140] sm:$0xff] %vm809_vm5, %v2962_v17  ;;  %v2262_v5 = vpop.permute.xlu1 %2261 }
 0x2ba   : > { %2294 = vst.msk [vmem:[#allocation3 + $0x168] sm:$0xff] %vm551_vm3, %v2262_v5 }
 0x2bc   : > { %v2708_v47 = vpop.permute.xlu0 %2707 }
 0x2bd   : > { %2741 = vst.msk [vmem:[#allocation3 + $0x158] sm:$0xff] %vm551_vm3, %v2708_v47  ;;  %v2390_v8 = vpop.permute.xlu1 %2389  ;;  %v10778_v63 = vpop.f32.mrb[72].mxu0  ;;  %v3105_v22 = vld [vmem:[#allocation3 + $0x150] sm:$0xff] }
 0x2be   : > { %2422 = vst.msk [vmem:[#allocation3 + $0x168] sm:$0xff] %vm680_vm4, %v2390_v8  ;;  %v10780_v32 = vpop.f32.mrb[73].mxu0 }
 0x2bf   : > { %v10782_v26 = vpop.f32.mrb[74].mxu0 }
 0x2c0   : > { %v2836_v6 = vpop.permute.xlu0 %2835  ;;  %v3103_v29 = vld [vmem:[#allocation3 + $0x140] sm:$0xff]  ;;  %v10784_v21 = vpop.f32.mrb[75].mxu0 }
 0x2c1   : > { %2869 = vst.msk [vmem:[#allocation3 + $0x158] sm:$0xff] %vm680_vm4, %v2836_v6  ;;  %v2518_v19 = vpop.permute.xlu1 %2517  ;;  %3440 = vmatprep.mubr.bf16.mxu1 %v3103_v29 }
 0x2c2   : > { %2550 = vst.msk [vmem:[#allocation3 + $0x168] sm:$0xff] %vm809_vm5, %v2518_v19  ;;  %3441 = vmatmul.mubr.bf16.gmra.mrb[84].mxu1 %v3102_v42 }
 0x2c4   : > { %v2964_v58 = vpop.permute.xlu0 %2963 }
 0x2c5   : > { %2997 = vst.msk [vmem:[#allocation3 + $0x158] sm:$0xff] %vm809_vm5, %v2964_v58  ;;  %v3957_v9 = vpop.permute.xlu1 %3956 }
 0x2c6   : > { %4004 = vst.msk [vmem:[#allocation3] sm:$0xff] %vm551_vm3, %v3957_v9 }
 0x2c8   : > { %v2710_v31 = vpop.permute.xlu0 %2709 }
 0x2c9   : > { %2742 = vst.msk [vmem:[#allocation3 + $0x170] sm:$0xff] %vm551_vm3, %v2710_v31  ;;  %v3108_v11 = vld [vmem:[#allocation3 + $0x168] sm:$0xff]  ;;  %v4085_v17 = vpop.permute.xlu1 %4084 }
 0x2ca   : > { %2870 = vst.msk [vmem:[#allocation3 + $0x170] sm:$0xff] %vm680_vm4, %v10534_v46  ;;  %v9528_v46 = vld [vmem:[%s12287_s1 + $0x170] sm:$0xff]   ;;  %4132 = vst.msk [vmem:[#allocation3] sm:$0xff] %vm680_vm4, %v4085_v17 }
 0x2cb   : > { %9037 = vmatprep.subr.bf16.mxu1 %v9528_v46 }
 0x2cc   : > { %v2966_v50 = vpop.permute.xlu0 %2965  ;;  %v3106_v35 = vld [vmem:[#allocation3 + $0x158] sm:$0xff]  ;;  %9038 = vmatpush3.bf16.msra.mxu1 %v9529_v12 }
 0x2cd   : > { %2998 = vst.msk [vmem:[#allocation3 + $0x170] sm:$0xff] %vm809_vm5, %v2966_v50  ;;  %3448 = vmatprep.mubr.bf16.mxu1 %v3106_v35  ;;  %9039 = vmatprep.subr.bf16.mxu1 %v9530_v15  ;;  %v9534_v50 = vld [vmem:[%s12287_s1 + $0x188] sm:$0xff]  }
 0x2ce   : > { %3449 = vmatmul.mubr.bf16.gmra.mrb[88].mxu1 %v3105_v22  ;;  %v9535_v35 = vld [vmem:[%s12287_s1 + $0x148] sm:$0xff]  }
 0x2d0   : > { %9040 = vmatpush3.bf16.msra.mxu1 %v9531_v54 }
 0x2d1   : > { %9041 = vmatprep.subr.bf16.mxu1 %v9532_v38 }
 0x2d4   : > { %v3109_v40 = vld [vmem:[#allocation3 + $0x170] sm:$0xff]  ;;  %9042 = vmatpush3.bf16.msra.mxu1 %v9533_v52 }
 0x2d5   : > { %3456 = vmatprep.mubr.bf16.mxu1 %v3109_v40  ;;  %v10799_v55 = vpop.f32.mrb[76].mxu0  ;;  %9043 = vmatprep.subr.bf16.mxu1 %v9534_v50 }
 0x2d6   : > { %3457 = vmatmul.mubr.bf16.gmra.mrb[92].mxu1 %v3108_v11  ;;  %v10801_v56 = vpop.f32.mrb[77].mxu0 }
 0x2d7   : > { %v10803_v20 = vpop.f32.mrb[78].mxu0 }
 0x2d8   : > { %v10805_v51 = vpop.f32.mrb[79].mxu0  ;;  %9044 = vmatpush3.bf16.msra.mxu1 %v9535_v35 }
 0x2ee   : > { %v10819_v0 = vpop.f32.mrb[80].mxu0 }
 0x2ef   : > { %v10821_v34 = vpop.f32.mrb[81].mxu0 }
 0x2f0   : > { %v10823_v60 = vpop.f32.mrb[82].mxu0 }
 0x2f1   : > { %v10825_v62 = vpop.f32.mrb[83].mxu0 }
 0x2f8   : > { %v8919_v30 = vpop.f32.mrb[32].mxu1 }
 0x2f9   : > { %v8920_v1 = vpop.f32.mrb[33].mxu1 }
 0x2fa   : > { %v8921_v2 = vadd.f32 %v8920_v1, %v8919_v30  ;;  %v8922_v39 = vpop.f32.mrb[34].mxu1 }
 0x2fb   : > { %v8923_v3 = vpop.f32.mrb[35].mxu1 }
 0x2fc   : > { %v3500_v4 = vadd.f32 %v8921_v2, %v10722_v43  ;;  %v8924_v33 = vadd.f32 %v8923_v3, %v8922_v39 }
 0x2fe   : > { %v3631_v53 = vmul.f32 %v10836_v36, %v3500_v4  ;;  %v3503_v61 = vadd.f32 %v8924_v33, %v10727_v45 }
 0x300   : > { %v3668_v14 = vadd.f32 %v10842_v44, %v3631_v53  ;;  %v3632_v16 = vmul.f32 %v10836_v36, %v3503_v61 }
 0x302   : > { %vm3700_vm14 = vcmp.gt.f32.partialorder %v3668_v14, 0.0  ;;  %v3732_v43 = vmul.f32 0.01, %v3668_v14  ;;  %v3669_v23 = vadd.f32 %v10842_v44, %v3632_v16 }
 0x304   : > { %v3764_v24 = vsel %vm3700_vm14, %v3668_v14, %v3732_v43  ;;  %vm3701_vm15 = vcmp.gt.f32.partialorder %v3669_v23, 0.0  ;;  %v3733_v27 = vmul.f32 0.01, %v3669_v23  ;;  %v8925_v45 = vpop.f32.mrb[36].mxu1 }
 0x305   : > { %3796 = vst.msk [vmem:[#allocation2 + $0x19] sm:$0xff] %vm253_vm0, %v3764_v24  ;;  %v8926_v47 = vpop.f32.mrb[37].mxu1 }
 0x306   : > { %v10853_v5 = vpop.f32.mrb[84].mxu0  ;;  %v3765_v8 = vsel %vm3701_vm15, %v3669_v23, %v3733_v27  ;;  %v8927_v6 = vadd.f32 %v8926_v47, %v8925_v45  ;;  %v8928_v19 = vpop.f32.mrb[38].mxu1  ;;  %v9536_v45 = vld [vmem:[%s12287_s1 + $0x190] sm:$0xff]  }
 0x307   : > { %v10855_v29 = vpop.f32.mrb[85].mxu0  ;;  %3797 = vst.msk [vmem:[#allocation2 + $0x21] sm:$0xff] %vm253_vm0, %v3765_v8  ;;  %v8929_v58 = vpop.f32.mrb[39].mxu1  ;;  %9045 = vmatprep.subr.bf16.mxu1 %v9536_v45 }
 0x308   : > { %v10858_v42 = vpop.f32.mrb[86].mxu0  ;;  %v3508_v48 = vadd.f32 %v10720_v41, %v8927_v6  ;;  %v8930_v37 = vadd.f32 %v8929_v58, %v8928_v19  ;;  %v9537_v6 = vld [vmem:[%s12287_s1 + $0x150] sm:$0xff]  }
 0x309   : > { %v10861_v31 = vpop.f32.mrb[87].mxu0  ;;  %9046 = vmatpush3.bf16.msra.mxu1 %v9537_v6 }
 0x30a   : > { %v3633_v22 = vmul.f32 %v10836_v36, %v3508_v48  ;;  %v3511_v40 = vadd.f32 %v10724_v49, %v8930_v37  ;;  %v9538_v48 = vld [vmem:[%s12287_s1 + $0x198] sm:$0xff]  }
 0x30b   : > { %9047 = vmatprep.subr.bf16.mxu1 %v9538_v48 }
 0x30c   : > { %v3670_v11 = vadd.f32 %v10842_v44, %v3633_v22  ;;  %v3634_v41 = vmul.f32 %v10836_v36, %v3511_v40  ;;  %v4148_v46 = vld [vmem:[#allocation2 + $0x18] sm:$0xff] }
 0x30d   : > { %v4276_v2 = vld [vmem:[#allocation2 + $0x19] sm:$0xff] }
 0x30e   : > { %vm3702_vm1 = vcmp.gt.f32.partialorder %v3670_v11, 0.0  ;;  %v3734_v12 = vmul.f32 0.01, %v3670_v11  ;;  %v3671_v15 = vadd.f32 %v10842_v44, %v3634_v41  ;;  %v4340_v54 = vld [vmem:[#allocation2 + $0x1a] sm:$0xff]  ;;  %v4341_v38 = vld [vmem:[#allocation2 + $0x22] sm:$0xff] }
 0x30f   : > { %v4149_v52 = vld [vmem:[#allocation2 + $0x20] sm:$0xff]  ;;  %v4372_v30 = vpack.c.bf16 %v4341_v38, %v4340_v54  ;;  %v3830_v53 = vld [vmem:[#allocation2 + $0x18] sm:$0xff] }
 0x310   : > { %v4180_v1 = vpack.c.bf16 %v4149_v52, %v4148_v46  ;;  %v4277_v39 = vld [vmem:[#allocation2 + $0x21] sm:$0xff]  ;;  %v3766_v49 = vsel %vm3702_vm1, %v3670_v11, %v3734_v12  ;;  %vm3703_vm2 = vcmp.gt.f32.partialorder %v3671_v15, 0.0  ;;  %v3735_v4 = vmul.f32 0.01, %v3671_v15  ;;  %v8931_v33 = vpop.f32.mrb[40].mxu1  ;;  %v3894_v43 = vld [vmem:[#allocation2 + $0x19] sm:$0xff] }
 0x311   : > { %v3831_v3 = vld [vmem:[#allocation2 + $0x20] sm:$0xff]  ;;  %3798 = vst.msk [vmem:[#allocation2 + $0x31] sm:$0xff] %vm253_vm0, %v3766_v49  ;;  %4404 = vrot.lane.b32.xlu0 %v4372_v30, %s9582_s13  ;;  %v8932_v61 = vpop.f32.mrb[41].mxu1  ;;  %v4308_v10 = vpack.c.bf16 %v4277_v39, %v4276_v2 }
 0x312   : > { %v3895_v9 = vld [vmem:[#allocation2 + $0x21] sm:$0xff]  ;;  %4212 = vrot.lane.b32.xlu1 %v4180_v1, %s9584_s15  ;;  %v3861_v13 = vpack.c.bf16 %v3831_v3, %v3830_v53  ;;  %v3767_v14 = vsel %vm3703_vm2, %v3671_v15, %v3735_v4  ;;  %v8933_v16 = vadd.f32 %v8932_v61, %v8931_v33  ;;  %v8934_v59 = vpop.f32.mrb[42].mxu1  ;;  %v9539_v1 = vld [vmem:[%s12287_s1 + $0x158] sm:$0xff]  }
 0x313   : > { %3799 = vst.msk [vmem:[#allocation2 + $0x39] sm:$0xff] %vm253_vm0, %v3767_v14  ;;  %v8935_v23 = vpop.f32.mrb[43].mxu1  ;;  %v3925_v17 = vpack.c.bf16 %v3895_v9, %v3894_v43  ;;  %4324 = vst.msk [vmem:[#allocation3 + $0x8] sm:$0xff] %vm253_vm0, %v4308_v10  ;;  %9048 = vmatpush3.bf16.msra.mxu1 %v9539_v1 }
 0x314   : > { %3877 = vst.msk [vmem:[#allocation3 + $0x18] sm:$0xff] %vm253_vm0, %v3861_v13  ;;  %v3516_v24 = vadd.f32 %v8933_v16, %v10744_v57  ;;  %v8936_v27 = vadd.f32 %v8935_v23, %v8934_v59  ;;  %9455 = vmatprep.subr.bf16.mxu1 %v10755_v25 }
 0x316   : > { %3958 = vrot.lane.b32.xlu1 %v3925_v17, %s9582_s13  ;;  %v3635_v47 = vmul.f32 %v10836_v36, %v3516_v24  ;;  %v3519_v8 = vadd.f32 %v8936_v27, %v10748_v7 }
 0x318   : > { %v3672_v19 = vadd.f32 %v10842_v44, %v3635_v47  ;;  %v3636_v57 = vmul.f32 %v10836_v36, %v3519_v8  ;;  %v4468_v58 = vld [vmem:[#allocation2 + $0x30] sm:$0xff] }
 0x319   : > { %v3832_v22 = vld [vmem:[#allocation2 + $0x30] sm:$0xff] }
 0x31a   : > { %4086 = vrot.lane.b32.xlu1 %v4372_v30, %s9583_s14  ;;  %vm3704_vm6 = vcmp.gt.f32.partialorder %v3672_v19, 0.0  ;;  %v3736_v37 = vmul.f32 0.01, %v3672_v19  ;;  %v3673_v7 = vadd.f32 %v10842_v44, %v3636_v57  ;;  %v4469_v50 = vld [vmem:[#allocation2 + $0x38] sm:$0xff] }
 0x31b   : > { %v4724_v35 = vld [vmem:[#allocation2 + $0x32] sm:$0xff]  ;;  %v4500_v11 = vpack.c.bf16 %v4469_v50, %v4468_v58  ;;  %v4725_v41 = vld [vmem:[#allocation2 + $0x3a] sm:$0xff] }
 0x31c   : > { %v4278_v40 = vld [vmem:[#allocation2 + $0x31] sm:$0xff]  ;;  %v4279_v12 = vld [vmem:[#allocation2 + $0x39] sm:$0xff]  ;;  %v3768_v15 = vsel %vm3704_vm6, %v3672_v19, %v3736_v37  ;;  %vm3705_vm7 = vcmp.gt.f32.partialorder %v3673_v7, 0.0  ;;  %v3737_v54 = vmul.f32 0.01, %v3673_v7  ;;  %v8937_v38 = vpop.f32.mrb[44].mxu1  ;;  %v4756_v30 = vpack.c.bf16 %v4725_v41, %v4724_v35 }
 0x31d   : > { %v3833_v46 = vld [vmem:[#allocation2 + $0x38] sm:$0xff]  ;;  %3800 = vst.msk [vmem:[#allocation2 + $0x49] sm:$0xff] %vm253_vm0, %v3768_v15  ;;  %4532 = vrot.lane.b32.xlu0 %v4500_v11, %s9583_s14  ;;  %v8938_v39 = vpop.f32.mrb[45].mxu1  ;;  %v4309_v49 = vpack.c.bf16 %v4279_v12, %v4278_v40 }
 0x31e   : > { %v4597_v52 = vld [vmem:[#allocation2 + $0x39] sm:$0xff]  ;;  %4214 = vrot.lane.b32.xlu1 %v4500_v11, %s9584_s15  ;;  %v3862_v3 = vpack.c.bf16 %v3833_v46, %v3832_v22  ;;  %v3769_v4 = vsel %vm3705_vm7, %v3673_v7, %v3737_v54  ;;  %v8939_v9 = vadd.f32 %v8938_v39, %v8937_v38  ;;  %v8940_v53 = vpop.f32.mrb[46].mxu1  ;;  %v4596_v61 = vld [vmem:[#allocation2 + $0x31] sm:$0xff]  ;;  %4772 = vst.msk [vmem:[#allocation3 + $0x10] sm:$0xff] %vm253_vm0, %v4756_v30 }
 0x31f   : > { %v10901_v2 = vpop.f32.mrb[88].mxu0  ;;  %3801 = vst.msk [vmem:[#allocation2 + $0x51] sm:$0xff] %vm253_vm0, %v3769_v4  ;;  %v8941_v13 = vpop.f32.mrb[47].mxu1  ;;  %v4628_v14 = vpack.c.bf16 %v4597_v52, %v4596_v61  ;;  %4325 = vst.msk [vmem:[#allocation3 + $0x20] sm:$0xff] %vm253_vm0, %v4309_v49 }
 0x320   : > { %v10905_v33 = vpop.f32.mrb[89].mxu0  ;;  %3878 = vst.msk [vmem:[#allocation3 + $0x30] sm:$0xff] %vm253_vm0, %v3862_v3  ;;  %v3524_v16 = vadd.f32 %v10742_v18, %v8939_v9  ;;  %v8942_v59 = vadd.f32 %v8941_v13, %v8940_v53 }
 0x321   : > { %v10909_v10 = vpop.f32.mrb[90].mxu0  ;;  %4660 = vrot.lane.b32.xlu0 %v4628_v14, %s9584_s15 }
 0x322   : > { %v10915_v43 = vpop.f32.mrb[91].mxu0  ;;  %3960 = vrot.lane.b32.xlu1 %v4628_v14, %s9582_s13  ;;  %v3637_v23 = vmul.f32 %v10836_v36, %v3524_v16  ;;  %v3527_v17 = vadd.f32 %v10746_v28, %v8942_v59 }
 0x324   : > { %v3674_v24 = vadd.f32 %v10842_v44, %v3637_v23  ;;  %v3638_v27 = vmul.f32 %v10836_v36, %v3527_v17  ;;  %v4470_v18 = vld [vmem:[#allocation2 + $0x48] sm:$0xff] }
 0x325   : > { %v4790_v45 = vld [vmem:[#allocation3 + $0x10] sm:$0xff]  ;;  %4406 = vrot.lane.b32.xlu0 %v4756_v30, %s9582_s13  ;;  %v3834_v19 = vld [vmem:[#allocation2 + $0x48] sm:$0xff] }
 0x326   : > { %4088 = vrot.lane.b32.xlu1 %v4756_v30, %s9583_s14  ;;  %vm3706_vm8 = vcmp.gt.f32.partialorder %v3674_v24, 0.0  ;;  %v3738_v25 = vmul.f32 0.01, %v3674_v24  ;;  %v3675_v47 = vadd.f32 %v10842_v44, %v3638_v27  ;;  %9387 = vmatprep.mubr.msk.bf16.mxu0 %vm253_vm0, %v4790_v45  ;;  %v4471_v8 = vld [vmem:[#allocation2 + $0x50] sm:$0xff] }
 0x327   : > { %v4726_v6 = vld [vmem:[#allocation2 + $0x4a] sm:$0xff]  ;;  %v4501_v28 = vpack.c.bf16 %v4471_v8, %v4470_v18  ;;  %v4727_v57 = vld [vmem:[#allocation2 + $0x52] sm:$0xff] }
 0x328   : > { %v3835_v58 = vld [vmem:[#allocation2 + $0x50] sm:$0xff]  ;;  %v3770_v37 = vsel %vm3706_vm8, %v3674_v24, %v3738_v25  ;;  %vm3707_vm9 = vcmp.gt.f32.partialorder %v3675_v47, 0.0  ;;  %v3739_v7 = vmul.f32 0.01, %v3675_v47  ;;  %v8943_v50 = vpop.f32.mrb[48].mxu1  ;;  %v4757_v22 = vpack.c.bf16 %v4727_v57, %v4726_v6 }
 0x329   : > { %v4281_v48 = vld [vmem:[#allocation2 + $0x51] sm:$0xff]  ;;  %v4280_v40 = vld [vmem:[#allocation2 + $0x49] sm:$0xff]  ;;  %3802 = vst.msk [vmem:[#allocation2 + $0x61] sm:$0xff] %vm253_vm0, %v3770_v37  ;;  %v8944_v11 = vpop.f32.mrb[49].mxu1  ;;  %4534 = vrot.lane.b32.xlu0 %v4501_v28, %s9583_s14  ;;  %v3863_v41 = vpack.c.bf16 %v3835_v58, %v3834_v19 }
 0x32a   : > { %v4599_v35 = vld [vmem:[#allocation2 + $0x51] sm:$0xff]  ;;  %4216 = vrot.lane.b32.xlu1 %v4501_v28, %s9584_s15  ;;  %v4310_v46 = vpack.c.bf16 %v4281_v48, %v4280_v40  ;;  %v3771_v12 = vsel %vm3707_vm9, %v3675_v47, %v3739_v7  ;;  %v8945_v15 = vadd.f32 %v8944_v11, %v8943_v50  ;;  %v8946_v54 = vpop.f32.mrb[50].mxu1  ;;  %v4598_v38 = vld [vmem:[#allocation2 + $0x49] sm:$0xff]  ;;  %4773 = vst.msk [vmem:[#allocation3 + $0x28] sm:$0xff] %vm253_vm0, %v4757_v22 }
 0x32b   : > { %3803 = vst.msk [vmem:[#allocation2 + $0x69] sm:$0xff] %vm253_vm0, %v3771_v12  ;;  %v8947_v30 = vpop.f32.mrb[51].mxu1  ;;  %v4629_v1 = vpack.c.bf16 %v4599_v35, %v4598_v38  ;;  %3879 = vst.msk [vmem:[#allocation3 + $0x48] sm:$0xff] %vm253_vm0, %v3863_v41 }
 0x32c   : > { %v10931_v52 = vpop.f32.mrb[92].mxu0  ;;  %4326 = vst.msk [vmem:[#allocation3 + $0x38] sm:$0xff] %vm253_vm0, %v4310_v46  ;;  %v3532_v3 = vadd.f32 %v8945_v15, %v10780_v32  ;;  %v8948_v49 = vadd.f32 %v8947_v30, %v8946_v54 }
 0x32d   : > { %v10935_v39 = vpop.f32.mrb[93].mxu0  ;;  %4662 = vrot.lane.b32.xlu0 %v4629_v1, %s9584_s15 }
 0x32e   : > { %v10939_v4 = vpop.f32.mrb[94].mxu0  ;;  %3962 = vrot.lane.b32.xlu1 %v4629_v1, %s9582_s13  ;;  %v3639_v53 = vmul.f32 %v10836_v36, %v3532_v3  ;;  %v3535_v61 = vadd.f32 %v8948_v49, %v10784_v21 }
 0x32f   : > { %v10943_v9 = vpop.f32.mrb[95].mxu0 }
 0x330   : > { %v3676_v13 = vadd.f32 %v10842_v44, %v3639_v53  ;;  %v3640_v14 = vmul.f32 %v10836_v36, %v3535_v61  ;;  %v4472_v32 = vld [vmem:[#allocation2 + $0x60] sm:$0xff] }
 0x331   : > { %v4793_v16 = vld [vmem:[#allocation3 + $0x28] sm:$0xff]  ;;  %4408 = vrot.lane.b32.xlu0 %v4757_v22, %s9582_s13  ;;  %v3836_v27 = vld [vmem:[#allocation2 + $0x60] sm:$0xff] }
 0x332   : > { %4090 = vrot.lane.b32.xlu1 %v4757_v22, %s9583_s14  ;;  %vm3708_vm10 = vcmp.gt.f32.partialorder %v3676_v13, 0.0  ;;  %v3740_v59 = vmul.f32 0.01, %v3676_v13  ;;  %v3677_v23 = vadd.f32 %v10842_v44, %v3640_v14  ;;  %9388 = vmatmul.mubr.msk.bf16.vlgmr.msra.gmra.mrb[96].mxu0 %vm253_vm0, %v4793_v16  ;;  %v4473_v17 = vld [vmem:[#allocation2 + $0x68] sm:$0xff] }
 0x333   : > { %v4728_v24 = vld [vmem:[#allocation2 + $0x62] sm:$0xff]  ;;  %v4502_v21 = vpack.c.bf16 %v4473_v17, %v4472_v32  ;;  %v4729_v45 = vld [vmem:[#allocation2 + $0x6a] sm:$0xff] }
 0x334   : > { %v3837_v18 = vld [vmem:[#allocation2 + $0x68] sm:$0xff]  ;;  %v3772_v47 = vsel %vm3708_vm10, %v3676_v13, %v3740_v59  ;;  %vm3709_vm11 = vcmp.gt.f32.partialorder %v3677_v23, 0.0  ;;  %v3741_v8 = vmul.f32 0.01, %v3677_v23  ;;  %v8949_v6 = vpop.f32.mrb[52].mxu1  ;;  %v4758_v28 = vpack.c.bf16 %v4729_v45, %v4728_v24 }
 0x335   : > { %v4283_v25 = vld [vmem:[#allocation2 + $0x69] sm:$0xff]  ;;  %v4282_v57 = vld [vmem:[#allocation2 + $0x61] sm:$0xff]  ;;  %3804 = vst.msk [vmem:[#allocation2 + $0x79] sm:$0xff] %vm253_vm0, %v3772_v47  ;;  %v8950_v58 = vpop.f32.mrb[53].mxu1  ;;  %4536 = vrot.lane.b32.xlu0 %v4502_v21, %s9583_s14  ;;  %v3864_v48 = vpack.c.bf16 %v3837_v18, %v3836_v27 }
 0x336   : > { %v4601_v19 = vld [vmem:[#allocation2 + $0x69] sm:$0xff]  ;;  %4218 = vrot.lane.b32.xlu1 %v4502_v21, %s9584_s15  ;;  %v4311_v37 = vpack.c.bf16 %v4283_v25, %v4282_v57  ;;  %v3773_v7 = vsel %vm3709_vm11, %v3677_v23, %v3741_v8  ;;  %v8951_v50 = vadd.f32 %v8950_v58, %v8949_v6  ;;  %v8952_v35 = vpop.f32.mrb[54].mxu1  ;;  %v4600_v22 = vld [vmem:[#allocation2 + $0x61] sm:$0xff]  ;;  %4774 = vst.msk [vmem:[#allocation3 + $0x40] sm:$0xff] %vm253_vm0, %v4758_v28 }
 0x337   : > { %3805 = vst.msk [vmem:[#allocation2 + $0x81] sm:$0xff] %vm253_vm0, %v3773_v7  ;;  %v8953_v40 = vpop.f32.mrb[55].mxu1  ;;  %v4630_v11 = vpack.c.bf16 %v4601_v19, %v4600_v22  ;;  %3880 = vst.msk [vmem:[#allocation3 + $0x60] sm:$0xff] %vm253_vm0, %v3864_v48 }
 0x338   : > { %4327 = vst.msk [vmem:[#allocation3 + $0x50] sm:$0xff] %vm253_vm0, %v4311_v37  ;;  %v3540_v41 = vadd.f32 %v10778_v63, %v8951_v50  ;;  %v8954_v46 = vadd.f32 %v8953_v40, %v8952_v35 }
 0x339   : > { %4664 = vrot.lane.b32.xlu0 %v4630_v11, %s9584_s15 }
 0x33a   : > { %3964 = vrot.lane.b32.xlu1 %v4630_v11, %s9582_s13  ;;  %v3641_v12 = vmul.f32 %v10836_v36, %v3540_v41  ;;  %v3543_v15 = vadd.f32 %v10782_v26, %v8954_v46 }
 0x33c   : > { %v3678_v54 = vadd.f32 %v10842_v44, %v3641_v12  ;;  %v3642_v38 = vmul.f32 %v10836_v36, %v3543_v15  ;;  %v4474_v1 = vld [vmem:[#allocation2 + $0x78] sm:$0xff] }
 0x33d   : > { %v4796_v30 = vld [vmem:[#allocation3 + $0x40] sm:$0xff]  ;;  %4410 = vrot.lane.b32.xlu0 %v4758_v28, %s9582_s13  ;;  %v3838_v61 = vld [vmem:[#allocation2 + $0x78] sm:$0xff] }
 0x33e   : > { %4092 = vrot.lane.b32.xlu1 %v4758_v28, %s9583_s14  ;;  %vm3710_vm12 = vcmp.gt.f32.partialorder %v3678_v54, 0.0  ;;  %v3742_v63 = vmul.f32 0.01, %v3678_v54  ;;  %v3679_v3 = vadd.f32 %v10842_v44, %v3642_v38  ;;  %9391 = vmatprep.mubr.msk.bf16.mxu0 %vm253_vm0, %v4796_v30  ;;  %v4475_v49 = vld [vmem:[#allocation2 + $0x80] sm:$0xff] }
 0x33f   : > { %v4730_v53 = vld [vmem:[#allocation2 + $0x7a] sm:$0xff]  ;;  %v4503_v26 = vpack.c.bf16 %v4475_v49, %v4474_v1  ;;  %v4731_v13 = vld [vmem:[#allocation2 + $0x82] sm:$0xff] }
 0x340   : > { %v3839_v14 = vld [vmem:[#allocation2 + $0x80] sm:$0xff]  ;;  %v3774_v32 = vsel %vm3710_vm12, %v3678_v54, %v3742_v63  ;;  %vm3711_vm13 = vcmp.gt.f32.partialorder %v3679_v3, 0.0  ;;  %v3743_v59 = vmul.f32 0.01, %v3679_v3  ;;  %v8955_v23 = vpop.f32.mrb[56].mxu1  ;;  %v4759_v24 = vpack.c.bf16 %v4731_v13, %v4730_v53 }
 0x341   : > { %v4285_v16 = vld [vmem:[#allocation2 + $0x81] sm:$0xff]  ;;  %v4284_v27 = vld [vmem:[#allocation2 + $0x79] sm:$0xff]  ;;  %3806 = vst.msk [vmem:[#allocation2 + $0x91] sm:$0xff] %vm253_vm0, %v3774_v32  ;;  %v8956_v21 = vpop.f32.mrb[57].mxu1  ;;  %4538 = vrot.lane.b32.xlu0 %v4503_v26, %s9583_s14  ;;  %v3865_v45 = vpack.c.bf16 %v3839_v14, %v3838_v61 }
 0x342   : > { %v4603_v17 = vld [vmem:[#allocation2 + $0x81] sm:$0xff]  ;;  %4220 = vrot.lane.b32.xlu1 %v4503_v26, %s9584_s15  ;;  %v4312_v18 = vpack.c.bf16 %v4285_v16, %v4284_v27  ;;  %v3775_v25 = vsel %vm3711_vm13, %v3679_v3, %v3743_v59  ;;  %v8957_v47 = vadd.f32 %v8956_v21, %v8955_v23  ;;  %v8958_v8 = vpop.f32.mrb[58].mxu1  ;;  %v4602_v6 = vld [vmem:[#allocation2 + $0x79] sm:$0xff]  ;;  %4775 = vst.msk [vmem:[#allocation3 + $0x58] sm:$0xff] %vm253_vm0, %v4759_v24 }
 0x343   : > { %3807 = vst.msk [vmem:[#allocation2 + $0x99] sm:$0xff] %vm253_vm0, %v3775_v25  ;;  %v8959_v19 = vpop.f32.mrb[59].mxu1  ;;  %v4631_v28 = vpack.c.bf16 %v4603_v17, %v4602_v6  ;;  %3881 = vst.msk [vmem:[#allocation3 + $0x78] sm:$0xff] %vm253_vm0, %v3865_v45 }
 0x344   : > { %4328 = vst.msk [vmem:[#allocation3 + $0x68] sm:$0xff] %vm253_vm0, %v4312_v18  ;;  %v3548_v57 = vadd.f32 %v8957_v47, %v10801_v56  ;;  %v8960_v58 = vadd.f32 %v8959_v19, %v8958_v8 }
 0x345   : > { %4666 = vrot.lane.b32.xlu0 %v4631_v28, %s9584_s15 }
 0x346   : > { %3966 = vrot.lane.b32.xlu1 %v4631_v28, %s9582_s13  ;;  %v3643_v48 = vmul.f32 %v10836_v36, %v3548_v57  ;;  %v3551_v37 = vadd.f32 %v8960_v58, %v10805_v51 }
 0x348   : > { %v3680_v7 = vadd.f32 %v10842_v44, %v3643_v48  ;;  %v3644_v50 = vmul.f32 %v10836_v36, %v3551_v37  ;;  %v4476_v22 = vld [vmem:[#allocation2 + $0x90] sm:$0xff] }
 0x349   : > { %v4799_v35 = vld [vmem:[#allocation3 + $0x58] sm:$0xff]  ;;  %4412 = vrot.lane.b32.xlu0 %v4759_v24, %s9582_s13  ;;  %v3840_v46 = vld [vmem:[#allocation2 + $0x90] sm:$0xff] }
 0x34a   : > { %4094 = vrot.lane.b32.xlu1 %v4759_v24, %s9583_s14  ;;  %vm3712_vm14 = vcmp.gt.f32.partialorder %v3680_v7, 0.0  ;;  %v3744_v56 = vmul.f32 0.01, %v3680_v7  ;;  %v3681_v40 = vadd.f32 %v10842_v44, %v3644_v50  ;;  %9392 = vmatmul.mubr.msk.bf16.gmra.mrb[100].mxu0 %vm253_vm0, %v4799_v35  ;;  %v4477_v11 = vld [vmem:[#allocation2 + $0x98] sm:$0xff] }
 0x34b   : > { %v4732_v41 = vld [vmem:[#allocation2 + $0x92] sm:$0xff]  ;;  %v4504_v51 = vpack.c.bf16 %v4477_v11, %v4476_v22  ;;  %v4733_v12 = vld [vmem:[#allocation2 + $0x9a] sm:$0xff] }
 0x34c   : > { %v3841_v15 = vld [vmem:[#allocation2 + $0x98] sm:$0xff]  ;;  %v3776_v38 = vsel %vm3712_vm14, %v3680_v7, %v3744_v56  ;;  %vm3713_vm15 = vcmp.gt.f32.partialorder %v3681_v40, 0.0  ;;  %v3745_v30 = vmul.f32 0.01, %v3681_v40  ;;  %v8961_v1 = vpop.f32.mrb[60].mxu1  ;;  %v4760_v3 = vpack.c.bf16 %v4733_v12, %v4732_v41 }
 0x34d   : > { %v4287_v54 = vld [vmem:[#allocation2 + $0x99] sm:$0xff]  ;;  %v4286_v49 = vld [vmem:[#allocation2 + $0x91] sm:$0xff]  ;;  %3808 = vst.msk [vmem:[#allocation2 + $0xa9] sm:$0xff] %vm253_vm0, %v3776_v38  ;;  %v8962_v53 = vpop.f32.mrb[61].mxu1  ;;  %4540 = vrot.lane.b32.xlu0 %v4504_v51, %s9583_s14  ;;  %v3866_v61 = vpack.c.bf16 %v3841_v15, %v3840_v46 }
 0x34e   : > { %v4605_v63 = vld [vmem:[#allocation2 + $0x99] sm:$0xff]  ;;  %4222 = vrot.lane.b32.xlu1 %v4504_v51, %s9584_s15  ;;  %v4313_v26 = vpack.c.bf16 %v4287_v54, %v4286_v49  ;;  %v3777_v13 = vsel %vm3713_vm15, %v3681_v40, %v3745_v30  ;;  %v8963_v14 = vadd.f32 %v8962_v53, %v8961_v1  ;;  %v8964_v16 = vpop.f32.mrb[62].mxu1  ;;  %v4604_v32 = vld [vmem:[#allocation2 + $0x91] sm:$0xff]  ;;  %4776 = vst.msk [vmem:[#allocation3 + $0x70] sm:$0xff] %vm253_vm0, %v4760_v3 }
 0x34f   : > { %3809 = vst.msk [vmem:[#allocation2 + $0xb1] sm:$0xff] %vm253_vm0, %v3777_v13  ;;  %v8965_v59 = vpop.f32.mrb[63].mxu1  ;;  %v4632_v23 = vpack.c.bf16 %v4605_v63, %v4604_v32  ;;  %3882 = vst.msk [vmem:[#allocation3 + $0x90] sm:$0xff] %vm253_vm0, %v3866_v61 }
 0x350   : > { %4329 = vst.msk [vmem:[#allocation3 + $0x80] sm:$0xff] %vm253_vm0, %v4313_v26  ;;  %v3556_v17 = vadd.f32 %v10799_v55, %v8963_v14  ;;  %v8966_v24 = vadd.f32 %v8965_v59, %v8964_v16 }
 0x351   : > { %4668 = vrot.lane.b32.xlu0 %v4632_v23, %s9584_s15 }
 0x352   : > { %3968 = vrot.lane.b32.xlu1 %v4632_v23, %s9582_s13  ;;  %v3645_v27 = vmul.f32 %v10836_v36, %v3556_v17  ;;  %v3559_v21 = vadd.f32 %v10803_v20, %v8966_v24 }
 0x354   : > { %v3682_v45 = vadd.f32 %v10842_v44, %v3645_v27  ;;  %v3646_v18 = vmul.f32 %v10836_v36, %v3559_v21  ;;  %v4478_v47 = vld [vmem:[#allocation2 + $0xa8] sm:$0xff] }
 0x355   : > { %v4802_v25 = vld [vmem:[#allocation3 + $0x70] sm:$0xff]  ;;  %4414 = vrot.lane.b32.xlu0 %v4760_v3, %s9582_s13  ;;  %v3842_v28 = vld [vmem:[#allocation2 + $0xa8] sm:$0xff] }
 0x356   : > { %4096 = vrot.lane.b32.xlu1 %v4760_v3, %s9583_s14  ;;  %vm3714_vm1 = vcmp.gt.f32.partialorder %v3682_v45, 0.0  ;;  %v3746_v55 = vmul.f32 0.01, %v3682_v45  ;;  %v3683_v8 = vadd.f32 %v10842_v44, %v3646_v18  ;;  %9395 = vmatprep.mubr.msk.bf16.mxu0 %vm253_vm0, %v4802_v25  ;;  %v4479_v6 = vld [vmem:[#allocation2 + $0xb0] sm:$0xff] }
 0x357   : > { %v4734_v19 = vld [vmem:[#allocation2 + $0xaa] sm:$0xff]  ;;  %v4505_v20 = vpack.c.bf16 %v4479_v6, %v4478_v47  ;;  %v4735_v57 = vld [vmem:[#allocation2 + $0xb2] sm:$0xff] }
 0x358   : > { %v3843_v58 = vld [vmem:[#allocation2 + $0xb0] sm:$0xff]  ;;  %v3778_v37 = vsel %vm3714_vm1, %v3682_v45, %v3746_v55  ;;  %vm3715_vm2 = vcmp.gt.f32.partialorder %v3683_v8, 0.0  ;;  %v3747_v7 = vmul.f32 0.01, %v3683_v8  ;;  %v8967_v50 = vpop.f32.mrb[64].mxu1  ;;  %v4761_v22 = vpack.c.bf16 %v4735_v57, %v4734_v19 }
 0x359   : > { %v4289_v48 = vld [vmem:[#allocation2 + $0xb1] sm:$0xff]  ;;  %v4288_v56 = vld [vmem:[#allocation2 + $0xa9] sm:$0xff]  ;;  %3810 = vst.msk [vmem:[#allocation2 + $0xc1] sm:$0xff] %vm253_vm0, %v3778_v37  ;;  %v8968_v40 = vpop.f32.mrb[65].mxu1  ;;  %4542 = vrot.lane.b32.xlu0 %v4505_v20, %s9583_s14  ;;  %v3867_v11 = vpack.c.bf16 %v3843_v58, %v3842_v28 }
 0x35a   : > { %v4607_v35 = vld [vmem:[#allocation2 + $0xb1] sm:$0xff]  ;;  %4224 = vrot.lane.b32.xlu1 %v4505_v20, %s9584_s15  ;;  %v4314_v41 = vpack.c.bf16 %v4289_v48, %v4288_v56  ;;  %v3779_v46 = vsel %vm3715_vm2, %v3683_v8, %v3747_v7  ;;  %v8969_v51 = vadd.f32 %v8968_v40, %v8967_v50  ;;  %v8970_v12 = vpop.f32.mrb[66].mxu1  ;;  %v4606_v15 = vld [vmem:[#allocation2 + $0xa9] sm:$0xff]  ;;  %4777 = vst.msk [vmem:[#allocation3 + $0x88] sm:$0xff] %vm253_vm0, %v4761_v22 }
 0x35b   : > { %3811 = vst.msk [vmem:[#allocation2 + $0xc9] sm:$0xff] %vm253_vm0, %v3779_v46  ;;  %v8971_v54 = vpop.f32.mrb[67].mxu1  ;;  %v4633_v38 = vpack.c.bf16 %v4607_v35, %v4606_v15  ;;  %3883 = vst.msk [vmem:[#allocation3 + $0xa8] sm:$0xff] %vm253_vm0, %v3867_v11 }
 0x35c   : > { %4330 = vst.msk [vmem:[#allocation3 + $0x98] sm:$0xff] %vm253_vm0, %v4314_v41  ;;  %v3564_v30 = vadd.f32 %v8969_v51, %v10821_v34  ;;  %v8972_v1 = vadd.f32 %v8971_v54, %v8970_v12 }
 0x35d   : > { %4670 = vrot.lane.b32.xlu0 %v4633_v38, %s9584_s15 }
 0x35e   : > { %3970 = vrot.lane.b32.xlu1 %v4633_v38, %s9582_s13  ;;  %v3647_v63 = vmul.f32 %v10836_v36, %v3564_v30  ;;  %v3567_v3 = vadd.f32 %v8972_v1, %v10825_v62 }
 0x360   : > { %v3684_v49 = vadd.f32 %v10842_v44, %v3647_v63  ;;  %v3648_v53 = vmul.f32 %v10836_v36, %v3567_v3  ;;  %v4480_v26 = vld [vmem:[#allocation2 + $0xc0] sm:$0xff] }
 0x361   : > { %v4805_v61 = vld [vmem:[#allocation3 + $0x88] sm:$0xff]  ;;  %4416 = vrot.lane.b32.xlu0 %v4761_v22, %s9582_s13  ;;  %v3844_v32 = vld [vmem:[#allocation2 + $0xc0] sm:$0xff] }
 0x362   : > { %4098 = vrot.lane.b32.xlu1 %v4761_v22, %s9583_s14  ;;  %vm3716_vm6 = vcmp.gt.f32.partialorder %v3684_v49, 0.0  ;;  %v3748_v34 = vmul.f32 0.01, %v3684_v49  ;;  %v3685_v13 = vadd.f32 %v10842_v44, %v3648_v53  ;;  %9396 = vmatmul.mubr.msk.bf16.gmra.mrb[104].mxu0 %vm253_vm0, %v4805_v61  ;;  %v4481_v14 = vld [vmem:[#allocation2 + $0xc8] sm:$0xff] }
 0x363   : > { %v4736_v16 = vld [vmem:[#allocation2 + $0xc2] sm:$0xff]  ;;  %v4506_v62 = vpack.c.bf16 %v4481_v14, %v4480_v26  ;;  %v4737_v59 = vld [vmem:[#allocation2 + $0xca] sm:$0xff] }
 0x364   : > { %v3845_v23 = vld [vmem:[#allocation2 + $0xc8] sm:$0xff]  ;;  %v3780_v24 = vsel %vm3716_vm6, %v3684_v49, %v3748_v34  ;;  %vm3717_vm7 = vcmp.gt.f32.partialorder %v3685_v13, 0.0  ;;  %v3749_v27 = vmul.f32 0.01, %v3685_v13  ;;  %v8973_v21 = vpop.f32.mrb[68].mxu1  ;;  %v4762_v18 = vpack.c.bf16 %v4737_v59, %v4736_v16 }
 0x365   : > { %v4291_v17 = vld [vmem:[#allocation2 + $0xc9] sm:$0xff]  ;;  %v4290_v25 = vld [vmem:[#allocation2 + $0xc1] sm:$0xff]  ;;  %3812 = vst.msk [vmem:[#allocation2 + $0xd9] sm:$0xff] %vm253_vm0, %v3780_v24  ;;  %v8974_v47 = vpop.f32.mrb[69].mxu1  ;;  %4544 = vrot.lane.b32.xlu0 %v4506_v62, %s9583_s14  ;;  %v3868_v55 = vpack.c.bf16 %v3845_v23, %v3844_v32 }
 0x366   : > { %v4609_v45 = vld [vmem:[#allocation2 + $0xc9] sm:$0xff]  ;;  %4226 = vrot.lane.b32.xlu1 %v4506_v62, %s9584_s15  ;;  %v4315_v8 = vpack.c.bf16 %v4291_v17, %v4290_v25  ;;  %v3781_v6 = vsel %vm3717_vm7, %v3685_v13, %v3749_v27  ;;  %v8975_v19 = vadd.f32 %v8974_v47, %v8973_v21  ;;  %v8976_v28 = vpop.f32.mrb[70].mxu1  ;;  %v4608_v20 = vld [vmem:[#allocation2 + $0xc1] sm:$0xff]  ;;  %4778 = vst.msk [vmem:[#allocation3 + $0xa0] sm:$0xff] %vm253_vm0, %v4762_v18 }
 0x367   : > { %3813 = vst.msk [vmem:[#allocation2 + $0xe1] sm:$0xff] %vm253_vm0, %v3781_v6  ;;  %v8977_v57 = vpop.f32.mrb[71].mxu1  ;;  %v4634_v58 = vpack.c.bf16 %v4609_v45, %v4608_v20  ;;  %3884 = vst.msk [vmem:[#allocation3 + $0xc0] sm:$0xff] %vm253_vm0, %v3868_v55 }
 0x368   : > { %4331 = vst.msk [vmem:[#allocation3 + $0xb0] sm:$0xff] %vm253_vm0, %v4315_v8  ;;  %v3572_v48 = vadd.f32 %v10819_v0, %v8975_v19  ;;  %v8978_v37 = vadd.f32 %v8977_v57, %v8976_v28 }
 0x369   : > { %4672 = vrot.lane.b32.xlu0 %v4634_v58, %s9584_s15 }
 0x36a   : > { %3972 = vrot.lane.b32.xlu1 %v4634_v58, %s9582_s13  ;;  %v3649_v7 = vmul.f32 %v10836_v36, %v3572_v48  ;;  %v3575_v50 = vadd.f32 %v10823_v60, %v8978_v37 }
 0x36c   : > { %v3686_v35 = vadd.f32 %v10842_v44, %v3649_v7  ;;  %v3650_v22 = vmul.f32 %v10836_v36, %v3575_v50  ;;  %v4482_v40 = vld [vmem:[#allocation2 + $0xd8] sm:$0xff] }
 0x36d   : > { %v4808_v56 = vld [vmem:[#allocation3 + $0xa0] sm:$0xff]  ;;  %4418 = vrot.lane.b32.xlu0 %v4762_v18, %s9582_s13  ;;  %v3846_v51 = vld [vmem:[#allocation2 + $0xd8] sm:$0xff] }
 0x36e   : > { %4100 = vrot.lane.b32.xlu1 %v4762_v18, %s9583_s14  ;;  %vm3718_vm8 = vcmp.gt.f32.partialorder %v3686_v35, 0.0  ;;  %v3750_v0 = vmul.f32 0.01, %v3686_v35  ;;  %v3687_v11 = vadd.f32 %v10842_v44, %v3650_v22  ;;  %9399 = vmatprep.mubr.msk.bf16.mxu0 %vm253_vm0, %v4808_v56  ;;  %v4483_v41 = vld [vmem:[#allocation2 + $0xe0] sm:$0xff] }
 0x36f   : > { %v4738_v46 = vld [vmem:[#allocation2 + $0xda] sm:$0xff]  ;;  %v4507_v60 = vpack.c.bf16 %v4483_v41, %v4482_v40  ;;  %v4739_v12 = vld [vmem:[#allocation2 + $0xe2] sm:$0xff] }
 0x370   : > { %v3847_v15 = vld [vmem:[#allocation2 + $0xe0] sm:$0xff]  ;;  %v3782_v38 = vsel %vm3718_vm8, %v3686_v35, %v3750_v0  ;;  %vm3719_vm9 = vcmp.gt.f32.partialorder %v3687_v11, 0.0  ;;  %v3751_v30 = vmul.f32 0.01, %v3687_v11  ;;  %v4763_v3 = vpack.c.bf16 %v4739_v12, %v4738_v46  ;;  %v11064_v35 = vpop.permute.xlu0 %4562 }
 0x371   : > { %v4293_v54 = vld [vmem:[#allocation2 + $0xe1] sm:$0xff]  ;;  %v8979_v1 = vpop.f32.mrb[72].mxu1  ;;  %v4292_v49 = vld [vmem:[#allocation2 + $0xd9] sm:$0xff]  ;;  %3814 = vst.msk [vmem:[#allocation2 + $0xf1] sm:$0xff] %vm253_vm0, %v3782_v38  ;;  %4546 = vrot.lane.b32.xlu0 %v4507_v60, %s9583_s14  ;;  %v3869_v61 = vpack.c.bf16 %v3847_v15, %v3846_v51 }
 0x372   : > { %v4611_v63 = vld [vmem:[#allocation2 + $0xe1] sm:$0xff]  ;;  %v8980_v53 = vpop.f32.mrb[73].mxu1  ;;  %4228 = vrot.lane.b32.xlu1 %v4507_v60, %s9584_s15  ;;  %v4316_v26 = vpack.c.bf16 %v4293_v54, %v4292_v49  ;;  %v3783_v34 = vsel %vm3719_vm9, %v3687_v11, %v3751_v30  ;;  %v4610_v16 = vld [vmem:[#allocation2 + $0xd9] sm:$0xff]  ;;  %4779 = vst.msk [vmem:[#allocation3 + $0xb8] sm:$0xff] %vm253_vm0, %v4763_v3 }
 0x373   : > { %v8981_v13 = vadd.f32 %v8980_v53, %v8979_v1  ;;  %v8982_v14 = vpop.f32.mrb[74].mxu1  ;;  %3815 = vst.msk [vmem:[#allocation2 + $0xf9] sm:$0xff] %vm253_vm0, %v3783_v34  ;;  %v4635_v62 = vpack.c.bf16 %v4611_v63, %v4610_v16  ;;  %3885 = vst.msk [vmem:[#allocation3 + $0xd8] sm:$0xff] %vm253_vm0, %v3869_v61  ;;  %v11079_v63 = vld [vmem:[%s12288_s2 + $0x1] ss:$0 sm:$0xff] }
 0x374   : > { %v8983_v32 = vpop.f32.mrb[75].mxu1  ;;  %4332 = vst.msk [vmem:[#allocation3 + $0xc8] sm:$0xff] %vm253_vm0, %v4316_v26  ;;  %v11089_v49 = vld [vmem:[%s12289_s3 + $0x1] ss:$0 sm:$0xff] }
 0x375   : > { %v3580_v59 = vadd.f32 %v8981_v13, %v10855_v29  ;;  %v8984_v23 = vadd.f32 %v8983_v32, %v8982_v14  ;;  %4674 = vrot.lane.b32.xlu0 %v4635_v62, %s9584_s15 }
 0x376   : > { %3974 = vrot.lane.b32.xlu1 %v4635_v62, %s9582_s13 }
 0x377   : > { %v3651_v17 = vmul.f32 %v10836_v36, %v3580_v59  ;;  %v3583_v24 = vadd.f32 %v8984_v23, %v10861_v31 }
 0x378   : > { %v4484_v18 = vld [vmem:[#allocation2 + $0xf0] sm:$0xff] }
 0x379   : > { %v3688_v27 = vadd.f32 %v10842_v44, %v3651_v17  ;;  %v3652_v21 = vmul.f32 %v10836_v36, %v3583_v24  ;;  %v4811_v45 = vld [vmem:[#allocation3 + $0xb8] sm:$0xff]  ;;  %4420 = vrot.lane.b32.xlu0 %v4763_v3, %s9582_s13  ;;  %v3848_v8 = vld [vmem:[#allocation2 + $0xf0] sm:$0xff] }
 0x37a   : > { %4102 = vrot.lane.b32.xlu1 %v4763_v3, %s9583_s14  ;;  %9400 = vmatmul.mubr.msk.bf16.gmra.mrb[108].mxu0 %vm253_vm0, %v4811_v45  ;;  %v4485_v47 = vld [vmem:[#allocation2 + $0xf8] sm:$0xff] }
 0x37b   : > { %vm3720_vm10 = vcmp.gt.f32.partialorder %v3688_v27, 0.0  ;;  %v3752_v29 = vmul.f32 0.01, %v3688_v27  ;;  %v3689_v25 = vadd.f32 %v10842_v44, %v3652_v21  ;;  %v4740_v55 = vld [vmem:[#allocation2 + $0xf2] sm:$0xff]  ;;  %v4508_v31 = vpack.c.bf16 %v4485_v47, %v4484_v18  ;;  %v4741_v6 = vld [vmem:[#allocation2 + $0xfa] sm:$0xff] }
 0x37c   : > { %v3849_v19 = vld [vmem:[#allocation2 + $0xf8] sm:$0xff]  ;;  %v4764_v37 = vpack.c.bf16 %v4741_v6, %v4740_v55 }
 0x37d   : > { %v4295_v28 = vld [vmem:[#allocation2 + $0xf9] sm:$0xff]  ;;  %v3784_v20 = vsel %vm3720_vm10, %v3688_v27, %v3752_v29  ;;  %vm3721_vm11 = vcmp.gt.f32.partialorder %v3689_v25, 0.0  ;;  %v3753_v57 = vmul.f32 0.01, %v3689_v25  ;;  %v8985_v58 = vpop.f32.mrb[76].mxu1  ;;  %v4294_v7 = vld [vmem:[#allocation2 + $0xf1] sm:$0xff]  ;;  %4548 = vrot.lane.b32.xlu0 %v4508_v31, %s9583_s14  ;;  %v3870_v22 = vpack.c.bf16 %v3849_v19, %v3848_v8 }
 0x37e   : > { %v4613_v48 = vld [vmem:[#allocation2 + $0xf9] sm:$0xff]  ;;  %3816 = vst.msk [vmem:[#allocation2 + $0x109] sm:$0xff] %vm253_vm0, %v3784_v20  ;;  %v8986_v50 = vpop.f32.mrb[77].mxu1  ;;  %4230 = vrot.lane.b32.xlu1 %v4508_v31, %s9584_s15  ;;  %v4317_v56 = vpack.c.bf16 %v4295_v28, %v4294_v7  ;;  %v4612_v41 = vld [vmem:[#allocation2 + $0xf1] sm:$0xff]  ;;  %4780 = vst.msk [vmem:[#allocation3 + $0xd0] sm:$0xff] %vm253_vm0, %v4764_v37 }
 0x37f   : > { %v3785_v40 = vsel %vm3721_vm11, %v3689_v25, %v3753_v57  ;;  %v8987_v0 = vadd.f32 %v8986_v50, %v8985_v58  ;;  %v8988_v11 = vpop.f32.mrb[78].mxu1  ;;  %v4636_v51 = vpack.c.bf16 %v4613_v48, %v4612_v41  ;;  %3886 = vst.msk [vmem:[#allocation3 + $0xf0] sm:$0xff] %vm253_vm0, %v3870_v22 }
 0x380   : > { %3817 = vst.msk [vmem:[#allocation2 + $0x111] sm:$0xff] %vm253_vm0, %v3785_v40  ;;  %v8989_v46 = vpop.f32.mrb[79].mxu1  ;;  %4333 = vst.msk [vmem:[#allocation3 + $0xe0] sm:$0xff] %vm253_vm0, %v4317_v56 }
 0x381   : > { %v3588_v60 = vadd.f32 %v10853_v5, %v8987_v0  ;;  %v8990_v12 = vadd.f32 %v8989_v46, %v8988_v11  ;;  %4676 = vrot.lane.b32.xlu0 %v4636_v51, %s9584_s15 }
 0x382   : > { %3976 = vrot.lane.b32.xlu1 %v4636_v51, %s9582_s13 }
 0x383   : > { %v3653_v15 = vmul.f32 %v10836_v36, %v3588_v60  ;;  %v3591_v54 = vadd.f32 %v10858_v42, %v8990_v12  ;;  %v4405_v38 = vpop.permute.xlu0 %4404 }
 0x384   : > { %v4213_v30 = vpop.permute.xlu1 %4212  ;;  %4452 = vst.msk [vmem:[#allocation3 + $0x8] sm:$0xff] %vm551_vm3, %v4405_v38 }
 0x385   : > { %v3690_v1 = vadd.f32 %v10842_v44, %v3653_v15  ;;  %v3654_v5 = vmul.f32 %v11079_v63, %v3591_v54  ;;  %4260 = vst.msk [vmem:[#allocation3] sm:$0xff] %vm809_vm5, %v4213_v30  ;;  %v4814_v3 = vld [vmem:[#allocation3 + $0xd0] sm:$0xff]  ;;  %4422 = vrot.lane.b32.xlu0 %v4764_v37, %s9582_s13  ;;  %v4486_v36 = vld [vmem:[#allocation2 + $0x108] sm:$0xff] }
 0x386   : > { %4104 = vrot.lane.b32.xlu1 %v4764_v37, %s9583_s14  ;;  %v4614_v42 = vld [vmem:[#allocation2 + $0x109] sm:$0xff]  ;;  %9403 = vmatprep.mubr.msk.bf16.mxu0 %vm253_vm0, %v4814_v3 }
 0x387   : > { %vm3722_vm12 = vcmp.gt.f32.partialorder %v3690_v1, 0.0  ;;  %v3754_v44 = vmul.f32 0.01, %v3690_v1  ;;  %v3691_v53 = vadd.f32 %v11089_v49, %v3654_v5  ;;  %v4487_v61 = vld [vmem:[#allocation2 + $0x110] sm:$0xff] }
 0x388   : > { %v4615_v26 = vld [vmem:[#allocation2 + $0x111] sm:$0xff]  ;;  %v3959_v13 = vpop.permute.xlu1 %3958  ;;  %v4509_v14 = vpack.c.bf16 %v4487_v61, %v4486_v36 }
 0x389   : > { %v4742_v34 = vld [vmem:[#allocation2 + $0x10a] sm:$0xff]  ;;  %v4637_v16 = vpack.c.bf16 %v4615_v26, %v4614_v42  ;;  %v4743_v32 = vld [vmem:[#allocation2 + $0x112] sm:$0xff]  ;;  %v3786_v62 = vsel %vm3722_vm12, %v3690_v1, %v3754_v44  ;;  %vm3723_vm13 = vcmp.gt.f32.partialorder %v3691_v53, 0.0  ;;  %v3755_v59 = vmul.f32 0.01, %v3691_v53  ;;  %4005 = vst.msk [vmem:[#allocation3 + $0x18] sm:$0xff] %vm551_vm3, %v3959_v13 }
 0x38a   : > { %v8991_v23 = vpop.f32.mrb[80].mxu1  ;;  %v4765_v17 = vpack.c.bf16 %v4743_v32, %v4742_v34  ;;  %3818 = vst.msk [vmem:[#allocation2 + $0x121] sm:$0xff] %vm253_vm0, %v3786_v62  ;;  %4550 = vrot.lane.b32.xlu0 %v4509_v14, %s9583_s14  ;;  %4232 = vrot.lane.b32.xlu1 %v4509_v14, %s9584_s15  ;;  %3887 = vst.msk [vmem:[#allocation3 + $0x108] sm:$0xff] %vm253_vm0, %v4509_v14 }
 0x38b   : > { %v8992_v24 = vpop.f32.mrb[81].mxu1  ;;  %4334 = vst.msk [vmem:[#allocation3 + $0xf8] sm:$0xff] %vm253_vm0, %v4637_v16  ;;  %v3787_v27 = vsel %vm3723_vm13, %v3691_v53, %v3755_v59 }
 0x38c   : > { %v8993_v21 = vadd.f32 %v8992_v24, %v8991_v23  ;;  %v8994_v45 = vpop.f32.mrb[82].mxu1  ;;  %4781 = vst.msk [vmem:[#allocation3 + $0xe8] sm:$0xff] %vm253_vm0, %v4765_v17  ;;  %3819 = vst.msk [vmem:[#allocation2 + $0x129] sm:$0xff] %vm253_vm0, %v3787_v27  ;;  %v4087_v18 = vpop.permute.xlu1 %4086 }
 0x38d   : > { %v8995_v29 = vpop.f32.mrb[83].mxu1  ;;  %4133 = vst.msk [vmem:[#allocation3 + $0x18] sm:$0xff] %vm680_vm4, %v4087_v18  ;;  %v9567_v18 = vld [vmem:[%s12287_s1 + $0x1a0] sm:$0xff]  }
 0x38e   : > { %v3596_v25 = vadd.f32 %v8993_v21, %v10905_v33  ;;  %v8996_v47 = vadd.f32 %v8995_v29, %v8994_v45  ;;  %4678 = vrot.lane.b32.xlu0 %v4637_v16, %s9584_s15  ;;  %3978 = vrot.lane.b32.xlu1 %v4637_v16, %s9582_s13 }
 0x38f   : > { %v4533_v31 = vpop.permute.xlu0 %4532 }
 0x390   : > { %v3655_v55 = vmul.f32 %v11079_v63, %v3596_v25  ;;  %v3599_v8 = vadd.f32 %v8996_v47, %v10915_v43  ;;  %v4215_v6 = vpop.permute.xlu1 %4214  ;;  %4580 = vst.msk [vmem:[#allocation3 + $0x8] sm:$0xff] %vm680_vm4, %v4533_v31 }
 0x391   : > { %4261 = vst.msk [vmem:[#allocation3 + $0x18] sm:$0xff] %vm809_vm5, %v4215_v6  ;;  %v4488_v20 = vld [vmem:[#allocation2 + $0x120] sm:$0xff] }
 0x392   : > { %v3692_v19 = vadd.f32 %v11089_v49, %v3655_v55  ;;  %v3656_v28 = vmul.f32 %v11079_v63, %v3599_v8  ;;  %4424 = vrot.lane.b32.xlu0 %v4765_v17, %s9582_s13  ;;  %4106 = vrot.lane.b32.xlu1 %v4765_v17, %s9583_s14  ;;  %v4616_v57 = vld [vmem:[#allocation2 + $0x121] sm:$0xff] }
 0x393   : > { %v4817_v33 = vld [vmem:[#allocation3 + $0xe8] sm:$0xff]  ;;  %v4489_v48 = vld [vmem:[#allocation2 + $0x128] sm:$0xff]  ;;  %v4661_v50 = vpop.permute.xlu0 %4660 }
 0x394   : > { %vm3724_vm14 = vcmp.gt.f32.partialorder %v3692_v19, 0.0  ;;  %v3756_v58 = vmul.f32 0.01, %v3692_v19  ;;  %v3693_v43 = vadd.f32 %v11089_v49, %v3656_v28  ;;  %9404 = vmatmul.mubr.msk.bf16.gmra.mrb[112].mxu0 %vm253_vm0, %v4817_v33  ;;  %v4617_v37 = vld [vmem:[#allocation2 + $0x129] sm:$0xff]  ;;  %v3961_v22 = vpop.permute.xlu1 %3960  ;;  %v4510_v56 = vpack.c.bf16 %v4489_v48, %v4488_v20  ;;  %4708 = vst.msk [vmem:[#allocation3 + $0x8] sm:$0xff] %vm809_vm5, %v4661_v50 }
 0x395   : > { %v4744_v7 = vld [vmem:[#allocation2 + $0x122] sm:$0xff]  ;;  %v4638_v40 = vpack.c.bf16 %v4617_v37, %v4616_v57  ;;  %v4745_v0 = vld [vmem:[#allocation2 + $0x12a] sm:$0xff]  ;;  %4006 = vst.msk [vmem:[#allocation3 + $0x30] sm:$0xff] %vm551_vm3, %v3961_v22  ;;  %v8997_v46 = vpop.f32.mrb[84].mxu1 }
 0x396   : > { %v3788_v11 = vsel %vm3724_vm14, %v3692_v19, %v3756_v58  ;;  %vm3725_vm15 = vcmp.gt.f32.partialorder %v3693_v43, 0.0  ;;  %v3757_v41 = vmul.f32 0.01, %v3693_v43  ;;  %v4766_v51 = vpack.c.bf16 %v4745_v0, %v4744_v7  ;;  %v8998_v60 = vpop.f32.mrb[85].mxu1  ;;  %4552 = vrot.lane.b32.xlu0 %v4510_v56, %s9583_s14  ;;  %4234 = vrot.lane.b32.xlu1 %v4510_v56, %s9584_s15  ;;  %3888 = vst.msk [vmem:[#allocation3 + $0x120] sm:$0xff] %vm253_vm0, %v4510_v56  ;;  %v9568_v55 = vld [vmem:[%s12287_s1 + $0x1a8] sm:$0xff]  }
 0x397   : > { %3820 = vst.msk [vmem:[#allocation2 + $0x139] sm:$0xff] %vm253_vm0, %v3788_v11  ;;  %4335 = vst.msk [vmem:[#allocation3 + $0x110] sm:$0xff] %vm253_vm0, %v4638_v40  ;;  %v8999_v15 = vadd.f32 %v8998_v60, %v8997_v46  ;;  %v9000_v54 = vpop.f32.mrb[86].mxu1  ;;  %v4407_v38 = vpop.permute.xlu0 %4406 }
 0x398   : > { %v3789_v12 = vsel %vm3725_vm15, %v3693_v43, %v3757_v41  ;;  %4782 = vst.msk [vmem:[#allocation3 + $0x100] sm:$0xff] %vm253_vm0, %v4766_v51  ;;  %v4089_v30 = vpop.permute.xlu1 %4088  ;;  %v9001_v5 = vpop.f32.mrb[87].mxu1  ;;  %v4791_v0 = vld [vmem:[#allocation3 + $0x18] sm:$0xff] }
 0x399   : > { %3821 = vst.msk [vmem:[#allocation2 + $0x141] sm:$0xff] %vm253_vm0, %v3789_v12  ;;  %v3604_v1 = vadd.f32 %v10901_v2, %v8999_v15  ;;  %v9002_v3 = vadd.f32 %v9001_v5, %v9000_v54  ;;  %v4788_v2 = vld [vmem:[#allocation3] sm:$0xff] }
 0x39a   : > { %4453 = vst.msk [vmem:[#allocation3 + $0x20] sm:$0xff] %vm551_vm3, %v4407_v38  ;;  %4680 = vrot.lane.b32.xlu0 %v4638_v40, %s9584_s15  ;;  %3980 = vrot.lane.b32.xlu1 %v4638_v40, %s9582_s13 }
 0x39b   : > { %4134 = vst.msk [vmem:[#allocation3 + $0x30] sm:$0xff] %vm680_vm4, %v4089_v30  ;;  %v3657_v36 = vmul.f32 %v11079_v63, %v3604_v1  ;;  %v3607_v42 = vadd.f32 %v10909_v10, %v9002_v3  ;;  %v4535_v44 = vpop.permute.xlu0 %4534  ;;  %v4789_v61 = vld [vmem:[#allocation3 + $0x8] sm:$0xff] }
 0x39c   : > { %v4217_v53 = vpop.permute.xlu1 %4216  ;;  %4581 = vst.msk [vmem:[#allocation3 + $0x20] sm:$0xff] %vm680_vm4, %v4535_v44  ;;  %5061 = vmatprep.mubr.bf16.mxu1 %v4789_v61 }
 0x39d   : > { %v3694_v26 = vadd.f32 %v11089_v49, %v3657_v36  ;;  %4262 = vst.msk [vmem:[#allocation3 + $0x30] sm:$0xff] %vm809_vm5, %v4217_v53  ;;  %v3658_v34 = vmul.f32 %v11079_v63, %v3607_v42  ;;  %5062 = vmatmul.mubr.bf16.vlgmr.msra.gmra.mrb[96].mxu1 %v4788_v2 }
 0x39e   : > { %4426 = vrot.lane.b32.xlu0 %v4766_v51, %s9582_s13  ;;  %v4490_v14 = vld [vmem:[#allocation2 + $0x138] sm:$0xff]  ;;  %4108 = vrot.lane.b32.xlu1 %v4766_v51, %s9583_s14 }
 0x39f   : > { %v4820_v13 = vld [vmem:[#allocation3 + $0x100] sm:$0xff]  ;;  %v4618_v16 = vld [vmem:[#allocation2 + $0x139] sm:$0xff]  ;;  %vm3726_vm1 = vcmp.gt.f32.partialorder %v3694_v26, 0.0  ;;  %v3758_v10 = vmul.f32 0.01, %v3694_v26  ;;  %v3695_v23 = vadd.f32 %v11089_v49, %v3658_v34  ;;  %v4663_v17 = vpop.permute.xlu0 %4662  ;;  %9457 = vmatpush3.bf16.msra.mxu1 %v9567_v18 }
 0x3a0   : > { %9407 = vmatprep.mubr.msk.bf16.mxu0 %vm253_vm0, %v4820_v13  ;;  %v4491_v32 = vld [vmem:[#allocation2 + $0x140] sm:$0xff]  ;;  %v3963_v24 = vpop.permute.xlu1 %3962  ;;  %4709 = vst.msk [vmem:[#allocation3 + $0x20] sm:$0xff] %vm809_vm5, %v4663_v17  ;;  %9456 = vmatprep.subr.bf16.mxu1 %v9568_v55 }
 0x3a1   : > { %v4619_v62 = vld [vmem:[#allocation2 + $0x141] sm:$0xff]  ;;  %v4511_v27 = vpack.c.bf16 %v4491_v32, %v4490_v14  ;;  %v3790_v29 = vsel %vm3726_vm1, %v3694_v26, %v3758_v10  ;;  %4007 = vst.msk [vmem:[#allocation3 + $0x48] sm:$0xff] %vm551_vm3, %v3963_v24  ;;  %v9003_v25 = vpop.f32.mrb[88].mxu1  ;;  %vm3727_vm2 = vcmp.gt.f32.partialorder %v3695_v23, 0.0  ;;  %v3759_v8 = vmul.f32 0.01, %v3695_v23 }
 0x3a2   : > { %v4746_v59 = vld [vmem:[#allocation2 + $0x13a] sm:$0xff]  ;;  %v4639_v21 = vpack.c.bf16 %v4619_v62, %v4618_v16  ;;  %v4747_v45 = vld [vmem:[#allocation2 + $0x142] sm:$0xff]  ;;  %3822 = vst.msk [vmem:[#allocation2 + $0x151] sm:$0xff] %vm253_vm0, %v3790_v29  ;;  %v9004_v31 = vpop.f32.mrb[89].mxu1 }
 0x3a3   : > { %v4767_v47 = vpack.c.bf16 %v4747_v45, %v4746_v59  ;;  %4554 = vrot.lane.b32.xlu0 %v4511_v27, %s9583_s14  ;;  %3889 = vst.msk [vmem:[#allocation3 + $0x138] sm:$0xff] %vm253_vm0, %v4511_v27  ;;  %v9005_v6 = vadd.f32 %v9004_v31, %v9003_v25  ;;  %4236 = vrot.lane.b32.xlu1 %v4511_v27, %s9584_s15  ;;  %v9006_v19 = vpop.f32.mrb[90].mxu1  ;;  %v4409_v20 = vpop.permute.xlu0 %4408 }
 0x3a4   : > { %4336 = vst.msk [vmem:[#allocation3 + $0x128] sm:$0xff] %vm253_vm0, %v4639_v21  ;;  %v3791_v28 = vsel %vm3727_vm2, %v3695_v23, %v3759_v8  ;;  %v9007_v33 = vpop.f32.mrb[91].mxu1  ;;  %9458 = vmatpush3.bf16.msra.mxu1 %v9568_v55  ;;  %v4091_v43 = vpop.permute.xlu1 %4090 }
 0x3a5   : > { %4783 = vst.msk [vmem:[#allocation3 + $0x118] sm:$0xff] %vm253_vm0, %v4767_v47  ;;  %3823 = vst.msk [vmem:[#allocation2 + $0x159] sm:$0xff] %vm253_vm0, %v3791_v28  ;;  %v3612_v57 = vadd.f32 %v9005_v6, %v10935_v39  ;;  %v9008_v58 = vadd.f32 %v9007_v33, %v9006_v19 }
 0x3a6   : > { %4454 = vst.msk [vmem:[#allocation3 + $0x38] sm:$0xff] %vm551_vm3, %v4409_v20 }
 0x3a7   : > { %4135 = vst.msk [vmem:[#allocation3 + $0x48] sm:$0xff] %vm680_vm4, %v4091_v43  ;;  %4682 = vrot.lane.b32.xlu0 %v4639_v21, %s9584_s15  ;;  %v3659_v48 = vmul.f32 %v11079_v63, %v3612_v57  ;;  %v3615_v37 = vadd.f32 %v9008_v58, %v10943_v9  ;;  %3982 = vrot.lane.b32.xlu1 %v4639_v21, %s9582_s13  ;;  %v4537_v7 = vpop.permute.xlu0 %4536  ;;  %v4792_v50 = vld [vmem:[#allocation3 + $0x20] sm:$0xff]  ;;  %v4794_v21 = vld [vmem:[#allocation3 + $0x30] sm:$0xff] }
 0x3a8   : > { %4582 = vst.msk [vmem:[#allocation3 + $0x38] sm:$0xff] %vm680_vm4, %v4537_v7  ;;  %v4219_v56 = vpop.permute.xlu1 %4218  ;;  %5069 = vmatprep.mubr.bf16.mxu1 %v4792_v50 }
 0x3a9   : > { %v3696_v22 = vadd.f32 %v11089_v49, %v3659_v48  ;;  %v3660_v39 = vmul.f32 %v11079_v63, %v3615_v37  ;;  %v9009_v40 = vpop.f32.mrb[92].mxu1  ;;  %4263 = vst.msk [vmem:[#allocation3 + $0x48] sm:$0xff] %vm809_vm5, %v4219_v56  ;;  %5070 = vmatmul.mubr.bf16.gmra.mrb[100].mxu1 %v4791_v0  ;;  %v4492_v42 = vld [vmem:[#allocation2 + $0x150] sm:$0xff] }
 0x3aa   : > { %v9010_v11 = vpop.f32.mrb[93].mxu1  ;;  %v4620_v44 = vld [vmem:[#allocation2 + $0x151] sm:$0xff] }
 0x3ab   : > { %4428 = vrot.lane.b32.xlu0 %v4767_v47, %s9582_s13  ;;  %vm3728_vm6 = vcmp.gt.f32.partialorder %v3696_v22, 0.0  ;;  %v3760_v9 = vmul.f32 0.01, %v3696_v22  ;;  %v3697_v46 = vadd.f32 %v11089_v49, %v3660_v39  ;;  %v9011_v51 = vadd.f32 %v9010_v11, %v9009_v40  ;;  %4110 = vrot.lane.b32.xlu1 %v4767_v47, %s9583_s14  ;;  %v9012_v60 = vpop.f32.mrb[94].mxu1  ;;  %v4665_v15 = vpop.permute.xlu0 %4664 }
 0x3ac   : > { %v4823_v41 = vld [vmem:[#allocation3 + $0x118] sm:$0xff]  ;;  %v9013_v12 = vpop.f32.mrb[95].mxu1  ;;  %v4493_v54 = vld [vmem:[#allocation2 + $0x158] sm:$0xff]  ;;  %4710 = vst.msk [vmem:[#allocation3 + $0x38] sm:$0xff] %vm809_vm5, %v4665_v15  ;;  %v3965_v36 = vpop.permute.xlu1 %3964 }
 0x3ad   : > { %9408 = vmatmul.mubr.msk.bf16.gmra.mrb[116].mxu0 %vm253_vm0, %v4823_v41  ;;  %v4621_v38 = vld [vmem:[#allocation2 + $0x159] sm:$0xff]  ;;  %v3792_v1 = vsel %vm3728_vm6, %v3696_v22, %v3760_v9  ;;  %vm3729_vm7 = vcmp.gt.f32.partialorder %v3697_v46, 0.0  ;;  %v3761_v5 = vmul.f32 0.01, %v3697_v46  ;;  %v3620_v3 = vadd.f32 %v10931_v52, %v9011_v51  ;;  %4008 = vst.msk [vmem:[#allocation3 + $0x60] sm:$0xff] %vm551_vm3, %v3965_v36 }
 0x3ae   : > { %v4748_v30 = vld [vmem:[#allocation2 + $0x152] sm:$0xff]  ;;  %v4749_v53 = vld [vmem:[#allocation2 + $0x15a] sm:$0xff]  ;;  %3824 = vst.msk [vmem:[#allocation2 + $0x169] sm:$0xff] %vm253_vm0, %v3792_v1  ;;  %v9014_v61 = vadd.f32 %v9013_v12, %v9012_v60  ;;  %v4512_v26 = vpack.c.bf16 %v4493_v54, %v4492_v42  ;;  %v4640_v2 = vpack.c.bf16 %v4621_v38, %v4620_v44 }
 0x3af   : > { %v4768_v34 = vpack.c.bf16 %v4749_v53, %v4748_v30  ;;  %v3793_v13 = vsel %vm3729_vm7, %v3697_v46, %v3761_v5  ;;  %v3661_v14 = vmul.f32 %v11079_v63, %v3620_v3  ;;  %v4411_v16 = vpop.permute.xlu0 %4410  ;;  %v4626_v1 = vld [vmem:[#allocation2 + $0x199] sm:$0xff]  ;;  %v4627_v5 = vld [vmem:[#allocation2 + $0x1a1] sm:$0xff] }
 0x3b0   : > { %3825 = vst.msk [vmem:[#allocation2 + $0x171] sm:$0xff] %vm253_vm0, %v3793_v13  ;;  %v3623_v52 = vadd.f32 %v10939_v4, %v9014_v61  ;;  %4556 = vrot.lane.b32.xlu0 %v4512_v26, %s9583_s14  ;;  %4238 = vrot.lane.b32.xlu1 %v4512_v26, %s9584_s15  ;;  %3890 = vst.msk [vmem:[#allocation3 + $0x150] sm:$0xff] %vm253_vm0, %v4512_v26  ;;  %v4093_v32 = vpop.permute.xlu1 %4092  ;;  %v4797_v50 = vld [vmem:[#allocation3 + $0x48] sm:$0xff]  ;;  %v4643_v36 = vpack.c.bf16 %v4627_v5, %v4626_v1 }
 0x3b1   : > { %4784 = vst.msk [vmem:[#allocation3 + $0x130] sm:$0xff] %vm253_vm0, %v4768_v34  ;;  %4337 = vst.msk [vmem:[#allocation3 + $0x140] sm:$0xff] %vm253_vm0, %v4640_v2  ;;  %v3698_v10 = vadd.f32 %v11089_v49, %v3661_v14 }
 0x3b2   : > { %4455 = vst.msk [vmem:[#allocation3 + $0x50] sm:$0xff] %vm551_vm3, %v4411_v16  ;;  %v3662_v62 = vmul.f32 %v11079_v63, %v3623_v52 }
 0x3b3   : > { %4136 = vst.msk [vmem:[#allocation3 + $0x60] sm:$0xff] %vm680_vm4, %v4093_v32  ;;  %vm3730_vm8 = vcmp.gt.f32.partialorder %v3698_v10, 0.0  ;;  %v3762_v4 = vmul.f32 0.01, %v3698_v10  ;;  %v4539_v23 = vpop.permute.xlu0 %4538  ;;  %v4795_v17 = vld [vmem:[#allocation3 + $0x38] sm:$0xff] }
 0x3b4   : > { %v3699_v59 = vadd.f32 %v11089_v49, %v3662_v62  ;;  %4684 = vrot.lane.b32.xlu0 %v4640_v2, %s9584_s15  ;;  %3984 = vrot.lane.b32.xlu1 %v4640_v2, %s9582_s13  ;;  %4583 = vst.msk [vmem:[#allocation3 + $0x50] sm:$0xff] %vm680_vm4, %v4539_v23  ;;  %v4221_v27 = vpop.permute.xlu1 %4220 }
 0x3b5   : > { %v3794_v24 = vsel %vm3730_vm8, %v3698_v10, %v3762_v4  ;;  %5077 = vmatprep.mubr.bf16.mxu1 %v4795_v17  ;;  %4264 = vst.msk [vmem:[#allocation3 + $0x60] sm:$0xff] %vm809_vm5, %v4221_v27  ;;  %v4494_v49 = vld [vmem:[#allocation2 + $0x168] sm:$0xff] }
 0x3b6   : > { %3826 = vst.msk [vmem:[#allocation2 + $0x181] sm:$0xff] %vm253_vm0, %v3794_v24  ;;  %vm3731_vm9 = vcmp.gt.f32.partialorder %v3699_v59, 0.0  ;;  %v3763_v63 = vmul.f32 0.01, %v3699_v59  ;;  %5078 = vmatmul.mubr.bf16.gmra.mrb[104].mxu1 %v4794_v21  ;;  %v4622_v45 = vld [vmem:[#allocation2 + $0x169] sm:$0xff] }
 0x3b7   : > { %v4495_v29 = vld [vmem:[#allocation2 + $0x170] sm:$0xff]  ;;  %v4667_v55 = vpop.permute.xlu0 %4666 }
 0x3b8   : > { %v4826_v18 = vld [vmem:[#allocation3 + $0x130] sm:$0xff]  ;;  %v4623_v25 = vld [vmem:[#allocation2 + $0x171] sm:$0xff]  ;;  %v3795_v47 = vsel %vm3731_vm9, %v3699_v59, %v3763_v63  ;;  %4430 = vrot.lane.b32.xlu0 %v4768_v34, %s9582_s13  ;;  %v4513_v8 = vpack.c.bf16 %v4495_v29, %v4494_v49  ;;  %4112 = vrot.lane.b32.xlu1 %v4768_v34, %s9583_s14  ;;  %4711 = vst.msk [vmem:[#allocation3 + $0x50] sm:$0xff] %vm809_vm5, %v4667_v55  ;;  %v3967_v28 = vpop.permute.xlu1 %3966 }
 0x3b9   : > { %9411 = vmatprep.mubr.msk.bf16.mxu0 %vm253_vm0, %v4826_v18  ;;  %v4641_v31 = vpack.c.bf16 %v4623_v25, %v4622_v45  ;;  %v4750_v6 = vld [vmem:[#allocation2 + $0x16a] sm:$0xff]  ;;  %v4751_v19 = vld [vmem:[#allocation2 + $0x172] sm:$0xff]  ;;  %3827 = vst.msk [vmem:[#allocation2 + $0x189] sm:$0xff] %vm253_vm0, %v3795_v47 }
 0x3ba   : > { %v4769_v33 = vpack.c.bf16 %v4751_v19, %v4750_v6  ;;  %4009 = vst.msk [vmem:[#allocation3 + $0x78] sm:$0xff] %vm551_vm3, %v3967_v28  ;;  %v5617_v28 = vld [vmem:[#allocation2 + $0x1] sm:$0xff] }
 0x3bb   : > { %3891 = vst.msk [vmem:[#allocation3 + $0x168] sm:$0xff] %vm253_vm0, %v4513_v8  ;;  %4338 = vst.msk [vmem:[#allocation3 + $0x158] sm:$0xff] %vm253_vm0, %v4641_v31  ;;  %v4413_v20 = vpop.permute.xlu0 %4412 }
 0x3bc   : > { %4785 = vst.msk [vmem:[#allocation3 + $0x148] sm:$0xff] %vm253_vm0, %v4769_v33  ;;  %4558 = vrot.lane.b32.xlu0 %v4513_v8, %s9583_s14  ;;  %4240 = vrot.lane.b32.xlu1 %v4513_v8, %s9584_s15  ;;  %v4095_v57 = vpop.permute.xlu1 %4094  ;;  %v4800_v30 = vld [vmem:[#allocation3 + $0x60] sm:$0xff] }
 0x3bd   : > { %4456 = vst.msk [vmem:[#allocation3 + $0x68] sm:$0xff] %vm551_vm3, %v4413_v20  ;;  %v4624_v48 = vld [vmem:[#allocation2 + $0x181] sm:$0xff] }
 0x3be   : > { %4137 = vst.msk [vmem:[#allocation3 + $0x78] sm:$0xff] %vm680_vm4, %v4095_v57  ;;  %v4496_v46 = vld [vmem:[#allocation2 + $0x180] sm:$0xff] }
 0x3bf   : > { %v4541_v58 = vpop.permute.xlu0 %4540  ;;  %v4798_v43 = vld [vmem:[#allocation3 + $0x50] sm:$0xff] }
 0x3c0   : > { %4686 = vrot.lane.b32.xlu0 %v4641_v31, %s9584_s15  ;;  %v4625_v37 = vld [vmem:[#allocation2 + $0x189] sm:$0xff]  ;;  %3986 = vrot.lane.b32.xlu1 %v4641_v31, %s9582_s13  ;;  %4584 = vst.msk [vmem:[#allocation3 + $0x68] sm:$0xff] %vm680_vm4, %v4541_v58  ;;  %v4223_v7 = vpop.permute.xlu1 %4222 }
 0x3c1   : > { %5085 = vmatprep.mubr.bf16.mxu1 %v4798_v43  ;;  %v4642_v22 = vpack.c.bf16 %v4625_v37, %v4624_v48  ;;  %v4370_v39 = vld [vmem:[#allocation2 + $0x182] sm:$0xff]  ;;  %v4371_v56 = vld [vmem:[#allocation2 + $0x18a] sm:$0xff]  ;;  %4265 = vst.msk [vmem:[#allocation3 + $0x78] sm:$0xff] %vm809_vm5, %v4223_v7 }
 0x3c2   : > { %5086 = vmatmul.mubr.bf16.gmra.mrb[108].mxu1 %v4797_v50  ;;  %v4387_v0 = vpack.c.bf16 %v4371_v56, %v4370_v39  ;;  %v4497_v11 = vld [vmem:[#allocation2 + $0x188] sm:$0xff] }
 0x3c3   : > { %v4829_v40 = vld [vmem:[#allocation3 + $0x148] sm:$0xff]  ;;  %4339 = vst.msk [vmem:[#allocation3 + $0x170] sm:$0xff] %vm253_vm0, %v4642_v22  ;;  %v4669_v41 = vpop.permute.xlu0 %4668  ;;  %v4514_v51 = vpack.c.bf16 %v4497_v11, %v4496_v46  ;;  %v5745_v48 = vld [vmem:[#allocation2 + $0x2] sm:$0xff]  ;;  %v5746_v37 = vld [vmem:[#allocation2 + $0xa] sm:$0xff] }
 0x3c4   : > { %9412 = vmatmul.mubr.msk.bf16.gmra.mrb[120].mxu0 %vm253_vm0, %v4829_v40  ;;  %4432 = vrot.lane.b32.xlu0 %v4769_v33, %s9582_s13  ;;  %4786 = vst.msk [vmem:[#allocation3 + $0x160] sm:$0xff] %vm253_vm0, %v4387_v0  ;;  %v3969_v9 = vpop.permute.xlu1 %3968  ;;  %v5777_v50 = vpack.c.bf16 %v5746_v37, %v5745_v48  ;;  %v4835_v48 = vld [vmem:[#allocation3 + $0x178] sm:$0xff]  ;;  %v9541_v37 = vld [vmem:[%s12287_s1 + $0x238] sm:$0xff]  }
 0x3c5   : > { %4114 = vrot.lane.b32.xlu1 %v4769_v33, %s9583_s14  ;;  %4712 = vst.msk [vmem:[#allocation3 + $0x68] sm:$0xff] %vm809_vm5, %v4669_v41  ;;  %v5618_v33 = vld [vmem:[#allocation2 + $0x9] sm:$0xff] }
 0x3c6   : > { %4010 = vst.msk [vmem:[#allocation3 + $0x90] sm:$0xff] %vm551_vm3, %v3969_v9  ;;  %v5649_v20 = vpack.c.bf16 %v5618_v33, %v5617_v28 }
 0x3c7   : > { %v4415_v60 = vpop.permute.xlu0 %4414 }
 0x3c8   : > { %4560 = vrot.lane.b32.xlu0 %v4514_v51, %s9583_s14  ;;  %4457 = vst.msk [vmem:[#allocation3 + $0x80] sm:$0xff] %vm551_vm3, %v4415_v60  ;;  %v4097_v12 = vpop.permute.xlu1 %4096  ;;  %v4803_v34 = vld [vmem:[#allocation3 + $0x78] sm:$0xff] }
 0x3c9   : > { %4242 = vrot.lane.b32.xlu1 %v4514_v51, %s9584_s15  ;;  %4138 = vst.msk [vmem:[#allocation3 + $0x90] sm:$0xff] %vm680_vm4, %v4097_v12 }
 0x3cb   : > { %v4543_v15 = vpop.permute.xlu0 %4542 }
 0x3cc   : > { %4688 = vrot.lane.b32.xlu0 %v4642_v22, %s9584_s15  ;;  %v4801_v54 = vld [vmem:[#allocation3 + $0x68] sm:$0xff]  ;;  %4585 = vst.msk [vmem:[#allocation3 + $0x80] sm:$0xff] %vm680_vm4, %v4543_v15  ;;  %v4225_v38 = vpop.permute.xlu1 %4224 }
 0x3cd   : > { %5093 = vmatprep.mubr.bf16.mxu1 %v4801_v54  ;;  %4266 = vst.msk [vmem:[#allocation3 + $0x90] sm:$0xff] %vm809_vm5, %v4225_v38  ;;  %5681 = vrot.lane.b32.xlu1 %v5649_v20, %s9582_s13 }
 0x3ce   : > { %5094 = vmatmul.mubr.bf16.gmra.mrb[112].mxu1 %v4800_v30 }
 0x3cf   : > { %v4671_v3 = vpop.permute.xlu0 %4670 }
 0x3d0   : > { %4434 = vrot.lane.b32.xlu0 %v4387_v0, %s9582_s13  ;;  %4713 = vst.msk [vmem:[#allocation3 + $0x80] sm:$0xff] %vm809_vm5, %v4671_v3  ;;  %v3971_v42 = vpop.permute.xlu1 %3970 }
 0x3d1   : > { %4011 = vst.msk [vmem:[#allocation3 + $0xa8] sm:$0xff] %vm551_vm3, %v3971_v42  ;;  %5809 = vrot.lane.b32.xlu1 %v5777_v50, %s9583_s14 }
 0x3d3   : > { %v4417_v44 = vpop.permute.xlu0 %4416 }
 0x3d4   : > { %4690 = vrot.lane.b32.xlu0 %v4643_v36, %s9584_s15  ;;  %4458 = vst.msk [vmem:[#allocation3 + $0x98] sm:$0xff] %vm551_vm3, %v4417_v44  ;;  %v4099_v53 = vpop.permute.xlu1 %4098  ;;  %v4806_v4 = vld [vmem:[#allocation3 + $0x90] sm:$0xff] }
 0x3d5   : > { %4139 = vst.msk [vmem:[#allocation3 + $0xa8] sm:$0xff] %vm680_vm4, %v4099_v53 }
 0x3d7   : > { %v4545_v61 = vpop.permute.xlu0 %4544  ;;  %v4804_v26 = vld [vmem:[#allocation3 + $0x80] sm:$0xff] }
 0x3d8   : > { %4586 = vst.msk [vmem:[#allocation3 + $0x98] sm:$0xff] %vm680_vm4, %v4545_v61  ;;  %v4227_v2 = vpop.permute.xlu1 %4226  ;;  %5101 = vmatprep.mubr.bf16.mxu1 %v4804_v26 }
 0x3d9   : > { %4267 = vst.msk [vmem:[#allocation3 + $0xa8] sm:$0xff] %vm809_vm5, %v4227_v2  ;;  %5102 = vmatmul.mubr.bf16.gmra.mrb[116].mxu1 %v4803_v34  ;;  %v9540_v34 = vld [vmem:[%s12287_s1 + $0x230] sm:$0xff]  }
 0x3da   : > { %9419 = vmatprep.subr.bf16.mxu1 %v9540_v34 }
 0x3db   : > { %v4673_v13 = vpop.permute.xlu0 %4672 }
 0x3dc   : > { %4714 = vst.msk [vmem:[#allocation3 + $0x98] sm:$0xff] %vm809_vm5, %v4673_v13  ;;  %v3973_v14 = vpop.permute.xlu1 %3972 }
 0x3dd   : > { %4012 = vst.msk [vmem:[#allocation3 + $0xc0] sm:$0xff] %vm551_vm3, %v3973_v14 }
 0x3df   : > { %v4419_v52 = vpop.permute.xlu0 %4418 }
 0x3e0   : > { %4459 = vst.msk [vmem:[#allocation3 + $0xb0] sm:$0xff] %vm551_vm3, %v4419_v52  ;;  %v4101_v16 = vpop.permute.xlu1 %4100  ;;  %v4809_v49 = vld [vmem:[#allocation3 + $0xa8] sm:$0xff] }
 0x3e1   : > { %4140 = vst.msk [vmem:[#allocation3 + $0xc0] sm:$0xff] %vm680_vm4, %v4101_v16 }
 0x3e3   : > { %v4547_v10 = vpop.permute.xlu0 %4546  ;;  %v4807_v32 = vld [vmem:[#allocation3 + $0x98] sm:$0xff] }
 0x3e4   : > { %4587 = vst.msk [vmem:[#allocation3 + $0xb0] sm:$0xff] %vm680_vm4, %v4547_v10  ;;  %v4229_v62 = vpop.permute.xlu1 %4228  ;;  %5109 = vmatprep.mubr.bf16.mxu1 %v4807_v32 }
 0x3e5   : > { %4268 = vst.msk [vmem:[#allocation3 + $0xc0] sm:$0xff] %vm809_vm5, %v4229_v62  ;;  %5110 = vmatmul.mubr.bf16.gmra.mrb[120].mxu1 %v4806_v4 }
 0x3e7   : > { %v4675_v59 = vpop.permute.xlu0 %4674 }
 0x3e8   : > { %4715 = vst.msk [vmem:[#allocation3 + $0xb0] sm:$0xff] %vm809_vm5, %v4675_v59  ;;  %v3975_v23 = vpop.permute.xlu1 %3974 }
 0x3e9   : > { %4013 = vst.msk [vmem:[#allocation3 + $0xd8] sm:$0xff] %vm551_vm3, %v3975_v23 }
 0x3eb   : > { %v4421_v17 = vpop.permute.xlu0 %4420 }
 0x3ec   : > { %4460 = vst.msk [vmem:[#allocation3 + $0xc8] sm:$0xff] %vm551_vm3, %v4421_v17  ;;  %v4103_v24 = vpop.permute.xlu1 %4102  ;;  %v4812_v31 = vld [vmem:[#allocation3 + $0xc0] sm:$0xff] }
 0x3ed   : > { %4141 = vst.msk [vmem:[#allocation3 + $0xd8] sm:$0xff] %vm680_vm4, %v4103_v24 }
 0x3ef   : > { %v4549_v27 = vpop.permute.xlu0 %4548  ;;  %v4810_v21 = vld [vmem:[#allocation3 + $0xb0] sm:$0xff] }
 0x3f0   : > { %4588 = vst.msk [vmem:[#allocation3 + $0xc8] sm:$0xff] %vm680_vm4, %v4549_v27  ;;  %v4231_v63 = vpop.permute.xlu1 %4230  ;;  %5117 = vmatprep.mubr.bf16.mxu1 %v4810_v21 }
 0x3f1   : > { %4269 = vst.msk [vmem:[#allocation3 + $0xd8] sm:$0xff] %vm809_vm5, %v4231_v63  ;;  %5118 = vmatmul.mubr.bf16.gmra.mrb[124].mxu1 %v4809_v49 }
 0x3f3   : > { %v4677_v45 = vpop.permute.xlu0 %4676 }
 0x3f4   : > { %4716 = vst.msk [vmem:[#allocation3 + $0xc8] sm:$0xff] %vm809_vm5, %v4677_v45  ;;  %v3977_v18 = vpop.permute.xlu1 %3976 }
 0x3f5   : > { %4014 = vst.msk [vmem:[#allocation3 + $0xf0] sm:$0xff] %vm551_vm3, %v3977_v18 }
 0x3f7   : > { %v4423_v29 = vpop.permute.xlu0 %4422 }
 0x3f8   : > { %4461 = vst.msk [vmem:[#allocation3 + $0xe0] sm:$0xff] %vm551_vm3, %v4423_v29  ;;  %v4105_v25 = vpop.permute.xlu1 %4104  ;;  %v4815_v11 = vld [vmem:[#allocation3 + $0xd8] sm:$0xff] }
 0x3f9   : > { %4142 = vst.msk [vmem:[#allocation3 + $0xf0] sm:$0xff] %vm680_vm4, %v4105_v25 }
 0x3fb   : > { %v4813_v55 = vld [vmem:[#allocation3 + $0xc8] sm:$0xff] }
 0x3fc   : > { %v4551_v47 = vpop.permute.xlu0 %4550  ;;  %v4233_v8 = vpop.permute.xlu1 %4232  ;;  %5125 = vmatprep.mubr.bf16.mxu1 %v4813_v55 }
 0x3fd   : > { %4589 = vst.msk [vmem:[#allocation3 + $0xe0] sm:$0xff] %vm680_vm4, %v4551_v47  ;;  %5126 = vmatmul.mubr.bf16.gmra.mrb[128].mxu1 %v4812_v31 }
 0x3fe   : > { %4270 = vst.msk [vmem:[#allocation3 + $0xf0] sm:$0xff] %vm809_vm5, %v4233_v8 }
 0x400   : > { %v4679_v6 = vpop.permute.xlu0 %4678  ;;  %v3979_v19 = vpop.permute.xlu1 %3978 }
 0x401   : > { %4717 = vst.msk [vmem:[#allocation3 + $0xe0] sm:$0xff] %vm809_vm5, %v4679_v6 }
 0x402   : > { %4015 = vst.msk [vmem:[#allocation3 + $0x108] sm:$0xff] %vm551_vm3, %v3979_v19 }
 0x404   : > { %v4425_v57 = vpop.permute.xlu0 %4424  ;;  %v4107_v58 = vpop.permute.xlu1 %4106 }
 0x405   : > { %4462 = vst.msk [vmem:[#allocation3 + $0xf8] sm:$0xff] %vm551_vm3, %v4425_v57  ;;  %v11253_v43 = vpop.f32.mrb[96].mxu0  ;;  %v4818_v54 = vld [vmem:[#allocation3 + $0xf0] sm:$0xff] }
 0x406   : > { %4143 = vst.msk [vmem:[#allocation3 + $0x108] sm:$0xff] %vm680_vm4, %v4107_v58  ;;  %v11255_v7 = vpop.f32.mrb[97].mxu0  ;;  %v4832_v58 = vld [vmem:[#allocation3 + $0x160] sm:$0xff] }
 0x407   : > { %v11257_v22 = vpop.f32.mrb[98].mxu0 }
 0x408   : > { %v4553_v39 = vpop.permute.xlu0 %4552  ;;  %v4816_v56 = vld [vmem:[#allocation3 + $0xe0] sm:$0xff]  ;;  %v11259_v40 = vpop.f32.mrb[99].mxu0 }
 0x409   : > { %4590 = vst.msk [vmem:[#allocation3 + $0xf8] sm:$0xff] %vm680_vm4, %v4553_v39  ;;  %v4235_v0 = vpop.permute.xlu1 %4234  ;;  %5133 = vmatprep.mubr.bf16.mxu1 %v4816_v56 }
 0x40a   : > { %4271 = vst.msk [vmem:[#allocation3 + $0x108] sm:$0xff] %vm809_vm5, %v4235_v0  ;;  %5134 = vmatmul.mubr.bf16.gmra.mrb[132].mxu1 %v4815_v11 }
 0x40c   : > { %v4681_v41 = vpop.permute.xlu0 %4680 }
 0x40d   : > { %4718 = vst.msk [vmem:[#allocation3 + $0xf8] sm:$0xff] %vm809_vm5, %v4681_v41  ;;  %v3981_v9 = vpop.permute.xlu1 %3980 }
 0x40e   : > { %4016 = vst.msk [vmem:[#allocation3 + $0x120] sm:$0xff] %vm551_vm3, %v3981_v9 }
 0x410   : > { %v4427_v46 = vpop.permute.xlu0 %4426 }
 0x411   : > { %4463 = vst.msk [vmem:[#allocation3 + $0x110] sm:$0xff] %vm551_vm3, %v4427_v46  ;;  %v4109_v51 = vpop.permute.xlu1 %4108  ;;  %v4821_v61 = vld [vmem:[#allocation3 + $0x108] sm:$0xff] }
 0x412   : > { %4144 = vst.msk [vmem:[#allocation3 + $0x120] sm:$0xff] %vm680_vm4, %v4109_v51  ;;  %v11336_v51 = vld [vmem:[%s12288_s2 + $0x2] ss:$0 sm:$0xff] }
 0x414   : > { %v4819_v12 = vld [vmem:[#allocation3 + $0xf8] sm:$0xff] }
 0x415   : > { %v4555_v60 = vpop.permute.xlu0 %4554  ;;  %v4237_v15 = vpop.permute.xlu1 %4236  ;;  %5141 = vmatprep.mubr.bf16.mxu1 %v4819_v12 }
 0x416   : > { %4591 = vst.msk [vmem:[#allocation3 + $0x110] sm:$0xff] %vm680_vm4, %v4555_v60  ;;  %5142 = vmatmul.mubr.bf16.gmra.mrb[136].mxu1 %v4818_v54  ;;  %v11342_v54 = vld [vmem:[%s12289_s3 + $0x2] ss:$0 sm:$0xff] }
 0x417   : > { %4272 = vst.msk [vmem:[#allocation3 + $0x120] sm:$0xff] %vm809_vm5, %v4237_v15 }
 0x419   : > { %v4683_v38 = vpop.permute.xlu0 %4682  ;;  %v3983_v30 = vpop.permute.xlu1 %3982 }
 0x41a   : > { %4719 = vst.msk [vmem:[#allocation3 + $0x110] sm:$0xff] %vm809_vm5, %v4683_v38 }
 0x41b   : > { %4017 = vst.msk [vmem:[#allocation3 + $0x138] sm:$0xff] %vm551_vm3, %v3983_v30 }
 0x41d   : > { %v4429_v1 = vpop.permute.xlu0 %4428  ;;  %v4111_v5 = vpop.permute.xlu1 %4110 }
 0x41e   : > { %4464 = vst.msk [vmem:[#allocation3 + $0x128] sm:$0xff] %vm551_vm3, %v4429_v1  ;;  %v11274_v3 = vpop.f32.mrb[100].mxu0  ;;  %v4824_v4 = vld [vmem:[#allocation3 + $0x120] sm:$0xff] }
 0x41f   : > { %4145 = vst.msk [vmem:[#allocation3 + $0x138] sm:$0xff] %vm680_vm4, %v4111_v5  ;;  %v11276_v36 = vpop.f32.mrb[101].mxu0  ;;  %v9542_v5 = vld [vmem:[%s12287_s1 + $0x1f0] sm:$0xff]  }
 0x420   : > { %v11278_v42 = vpop.f32.mrb[102].mxu0  ;;  %9163 = vmatprep.subr.bf16.mxu0 %v9542_v5 }
 0x421   : > { %v4822_v44 = vld [vmem:[#allocation3 + $0x110] sm:$0xff]  ;;  %v11280_v53 = vpop.f32.mrb[103].mxu0 }
 0x422   : > { %5149 = vmatprep.mubr.bf16.mxu1 %v4822_v44  ;;  %v4557_v26 = vpop.permute.xlu0 %4556  ;;  %v4239_v2 = vpop.permute.xlu1 %4238  ;;  %v5553_v44 = vld [vmem:[#allocation2] sm:$0xff] }
 0x423   : > { %5150 = vmatmul.mubr.bf16.gmra.mrb[140].mxu1 %v4821_v61  ;;  %4592 = vst.msk [vmem:[#allocation3 + $0x128] sm:$0xff] %vm680_vm4, %v4557_v26  ;;  %v5554_v61 = vld [vmem:[#allocation2 + $0x8] sm:$0xff] }
 0x424   : > { %4273 = vst.msk [vmem:[#allocation3 + $0x138] sm:$0xff] %vm809_vm5, %v4239_v2 }
 0x426   : > { %v4685_v13 = vpop.permute.xlu0 %4684  ;;  %v3985_v14 = vpop.permute.xlu1 %3984 }
 0x427   : > { %4720 = vst.msk [vmem:[#allocation3 + $0x128] sm:$0xff] %vm809_vm5, %v4685_v13 }
 0x428   : > { %4018 = vst.msk [vmem:[#allocation3 + $0x150] sm:$0xff] %vm551_vm3, %v3985_v14  ;;  %v9544_v14 = vld [vmem:[%s12287_s1 + $0x1f8] sm:$0xff]  }
 0x42a   : > { %v4431_v52 = vpop.permute.xlu0 %4430  ;;  %v4113_v16 = vpop.permute.xlu1 %4112 }
 0x42b   : > { %4465 = vst.msk [vmem:[#allocation3 + $0x140] sm:$0xff] %vm551_vm3, %v4431_v52  ;;  %v4827_v25 = vld [vmem:[#allocation3 + $0x138] sm:$0xff] }
 0x42c   : > { %4146 = vst.msk [vmem:[#allocation3 + $0x150] sm:$0xff] %vm680_vm4, %v4113_v16  ;;  %v9545_v16 = vld [vmem:[%s12287_s1 + $0x1b8] sm:$0xff]  }
 0x42e   : > { %v4559_v10 = vpop.permute.xlu0 %4558  ;;  %v4825_v32 = vld [vmem:[#allocation3 + $0x128] sm:$0xff]  ;;  %v4241_v62 = vpop.permute.xlu1 %4240 }
 0x42f   : > { %4593 = vst.msk [vmem:[#allocation3 + $0x140] sm:$0xff] %vm680_vm4, %v4559_v10  ;;  %5157 = vmatprep.mubr.bf16.mxu1 %v4825_v32 }
 0x430   : > { %4274 = vst.msk [vmem:[#allocation3 + $0x150] sm:$0xff] %vm809_vm5, %v4241_v62  ;;  %5158 = vmatmul.mubr.bf16.gmra.mrb[144].mxu1 %v4824_v4 }
 0x432   : > { %v4687_v59 = vpop.permute.xlu0 %4686  ;;  %v3987_v23 = vpop.permute.xlu1 %3986 }
 0x433   : > { %4721 = vst.msk [vmem:[#allocation3 + $0x140] sm:$0xff] %vm809_vm5, %v4687_v59 }
 0x434   : > { %4019 = vst.msk [vmem:[#allocation3 + $0x168] sm:$0xff] %vm551_vm3, %v3987_v23 }
 0x435   : > { %v11295_v24 = vpop.f32.mrb[104].mxu0 }
 0x436   : > { %v4433_v17 = vpop.permute.xlu0 %4432  ;;  %v11298_v21 = vpop.f32.mrb[105].mxu0 }
 0x437   : > { %4466 = vst.msk [vmem:[#allocation3 + $0x158] sm:$0xff] %vm551_vm3, %v4433_v17  ;;  %v4115_v27 = vpop.permute.xlu1 %4114  ;;  %v11301_v63 = vpop.f32.mrb[106].mxu0  ;;  %v4830_v6 = vld [vmem:[#allocation3 + $0x150] sm:$0xff] }
 0x438   : > { %4147 = vst.msk [vmem:[#allocation3 + $0x168] sm:$0xff] %vm680_vm4, %v4115_v27  ;;  %v11303_v49 = vpop.f32.mrb[107].mxu0 }
 0x43a   : > { %v4561_v45 = vpop.permute.xlu0 %4560  ;;  %v4828_v18 = vld [vmem:[#allocation3 + $0x140] sm:$0xff] }
 0x43b   : > { %4594 = vst.msk [vmem:[#allocation3 + $0x158] sm:$0xff] %vm680_vm4, %v4561_v45  ;;  %v4243_v29 = vpop.permute.xlu1 %4242  ;;  %5165 = vmatprep.mubr.bf16.mxu1 %v4828_v18  ;;  %v9546_v18 = vld [vmem:[%s12287_s1 + $0x200] sm:$0xff]  }
 0x43c   : > { %4275 = vst.msk [vmem:[#allocation3 + $0x168] sm:$0xff] %vm809_vm5, %v4243_v29  ;;  %5166 = vmatmul.mubr.bf16.gmra.mrb[148].mxu1 %v4827_v25 }
 0x43e   : > { %v4689_v47 = vpop.permute.xlu0 %4688 }
 0x43f   : > { %4722 = vst.msk [vmem:[#allocation3 + $0x158] sm:$0xff] %vm809_vm5, %v4689_v47  ;;  %v5682_v1 = vpop.permute.xlu1 %5681  ;;  %v9547_v47 = vld [vmem:[%s12287_s1 + $0x1c0] sm:$0xff]  }
 0x442   : > { %v4435_v55 = vpop.permute.xlu0 %4434 }
 0x443   : > { %4467 = vst.msk [vmem:[#allocation3 + $0x170] sm:$0xff] %vm551_vm3, %v4435_v55  ;;  %v4833_v33 = vld [vmem:[#allocation3 + $0x168] sm:$0xff]  ;;  %v5810_v52 = vpop.permute.xlu1 %5809 }
 0x444   : > { %4595 = vst.msk [vmem:[#allocation3 + $0x170] sm:$0xff] %vm680_vm4, %v11064_v35 }
 0x446   : > { %v4691_v8 = vpop.permute.xlu0 %4690  ;;  %v4831_v31 = vld [vmem:[#allocation3 + $0x158] sm:$0xff] }
 0x447   : > { %4723 = vst.msk [vmem:[#allocation3 + $0x170] sm:$0xff] %vm809_vm5, %v4691_v8  ;;  %5173 = vmatprep.mubr.bf16.mxu1 %v4831_v31 }
 0x448   : > { %5174 = vmatmul.mubr.bf16.gmra.mrb[152].mxu1 %v4830_v6 }
 0x44d   : > { %v11312_v28 = vpop.f32.mrb[108].mxu0 }
 0x44e   : > { %v4834_v19 = vld [vmem:[#allocation3 + $0x170] sm:$0xff]  ;;  %v11314_v20 = vpop.f32.mrb[109].mxu0 }
 0x44f   : > { %5181 = vmatprep.mubr.bf16.mxu1 %v4834_v19  ;;  %v11316_v57 = vpop.f32.mrb[110].mxu0 }
 0x450   : > { %5182 = vmatmul.mubr.bf16.gmra.mrb[156].mxu1 %v4833_v33  ;;  %v11319_v35 = vpop.f32.mrb[111].mxu0  ;;  %v9548_v33 = vld [vmem:[%s12287_s1 + $0x208] sm:$0xff]  }
 0x451   : > { %9415 = vmatprep.mubr.msk.bf16.mxu1 %vm253_vm0, %v4832_v58  ;;  %v9549_v58 = vld [vmem:[%s12287_s1 + $0x1c8] sm:$0xff]  }
 0x458   : > { %9416 = vmatmul.mubr.msk.bf16.vlgmr.msra.gmra.mrb[160].mxu1 %vm253_vm0, %v4835_v48 }
 0x459   : > { %9420 = vmatpush3.bf16.msra.mxu1 %v9540_v34  ;;  %v5585_v34 = vpack.c.bf16 %v5554_v61, %v5553_v44 }
 0x45a   : > { %9421 = vmatprep.subr.bf16.mxu1 %v9541_v37 }
 0x45b   : > { %5601 = vst.msk [vmem:[#allocation3] sm:$0xff] %vm253_vm0, %v5585_v34 }
 0x45c   : > { %5729 = vst.msk [vmem:[#allocation3] sm:$0xff] %vm551_vm3, %v5682_v1  ;;  %v9550_v1 = vld [vmem:[%s12287_s1 + $0x210] sm:$0xff]  }
 0x45d   : > { %9422 = vmatpush3.bf16.msra.mxu1 %v9541_v37  ;;  %5857 = vst.msk [vmem:[#allocation3] sm:$0xff] %vm680_vm4, %v5810_v52 }
 0x467   : > { %v11325_v50 = vpop.f32.mrb[112].mxu0 }
 0x468   : > { %v11327_v39 = vpop.f32.mrb[113].mxu0 }
 0x469   : > { %v11329_v56 = vpop.f32.mrb[114].mxu0 }
 0x46a   : > { %v11331_v0 = vpop.f32.mrb[115].mxu0 }
 0x470   : > { %v9049_v11 = vpop.f32.mrb[96].mxu1 }
 0x471   : > { %v9050_v41 = vpop.f32.mrb[97].mxu1 }
 0x472   : > { %v9051_v9 = vadd.f32 %v9050_v41, %v9049_v11  ;;  %v9052_v46 = vpop.f32.mrb[98].mxu1 }
 0x473   : > { %v9053_v60 = vpop.f32.mrb[99].mxu1 }
 0x474   : > { %v5225_v12 = vadd.f32 %v9051_v9, %v11255_v7  ;;  %v9054_v15 = vadd.f32 %v9053_v60, %v9052_v46  ;;  %v9543_v7 = vld [vmem:[%s12287_s1 + $0x1b0] sm:$0xff]  }
 0x475   : > { %9164 = vmatpush3.bf16.msra.mxu0 %v9543_v7 }
 0x476   : > { %v5356_v38 = vmul.f32 %v11336_v51, %v5225_v12  ;;  %v5228_v30 = vadd.f32 %v9054_v15, %v11259_v40  ;;  %9165 = vmatprep.subr.bf16.mxu0 %v9544_v14 }
 0x478   : > { %v5393_v26 = vadd.f32 %v11342_v54, %v5356_v38  ;;  %v5357_v2 = vmul.f32 %v11336_v51, %v5228_v30 }
 0x479   : > { %9166 = vmatpush3.bf16.msra.mxu0 %v9545_v16  ;;  %v9552_v16 = vld [vmem:[%s12287_s1 + $0x218] sm:$0xff]  }
 0x47a   : > { %vm5425_vm10 = vcmp.gt.f32.partialorder %v5393_v26, 0.0  ;;  %v5457_v40 = vmul.f32 0.01, %v5393_v26  ;;  %v5394_v13 = vadd.f32 %v11342_v54, %v5357_v2  ;;  %9167 = vmatprep.subr.bf16.mxu0 %v9546_v18  ;;  %v9551_v2 = vld [vmem:[%s12287_s1 + $0x1d0] sm:$0xff]   ;;  %v9555_v18 = vld [vmem:[%s12287_s1 + $0x1e0] sm:$0xff]  }
 0x47c   : > { %v5489_v10 = vsel %vm5425_vm10, %v5393_v26, %v5457_v40  ;;  %vm5426_vm11 = vcmp.gt.f32.partialorder %v5394_v13, 0.0  ;;  %v5458_v32 = vmul.f32 0.01, %v5394_v13  ;;  %v9055_v62 = vpop.f32.mrb[100].mxu1 }
 0x47d   : > { %5521 = vst.msk [vmem:[#allocation2 + $0x19] sm:$0xff] %vm253_vm0, %v5489_v10  ;;  %v9056_v59 = vpop.f32.mrb[101].mxu1  ;;  %9168 = vmatpush3.bf16.msra.mxu0 %v9547_v47 }
 0x47e   : > { %v5490_v23 = vsel %vm5426_vm11, %v5394_v13, %v5458_v32  ;;  %v9057_v17 = vadd.f32 %v9056_v59, %v9055_v62  ;;  %v9058_v45 = vpop.f32.mrb[102].mxu1  ;;  %9169 = vmatprep.subr.bf16.mxu0 %v9548_v33  ;;  %v9553_v32 = vld [vmem:[%s12287_s1 + $0x1d8] sm:$0xff]  }
 0x47f   : > { %5522 = vst.msk [vmem:[#allocation2 + $0x21] sm:$0xff] %vm253_vm0, %v5490_v23  ;;  %v9059_v25 = vpop.f32.mrb[103].mxu1 }
 0x480   : > { %v11365_v4 = vpop.f32.mrb[116].mxu0  ;;  %v5233_v55 = vadd.f32 %v11253_v43, %v9057_v17  ;;  %v9060_v8 = vadd.f32 %v9059_v25, %v9058_v45  ;;  %v9554_v45 = vld [vmem:[%s12287_s1 + $0x220] sm:$0xff]  }
 0x481   : > { %v11367_v27 = vpop.f32.mrb[117].mxu0  ;;  %9170 = vmatpush3.bf16.msra.mxu0 %v9549_v58 }
 0x482   : > { %v11373_v29 = vpop.f32.mrb[118].mxu0  ;;  %v5358_v6 = vmul.f32 %v11336_v51, %v5233_v55  ;;  %v5236_v19 = vadd.f32 %v11257_v22, %v9060_v8  ;;  %9171 = vmatprep.subr.bf16.mxu0 %v9550_v1 }
 0x483   : > { %v11379_v31 = vpop.f32.mrb[119].mxu0 }
 0x484   : > { %v5395_v48 = vadd.f32 %v11342_v54, %v5358_v6  ;;  %v5359_v43 = vmul.f32 %v11336_v51, %v5236_v19  ;;  %v5873_v37 = vld [vmem:[#allocation2 + $0x18] sm:$0xff] }
 0x485   : > { %v5619_v11 = vld [vmem:[#allocation2 + $0x19] sm:$0xff]  ;;  %9172 = vmatpush3.bf16.msra.mxu0 %v9551_v2 }
 0x486   : > { %vm5427_vm12 = vcmp.gt.f32.partialorder %v5395_v48, 0.0  ;;  %v5459_v41 = vmul.f32 0.01, %v5395_v48  ;;  %v5396_v22 = vadd.f32 %v11342_v54, %v5359_v43  ;;  %v6065_v9 = vld [vmem:[#allocation2 + $0x1a] sm:$0xff]  ;;  %v6066_v46 = vld [vmem:[#allocation2 + $0x22] sm:$0xff]  ;;  %9173 = vmatprep.subr.bf16.mxu0 %v9552_v16 }
 0x487   : > { %v5874_v60 = vld [vmem:[#allocation2 + $0x20] sm:$0xff]  ;;  %v6097_v12 = vpack.c.bf16 %v6066_v46, %v6065_v9  ;;  %v5555_v26 = vld [vmem:[#allocation2 + $0x18] sm:$0xff] }
 0x488   : > { %v5905_v15 = vpack.c.bf16 %v5874_v60, %v5873_v37  ;;  %v5620_v38 = vld [vmem:[#allocation2 + $0x21] sm:$0xff]  ;;  %v5491_v5 = vsel %vm5427_vm12, %v5395_v48, %v5459_v41  ;;  %vm5428_vm13 = vcmp.gt.f32.partialorder %v5396_v22, 0.0  ;;  %v5460_v44 = vmul.f32 0.01, %v5396_v22 }
 0x489   : > { %v5556_v30 = vld [vmem:[#allocation2 + $0x20] sm:$0xff]  ;;  %v9061_v61 = vpop.f32.mrb[104].mxu1  ;;  %v5650_v7 = vpack.c.bf16 %v5620_v38, %v5619_v11  ;;  %5523 = vst.msk [vmem:[#allocation2 + $0x31] sm:$0xff] %vm253_vm0, %v5491_v5  ;;  %6129 = vrot.lane.b32.xlu0 %v6097_v12, %s9582_s13  ;;  %9174 = vmatpush3.bf16.msra.mxu0 %v9553_v32  ;;  %v9556_v60 = vld [vmem:[%s12287_s1 + $0x228] sm:$0xff]  }
 0x48a   : > { %v9062_v34 = vpop.f32.mrb[105].mxu1  ;;  %5937 = vrot.lane.b32.xlu1 %v5905_v15, %s9584_s15  ;;  %v5586_v40 = vpack.c.bf16 %v5556_v30, %v5555_v26  ;;  %v5492_v13 = vsel %vm5428_vm13, %v5396_v22, %v5460_v44  ;;  %9175 = vmatprep.subr.bf16.mxu0 %v9554_v45 }
 0x48b   : > { %v9063_v14 = vadd.f32 %v9062_v34, %v9061_v61  ;;  %v9064_v52 = vpop.f32.mrb[106].mxu1  ;;  %6049 = vst.msk [vmem:[#allocation3 + $0x8] sm:$0xff] %vm253_vm0, %v5650_v7  ;;  %5524 = vst.msk [vmem:[#allocation2 + $0x39] sm:$0xff] %vm253_vm0, %v5492_v13 }
 0x48c   : > { %v9065_v10 = vpop.f32.mrb[107].mxu1  ;;  %5602 = vst.msk [vmem:[#allocation3 + $0x18] sm:$0xff] %vm253_vm0, %v5586_v40 }
 0x48d   : > { %v5241_v62 = vadd.f32 %v9063_v14, %v11276_v36  ;;  %v9066_v59 = vadd.f32 %v9065_v10, %v9064_v52  ;;  %9176 = vmatpush3.bf16.msra.mxu0 %v9555_v18 }
 0x48e   : > { %5683 = vrot.lane.b32.xlu1 %v5650_v7, %s9582_s13  ;;  %9177 = vmatprep.subr.bf16.mxu0 %v9556_v60 }
 0x48f   : > { %v5360_v23 = vmul.f32 %v11336_v51, %v5241_v62  ;;  %v5244_v17 = vadd.f32 %v9066_v59, %v11280_v53 }
 0x490   : > { %v6193_v47 = vld [vmem:[#allocation2 + $0x30] sm:$0xff] }
 0x491   : > { %v5397_v25 = vadd.f32 %v11342_v54, %v5360_v23  ;;  %v5361_v36 = vmul.f32 %v11336_v51, %v5244_v17  ;;  %v5557_v33 = vld [vmem:[#allocation2 + $0x30] sm:$0xff] }
 0x492   : > { %5811 = vrot.lane.b32.xlu1 %v6097_v12, %s9583_s14  ;;  %v6194_v8 = vld [vmem:[#allocation2 + $0x38] sm:$0xff]  ;;  %v9557_v12 = vld [vmem:[%s12287_s1 + $0x1e8] sm:$0xff]  }
 0x493   : > { %vm5429_vm14 = vcmp.gt.f32.partialorder %v5397_v25, 0.0  ;;  %v5461_v55 = vmul.f32 0.01, %v5397_v25  ;;  %v5398_v53 = vadd.f32 %v11342_v54, %v5361_v36  ;;  %v6322_v6 = vld [vmem:[#allocation2 + $0x39] sm:$0xff]  ;;  %v6003_v58 = vld [vmem:[#allocation2 + $0x31] sm:$0xff]  ;;  %v6225_v48 = vpack.c.bf16 %v6194_v8, %v6193_v47  ;;  %9178 = vmatpush3.bf16.msra.mxu0 %v9557_v12 }
 0x494   : > { %v6067_v19 = vld [vmem:[#allocation2 + $0x32] sm:$0xff]  ;;  %v6068_v43 = vld [vmem:[#allocation2 + $0x3a] sm:$0xff] }
 0x495   : > { %v5558_v37 = vld [vmem:[#allocation2 + $0x38] sm:$0xff]  ;;  %v5493_v41 = vsel %vm5429_vm14, %v5397_v25, %v5461_v55  ;;  %vm5430_vm15 = vcmp.gt.f32.partialorder %v5398_v53, 0.0  ;;  %v5462_v22 = vmul.f32 0.01, %v5398_v53  ;;  %v9067_v9 = vpop.f32.mrb[108].mxu1  ;;  %v6098_v46 = vpack.c.bf16 %v6068_v43, %v6067_v19  ;;  %6257 = vrot.lane.b32.xlu0 %v6225_v48, %s9583_s14 }
 0x496   : > { %v6004_v11 = vld [vmem:[#allocation2 + $0x39] sm:$0xff]  ;;  %5525 = vst.msk [vmem:[#allocation2 + $0x49] sm:$0xff] %vm253_vm0, %v5493_v41  ;;  %5939 = vrot.lane.b32.xlu1 %v6225_v48, %s9584_s15  ;;  %v9068_v38 = vpop.f32.mrb[109].mxu1  ;;  %v5587_v30 = vpack.c.bf16 %v5558_v37, %v5557_v33  ;;  %v6321_v26 = vld [vmem:[#allocation2 + $0x31] sm:$0xff] }
 0x497   : > { %v11431_v15 = vpop.f32.mrb[120].mxu0  ;;  %v6034_v1 = vpack.c.bf16 %v6004_v11, %v6003_v58  ;;  %v5494_v5 = vsel %vm5430_vm15, %v5398_v53, %v5462_v22  ;;  %v9069_v61 = vadd.f32 %v9068_v38, %v9067_v9  ;;  %v9070_v7 = vpop.f32.mrb[110].mxu1  ;;  %6497 = vst.msk [vmem:[#allocation3 + $0x10] sm:$0xff] %vm253_vm0, %v6098_v46  ;;  %v6353_v40 = vpack.c.bf16 %v6322_v6, %v6321_v26 }
 0x498   : > { %v11435_v44 = vpop.f32.mrb[121].mxu0  ;;  %5526 = vst.msk [vmem:[#allocation2 + $0x51] sm:$0xff] %vm253_vm0, %v5494_v5  ;;  %v9071_v34 = vpop.f32.mrb[111].mxu1  ;;  %5603 = vst.msk [vmem:[#allocation3 + $0x30] sm:$0xff] %vm253_vm0, %v5587_v30 }
 0x499   : > { %v11439_v2 = vpop.f32.mrb[122].mxu0  ;;  %6050 = vst.msk [vmem:[#allocation3 + $0x20] sm:$0xff] %vm253_vm0, %v6034_v1  ;;  %v5249_v13 = vadd.f32 %v11274_v3, %v9069_v61  ;;  %v9072_v14 = vadd.f32 %v9071_v34, %v9070_v7  ;;  %6385 = vrot.lane.b32.xlu0 %v6353_v40, %s9584_s15 }
 0x49a   : > { %v11444_v52 = vpop.f32.mrb[123].mxu0  ;;  %5685 = vrot.lane.b32.xlu1 %v6353_v40, %s9582_s13 }
 0x49b   : > { %v5362_v16 = vmul.f32 %v11336_v51, %v5249_v13  ;;  %v5252_v10 = vadd.f32 %v11278_v42, %v9072_v14 }
 0x49d   : > { %v5399_v32 = vadd.f32 %v11342_v54, %v5362_v16  ;;  %v5363_v62 = vmul.f32 %v11336_v51, %v5252_v10  ;;  %6131 = vrot.lane.b32.xlu0 %v6098_v46, %s9582_s13  ;;  %v6195_v59 = vld [vmem:[#allocation2 + $0x48] sm:$0xff] }
 0x49e   : > { %5813 = vrot.lane.b32.xlu1 %v6098_v46, %s9583_s14  ;;  %v6515_v3 = vld [vmem:[#allocation3 + $0x10] sm:$0xff]  ;;  %v5559_v25 = vld [vmem:[#allocation2 + $0x48] sm:$0xff] }
 0x49f   : > { %vm5431_vm1 = vcmp.gt.f32.partialorder %v5399_v32, 0.0  ;;  %v5463_v23 = vmul.f32 0.01, %v5399_v32  ;;  %v5400_v17 = vadd.f32 %v11342_v54, %v5363_v62  ;;  %9423 = vmatprep.mubr.msk.bf16.mxu1 %vm253_vm0, %v6515_v3  ;;  %v6196_v45 = vld [vmem:[#allocation2 + $0x50] sm:$0xff] }
 0x4a0   : > { %v6069_v18 = vld [vmem:[#allocation2 + $0x4a] sm:$0xff]  ;;  %v6226_v42 = vpack.c.bf16 %v6196_v45, %v6195_v59  ;;  %v6070_v36 = vld [vmem:[#allocation2 + $0x52] sm:$0xff] }
 0x4a1   : > { %v5560_v47 = vld [vmem:[#allocation2 + $0x50] sm:$0xff]  ;;  %v5495_v53 = vsel %vm5431_vm1, %v5399_v32, %v5463_v23  ;;  %vm5432_vm2 = vcmp.gt.f32.partialorder %v5400_v17, 0.0  ;;  %v5464_v8 = vmul.f32 0.01, %v5400_v17  ;;  %v9073_v6 = vpop.f32.mrb[112].mxu1  ;;  %v6099_v33 = vpack.c.bf16 %v6070_v36, %v6069_v18 }
 0x4a2   : > { %v6006_v55 = vld [vmem:[#allocation2 + $0x51] sm:$0xff]  ;;  %v6005_v58 = vld [vmem:[#allocation2 + $0x49] sm:$0xff]  ;;  %5527 = vst.msk [vmem:[#allocation2 + $0x61] sm:$0xff] %vm253_vm0, %v5495_v53  ;;  %6259 = vrot.lane.b32.xlu0 %v6226_v42, %s9583_s14  ;;  %5941 = vrot.lane.b32.xlu1 %v6226_v42, %s9584_s15  ;;  %v9074_v48 = vpop.f32.mrb[113].mxu1  ;;  %v5588_v43 = vpack.c.bf16 %v5560_v47, %v5559_v25 }
 0x4a3   : > { %v6324_v19 = vld [vmem:[#allocation2 + $0x51] sm:$0xff]  ;;  %v6035_v37 = vpack.c.bf16 %v6006_v55, %v6005_v58  ;;  %v5496_v11 = vsel %vm5432_vm2, %v5400_v17, %v5464_v8  ;;  %v9075_v41 = vadd.f32 %v9074_v48, %v9073_v6  ;;  %v9076_v22 = vpop.f32.mrb[114].mxu1  ;;  %v6323_v9 = vld [vmem:[#allocation2 + $0x49] sm:$0xff]  ;;  %6498 = vst.msk [vmem:[#allocation3 + $0x28] sm:$0xff] %vm253_vm0, %v6099_v33 }
 0x4a4   : > { %5528 = vst.msk [vmem:[#allocation2 + $0x69] sm:$0xff] %vm253_vm0, %v5496_v11  ;;  %v9077_v46 = vpop.f32.mrb[115].mxu1  ;;  %v6354_v60 = vpack.c.bf16 %v6324_v19, %v6323_v9  ;;  %5604 = vst.msk [vmem:[#allocation3 + $0x48] sm:$0xff] %vm253_vm0, %v5588_v43 }
 0x4a5   : > { %6051 = vst.msk [vmem:[#allocation3 + $0x38] sm:$0xff] %vm253_vm0, %v6035_v37  ;;  %v5257_v12 = vadd.f32 %v9075_v41, %v11298_v21  ;;  %v9078_v38 = vadd.f32 %v9077_v46, %v9076_v22 }
 0x4a6   : > { %6387 = vrot.lane.b32.xlu0 %v6354_v60, %s9584_s15  ;;  %5687 = vrot.lane.b32.xlu1 %v6354_v60, %s9582_s13 }
 0x4a7   : > { %v5364_v30 = vmul.f32 %v11336_v51, %v5257_v12  ;;  %v5260_v1 = vadd.f32 %v9078_v38, %v11303_v49 }
 0x4a9   : > { %v5401_v5 = vadd.f32 %v11342_v54, %v5364_v30  ;;  %v5365_v61 = vmul.f32 %v11336_v51, %v5260_v1  ;;  %v6197_v26 = vld [vmem:[#allocation2 + $0x60] sm:$0xff] }
 0x4aa   : > { %6133 = vrot.lane.b32.xlu0 %v6099_v33, %s9582_s13  ;;  %5815 = vrot.lane.b32.xlu1 %v6099_v33, %s9583_s14  ;;  %v6518_v7 = vld [vmem:[#allocation3 + $0x28] sm:$0xff]  ;;  %v5561_v14 = vld [vmem:[#allocation2 + $0x60] sm:$0xff] }
 0x4ab   : > { %vm5433_vm6 = vcmp.gt.f32.partialorder %v5401_v5, 0.0  ;;  %v5465_v21 = vmul.f32 0.01, %v5401_v5  ;;  %v5402_v34 = vadd.f32 %v11342_v54, %v5365_v61  ;;  %9424 = vmatmul.mubr.msk.bf16.vlgmr.msra.gmra.mrb[164].mxu1 %vm253_vm0, %v6518_v7  ;;  %v6198_v40 = vld [vmem:[#allocation2 + $0x68] sm:$0xff] }
 0x4ac   : > { %v6453_v13 = vld [vmem:[#allocation2 + $0x62] sm:$0xff]  ;;  %v6227_v49 = vpack.c.bf16 %v6198_v40, %v6197_v26  ;;  %v6454_v16 = vld [vmem:[#allocation2 + $0x6a] sm:$0xff]  ;;  %v9079_v59 = vpop.f32.mrb[116].mxu1 }
 0x4ad   : > { %v5562_v10 = vld [vmem:[#allocation2 + $0x68] sm:$0xff]  ;;  %v5497_v62 = vsel %vm5433_vm6, %v5401_v5, %v5465_v21  ;;  %vm5434_vm7 = vcmp.gt.f32.partialorder %v5402_v34, 0.0  ;;  %v5466_v3 = vmul.f32 0.01, %v5402_v34  ;;  %v6483_v17 = vpack.c.bf16 %v6454_v16, %v6453_v13  ;;  %v9080_v18 = vpop.f32.mrb[117].mxu1 }
 0x4ae   : > { %v6008_v32 = vld [vmem:[#allocation2 + $0x69] sm:$0xff]  ;;  %v6007_v45 = vld [vmem:[#allocation2 + $0x61] sm:$0xff]  ;;  %5529 = vst.msk [vmem:[#allocation2 + $0x79] sm:$0xff] %vm253_vm0, %v5497_v62  ;;  %6261 = vrot.lane.b32.xlu0 %v6227_v49, %s9583_s14  ;;  %5943 = vrot.lane.b32.xlu1 %v6227_v49, %s9584_s15  ;;  %v5589_v25 = vpack.c.bf16 %v5562_v10, %v5561_v14  ;;  %v9081_v47 = vadd.f32 %v9080_v18, %v9079_v59  ;;  %v9082_v55 = vpop.f32.mrb[118].mxu1 }
 0x4af   : > { %v6326_v23 = vld [vmem:[#allocation2 + $0x69] sm:$0xff]  ;;  %v6036_v42 = vpack.c.bf16 %v6008_v32, %v6007_v45  ;;  %v5498_v36 = vsel %vm5434_vm7, %v5402_v34, %v5466_v3  ;;  %v6325_v53 = vld [vmem:[#allocation2 + $0x61] sm:$0xff]  ;;  %6499 = vst.msk [vmem:[#allocation3 + $0x40] sm:$0xff] %vm253_vm0, %v6483_v17  ;;  %v9083_v8 = vpop.f32.mrb[119].mxu1 }
 0x4b0   : > { %5530 = vst.msk [vmem:[#allocation2 + $0x81] sm:$0xff] %vm253_vm0, %v5498_v36  ;;  %v6355_v6 = vpack.c.bf16 %v6326_v23, %v6325_v53  ;;  %5605 = vst.msk [vmem:[#allocation3 + $0x60] sm:$0xff] %vm253_vm0, %v5589_v25  ;;  %v5265_v19 = vadd.f32 %v11295_v24, %v9081_v47  ;;  %v9084_v33 = vadd.f32 %v9083_v8, %v9082_v55 }
 0x4b1   : > { %6052 = vst.msk [vmem:[#allocation3 + $0x50] sm:$0xff] %vm253_vm0, %v6036_v42 }
 0x4b2   : > { %6389 = vrot.lane.b32.xlu0 %v6355_v6, %s9584_s15  ;;  %5689 = vrot.lane.b32.xlu1 %v6355_v6, %s9582_s13  ;;  %v5366_v58 = vmul.f32 %v11336_v51, %v5265_v19  ;;  %v5268_v48 = vadd.f32 %v11301_v63, %v9084_v33 }
 0x4b4   : > { %v5403_v43 = vadd.f32 %v11342_v54, %v5366_v58  ;;  %v5367_v37 = vmul.f32 %v11336_v51, %v5268_v48 }
 0x4b5   : > { %v6199_v41 = vld [vmem:[#allocation2 + $0x78] sm:$0xff] }
 0x4b6   : > { %v6521_v11 = vld [vmem:[#allocation3 + $0x40] sm:$0xff]  ;;  %6135 = vrot.lane.b32.xlu0 %v6483_v17, %s9582_s13  ;;  %5817 = vrot.lane.b32.xlu1 %v6483_v17, %s9583_s14  ;;  %vm5435_vm8 = vcmp.gt.f32.partialorder %v5403_v43, 0.0  ;;  %v5467_v24 = vmul.f32 0.01, %v5403_v43  ;;  %v5404_v22 = vadd.f32 %v11342_v54, %v5367_v37  ;;  %v5563_v60 = vld [vmem:[#allocation2 + $0x78] sm:$0xff] }
 0x4b7   : > { %9427 = vmatprep.mubr.msk.bf16.mxu1 %vm253_vm0, %v6521_v11  ;;  %v6200_v9 = vld [vmem:[#allocation2 + $0x80] sm:$0xff] }
 0x4b8   : > { %v6455_v46 = vld [vmem:[#allocation2 + $0x7a] sm:$0xff]  ;;  %v6228_v63 = vpack.c.bf16 %v6200_v9, %v6199_v41  ;;  %v6456_v12 = vld [vmem:[#allocation2 + $0x82] sm:$0xff]  ;;  %v5499_v1 = vsel %vm5435_vm8, %v5403_v43, %v5467_v24  ;;  %vm5436_vm9 = vcmp.gt.f32.partialorder %v5404_v22, 0.0  ;;  %v5468_v5 = vmul.f32 0.01, %v5404_v22  ;;  %v9085_v61 = vpop.f32.mrb[120].mxu1 }
 0x4b9   : > { %v5564_v38 = vld [vmem:[#allocation2 + $0x80] sm:$0xff]  ;;  %v6484_v26 = vpack.c.bf16 %v6456_v12, %v6455_v46  ;;  %5531 = vst.msk [vmem:[#allocation2 + $0x91] sm:$0xff] %vm253_vm0, %v5499_v1  ;;  %v9086_v34 = vpop.f32.mrb[121].mxu1 }
 0x4ba   : > { %v6010_v30 = vld [vmem:[#allocation2 + $0x81] sm:$0xff]  ;;  %v6009_v21 = vld [vmem:[#allocation2 + $0x79] sm:$0xff]  ;;  %6263 = vrot.lane.b32.xlu0 %v6228_v63, %s9583_s14  ;;  %5945 = vrot.lane.b32.xlu1 %v6228_v63, %s9584_s15  ;;  %v5590_v40 = vpack.c.bf16 %v5564_v38, %v5563_v60  ;;  %v5500_v14 = vsel %vm5436_vm9, %v5404_v22, %v5468_v5  ;;  %v9087_v49 = vadd.f32 %v9086_v34, %v9085_v61  ;;  %v9088_v16 = vpop.f32.mrb[122].mxu1 }
 0x4bb   : > { %v6328_v7 = vld [vmem:[#allocation2 + $0x81] sm:$0xff]  ;;  %v6037_v13 = vpack.c.bf16 %v6010_v30, %v6009_v21  ;;  %v6327_v10 = vld [vmem:[#allocation2 + $0x79] sm:$0xff]  ;;  %6500 = vst.msk [vmem:[#allocation3 + $0x58] sm:$0xff] %vm253_vm0, %v6484_v26  ;;  %5532 = vst.msk [vmem:[#allocation2 + $0x99] sm:$0xff] %vm253_vm0, %v5500_v14  ;;  %v9089_v32 = vpop.f32.mrb[123].mxu1 }
 0x4bc   : > { %v6356_v62 = vpack.c.bf16 %v6328_v7, %v6327_v10  ;;  %5606 = vst.msk [vmem:[#allocation3 + $0x78] sm:$0xff] %vm253_vm0, %v5590_v40  ;;  %v5273_v3 = vadd.f32 %v9087_v49, %v11314_v20  ;;  %v9090_v59 = vadd.f32 %v9089_v32, %v9088_v16 }
 0x4bd   : > { %6053 = vst.msk [vmem:[#allocation3 + $0x68] sm:$0xff] %vm253_vm0, %v6037_v13 }
 0x4be   : > { %6391 = vrot.lane.b32.xlu0 %v6356_v62, %s9584_s15  ;;  %5691 = vrot.lane.b32.xlu1 %v6356_v62, %s9582_s13  ;;  %v5368_v23 = vmul.f32 %v11336_v51, %v5273_v3  ;;  %v5276_v17 = vadd.f32 %v9090_v59, %v11319_v35 }
 0x4c0   : > { %v5405_v45 = vadd.f32 %v11342_v54, %v5368_v23  ;;  %v5369_v18 = vmul.f32 %v11336_v51, %v5276_v17  ;;  %v6201_v42 = vld [vmem:[#allocation2 + $0x90] sm:$0xff] }
 0x4c1   : > { %v5565_v53 = vld [vmem:[#allocation2 + $0x90] sm:$0xff] }
 0x4c2   : > { %v6524_v25 = vld [vmem:[#allocation3 + $0x58] sm:$0xff]  ;;  %6137 = vrot.lane.b32.xlu0 %v6484_v26, %s9582_s13  ;;  %5819 = vrot.lane.b32.xlu1 %v6484_v26, %s9583_s14  ;;  %vm5437_vm10 = vcmp.gt.f32.partialorder %v5405_v45, 0.0  ;;  %v5469_v20 = vmul.f32 0.01, %v5405_v45  ;;  %v5406_v36 = vadd.f32 %v11342_v54, %v5369_v18  ;;  %v6202_v47 = vld [vmem:[#allocation2 + $0x98] sm:$0xff] }
 0x4c3   : > { %9428 = vmatmul.mubr.msk.bf16.gmra.mrb[168].mxu1 %vm253_vm0, %v6524_v25  ;;  %v6457_v55 = vld [vmem:[#allocation2 + $0x92] sm:$0xff]  ;;  %v6229_v35 = vpack.c.bf16 %v6202_v47, %v6201_v42  ;;  %v6458_v8 = vld [vmem:[#allocation2 + $0x9a] sm:$0xff] }
 0x4c4   : > { %v5566_v6 = vld [vmem:[#allocation2 + $0x98] sm:$0xff]  ;;  %v5501_v33 = vsel %vm5437_vm10, %v5405_v45, %v5469_v20  ;;  %vm5438_vm11 = vcmp.gt.f32.partialorder %v5406_v36, 0.0  ;;  %v5470_v58 = vmul.f32 0.01, %v5406_v36  ;;  %v9091_v48 = vpop.f32.mrb[124].mxu1  ;;  %v6485_v37 = vpack.c.bf16 %v6458_v8, %v6457_v55 }
 0x4c5   : > { %v6012_v19 = vld [vmem:[#allocation2 + $0x99] sm:$0xff]  ;;  %v6011_v11 = vld [vmem:[#allocation2 + $0x91] sm:$0xff]  ;;  %5533 = vst.msk [vmem:[#allocation2 + $0xa9] sm:$0xff] %vm253_vm0, %v5501_v33  ;;  %v9092_v41 = vpop.f32.mrb[125].mxu1  ;;  %v5591_v24 = vpack.c.bf16 %v5566_v6, %v5565_v53 }
 0x4c6   : > { %v6330_v43 = vld [vmem:[#allocation2 + $0x99] sm:$0xff]  ;;  %6265 = vrot.lane.b32.xlu0 %v6229_v35, %s9583_s14  ;;  %5947 = vrot.lane.b32.xlu1 %v6229_v35, %s9584_s15  ;;  %v6038_v22 = vpack.c.bf16 %v6012_v19, %v6011_v11  ;;  %v5502_v9 = vsel %vm5438_vm11, %v5406_v36, %v5470_v58  ;;  %v9093_v46 = vadd.f32 %v9092_v41, %v9091_v48  ;;  %v9094_v60 = vpop.f32.mrb[126].mxu1  ;;  %v6329_v63 = vld [vmem:[#allocation2 + $0x91] sm:$0xff] }
 0x4c7   : > { %6501 = vst.msk [vmem:[#allocation3 + $0x70] sm:$0xff] %vm253_vm0, %v6485_v37  ;;  %5534 = vst.msk [vmem:[#allocation2 + $0xb1] sm:$0xff] %vm253_vm0, %v5502_v9  ;;  %v9095_v12 = vpop.f32.mrb[127].mxu1  ;;  %v6357_v38 = vpack.c.bf16 %v6330_v43, %v6329_v63 }
 0x4c8   : > { %5607 = vst.msk [vmem:[#allocation3 + $0x90] sm:$0xff] %vm253_vm0, %v5591_v24  ;;  %6054 = vst.msk [vmem:[#allocation3 + $0x80] sm:$0xff] %vm253_vm0, %v6038_v22  ;;  %v5281_v30 = vadd.f32 %v11312_v28, %v9093_v46  ;;  %v9096_v1 = vadd.f32 %v9095_v12, %v9094_v60 }
 0x4ca   : > { %6393 = vrot.lane.b32.xlu0 %v6357_v38, %s9584_s15  ;;  %5693 = vrot.lane.b32.xlu1 %v6357_v38, %s9582_s13  ;;  %v5370_v5 = vmul.f32 %v11336_v51, %v5281_v30  ;;  %v5284_v61 = vadd.f32 %v11316_v57, %v9096_v1 }
 0x4cc   : > { %v5407_v7 = vadd.f32 %v11342_v54, %v5370_v5  ;;  %v5371_v26 = vmul.f32 %v11336_v51, %v5284_v61  ;;  %v6203_v34 = vld [vmem:[#allocation2 + $0xa8] sm:$0xff] }
 0x4cd   : > { %v5567_v49 = vld [vmem:[#allocation2 + $0xa8] sm:$0xff] }
 0x4ce   : > { %v6527_v21 = vld [vmem:[#allocation3 + $0x70] sm:$0xff]  ;;  %6139 = vrot.lane.b32.xlu0 %v6485_v37, %s9582_s13  ;;  %5821 = vrot.lane.b32.xlu1 %v6485_v37, %s9583_s14  ;;  %vm5439_vm12 = vcmp.gt.f32.partialorder %v5407_v7, 0.0  ;;  %v5471_v28 = vmul.f32 0.01, %v5407_v7  ;;  %v5408_v40 = vadd.f32 %v11342_v54, %v5371_v26  ;;  %v6204_v13 = vld [vmem:[#allocation2 + $0xb0] sm:$0xff] }
 0x4cf   : > { %9431 = vmatprep.mubr.msk.bf16.mxu1 %vm253_vm0, %v6527_v21  ;;  %v6459_v14 = vld [vmem:[#allocation2 + $0xaa] sm:$0xff]  ;;  %v6230_v57 = vpack.c.bf16 %v6204_v13, %v6203_v34  ;;  %v6460_v16 = vld [vmem:[#allocation2 + $0xb2] sm:$0xff] }
 0x4d0   : > { %v5568_v10 = vld [vmem:[#allocation2 + $0xb0] sm:$0xff]  ;;  %v5503_v62 = vsel %vm5439_vm12, %v5407_v7, %v5471_v28  ;;  %vm5440_vm13 = vcmp.gt.f32.partialorder %v5408_v40, 0.0  ;;  %v5472_v3 = vmul.f32 0.01, %v5408_v40  ;;  %v9097_v59 = vpop.f32.mrb[128].mxu1  ;;  %v6486_v17 = vpack.c.bf16 %v6460_v16, %v6459_v14 }
 0x4d1   : > { %v6014_v32 = vld [vmem:[#allocation2 + $0xb1] sm:$0xff]  ;;  %v6013_v45 = vld [vmem:[#allocation2 + $0xa9] sm:$0xff]  ;;  %5535 = vst.msk [vmem:[#allocation2 + $0xc1] sm:$0xff] %vm253_vm0, %v5503_v62  ;;  %v9098_v18 = vpop.f32.mrb[129].mxu1  ;;  %v5592_v25 = vpack.c.bf16 %v5568_v10, %v5567_v49 }
 0x4d2   : > { %v6332_v23 = vld [vmem:[#allocation2 + $0xb1] sm:$0xff]  ;;  %6267 = vrot.lane.b32.xlu0 %v6230_v57, %s9583_s14  ;;  %5949 = vrot.lane.b32.xlu1 %v6230_v57, %s9584_s15  ;;  %v6039_v42 = vpack.c.bf16 %v6014_v32, %v6013_v45  ;;  %v5504_v20 = vsel %vm5440_vm13, %v5408_v40, %v5472_v3  ;;  %v9099_v36 = vadd.f32 %v9098_v18, %v9097_v59  ;;  %v9100_v47 = vpop.f32.mrb[130].mxu1  ;;  %v6331_v55 = vld [vmem:[#allocation2 + $0xa9] sm:$0xff] }
 0x4d3   : > { %6502 = vst.msk [vmem:[#allocation3 + $0x88] sm:$0xff] %vm253_vm0, %v6486_v17  ;;  %5536 = vst.msk [vmem:[#allocation2 + $0xc9] sm:$0xff] %vm253_vm0, %v5504_v20  ;;  %v9101_v53 = vpop.f32.mrb[131].mxu1  ;;  %v6358_v35 = vpack.c.bf16 %v6332_v23, %v6331_v55 }
 0x4d4   : > { %5608 = vst.msk [vmem:[#allocation3 + $0xa8] sm:$0xff] %vm253_vm0, %v5592_v25  ;;  %6055 = vst.msk [vmem:[#allocation3 + $0x98] sm:$0xff] %vm253_vm0, %v6039_v42  ;;  %v5289_v8 = vadd.f32 %v9099_v36, %v11327_v39  ;;  %v9102_v6 = vadd.f32 %v9101_v53, %v9100_v47 }
 0x4d6   : > { %6395 = vrot.lane.b32.xlu0 %v6358_v35, %s9584_s15  ;;  %5695 = vrot.lane.b32.xlu1 %v6358_v35, %s9582_s13  ;;  %v5372_v19 = vmul.f32 %v11336_v51, %v5289_v8  ;;  %v5292_v33 = vadd.f32 %v9102_v6, %v11331_v0 }
 0x4d8   : > { %v5409_v58 = vadd.f32 %v11342_v54, %v5372_v19  ;;  %v5373_v48 = vmul.f32 %v11336_v51, %v5292_v33  ;;  %v6205_v37 = vld [vmem:[#allocation2 + $0xc0] sm:$0xff] }
 0x4d9   : > { %v5569_v22 = vld [vmem:[#allocation2 + $0xc0] sm:$0xff] }
 0x4da   : > { %v6530_v43 = vld [vmem:[#allocation3 + $0x88] sm:$0xff]  ;;  %6141 = vrot.lane.b32.xlu0 %v6486_v17, %s9582_s13  ;;  %5823 = vrot.lane.b32.xlu1 %v6486_v17, %s9583_s14  ;;  %vm5441_vm14 = vcmp.gt.f32.partialorder %v5409_v58, 0.0  ;;  %v5473_v39 = vmul.f32 0.01, %v5409_v58  ;;  %v5410_v11 = vadd.f32 %v11342_v54, %v5373_v48  ;;  %v6206_v41 = vld [vmem:[#allocation2 + $0xc8] sm:$0xff] }
 0x4db   : > { %9432 = vmatmul.mubr.msk.bf16.gmra.mrb[172].mxu1 %vm253_vm0, %v6530_v43  ;;  %v6461_v24 = vld [vmem:[#allocation2 + $0xc2] sm:$0xff]  ;;  %v6231_v0 = vpack.c.bf16 %v6206_v41, %v6205_v37  ;;  %v6462_v9 = vld [vmem:[#allocation2 + $0xca] sm:$0xff] }
 0x4dc   : > { %v5570_v46 = vld [vmem:[#allocation2 + $0xc8] sm:$0xff]  ;;  %v5505_v63 = vsel %vm5441_vm14, %v5409_v58, %v5473_v39  ;;  %vm5442_vm15 = vcmp.gt.f32.partialorder %v5410_v11, 0.0  ;;  %v5474_v12 = vmul.f32 0.01, %v5410_v11  ;;  %v6487_v1 = vpack.c.bf16 %v6462_v9, %v6461_v24 }
 0x4dd   : > { %v6016_v60 = vld [vmem:[#allocation2 + $0xc9] sm:$0xff]  ;;  %v9103_v38 = vpop.f32.mrb[132].mxu1  ;;  %v6015_v5 = vld [vmem:[#allocation2 + $0xc1] sm:$0xff]  ;;  %5537 = vst.msk [vmem:[#allocation2 + $0xd9] sm:$0xff] %vm253_vm0, %v5505_v63  ;;  %v5593_v7 = vpack.c.bf16 %v5570_v46, %v5569_v22 }
 0x4de   : > { %v6334_v30 = vld [vmem:[#allocation2 + $0xc9] sm:$0xff]  ;;  %v9104_v61 = vpop.f32.mrb[133].mxu1  ;;  %6269 = vrot.lane.b32.xlu0 %v6231_v0, %s9583_s14  ;;  %5951 = vrot.lane.b32.xlu1 %v6231_v0, %s9584_s15  ;;  %v6040_v26 = vpack.c.bf16 %v6016_v60, %v6015_v5  ;;  %v5506_v21 = vsel %vm5442_vm15, %v5410_v11, %v5474_v12  ;;  %v6333_v40 = vld [vmem:[#allocation2 + $0xc1] sm:$0xff]  ;;  %6503 = vst.msk [vmem:[#allocation3 + $0xa0] sm:$0xff] %vm253_vm0, %v6487_v1 }
 0x4df   : > { %v9105_v34 = vadd.f32 %v9104_v61, %v9103_v38  ;;  %v9106_v28 = vpop.f32.mrb[134].mxu1  ;;  %5538 = vst.msk [vmem:[#allocation2 + $0xe1] sm:$0xff] %vm253_vm0, %v5506_v21  ;;  %v6359_v14 = vpack.c.bf16 %v6334_v30, %v6333_v40  ;;  %5609 = vst.msk [vmem:[#allocation3 + $0xc0] sm:$0xff] %vm253_vm0, %v5593_v7 }
 0x4e0   : > { %v9107_v13 = vpop.f32.mrb[135].mxu1  ;;  %6056 = vst.msk [vmem:[#allocation3 + $0xb0] sm:$0xff] %vm253_vm0, %v6040_v26 }
 0x4e1   : > { %v5297_v49 = vadd.f32 %v11325_v50, %v9105_v34  ;;  %v9108_v57 = vadd.f32 %v9107_v13, %v9106_v28 }
 0x4e2   : > { %6397 = vrot.lane.b32.xlu0 %v6359_v14, %s9584_s15  ;;  %5697 = vrot.lane.b32.xlu1 %v6359_v14, %s9582_s13 }
 0x4e3   : > { %v5374_v16 = vmul.f32 %v11336_v51, %v5297_v49  ;;  %v5300_v10 = vadd.f32 %v11329_v56, %v9108_v57 }
 0x4e4   : > { %v6207_v59 = vld [vmem:[#allocation2 + $0xd8] sm:$0xff] }
 0x4e5   : > { %v5411_v32 = vadd.f32 %v11342_v54, %v5374_v16  ;;  %v5375_v62 = vmul.f32 %v11336_v51, %v5300_v10  ;;  %v6533_v3 = vld [vmem:[#allocation3 + $0xa0] sm:$0xff]  ;;  %v5571_v18 = vld [vmem:[#allocation2 + $0xd8] sm:$0xff] }
 0x4e6   : > { %6143 = vrot.lane.b32.xlu0 %v6487_v1, %s9582_s13  ;;  %5825 = vrot.lane.b32.xlu1 %v6487_v1, %s9583_s14  ;;  %v6208_v17 = vld [vmem:[#allocation2 + $0xe0] sm:$0xff] }
 0x4e7   : > { %vm5443_vm1 = vcmp.gt.f32.partialorder %v5411_v32, 0.0  ;;  %v5475_v50 = vmul.f32 0.01, %v5411_v32  ;;  %v5412_v23 = vadd.f32 %v11342_v54, %v5375_v62  ;;  %9435 = vmatprep.mubr.msk.bf16.mxu1 %vm253_vm0, %v6533_v3  ;;  %v6463_v45 = vld [vmem:[#allocation2 + $0xda] sm:$0xff]  ;;  %v6232_v56 = vpack.c.bf16 %v6208_v17, %v6207_v59  ;;  %v6464_v25 = vld [vmem:[#allocation2 + $0xe2] sm:$0xff] }
 0x4e8   : > { %v5572_v42 = vld [vmem:[#allocation2 + $0xe0] sm:$0xff]  ;;  %v6488_v35 = vpack.c.bf16 %v6464_v25, %v6463_v45 }
 0x4e9   : > { %v6018_v20 = vld [vmem:[#allocation2 + $0xe1] sm:$0xff]  ;;  %v5507_v36 = vsel %vm5443_vm1, %v5411_v32, %v5475_v50  ;;  %vm5444_vm2 = vcmp.gt.f32.partialorder %v5412_v23, 0.0  ;;  %v5476_v47 = vmul.f32 0.01, %v5412_v23  ;;  %v9109_v55 = vpop.f32.mrb[136].mxu1  ;;  %v6017_v8 = vld [vmem:[#allocation2 + $0xd9] sm:$0xff]  ;;  %v5594_v19 = vpack.c.bf16 %v5572_v42, %v5571_v18 }
 0x4ea   : > { %v6336_v53 = vld [vmem:[#allocation2 + $0xe1] sm:$0xff]  ;;  %5539 = vst.msk [vmem:[#allocation2 + $0xf1] sm:$0xff] %vm253_vm0, %v5507_v36  ;;  %v9110_v6 = vpop.f32.mrb[137].mxu1  ;;  %6271 = vrot.lane.b32.xlu0 %v6232_v56, %s9583_s14  ;;  %5953 = vrot.lane.b32.xlu1 %v6232_v56, %s9584_s15  ;;  %v6041_v33 = vpack.c.bf16 %v6018_v20, %v6017_v8  ;;  %v6335_v37 = vld [vmem:[#allocation2 + $0xd9] sm:$0xff]  ;;  %6504 = vst.msk [vmem:[#allocation3 + $0xb8] sm:$0xff] %vm253_vm0, %v6488_v35 }
 0x4eb   : > { %v5508_v58 = vsel %vm5444_vm2, %v5412_v23, %v5476_v47  ;;  %v9111_v48 = vadd.f32 %v9110_v6, %v9109_v55  ;;  %v9112_v43 = vpop.f32.mrb[138].mxu1  ;;  %v6360_v11 = vpack.c.bf16 %v6336_v53, %v6335_v37  ;;  %5610 = vst.msk [vmem:[#allocation3 + $0xd8] sm:$0xff] %vm253_vm0, %v5594_v19  ;;  %v11595_v50 = vld [vmem:[%s12288_s2 + $0x2] ss:$0 sm:$0xff] }
 0x4ec   : > { %5540 = vst.msk [vmem:[#allocation2 + $0xf9] sm:$0xff] %vm253_vm0, %v5508_v58  ;;  %v9113_v39 = vpop.f32.mrb[139].mxu1  ;;  %6057 = vst.msk [vmem:[#allocation3 + $0xc8] sm:$0xff] %vm253_vm0, %v6041_v33 }
 0x4ed   : > { %v5305_v41 = vadd.f32 %v9111_v48, %v11367_v27  ;;  %v9114_v24 = vadd.f32 %v9113_v39, %v9112_v43 }
 0x4ee   : > { %6399 = vrot.lane.b32.xlu0 %v6360_v11, %s9584_s15  ;;  %5699 = vrot.lane.b32.xlu1 %v6360_v11, %s9582_s13 }
 0x4ef   : > { %v5376_v22 = vmul.f32 %v11336_v51, %v5305_v41  ;;  %v5308_v0 = vadd.f32 %v9114_v24, %v11379_v31 }
 0x4f1   : > { %v5413_v9 = vadd.f32 %v11342_v54, %v5376_v22  ;;  %v5377_v46 = vmul.f32 %v11336_v51, %v5308_v0  ;;  %v6536_v60 = vld [vmem:[#allocation3 + $0xb8] sm:$0xff]  ;;  %v6209_v63 = vld [vmem:[#allocation2 + $0xf0] sm:$0xff] }
 0x4f2   : > { %6145 = vrot.lane.b32.xlu0 %v6488_v35, %s9582_s13  ;;  %5827 = vrot.lane.b32.xlu1 %v6488_v35, %s9583_s14  ;;  %v5573_v1 = vld [vmem:[#allocation2 + $0xf0] sm:$0xff] }
 0x4f3   : > { %vm5445_vm6 = vcmp.gt.f32.partialorder %v5413_v9, 0.0  ;;  %v5477_v27 = vmul.f32 0.01, %v5413_v9  ;;  %v5414_v12 = vadd.f32 %v11342_v54, %v5377_v46  ;;  %9436 = vmatmul.mubr.msk.bf16.gmra.mrb[176].mxu1 %vm253_vm0, %v6536_v60  ;;  %v6210_v38 = vld [vmem:[#allocation2 + $0xf8] sm:$0xff] }
 0x4f4   : > { %v6465_v30 = vld [vmem:[#allocation2 + $0xf2] sm:$0xff]  ;;  %v6233_v31 = vpack.c.bf16 %v6210_v38, %v6209_v63  ;;  %v6466_v5 = vld [vmem:[#allocation2 + $0xfa] sm:$0xff] }
 0x4f5   : > { %v5574_v61 = vld [vmem:[#allocation2 + $0xf8] sm:$0xff]  ;;  %v5509_v51 = vsel %vm5445_vm6, %v5413_v9, %v5477_v27  ;;  %vm5446_vm7 = vcmp.gt.f32.partialorder %v5414_v12, 0.0  ;;  %v5478_v26 = vmul.f32 0.01, %v5414_v12  ;;  %v6489_v28 = vpack.c.bf16 %v6466_v5, %v6465_v30 }
 0x4f6   : > { %v6020_v7 = vld [vmem:[#allocation2 + $0xf9] sm:$0xff]  ;;  %v9115_v21 = vpop.f32.mrb[140].mxu1  ;;  %v6019_v40 = vld [vmem:[#allocation2 + $0xf1] sm:$0xff]  ;;  %5541 = vst.msk [vmem:[#allocation2 + $0x109] sm:$0xff] %vm253_vm0, %v5509_v51  ;;  %6273 = vrot.lane.b32.xlu0 %v6233_v31, %s9583_s14  ;;  %5955 = vrot.lane.b32.xlu1 %v6233_v31, %s9584_s15  ;;  %v5595_v54 = vpack.c.bf16 %v5574_v61, %v5573_v1 }
 0x4f7   : > { %v6338_v34 = vld [vmem:[#allocation2 + $0xf9] sm:$0xff]  ;;  %v9116_v13 = vpop.f32.mrb[141].mxu1  ;;  %v6042_v14 = vpack.c.bf16 %v6020_v7, %v6019_v40  ;;  %v5510_v49 = vsel %vm5446_vm7, %v5414_v12, %v5478_v26  ;;  %v6337_v10 = vld [vmem:[#allocation2 + $0xf1] sm:$0xff]  ;;  %6505 = vst.msk [vmem:[#allocation3 + $0xd0] sm:$0xff] %vm253_vm0, %v6489_v28 }
 0x4f8   : > { %v9117_v57 = vadd.f32 %v9116_v13, %v9115_v21  ;;  %v9118_v16 = vpop.f32.mrb[142].mxu1  ;;  %5542 = vst.msk [vmem:[#allocation2 + $0x111] sm:$0xff] %vm253_vm0, %v5510_v49  ;;  %v6361_v62 = vpack.c.bf16 %v6338_v34, %v6337_v10  ;;  %5611 = vst.msk [vmem:[#allocation3 + $0xf0] sm:$0xff] %vm253_vm0, %v5595_v54 }
 0x4f9   : > { %v9119_v32 = vpop.f32.mrb[143].mxu1  ;;  %6058 = vst.msk [vmem:[#allocation3 + $0xe0] sm:$0xff] %vm253_vm0, %v6042_v14 }
 0x4fa   : > { %v5313_v3 = vadd.f32 %v11365_v4, %v9117_v57  ;;  %v9120_v59 = vadd.f32 %v9119_v32, %v9118_v16  ;;  %6401 = vrot.lane.b32.xlu0 %v6361_v62, %s9584_s15  ;;  %5701 = vrot.lane.b32.xlu1 %v6361_v62, %s9582_s13  ;;  %v11602_v4 = vld [vmem:[%s12289_s3 + $0x2] ss:$0 sm:$0xff] }
 0x4fb   : > { %v6130_v45 = vpop.permute.xlu0 %6129 }
 0x4fc   : > { %v5378_v23 = vmul.f32 %v11595_v50, %v5313_v3  ;;  %v5316_v17 = vadd.f32 %v11373_v29, %v9120_v59  ;;  %v5938_v18 = vpop.permute.xlu1 %5937  ;;  %6177 = vst.msk [vmem:[#allocation3 + $0x8] sm:$0xff] %vm551_vm3, %v6130_v45 }
 0x4fd   : > { %5985 = vst.msk [vmem:[#allocation3] sm:$0xff] %vm809_vm5, %v5938_v18  ;;  %v6211_v29 = vld [vmem:[#allocation2 + $0x108] sm:$0xff] }
 0x4fe   : > { %v5415_v56 = vadd.f32 %v11602_v4, %v5378_v23  ;;  %v5379_v25 = vmul.f32 %v11595_v50, %v5316_v17  ;;  %v6539_v42 = vld [vmem:[#allocation3 + $0xd0] sm:$0xff]  ;;  %6147 = vrot.lane.b32.xlu0 %v6489_v28, %s9582_s13  ;;  %5829 = vrot.lane.b32.xlu1 %v6489_v28, %s9583_s14  ;;  %v6339_v20 = vld [vmem:[#allocation2 + $0x109] sm:$0xff] }
 0x4ff   : > { %9439 = vmatprep.mubr.msk.bf16.mxu1 %vm253_vm0, %v6539_v42  ;;  %v6212_v55 = vld [vmem:[#allocation2 + $0x110] sm:$0xff]  ;;  %v5575_v39 = vld [vmem:[#allocation2 + $0x108] sm:$0xff] }
 0x500   : > { %vm5447_vm8 = vcmp.gt.f32.partialorder %v5415_v56, 0.0  ;;  %v5479_v36 = vmul.f32 0.01, %v5415_v56  ;;  %v5416_v47 = vadd.f32 %v11602_v4, %v5379_v25  ;;  %v6340_v53 = vld [vmem:[#allocation2 + $0x111] sm:$0xff]  ;;  %v5684_v8 = vpop.permute.xlu1 %5683  ;;  %v6234_v6 = vpack.c.bf16 %v6212_v55, %v6211_v29 }
 0x501   : > { %v6467_v35 = vld [vmem:[#allocation2 + $0x10a] sm:$0xff]  ;;  %v6362_v19 = vpack.c.bf16 %v6340_v53, %v6339_v20  ;;  %v6468_v33 = vld [vmem:[#allocation2 + $0x112] sm:$0xff]  ;;  %5730 = vst.msk [vmem:[#allocation3 + $0x18] sm:$0xff] %vm551_vm3, %v5684_v8 }
 0x502   : > { %v5576_v58 = vld [vmem:[#allocation2 + $0x110] sm:$0xff]  ;;  %v5511_v48 = vsel %vm5447_vm8, %v5415_v56, %v5479_v36  ;;  %vm5448_vm9 = vcmp.gt.f32.partialorder %v5416_v47, 0.0  ;;  %v5480_v43 = vmul.f32 0.01, %v5416_v47  ;;  %v6490_v37 = vpack.c.bf16 %v6468_v33, %v6467_v35  ;;  %6275 = vrot.lane.b32.xlu0 %v6234_v6, %s9583_s14  ;;  %5957 = vrot.lane.b32.xlu1 %v6234_v6, %s9584_s15 }
 0x503   : > { %5543 = vst.msk [vmem:[#allocation2 + $0x121] sm:$0xff] %vm253_vm0, %v5511_v48  ;;  %v5596_v11 = vpack.c.bf16 %v5576_v58, %v5575_v39  ;;  %6059 = vst.msk [vmem:[#allocation3 + $0xf8] sm:$0xff] %vm253_vm0, %v6362_v19  ;;  %v9121_v24 = vpop.f32.mrb[144].mxu1 }
 0x504   : > { %v5512_v41 = vsel %vm5448_vm9, %v5416_v47, %v5480_v43  ;;  %6506 = vst.msk [vmem:[#allocation3 + $0xe8] sm:$0xff] %vm253_vm0, %v6490_v37  ;;  %v9122_v22 = vpop.f32.mrb[145].mxu1  ;;  %v5812_v0 = vpop.permute.xlu1 %5811  ;;  %v6513_v47 = vld [vmem:[#allocation3] sm:$0xff] }
 0x505   : > { %5544 = vst.msk [vmem:[#allocation2 + $0x129] sm:$0xff] %vm253_vm0, %v5512_v41  ;;  %5612 = vst.msk [vmem:[#allocation3 + $0x108] sm:$0xff] %vm253_vm0, %v5596_v11  ;;  %v9123_v9 = vadd.f32 %v9122_v22, %v9121_v24  ;;  %v9124_v46 = vpop.f32.mrb[146].mxu1 }
 0x506   : > { %5858 = vst.msk [vmem:[#allocation3 + $0x18] sm:$0xff] %vm680_vm4, %v5812_v0  ;;  %v9125_v60 = vpop.f32.mrb[147].mxu1  ;;  %6403 = vrot.lane.b32.xlu0 %v6362_v19, %s9584_s15  ;;  %5703 = vrot.lane.b32.xlu1 %v6362_v19, %s9582_s13 }
 0x507   : > { %v5321_v63 = vadd.f32 %v9123_v9, %v11435_v44  ;;  %v9126_v27 = vadd.f32 %v9125_v60, %v9124_v46  ;;  %v6258_v12 = vpop.permute.xlu0 %6257 }
 0x508   : > { %v5940_v38 = vpop.permute.xlu1 %5939  ;;  %6305 = vst.msk [vmem:[#allocation3 + $0x8] sm:$0xff] %vm680_vm4, %v6258_v12 }
 0x509   : > { %v5380_v30 = vmul.f32 %v11595_v50, %v5321_v63  ;;  %v5324_v1 = vadd.f32 %v9126_v27, %v11444_v52  ;;  %5986 = vst.msk [vmem:[#allocation3 + $0x18] sm:$0xff] %vm809_vm5, %v5940_v38 }
 0x50a   : > { %6149 = vrot.lane.b32.xlu0 %v6490_v37, %s9582_s13  ;;  %5831 = vrot.lane.b32.xlu1 %v6490_v37, %s9583_s14  ;;  %v6213_v5 = vld [vmem:[#allocation2 + $0x120] sm:$0xff] }
 0x50b   : > { %v6542_v31 = vld [vmem:[#allocation3 + $0xe8] sm:$0xff]  ;;  %v6341_v61 = vld [vmem:[#allocation2 + $0x121] sm:$0xff]  ;;  %v5417_v44 = vadd.f32 %v11602_v4, %v5380_v30  ;;  %v5381_v7 = vmul.f32 %v11595_v50, %v5324_v1  ;;  %v6386_v21 = vpop.permute.xlu0 %6385 }
 0x50c   : > { %9440 = vmatmul.mubr.msk.bf16.gmra.mrb[180].mxu1 %vm253_vm0, %v6542_v31  ;;  %v6214_v51 = vld [vmem:[#allocation2 + $0x128] sm:$0xff]  ;;  %v5686_v34 = vpop.permute.xlu1 %5685  ;;  %6433 = vst.msk [vmem:[#allocation3 + $0x8] sm:$0xff] %vm809_vm5, %v6386_v21 }
 0x50d   : > { %v6342_v26 = vld [vmem:[#allocation2 + $0x129] sm:$0xff]  ;;  %v6235_v28 = vpack.c.bf16 %v6214_v51, %v6213_v5  ;;  %vm5449_vm10 = vcmp.gt.f32.partialorder %v5417_v44, 0.0  ;;  %v5481_v54 = vmul.f32 0.01, %v5417_v44  ;;  %v5418_v14 = vadd.f32 %v11602_v4, %v5381_v7  ;;  %5731 = vst.msk [vmem:[#allocation3 + $0x30] sm:$0xff] %vm551_vm3, %v5686_v34 }
 0x50e   : > { %v6469_v52 = vld [vmem:[#allocation2 + $0x122] sm:$0xff]  ;;  %v6363_v40 = vpack.c.bf16 %v6342_v26, %v6341_v61  ;;  %v6470_v13 = vld [vmem:[#allocation2 + $0x12a] sm:$0xff] }
 0x50f   : > { %v6491_v49 = vpack.c.bf16 %v6470_v13, %v6469_v52  ;;  %6277 = vrot.lane.b32.xlu0 %v6235_v28, %s9583_s14  ;;  %5959 = vrot.lane.b32.xlu1 %v6235_v28, %s9584_s15  ;;  %5613 = vst.msk [vmem:[#allocation3 + $0x120] sm:$0xff] %vm253_vm0, %v6235_v28  ;;  %v5513_v57 = vsel %vm5449_vm10, %v5417_v44, %v5481_v54  ;;  %vm5450_vm11 = vcmp.gt.f32.partialorder %v5418_v14, 0.0  ;;  %v5482_v16 = vmul.f32 0.01, %v5418_v14  ;;  %v9127_v10 = vpop.f32.mrb[148].mxu1  ;;  %v6132_v62 = vpop.permute.xlu0 %6131 }
 0x510   : > { %6060 = vst.msk [vmem:[#allocation3 + $0x110] sm:$0xff] %vm253_vm0, %v6363_v40  ;;  %5545 = vst.msk [vmem:[#allocation2 + $0x139] sm:$0xff] %vm253_vm0, %v5513_v57  ;;  %v9128_v32 = vpop.f32.mrb[149].mxu1  ;;  %v5814_v17 = vpop.permute.xlu1 %5813  ;;  %v6516_v61 = vld [vmem:[#allocation3 + $0x18] sm:$0xff] }
 0x511   : > { %6507 = vst.msk [vmem:[#allocation3 + $0x100] sm:$0xff] %vm253_vm0, %v6491_v49  ;;  %v5514_v3 = vsel %vm5450_vm11, %v5418_v14, %v5482_v16  ;;  %v9129_v59 = vadd.f32 %v9128_v32, %v9127_v10  ;;  %v9130_v23 = vpop.f32.mrb[150].mxu1 }
 0x512   : > { %6178 = vst.msk [vmem:[#allocation3 + $0x20] sm:$0xff] %vm551_vm3, %v6132_v62  ;;  %v9131_v45 = vpop.f32.mrb[151].mxu1 }
 0x513   : > { %5546 = vst.msk [vmem:[#allocation2 + $0x141] sm:$0xff] %vm253_vm0, %v5514_v3  ;;  %6405 = vrot.lane.b32.xlu0 %v6363_v40, %s9584_s15  ;;  %5705 = vrot.lane.b32.xlu1 %v6363_v40, %s9582_s13  ;;  %v5329_v18 = vadd.f32 %v11431_v15, %v9129_v59  ;;  %v9132_v56 = vadd.f32 %v9131_v45, %v9130_v23  ;;  %v6514_v42 = vld [vmem:[#allocation3 + $0x8] sm:$0xff] }
 0x514   : > { %5859 = vst.msk [vmem:[#allocation3 + $0x30] sm:$0xff] %vm680_vm4, %v5814_v17  ;;  %v6260_v25 = vpop.permute.xlu0 %6259  ;;  %v5942_v36 = vpop.permute.xlu1 %5941  ;;  %6786 = vmatprep.mubr.bf16.mxu0 %v6514_v42 }
 0x515   : > { %v5382_v29 = vmul.f32 %v11595_v50, %v5329_v18  ;;  %v5332_v20 = vadd.f32 %v11439_v2, %v9132_v56  ;;  %6306 = vst.msk [vmem:[#allocation3 + $0x20] sm:$0xff] %vm680_vm4, %v6260_v25  ;;  %6787 = vmatmul.mubr.bf16.vlgmr.msra.gmra.mrb[124].mxu0 %v6513_v47 }
 0x516   : > { %5987 = vst.msk [vmem:[#allocation3 + $0x30] sm:$0xff] %vm809_vm5, %v5942_v36 }
 0x517   : > { %6151 = vrot.lane.b32.xlu0 %v6491_v49, %s9582_s13  ;;  %v5419_v15 = vadd.f32 %v11602_v4, %v5382_v29  ;;  %v5383_v53 = vmul.f32 %v11595_v50, %v5332_v20  ;;  %5833 = vrot.lane.b32.xlu1 %v6491_v49, %s9583_s14  ;;  %v6215_v35 = vld [vmem:[#allocation2 + $0x138] sm:$0xff] }
 0x518   : > { %v6545_v55 = vld [vmem:[#allocation3 + $0x100] sm:$0xff]  ;;  %v6388_v2 = vpop.permute.xlu0 %6387  ;;  %v6343_v8 = vld [vmem:[#allocation2 + $0x139] sm:$0xff]  ;;  %v5688_v33 = vpop.permute.xlu1 %5687 }
 0x519   : > { %9443 = vmatprep.mubr.msk.bf16.mxu1 %vm253_vm0, %v6545_v55  ;;  %vm5451_vm12 = vcmp.gt.f32.partialorder %v5419_v15, 0.0  ;;  %v5483_v6 = vmul.f32 0.01, %v5419_v15  ;;  %v5420_v19 = vadd.f32 %v11602_v4, %v5383_v53  ;;  %6434 = vst.msk [vmem:[#allocation3 + $0x20] sm:$0xff] %vm809_vm5, %v6388_v2 }
 0x51a   : > { %v6216_v58 = vld [vmem:[#allocation2 + $0x140] sm:$0xff]  ;;  %5732 = vst.msk [vmem:[#allocation3 + $0x48] sm:$0xff] %vm551_vm3, %v5688_v33 }
 0x51b   : > { %v6344_v48 = vld [vmem:[#allocation2 + $0x141] sm:$0xff]  ;;  %v6236_v37 = vpack.c.bf16 %v6216_v58, %v6215_v35  ;;  %v5515_v41 = vsel %vm5451_vm12, %v5419_v15, %v5483_v6  ;;  %vm5452_vm13 = vcmp.gt.f32.partialorder %v5420_v19, 0.0  ;;  %v5484_v24 = vmul.f32 0.01, %v5420_v19  ;;  %v9133_v22 = vpop.f32.mrb[152].mxu1 }
 0x51c   : > { %v6471_v43 = vld [vmem:[#allocation2 + $0x13a] sm:$0xff]  ;;  %v6364_v39 = vpack.c.bf16 %v6344_v48, %v6343_v8  ;;  %v6472_v11 = vld [vmem:[#allocation2 + $0x142] sm:$0xff]  ;;  %5547 = vst.msk [vmem:[#allocation2 + $0x151] sm:$0xff] %vm253_vm0, %v5515_v41  ;;  %v9134_v9 = vpop.f32.mrb[153].mxu1  ;;  %v6134_v46 = vpop.permute.xlu0 %6133 }
 0x51d   : > { %v6492_v0 = vpack.c.bf16 %v6472_v11, %v6471_v43  ;;  %6279 = vrot.lane.b32.xlu0 %v6236_v37, %s9583_s14  ;;  %5961 = vrot.lane.b32.xlu1 %v6236_v37, %s9584_s15  ;;  %5614 = vst.msk [vmem:[#allocation3 + $0x138] sm:$0xff] %vm253_vm0, %v6236_v37  ;;  %v5516_v60 = vsel %vm5452_vm13, %v5420_v19, %v5484_v24  ;;  %v9136_v27 = vpop.f32.mrb[154].mxu1  ;;  %v5816_v12 = vpop.permute.xlu1 %5815  ;;  %v6519_v20 = vld [vmem:[#allocation3 + $0x30] sm:$0xff] }
 0x51e   : > { %6061 = vst.msk [vmem:[#allocation3 + $0x128] sm:$0xff] %vm253_vm0, %v6364_v39  ;;  %v9135_v63 = vadd.f32 %v9134_v9, %v9133_v22  ;;  %5548 = vst.msk [vmem:[#allocation2 + $0x159] sm:$0xff] %vm253_vm0, %v5516_v60  ;;  %v9137_v38 = vpop.f32.mrb[155].mxu1 }
 0x51f   : > { %6179 = vst.msk [vmem:[#allocation3 + $0x38] sm:$0xff] %vm551_vm3, %v6134_v46  ;;  %v9138_v30 = vadd.f32 %v9137_v38, %v9136_v27 }
 0x520   : > { %6508 = vst.msk [vmem:[#allocation3 + $0x118] sm:$0xff] %vm253_vm0, %v6492_v0  ;;  %v6262_v1 = vpop.permute.xlu0 %6261  ;;  %v6517_v31 = vld [vmem:[#allocation3 + $0x20] sm:$0xff] }
 0x521   : > { %5860 = vst.msk [vmem:[#allocation3 + $0x48] sm:$0xff] %vm680_vm4, %v5816_v12  ;;  %6407 = vrot.lane.b32.xlu0 %v6364_v39, %s9584_s15  ;;  %5707 = vrot.lane.b32.xlu1 %v6364_v39, %s9582_s13  ;;  %6307 = vst.msk [vmem:[#allocation3 + $0x38] sm:$0xff] %vm680_vm4, %v6262_v1  ;;  %v5944_v5 = vpop.permute.xlu1 %5943 }
 0x522   : > { %6794 = vmatprep.mubr.bf16.mxu0 %v6517_v31  ;;  %5988 = vst.msk [vmem:[#allocation3 + $0x48] sm:$0xff] %vm809_vm5, %v5944_v5 }
 0x523   : > { %6795 = vmatmul.mubr.bf16.gmra.mrb[128].mxu0 %v6516_v61  ;;  %v9139_v44 = vpop.f32.mrb[156].mxu1  ;;  %v6217_v52 = vld [vmem:[#allocation2 + $0x150] sm:$0xff] }
 0x524   : > { %v9140_v7 = vpop.f32.mrb[157].mxu1  ;;  %v6390_v26 = vpop.permute.xlu0 %6389  ;;  %v6345_v21 = vld [vmem:[#allocation2 + $0x151] sm:$0xff] }
 0x525   : > { %6153 = vrot.lane.b32.xlu0 %v6492_v0, %s9582_s13  ;;  %5835 = vrot.lane.b32.xlu1 %v6492_v0, %s9583_s14  ;;  %v9141_v34 = vadd.f32 %v9140_v7, %v9139_v44  ;;  %v9142_v28 = vpop.f32.mrb[158].mxu1  ;;  %6435 = vst.msk [vmem:[#allocation3 + $0x38] sm:$0xff] %vm809_vm5, %v6390_v26  ;;  %v5690_v40 = vpop.permute.xlu1 %5689  ;;  %v6218_v13 = vld [vmem:[#allocation2 + $0x158] sm:$0xff] }
 0x526   : > { %v6346_v54 = vld [vmem:[#allocation2 + $0x159] sm:$0xff]  ;;  %v9143_v49 = vpop.f32.mrb[159].mxu1  ;;  %5733 = vst.msk [vmem:[#allocation3 + $0x60] sm:$0xff] %vm551_vm3, %v5690_v40  ;;  %v6237_v57 = vpack.c.bf16 %v6218_v13, %v6217_v52 }
 0x527   : > { %v6548_v51 = vld [vmem:[#allocation3 + $0x118] sm:$0xff]  ;;  %v6473_v14 = vld [vmem:[#allocation2 + $0x152] sm:$0xff]  ;;  %v6365_v16 = vpack.c.bf16 %v6346_v54, %v6345_v21  ;;  %v6474_v10 = vld [vmem:[#allocation2 + $0x15a] sm:$0xff]  ;;  %v9144_v32 = vadd.f32 %v9143_v49, %v9142_v28 }
 0x528   : > { %9444 = vmatmul.mubr.msk.bf16.gmra.mrb[184].mxu1 %vm253_vm0, %v6548_v51  ;;  %v6493_v62 = vpack.c.bf16 %v6474_v10, %v6473_v14  ;;  %v6136_v3 = vpop.permute.xlu0 %6135  ;;  %5615 = vst.msk [vmem:[#allocation3 + $0x150] sm:$0xff] %vm253_vm0, %v6237_v57 }
 0x529   : > { %6281 = vrot.lane.b32.xlu0 %v6237_v57, %s9583_s14  ;;  %5963 = vrot.lane.b32.xlu1 %v6237_v57, %s9584_s15  ;;  %6062 = vst.msk [vmem:[#allocation3 + $0x140] sm:$0xff] %vm253_vm0, %v6365_v16  ;;  %v5818_v59 = vpop.permute.xlu1 %5817  ;;  %v6522_v27 = vld [vmem:[#allocation3 + $0x48] sm:$0xff] }
 0x52a   : > { %6180 = vst.msk [vmem:[#allocation3 + $0x50] sm:$0xff] %vm551_vm3, %v6136_v3 }
 0x52b   : > { %6509 = vst.msk [vmem:[#allocation3 + $0x130] sm:$0xff] %vm253_vm0, %v6493_v62  ;;  %v9417_v23 = vpop.f32.mrb[160].mxu1 }
 0x52c   : > { %5861 = vst.msk [vmem:[#allocation3 + $0x60] sm:$0xff] %vm680_vm4, %v5818_v59  ;;  %v5345_v17 = vadd.f32 %v9417_v23, %v9141_v34  ;;  %v5336_v45 = vpop.f32.mrb[161].mxu1  ;;  %v6264_v18 = vpop.permute.xlu0 %6263  ;;  %v6520_v56 = vld [vmem:[#allocation3 + $0x38] sm:$0xff] }
 0x52d   : > { %6409 = vrot.lane.b32.xlu0 %v6365_v16, %s9584_s15  ;;  %5709 = vrot.lane.b32.xlu1 %v6365_v16, %s9582_s13  ;;  %v5337_v25 = vadd.f32 %v9135_v63, %v5336_v45  ;;  %v9418_v42 = vpop.f32.mrb[162].mxu1  ;;  %6308 = vst.msk [vmem:[#allocation3 + $0x50] sm:$0xff] %vm680_vm4, %v6264_v18  ;;  %v5946_v29 = vpop.permute.xlu1 %5945  ;;  %v6479_v45 = vld [vmem:[#allocation2 + $0x19a] sm:$0xff] }
 0x52e   : > { %6802 = vmatprep.mubr.bf16.mxu0 %v6520_v56  ;;  %v5386_v36 = vmul.f32 %v11595_v50, %v5345_v17  ;;  %v5348_v47 = vadd.f32 %v9418_v42, %v9144_v32  ;;  %v5339_v55 = vpop.f32.mrb[163].mxu1  ;;  %5989 = vst.msk [vmem:[#allocation3 + $0x60] sm:$0xff] %vm809_vm5, %v5946_v29  ;;  %v6480_v56 = vld [vmem:[#allocation2 + $0x1a2] sm:$0xff] }
 0x52f   : > { %6803 = vmatmul.mubr.bf16.gmra.mrb[132].mxu0 %v6519_v20  ;;  %v5384_v15 = vmul.f32 %v11595_v50, %v5337_v25  ;;  %v5340_v53 = vadd.f32 %v9138_v30, %v5339_v55  ;;  %v6496_v42 = vpack.c.bf16 %v6480_v56, %v6479_v45 }
 0x530   : > { %v5423_v2 = vadd.f32 %v11602_v4, %v5386_v36  ;;  %v5387_v35 = vmul.f32 %v11595_v50, %v5348_v47  ;;  %v6392_v6 = vpop.permute.xlu0 %6391 }
 0x531   : > { %6155 = vrot.lane.b32.xlu0 %v6493_v62, %s9582_s13  ;;  %5837 = vrot.lane.b32.xlu1 %v6493_v62, %s9583_s14  ;;  %v5421_v19 = vadd.f32 %v11602_v4, %v5384_v15  ;;  %v5385_v33 = vmul.f32 %v11595_v50, %v5340_v53  ;;  %6436 = vst.msk [vmem:[#allocation3 + $0x50] sm:$0xff] %vm809_vm5, %v6392_v6  ;;  %v5692_v58 = vpop.permute.xlu1 %5691  ;;  %v6223_v15 = vld [vmem:[#allocation2 + $0x198] sm:$0xff]  ;;  %v6224_v53 = vld [vmem:[#allocation2 + $0x1a0] sm:$0xff] }
 0x532   : > { %v6551_v8 = vld [vmem:[#allocation3 + $0x130] sm:$0xff]  ;;  %vm5455_vm14 = vcmp.gt.f32.partialorder %v5423_v2, 0.0  ;;  %v5487_v48 = vmul.f32 0.01, %v5423_v2  ;;  %v5424_v43 = vadd.f32 %v11602_v4, %v5387_v35  ;;  %5734 = vst.msk [vmem:[#allocation3 + $0x78] sm:$0xff] %vm551_vm3, %v5692_v58 }
 0x533   : > { %9447 = vmatprep.mubr.msk.bf16.mxu1 %vm253_vm0, %v6551_v8  ;;  %vm5453_vm15 = vcmp.gt.f32.partialorder %v5421_v19, 0.0  ;;  %v5485_v37 = vmul.f32 0.01, %v5421_v19  ;;  %v5422_v39 = vadd.f32 %v11602_v4, %v5385_v33  ;;  %6512 = vst.msk [vmem:[#allocation3 + $0x178] sm:$0xff] %vm253_vm0, %v6496_v42  ;;  %v6240_v8 = vpack.c.bf16 %v6224_v53, %v6223_v15  ;;  %v6352_v33 = vld [vmem:[#allocation2 + $0x1a1] sm:$0xff] }
 0x534   : > { %v5519_v11 = vsel %vm5455_vm14, %v5423_v2, %v5487_v48  ;;  %vm5456_vm1 = vcmp.gt.f32.partialorder %v5424_v43, 0.0  ;;  %v5488_v41 = vmul.f32 0.01, %v5424_v43  ;;  %v6138_v24 = vpop.permute.xlu0 %6137 }
 0x535   : > { %5551 = vst.msk [vmem:[#allocation2 + $0x181] sm:$0xff] %vm253_vm0, %v5519_v11  ;;  %v5517_v50 = vsel %vm5453_vm15, %v5421_v19, %v5485_v37  ;;  %vm5454_vm2 = vcmp.gt.f32.partialorder %v5422_v39, 0.0  ;;  %v5486_v22 = vmul.f32 0.01, %v5422_v39  ;;  %v5820_v0 = vpop.permute.xlu1 %5819  ;;  %v6525_v3 = vld [vmem:[#allocation3 + $0x60] sm:$0xff]  ;;  %v6351_v19 = vld [vmem:[#allocation2 + $0x199] sm:$0xff] }
 0x536   : > { %6181 = vst.msk [vmem:[#allocation3 + $0x68] sm:$0xff] %vm551_vm3, %v6138_v24  ;;  %v5520_v9 = vsel %vm5456_vm1, %v5424_v43, %v5488_v41  ;;  %v6368_v43 = vpack.c.bf16 %v6352_v33, %v6351_v19 }
 0x537   : > { %5549 = vst.msk [vmem:[#allocation2 + $0x169] sm:$0xff] %vm253_vm0, %v5517_v50  ;;  %5552 = vst.msk [vmem:[#allocation2 + $0x189] sm:$0xff] %vm253_vm0, %v5520_v9  ;;  %v5518_v4 = vsel %vm5454_vm2, %v5422_v39, %v5486_v22 }
 0x538   : > { %5862 = vst.msk [vmem:[#allocation3 + $0x78] sm:$0xff] %vm680_vm4, %v5820_v0  ;;  %v6266_v46 = vpop.permute.xlu0 %6265  ;;  %v6523_v60 = vld [vmem:[#allocation3 + $0x50] sm:$0xff] }
 0x539   : > { %5550 = vst.msk [vmem:[#allocation2 + $0x171] sm:$0xff] %vm253_vm0, %v5518_v4  ;;  %v5948_v63 = vpop.permute.xlu1 %5947  ;;  %6810 = vmatprep.mubr.bf16.mxu0 %v6523_v60 }
 0x53a   : > { %6309 = vst.msk [vmem:[#allocation3 + $0x68] sm:$0xff] %vm680_vm4, %v6266_v46  ;;  %6811 = vmatmul.mubr.bf16.gmra.mrb[136].mxu0 %v6522_v27  ;;  %v6560_v6 = vld [vmem:[#allocation3 + $0x178] sm:$0xff] }
 0x53b   : > { %5990 = vst.msk [vmem:[#allocation3 + $0x78] sm:$0xff] %vm809_vm5, %v5948_v63 }
 0x53c   : > { %v6394_v12 = vpop.permute.xlu0 %6393  ;;  %v6221_v38 = vld [vmem:[#allocation2 + $0x180] sm:$0xff]  ;;  %8237 = vst.msk [vmem:[#allocation3 + $0x178] sm:$0xff] %vm253_vm0, %v6496_v42 }
 0x53d   : > { %6437 = vst.msk [vmem:[#allocation3 + $0x68] sm:$0xff] %vm809_vm5, %v6394_v12  ;;  %v5694_v30 = vpop.permute.xlu1 %5693  ;;  %v6349_v31 = vld [vmem:[#allocation2 + $0x181] sm:$0xff] }
 0x53e   : > { %v5901_v1 = vld [vmem:[#allocation2 + $0x168] sm:$0xff]  ;;  %5735 = vst.msk [vmem:[#allocation3 + $0x90] sm:$0xff] %vm551_vm3, %v5694_v30 }
 0x53f   : > { %v5647_v5 = vld [vmem:[#allocation2 + $0x169] sm:$0xff] }
 0x540   : > { %v6222_v61 = vld [vmem:[#allocation2 + $0x188] sm:$0xff]  ;;  %v5902_v26 = vld [vmem:[#allocation2 + $0x170] sm:$0xff]  ;;  %v6140_v28 = vpop.permute.xlu0 %6139 }
 0x541   : > { %v6350_v44 = vld [vmem:[#allocation2 + $0x189] sm:$0xff]  ;;  %v6239_v51 = vpack.c.bf16 %v6222_v61, %v6221_v38  ;;  %v5648_v21 = vld [vmem:[#allocation2 + $0x171] sm:$0xff]  ;;  %v5919_v40 = vpack.c.bf16 %v5902_v26, %v5901_v1  ;;  %6182 = vst.msk [vmem:[#allocation3 + $0x80] sm:$0xff] %vm551_vm3, %v6140_v28  ;;  %v5822_v49 = vpop.permute.xlu1 %5821 }
 0x542   : > { %v6477_v7 = vld [vmem:[#allocation2 + $0x182] sm:$0xff]  ;;  %v6367_v52 = vpack.c.bf16 %v6350_v44, %v6349_v31  ;;  %v6475_v34 = vld [vmem:[#allocation2 + $0x16a] sm:$0xff]  ;;  %v5664_v13 = vpack.c.bf16 %v5648_v21, %v5647_v5  ;;  %v6476_v54 = vld [vmem:[#allocation2 + $0x172] sm:$0xff]  ;;  %5863 = vst.msk [vmem:[#allocation3 + $0x90] sm:$0xff] %vm680_vm4, %v5822_v49 }
 0x543   : > { %v6478_v14 = vld [vmem:[#allocation2 + $0x18a] sm:$0xff]  ;;  %6285 = vrot.lane.b32.xlu0 %v6239_v51, %s9583_s14  ;;  %v6494_v57 = vpack.c.bf16 %v6476_v54, %v6475_v34  ;;  %5965 = vrot.lane.b32.xlu1 %v5919_v40, %s9584_s15  ;;  %5616 = vst.msk [vmem:[#allocation3 + $0x168] sm:$0xff] %vm253_vm0, %v5919_v40 }
 0x544   : > { %v6495_v16 = vpack.c.bf16 %v6478_v14, %v6477_v7  ;;  %6064 = vst.msk [vmem:[#allocation3 + $0x170] sm:$0xff] %vm253_vm0, %v6367_v52  ;;  %6063 = vst.msk [vmem:[#allocation3 + $0x158] sm:$0xff] %vm253_vm0, %v5664_v13  ;;  %v6268_v10 = vpop.permute.xlu0 %6267  ;;  %v6526_v32 = vld [vmem:[#allocation3 + $0x68] sm:$0xff]  ;;  %v6528_v55 = vld [vmem:[#allocation3 + $0x78] sm:$0xff] }
 0x545   : > { %6510 = vst.msk [vmem:[#allocation3 + $0x148] sm:$0xff] %vm253_vm0, %v6494_v57  ;;  %v5950_v62 = vpop.permute.xlu1 %5949  ;;  %6818 = vmatprep.mubr.bf16.mxu0 %v6526_v32  ;;  %v7342_v7 = vld [vmem:[#allocation2 + $0x1] sm:$0xff] }
 0x546   : > { %6511 = vst.msk [vmem:[#allocation3 + $0x160] sm:$0xff] %vm253_vm0, %v6495_v16  ;;  %6819 = vmatmul.mubr.bf16.gmra.mrb[140].mxu0 %v6525_v3 }
 0x547   : > { %6413 = vrot.lane.b32.xlu0 %v6367_v52, %s9584_s15  ;;  %6310 = vst.msk [vmem:[#allocation3 + $0x80] sm:$0xff] %vm680_vm4, %v6268_v10  ;;  %5711 = vrot.lane.b32.xlu1 %v5664_v13, %s9582_s13 }
 0x548   : > { %5991 = vst.msk [vmem:[#allocation3 + $0x90] sm:$0xff] %vm809_vm5, %v5950_v62  ;;  %v6396_v59 = vpop.permute.xlu0 %6395 }
 0x549   : > { %6438 = vst.msk [vmem:[#allocation3 + $0x80] sm:$0xff] %vm809_vm5, %v6396_v59  ;;  %v5696_v23 = vpop.permute.xlu1 %5695 }
 0x54a   : > { %5736 = vst.msk [vmem:[#allocation3 + $0xa8] sm:$0xff] %vm551_vm3, %v5696_v23 }
 0x54b   : > { %6283 = vrot.lane.b32.xlu0 %v5919_v40, %s9583_s14  ;;  %5839 = vrot.lane.b32.xlu1 %v6494_v57, %s9583_s14  ;;  %v7470_v40 = vld [vmem:[#allocation2 + $0x2] sm:$0xff] }
 0x54c   : > { %v6554_v17 = vld [vmem:[#allocation3 + $0x148] sm:$0xff]  ;;  %v6142_v25 = vpop.permute.xlu0 %6141 }
 0x54d   : > { %9448 = vmatmul.mubr.msk.bf16.gmra.mrb[188].mxu1 %vm253_vm0, %v6554_v17  ;;  %v6557_v18 = vld [vmem:[#allocation3 + $0x160] sm:$0xff]  ;;  %6183 = vst.msk [vmem:[#allocation3 + $0x98] sm:$0xff] %vm551_vm3, %v6142_v25  ;;  %v5824_v29 = vpop.permute.xlu1 %5823 }
 0x54e   : > { %9451 = vmatprep.mubr.msk.bf16.mxu1 %vm253_vm0, %v6557_v18  ;;  %5864 = vst.msk [vmem:[#allocation3 + $0xa8] sm:$0xff] %vm680_vm4, %v5824_v29 }
 0x54f   : > { %6411 = vrot.lane.b32.xlu0 %v5664_v13, %s9584_s15  ;;  %5967 = vrot.lane.b32.xlu1 %v6239_v51, %s9584_s15  ;;  %v6531_v41 = vld [vmem:[#allocation3 + $0x90] sm:$0xff]  ;;  %v7343_v51 = vld [vmem:[#allocation2 + $0x9] sm:$0xff] }
 0x550   : > { %v6270_v20 = vpop.permute.xlu0 %6269  ;;  %v6529_v36 = vld [vmem:[#allocation3 + $0x80] sm:$0xff]  ;;  %v7374_v52 = vpack.c.bf16 %v7343_v51, %v7342_v7 }
 0x551   : > { %6311 = vst.msk [vmem:[#allocation3 + $0x98] sm:$0xff] %vm680_vm4, %v6270_v20  ;;  %v5952_v47 = vpop.permute.xlu1 %5951  ;;  %6826 = vmatprep.mubr.bf16.mxu0 %v6529_v36  ;;  %v7471_v13 = vld [vmem:[#allocation2 + $0xa] sm:$0xff] }
 0x552   : > { %5992 = vst.msk [vmem:[#allocation3 + $0xa8] sm:$0xff] %vm809_vm5, %v5952_v47  ;;  %6827 = vmatmul.mubr.bf16.gmra.mrb[144].mxu0 %v6528_v55 }
 0x553   : > { %6157 = vrot.lane.b32.xlu0 %v6494_v57, %s9582_s13  ;;  %7406 = vrot.lane.b32.xlu1 %v7374_v52, %s9582_s13  ;;  %v7502_v57 = vpack.c.bf16 %v7471_v13, %v7470_v40 }
 0x554   : > { %v6398_v2 = vpop.permute.xlu0 %6397 }
 0x555   : > { %6439 = vst.msk [vmem:[#allocation3 + $0x98] sm:$0xff] %vm809_vm5, %v6398_v2  ;;  %v5698_v35 = vpop.permute.xlu1 %5697  ;;  %9452 = vmatmul.mubr.msk.bf16.gmra.mrb[192].mxu1 %vm253_vm0, %v6560_v6 }
 0x556   : > { %5737 = vst.msk [vmem:[#allocation3 + $0xc0] sm:$0xff] %vm551_vm3, %v5698_v35 }
 0x557   : > { %6159 = vrot.lane.b32.xlu0 %v6495_v16, %s9582_s13  ;;  %7534 = vrot.lane.b32.xlu1 %v7502_v57, %s9583_s14 }
 0x558   : > { %v6144_v58 = vpop.permute.xlu0 %6143 }
 0x559   : > { %6184 = vst.msk [vmem:[#allocation3 + $0xb0] sm:$0xff] %vm551_vm3, %v6144_v58  ;;  %v5826_v48 = vpop.permute.xlu1 %5825  ;;  %v6534_v60 = vld [vmem:[#allocation3 + $0xa8] sm:$0xff] }
 0x55a   : > { %5865 = vst.msk [vmem:[#allocation3 + $0xc0] sm:$0xff] %vm680_vm4, %v5826_v48 }
 0x55b   : > { %6287 = vrot.lane.b32.xlu0 %v6240_v8, %s9583_s14 }
 0x55c   : > { %v6272_v37 = vpop.permute.xlu0 %6271  ;;  %v6532_v39 = vld [vmem:[#allocation3 + $0x98] sm:$0xff] }
 0x55d   : > { %6312 = vst.msk [vmem:[#allocation3 + $0xb0] sm:$0xff] %vm680_vm4, %v6272_v37  ;;  %v5954_v11 = vpop.permute.xlu1 %5953  ;;  %6834 = vmatprep.mubr.bf16.mxu0 %v6532_v39 }
 0x55e   : > { %5993 = vst.msk [vmem:[#allocation3 + $0xc0] sm:$0xff] %vm809_vm5, %v5954_v11  ;;  %6835 = vmatmul.mubr.bf16.gmra.mrb[148].mxu0 %v6531_v41 }
 0x55f   : > { %6415 = vrot.lane.b32.xlu0 %v6368_v43, %s9584_s15 }
 0x560   : > { %v6400_v24 = vpop.permute.xlu0 %6399 }
 0x561   : > { %6440 = vst.msk [vmem:[#allocation3 + $0xb0] sm:$0xff] %vm809_vm5, %v6400_v24  ;;  %v5700_v50 = vpop.permute.xlu1 %5699 }
 0x562   : > { %5738 = vst.msk [vmem:[#allocation3 + $0xd8] sm:$0xff] %vm551_vm3, %v5700_v50 }
 0x563   : > { %8012 = vrot.lane.b32.xlu0 %v6240_v8, %s9583_s14 }
 0x564   : > { %v6146_v22 = vpop.permute.xlu0 %6145 }
 0x565   : > { %6185 = vst.msk [vmem:[#allocation3 + $0xc8] sm:$0xff] %vm551_vm3, %v6146_v22  ;;  %v5828_v0 = vpop.permute.xlu1 %5827  ;;  %v6537_v5 = vld [vmem:[#allocation3 + $0xc0] sm:$0xff] }
 0x566   : > { %5866 = vst.msk [vmem:[#allocation3 + $0xd8] sm:$0xff] %vm680_vm4, %v5828_v0 }
 0x568   : > { %v6274_v9 = vpop.permute.xlu0 %6273  ;;  %v6535_v4 = vld [vmem:[#allocation3 + $0xb0] sm:$0xff] }
 0x569   : > { %6313 = vst.msk [vmem:[#allocation3 + $0xc8] sm:$0xff] %vm680_vm4, %v6274_v9  ;;  %v5956_v46 = vpop.permute.xlu1 %5955  ;;  %6842 = vmatprep.mubr.bf16.mxu0 %v6535_v4 }
 0x56a   : > { %5994 = vst.msk [vmem:[#allocation3 + $0xd8] sm:$0xff] %vm809_vm5, %v5956_v46  ;;  %6843 = vmatmul.mubr.bf16.gmra.mrb[152].mxu0 %v6534_v60 }
 0x56c   : > { %v6402_v63 = vpop.permute.xlu0 %6401 }
 0x56d   : > { %6441 = vst.msk [vmem:[#allocation3 + $0xc8] sm:$0xff] %vm809_vm5, %v6402_v63  ;;  %v5702_v27 = vpop.permute.xlu1 %5701 }
 0x56e   : > { %5739 = vst.msk [vmem:[#allocation3 + $0xf0] sm:$0xff] %vm551_vm3, %v5702_v27 }
 0x570   : > { %v6148_v12 = vpop.permute.xlu0 %6147 }
 0x571   : > { %6186 = vst.msk [vmem:[#allocation3 + $0xe0] sm:$0xff] %vm551_vm3, %v6148_v12  ;;  %v5830_v38 = vpop.permute.xlu1 %5829  ;;  %v6540_v32 = vld [vmem:[#allocation3 + $0xd8] sm:$0xff] }
 0x572   : > { %5867 = vst.msk [vmem:[#allocation3 + $0xf0] sm:$0xff] %vm680_vm4, %v5830_v38 }
 0x574   : > { %v6276_v30 = vpop.permute.xlu0 %6275  ;;  %v6538_v1 = vld [vmem:[#allocation3 + $0xc8] sm:$0xff] }
 0x575   : > { %6314 = vst.msk [vmem:[#allocation3 + $0xe0] sm:$0xff] %vm680_vm4, %v6276_v30  ;;  %v5958_v31 = vpop.permute.xlu1 %5957  ;;  %6850 = vmatprep.mubr.bf16.mxu0 %v6538_v1 }
 0x576   : > { %5995 = vst.msk [vmem:[#allocation3 + $0xf0] sm:$0xff] %vm809_vm5, %v5958_v31  ;;  %6851 = vmatmul.mubr.bf16.gmra.mrb[156].mxu0 %v6537_v5 }
 0x578   : > { %v6404_v61 = vpop.permute.xlu0 %6403 }
 0x579   : > { %6442 = vst.msk [vmem:[#allocation3 + $0xe0] sm:$0xff] %vm809_vm5, %v6404_v61  ;;  %v5704_v44 = vpop.permute.xlu1 %5703 }
 0x57a   : > { %5740 = vst.msk [vmem:[#allocation3 + $0x108] sm:$0xff] %vm551_vm3, %v5704_v44 }
 0x57c   : > { %v6150_v26 = vpop.permute.xlu0 %6149 }
 0x57d   : > { %6187 = vst.msk [vmem:[#allocation3 + $0xf8] sm:$0xff] %vm551_vm3, %v6150_v26  ;;  %v5832_v21 = vpop.permute.xlu1 %5831  ;;  %v6543_v45 = vld [vmem:[#allocation3 + $0xf0] sm:$0xff] }
 0x57e   : > { %5868 = vst.msk [vmem:[#allocation3 + $0x108] sm:$0xff] %vm680_vm4, %v5832_v21  ;;  %v11767_v34 = vpop.f32.mrb[164].mxu1 }
 0x57f   : > { %v11770_v28 = vpop.f32.mrb[165].mxu1 }
 0x580   : > { %v11772_v54 = vpop.f32.mrb[166].mxu1  ;;  %v6541_v49 = vld [vmem:[#allocation3 + $0xe0] sm:$0xff] }
 0x581   : > { %v6278_v14 = vpop.permute.xlu0 %6277  ;;  %v11774_v16 = vpop.f32.mrb[167].mxu1  ;;  %6858 = vmatprep.mubr.bf16.mxu0 %v6541_v49 }
 0x582   : > { %6315 = vst.msk [vmem:[#allocation3 + $0xf8] sm:$0xff] %vm680_vm4, %v6278_v14  ;;  %v5960_v10 = vpop.permute.xlu1 %5959  ;;  %6859 = vmatmul.mubr.bf16.gmra.mrb[160].mxu0 %v6540_v32 }
 0x583   : > { %5996 = vst.msk [vmem:[#allocation3 + $0x108] sm:$0xff] %vm809_vm5, %v5960_v10 }
 0x585   : > { %v6406_v62 = vpop.permute.xlu0 %6405 }
 0x586   : > { %6443 = vst.msk [vmem:[#allocation3 + $0xf8] sm:$0xff] %vm809_vm5, %v6406_v62  ;;  %v5706_v3 = vpop.permute.xlu1 %5705  ;;  %v11842_v62 = vld [vmem:[%s12288_s2 + $0x3] ss:$0 sm:$0xff] }
 0x587   : > { %5741 = vst.msk [vmem:[#allocation3 + $0x120] sm:$0xff] %vm551_vm3, %v5706_v3 }
 0x589   : > { %v6152_v59 = vpop.permute.xlu0 %6151 }
 0x58a   : > { %6188 = vst.msk [vmem:[#allocation3 + $0x110] sm:$0xff] %vm551_vm3, %v6152_v59  ;;  %v5834_v23 = vpop.permute.xlu1 %5833  ;;  %v6546_v8 = vld [vmem:[#allocation3 + $0x108] sm:$0xff] }
 0x58b   : > { %5869 = vst.msk [vmem:[#allocation3 + $0x120] sm:$0xff] %vm680_vm4, %v5834_v23 }
 0x58d   : > { %v6544_v17 = vld [vmem:[#allocation3 + $0xf8] sm:$0xff] }
 0x58e   : > { %6866 = vmatprep.mubr.bf16.mxu0 %v6544_v17  ;;  %v11848_v17 = vld [vmem:[%s12289_s3 + $0x3] ss:$0 sm:$0xff] }
 0x58f   : > { %v6280_v18 = vpop.permute.xlu0 %6279  ;;  %v5962_v56 = vpop.permute.xlu1 %5961  ;;  %6867 = vmatmul.mubr.bf16.gmra.mrb[164].mxu0 %v6543_v45 }
 0x590   : > { %6316 = vst.msk [vmem:[#allocation3 + $0x110] sm:$0xff] %vm680_vm4, %v6280_v18 }
 0x591   : > { %5997 = vst.msk [vmem:[#allocation3 + $0x120] sm:$0xff] %vm809_vm5, %v5962_v56  ;;  %v7278_v56 = vld [vmem:[#allocation2] sm:$0xff] }
 0x593   : > { %v6408_v25 = vpop.permute.xlu0 %6407  ;;  %v5708_v42 = vpop.permute.xlu1 %5707 }
 0x594   : > { %6444 = vst.msk [vmem:[#allocation3 + $0x110] sm:$0xff] %vm809_vm5, %v6408_v25  ;;  %v7279_v25 = vld [vmem:[#allocation2 + $0x8] sm:$0xff] }
 0x595   : > { %5742 = vst.msk [vmem:[#allocation3 + $0x138] sm:$0xff] %vm551_vm3, %v5708_v42 }
 0x596   : > { %v11789_v36 = vpop.f32.mrb[168].mxu1 }
 0x597   : > { %v6154_v29 = vpop.permute.xlu0 %6153  ;;  %v5836_v20 = vpop.permute.xlu1 %5835 }
 0x598   : > { %6189 = vst.msk [vmem:[#allocation3 + $0x128] sm:$0xff] %vm551_vm3, %v6154_v29  ;;  %v11791_v47 = vpop.f32.mrb[169].mxu1  ;;  %v6549_v43 = vld [vmem:[#allocation3 + $0x120] sm:$0xff] }
 0x599   : > { %5870 = vst.msk [vmem:[#allocation3 + $0x138] sm:$0xff] %vm680_vm4, %v5836_v20  ;;  %v11793_v55 = vpop.f32.mrb[170].mxu1 }
 0x59a   : > { %v11795_v15 = vpop.f32.mrb[171].mxu1 }
 0x59b   : > { %v6282_v53 = vpop.permute.xlu0 %6281  ;;  %v6547_v2 = vld [vmem:[#allocation3 + $0x110] sm:$0xff]  ;;  %v5964_v35 = vpop.permute.xlu1 %5963 }
 0x59c   : > { %6317 = vst.msk [vmem:[#allocation3 + $0x128] sm:$0xff] %vm680_vm4, %v6282_v53  ;;  %6874 = vmatprep.mubr.bf16.mxu0 %v6547_v2  ;;  %v7310_v53 = vpack.c.bf16 %v7279_v25, %v7278_v56 }
 0x59d   : > { %5998 = vst.msk [vmem:[#allocation3 + $0x138] sm:$0xff] %vm809_vm5, %v5964_v35  ;;  %6875 = vmatmul.mubr.bf16.gmra.mrb[168].mxu0 %v6546_v8 }
 0x59e   : > { %7326 = vst.msk [vmem:[#allocation3] sm:$0xff] %vm253_vm0, %v7310_v53 }
 0x59f   : > { %v6410_v6 = vpop.permute.xlu0 %6409  ;;  %v5710_v19 = vpop.permute.xlu1 %5709 }
 0x5a0   : > { %6445 = vst.msk [vmem:[#allocation3 + $0x128] sm:$0xff] %vm809_vm5, %v6410_v6 }
 0x5a1   : > { %5743 = vst.msk [vmem:[#allocation3 + $0x150] sm:$0xff] %vm551_vm3, %v5710_v19 }
 0x5a3   : > { %v6156_v33 = vpop.permute.xlu0 %6155  ;;  %v5838_v58 = vpop.permute.xlu1 %5837 }
 0x5a4   : > { %6190 = vst.msk [vmem:[#allocation3 + $0x140] sm:$0xff] %vm551_vm3, %v6156_v33  ;;  %v6552_v1 = vld [vmem:[#allocation3 + $0x138] sm:$0xff] }
 0x5a5   : > { %5871 = vst.msk [vmem:[#allocation3 + $0x150] sm:$0xff] %vm680_vm4, %v5838_v58 }
 0x5a7   : > { %v6550_v48 = vld [vmem:[#allocation3 + $0x128] sm:$0xff] }
 0x5a8   : > { %6882 = vmatprep.mubr.bf16.mxu0 %v6550_v48 }
 0x5a9   : > { %6883 = vmatmul.mubr.bf16.gmra.mrb[172].mxu0 %v6549_v43 }
 0x5ae   : > { %v11803_v37 = vpop.f32.mrb[172].mxu1 }
 0x5af   : > { %v11805_v39 = vpop.f32.mrb[173].mxu1 }
 0x5b0   : > { %v11807_v11 = vpop.f32.mrb[174].mxu1 }
 0x5b1   : > { %v11809_v41 = vpop.f32.mrb[175].mxu1 }
 0x5b5   : > { %v6286_v24 = vpop.permute.xlu0 %6285  ;;  %v5966_v50 = vpop.permute.xlu1 %5965 }
 0x5b6   : > { %5999 = vst.msk [vmem:[#allocation3 + $0x150] sm:$0xff] %vm809_vm5, %v5966_v50 }
 0x5b9   : > { %v6414_v22 = vpop.permute.xlu0 %6413  ;;  %v5712_v0 = vpop.permute.xlu1 %5711 }
 0x5ba   : > { %5744 = vst.msk [vmem:[#allocation3 + $0x168] sm:$0xff] %vm551_vm3, %v5712_v0 }
 0x5bd   : > { %v6284_v9 = vpop.permute.xlu0 %6283  ;;  %v5840_v4 = vpop.permute.xlu1 %5839  ;;  %v6555_v51 = vld [vmem:[#allocation3 + $0x150] sm:$0xff] }
 0x5be   : > { %6318 = vst.msk [vmem:[#allocation3 + $0x140] sm:$0xff] %vm680_vm4, %v6284_v9  ;;  %5872 = vst.msk [vmem:[#allocation3 + $0x168] sm:$0xff] %vm680_vm4, %v5840_v4 }
 0x5c1   : > { %v6412_v46 = vpop.permute.xlu0 %6411  ;;  %v5968_v60 = vpop.permute.xlu1 %5967 }
 0x5c2   : > { %6446 = vst.msk [vmem:[#allocation3 + $0x140] sm:$0xff] %vm809_vm5, %v6412_v46  ;;  %6000 = vst.msk [vmem:[#allocation3 + $0x168] sm:$0xff] %vm809_vm5, %v5968_v60 }
 0x5c5   : > { %v6158_v63 = vpop.permute.xlu0 %6157  ;;  %v7407_v42 = vpop.permute.xlu1 %7406 }
 0x5c6   : > { %6191 = vst.msk [vmem:[#allocation3 + $0x158] sm:$0xff] %vm551_vm3, %v6158_v63  ;;  %v11820_v27 = vpop.f32.mrb[176].mxu1  ;;  %7454 = vst.msk [vmem:[#allocation3] sm:$0xff] %vm551_vm3, %v7407_v42 }
 0x5c7   : > { %6319 = vst.msk [vmem:[#allocation3 + $0x158] sm:$0xff] %vm680_vm4, %v6286_v24  ;;  %v11822_v30 = vpop.f32.mrb[177].mxu1 }
 0x5c8   : > { %6447 = vst.msk [vmem:[#allocation3 + $0x158] sm:$0xff] %vm809_vm5, %v6414_v22  ;;  %v11825_v31 = vpop.f32.mrb[178].mxu1 }
 0x5c9   : > { %v6160_v12 = vpop.permute.xlu0 %6159  ;;  %v6553_v38 = vld [vmem:[#allocation3 + $0x140] sm:$0xff]  ;;  %v11827_v5 = vpop.f32.mrb[179].mxu1  ;;  %v6558_v52 = vld [vmem:[#allocation3 + $0x168] sm:$0xff] }
 0x5ca   : > { %6192 = vst.msk [vmem:[#allocation3 + $0x170] sm:$0xff] %vm551_vm3, %v6160_v12  ;;  %6890 = vmatprep.mubr.bf16.mxu0 %v6553_v38  ;;  %v7535_v35 = vpop.permute.xlu1 %7534 }
 0x5cb   : > { %6891 = vmatmul.mubr.bf16.gmra.mrb[176].mxu0 %v6552_v1  ;;  %7582 = vst.msk [vmem:[#allocation3] sm:$0xff] %vm680_vm4, %v7535_v35 }
 0x5cd   : > { %v6288_v61 = vpop.permute.xlu0 %6287 }
 0x5ce   : > { %6320 = vst.msk [vmem:[#allocation3 + $0x170] sm:$0xff] %vm680_vm4, %v6288_v61 }
 0x5cf   : > { %v6556_v44 = vld [vmem:[#allocation3 + $0x158] sm:$0xff] }
 0x5d0   : > { %6898 = vmatprep.mubr.bf16.mxu0 %v6556_v44 }
 0x5d1   : > { %v6416_v7 = vpop.permute.xlu0 %6415 }
 0x5d2   : > { %6448 = vst.msk [vmem:[#allocation3 + $0x170] sm:$0xff] %vm809_vm5, %v6416_v7 }
 0x5d3   : > { %6899 = vmatmul.mubr.bf16.gmra.mrb[180].mxu0 %v6555_v51 }
 0x5d9   : > { %v6559_v26 = vld [vmem:[#allocation3 + $0x170] sm:$0xff] }
 0x5da   : > { %6906 = vmatprep.mubr.bf16.mxu0 %v6559_v26 }
 0x5db   : > { %6907 = vmatmul.mubr.bf16.gmra.mrb[184].mxu0 %v6558_v52 }
 0x5df   : > { %v11831_v21 = vpop.f32.mrb[180].mxu1 }
 0x5e0   : > { %v11833_v40 = vpop.f32.mrb[181].mxu1 }
 0x5e1   : > { %v11835_v13 = vpop.f32.mrb[182].mxu1 }
 0x5e2   : > { %v11837_v14 = vpop.f32.mrb[183].mxu1 }
 0x5e8   : > { %v9179_v49 = vpop.f32.mrb[124].mxu0 }
 0x5e9   : > { %v9180_v57 = vpop.f32.mrb[125].mxu0 }
 0x5ea   : > { %v9181_v10 = vadd.f32 %v9180_v57, %v9179_v49  ;;  %v9182_v32 = vpop.f32.mrb[126].mxu0 }
 0x5eb   : > { %v9183_v3 = vpop.f32.mrb[127].mxu0 }
 0x5ec   : > { %v6950_v59 = vadd.f32 %v9181_v10, %v11770_v28  ;;  %v9184_v23 = vadd.f32 %v9183_v3, %v9182_v32 }
 0x5ee   : > { %v7081_v45 = vmul.f32 %v11842_v62, %v6950_v59  ;;  %v6953_v18 = vadd.f32 %v9184_v23, %v11774_v16 }
 0x5f0   : > { %v7118_v29 = vadd.f32 %v11848_v17, %v7081_v45  ;;  %v7082_v20 = vmul.f32 %v11842_v62, %v6953_v18 }
 0x5f2   : > { %vm7150_vm6 = vcmp.gt.f32.partialorder %v7118_v29, 0.0  ;;  %v7182_v28 = vmul.f32 0.01, %v7118_v29  ;;  %v7119_v2 = vadd.f32 %v11848_v17, %v7082_v20 }
 0x5f4   : > { %v7214_v8 = vsel %vm7150_vm6, %v7118_v29, %v7182_v28  ;;  %vm7151_vm7 = vcmp.gt.f32.partialorder %v7119_v2, 0.0  ;;  %v7183_v16 = vmul.f32 0.01, %v7119_v2 }
 0x5f5   : > { %7246 = vst.msk [vmem:[#allocation2 + $0x19] sm:$0xff] %vm253_vm0, %v7214_v8 }
 0x5f6   : > { %v9185_v6 = vpop.f32.mrb[128].mxu0  ;;  %v7215_v33 = vsel %vm7151_vm7, %v7119_v2, %v7183_v16 }
 0x5f7   : > { %v9186_v19 = vpop.f32.mrb[129].mxu0  ;;  %7247 = vst.msk [vmem:[#allocation2 + $0x21] sm:$0xff] %vm253_vm0, %v7215_v33 }
 0x5f8   : > { %v9187_v58 = vadd.f32 %v9186_v19, %v9185_v6  ;;  %v9188_v48 = vpop.f32.mrb[130].mxu0 }
 0x5f9   : > { %v9189_v24 = vpop.f32.mrb[131].mxu0 }
 0x5fa   : > { %v6958_v50 = vadd.f32 %v11767_v34, %v9187_v58  ;;  %v9190_v0 = vadd.f32 %v9189_v24, %v9188_v48 }
 0x5fb   : > { %v11860_v43 = vpop.f32.mrb[184].mxu1 }
 0x5fc   : > { %v11863_v22 = vpop.f32.mrb[185].mxu1  ;;  %v7083_v4 = vmul.f32 %v11842_v62, %v6958_v50  ;;  %v6961_v46 = vadd.f32 %v11772_v54, %v9190_v0  ;;  %v7598_v38 = vld [vmem:[#allocation2 + $0x18] sm:$0xff] }
 0x5fd   : > { %v11865_v9 = vpop.f32.mrb[186].mxu1  ;;  %v7344_v52 = vld [vmem:[#allocation2 + $0x19] sm:$0xff] }
 0x5fe   : > { %v11869_v60 = vpop.f32.mrb[187].mxu1  ;;  %v7120_v63 = vadd.f32 %v11848_v17, %v7083_v4  ;;  %v7084_v12 = vmul.f32 %v11842_v62, %v6961_v46  ;;  %v7790_v61 = vld [vmem:[#allocation2 + $0x1a] sm:$0xff]  ;;  %v7791_v44 = vld [vmem:[#allocation2 + $0x22] sm:$0xff] }
 0x5ff   : > { %v7599_v7 = vld [vmem:[#allocation2 + $0x20] sm:$0xff]  ;;  %v7822_v51 = vpack.c.bf16 %v7791_v44, %v7790_v61 }
 0x600   : > { %vm7152_vm8 = vcmp.gt.f32.partialorder %v7120_v63, 0.0  ;;  %v7184_v1 = vmul.f32 0.01, %v7120_v63  ;;  %v7121_v34 = vadd.f32 %v11848_v17, %v7084_v12  ;;  %v7630_v26 = vpack.c.bf16 %v7599_v7, %v7598_v38  ;;  %v7345_v49 = vld [vmem:[#allocation2 + $0x21] sm:$0xff] }
 0x601   : > { %v7375_v32 = vpack.c.bf16 %v7345_v49, %v7344_v52  ;;  %7854 = vrot.lane.b32.xlu0 %v7822_v51, %s9582_s13 }
 0x602   : > { %v7216_v57 = vsel %vm7152_vm8, %v7120_v63, %v7184_v1  ;;  %vm7153_vm9 = vcmp.gt.f32.partialorder %v7121_v34, 0.0  ;;  %v7185_v54 = vmul.f32 0.01, %v7121_v34  ;;  %v9191_v10 = vpop.f32.mrb[132].mxu0  ;;  %7662 = vrot.lane.b32.xlu1 %v7630_v26, %s9584_s15  ;;  %7327 = vst.msk [vmem:[#allocation3 + $0x18] sm:$0xff] %vm253_vm0, %v7630_v26 }
 0x603   : > { %7248 = vst.msk [vmem:[#allocation2 + $0x31] sm:$0xff] %vm253_vm0, %v7216_v57  ;;  %v9192_v3 = vpop.f32.mrb[133].mxu0  ;;  %7774 = vst.msk [vmem:[#allocation3 + $0x8] sm:$0xff] %vm253_vm0, %v7375_v32 }
 0x604   : > { %v7217_v59 = vsel %vm7153_vm9, %v7121_v34, %v7185_v54  ;;  %v9193_v23 = vadd.f32 %v9192_v3, %v9191_v10  ;;  %v9194_v45 = vpop.f32.mrb[134].mxu0 }
 0x605   : > { %7249 = vst.msk [vmem:[#allocation2 + $0x39] sm:$0xff] %vm253_vm0, %v7217_v59  ;;  %v9195_v18 = vpop.f32.mrb[135].mxu0 }
 0x606   : > { %v6966_v56 = vadd.f32 %v9193_v23, %v11791_v47  ;;  %v9196_v25 = vadd.f32 %v9195_v18, %v9194_v45  ;;  %7408 = vrot.lane.b32.xlu1 %v7375_v32, %s9582_s13 }
 0x608   : > { %v7085_v42 = vmul.f32 %v11842_v62, %v6966_v56  ;;  %v6969_v29 = vadd.f32 %v9196_v25, %v11795_v15 }
 0x60a   : > { %v7122_v20 = vadd.f32 %v11848_v17, %v7085_v42  ;;  %v7086_v53 = vmul.f32 %v11842_v62, %v6969_v29  ;;  %7536 = vrot.lane.b32.xlu1 %v7822_v51, %s9583_s14  ;;  %v7918_v28 = vld [vmem:[#allocation2 + $0x30] sm:$0xff] }
 0x60b   : > { %v8046_v2 = vld [vmem:[#allocation2 + $0x31] sm:$0xff] }
 0x60c   : > { %vm7154_vm10 = vcmp.gt.f32.partialorder %v7122_v20, 0.0  ;;  %v7186_v35 = vmul.f32 0.01, %v7122_v20  ;;  %v7123_v8 = vadd.f32 %v11848_v17, %v7086_v53  ;;  %v7919_v47 = vld [vmem:[#allocation2 + $0x38] sm:$0xff] }
 0x60d   : > { %v8047_v16 = vld [vmem:[#allocation2 + $0x39] sm:$0xff]  ;;  %v7950_v19 = vpack.c.bf16 %v7919_v47, %v7918_v28  ;;  %v9197_v24 = vpop.f32.mrb[136].mxu0 }
 0x60e   : > { %v7792_v6 = vld [vmem:[#allocation2 + $0x32] sm:$0xff]  ;;  %v8078_v33 = vpack.c.bf16 %v8047_v16, %v8046_v2  ;;  %v7793_v58 = vld [vmem:[#allocation2 + $0x3a] sm:$0xff]  ;;  %v7218_v48 = vsel %vm7154_vm10, %v7122_v20, %v7186_v35  ;;  %vm7155_vm11 = vcmp.gt.f32.partialorder %v7123_v8, 0.0  ;;  %v7187_v15 = vmul.f32 0.01, %v7123_v8  ;;  %v9198_v0 = vpop.f32.mrb[137].mxu0 }
 0x60f   : > { %v7823_v50 = vpack.c.bf16 %v7793_v58, %v7792_v6  ;;  %7250 = vst.msk [vmem:[#allocation2 + $0x49] sm:$0xff] %vm253_vm0, %v7218_v48  ;;  %7982 = vrot.lane.b32.xlu0 %v7950_v19, %s9583_s14  ;;  %7664 = vrot.lane.b32.xlu1 %v7950_v19, %s9584_s15  ;;  %7328 = vst.msk [vmem:[#allocation3 + $0x30] sm:$0xff] %vm253_vm0, %v7950_v19  ;;  %v9199_v46 = vadd.f32 %v9198_v0, %v9197_v24  ;;  %v9200_v63 = vpop.f32.mrb[138].mxu0 }
 0x610   : > { %7775 = vst.msk [vmem:[#allocation3 + $0x20] sm:$0xff] %vm253_vm0, %v8078_v33  ;;  %v7219_v4 = vsel %vm7155_vm11, %v7123_v8, %v7187_v15  ;;  %v9201_v12 = vpop.f32.mrb[139].mxu0 }
 0x611   : > { %8222 = vst.msk [vmem:[#allocation3 + $0x10] sm:$0xff] %vm253_vm0, %v7823_v50  ;;  %7251 = vst.msk [vmem:[#allocation2 + $0x51] sm:$0xff] %vm253_vm0, %v7219_v4  ;;  %v6974_v38 = vadd.f32 %v11789_v36, %v9199_v46  ;;  %v9202_v1 = vadd.f32 %v9201_v12, %v9200_v63 }
 0x613   : > { %8110 = vrot.lane.b32.xlu0 %v8078_v33, %s9584_s15  ;;  %7410 = vrot.lane.b32.xlu1 %v8078_v33, %s9582_s13  ;;  %v7087_v34 = vmul.f32 %v11842_v62, %v6974_v38  ;;  %v6977_v61 = vadd.f32 %v11793_v55, %v9202_v1 }
 0x615   : > { %v7124_v44 = vadd.f32 %v11848_v17, %v7087_v34  ;;  %v7088_v7 = vmul.f32 %v11842_v62, %v6977_v61 }
 0x616   : > { %v7920_v51 = vld [vmem:[#allocation2 + $0x48] sm:$0xff] }
 0x617   : > { %7856 = vrot.lane.b32.xlu0 %v7823_v50, %s9582_s13  ;;  %7538 = vrot.lane.b32.xlu1 %v7823_v50, %s9583_s14  ;;  %v8048_v26 = vld [vmem:[#allocation2 + $0x49] sm:$0xff]  ;;  %vm7156_vm12 = vcmp.gt.f32.partialorder %v7124_v44, 0.0  ;;  %v7188_v36 = vmul.f32 0.01, %v7124_v44  ;;  %v7125_v52 = vadd.f32 %v11848_v17, %v7088_v7 }
 0x618   : > { %v7921_v49 = vld [vmem:[#allocation2 + $0x50] sm:$0xff]  ;;  %v7284_v56 = vld [vmem:[#allocation2 + $0x48] sm:$0xff] }
 0x619   : > { %v8049_v57 = vld [vmem:[#allocation2 + $0x51] sm:$0xff]  ;;  %v7951_v10 = vpack.c.bf16 %v7921_v49, %v7920_v51  ;;  %v7220_v59 = vsel %vm7156_vm12, %v7124_v44, %v7188_v36  ;;  %vm7157_vm13 = vcmp.gt.f32.partialorder %v7125_v52, 0.0  ;;  %v7189_v23 = vmul.f32 0.01, %v7125_v52  ;;  %v9203_v45 = vpop.f32.mrb[140].mxu0 }
 0x61a   : > { %v7794_v54 = vld [vmem:[#allocation2 + $0x4a] sm:$0xff]  ;;  %v8079_v32 = vpack.c.bf16 %v8049_v57, %v8048_v26  ;;  %v7795_v55 = vld [vmem:[#allocation2 + $0x52] sm:$0xff]  ;;  %7252 = vst.msk [vmem:[#allocation2 + $0x61] sm:$0xff] %vm253_vm0, %v7220_v59  ;;  %v9204_v25 = vpop.f32.mrb[141].mxu0 }
 0x61b   : > { %v7285_v3 = vld [vmem:[#allocation2 + $0x50] sm:$0xff]  ;;  %v7824_v18 = vpack.c.bf16 %v7795_v55, %v7794_v54  ;;  %7984 = vrot.lane.b32.xlu0 %v7951_v10, %s9583_s14  ;;  %7666 = vrot.lane.b32.xlu1 %v7951_v10, %s9584_s15  ;;  %v7221_v29 = vsel %vm7157_vm13, %v7125_v52, %v7189_v23  ;;  %v9205_v20 = vadd.f32 %v9204_v25, %v9203_v45  ;;  %v9206_v53 = vpop.f32.mrb[142].mxu0 }
 0x61c   : > { %v7313_v42 = vpack.c.bf16 %v7285_v3, %v7284_v56  ;;  %7776 = vst.msk [vmem:[#allocation3 + $0x38] sm:$0xff] %vm253_vm0, %v8079_v32  ;;  %7253 = vst.msk [vmem:[#allocation2 + $0x69] sm:$0xff] %vm253_vm0, %v7221_v29  ;;  %v9207_v28 = vpop.f32.mrb[143].mxu0 }
 0x61d   : > { %8223 = vst.msk [vmem:[#allocation3 + $0x28] sm:$0xff] %vm253_vm0, %v7824_v18  ;;  %v6982_v2 = vadd.f32 %v9205_v20, %v11805_v39  ;;  %v9208_v35 = vadd.f32 %v9207_v28, %v9206_v53 }
 0x61e   : > { %7329 = vst.msk [vmem:[#allocation3 + $0x48] sm:$0xff] %vm253_vm0, %v7313_v42 }
 0x61f   : > { %8112 = vrot.lane.b32.xlu0 %v8079_v32, %s9584_s15  ;;  %7412 = vrot.lane.b32.xlu1 %v8079_v32, %s9582_s13  ;;  %v7089_v47 = vmul.f32 %v11842_v62, %v6982_v2  ;;  %v6985_v16 = vadd.f32 %v9208_v35, %v11809_v41 }
 0x620   : > { %v11913_v8 = vpop.f32.mrb[188].mxu1 }
 0x621   : > { %v11919_v6 = vpop.f32.mrb[189].mxu1  ;;  %v7126_v33 = vadd.f32 %v11848_v17, %v7089_v47  ;;  %v7090_v58 = vmul.f32 %v11842_v62, %v6985_v16  ;;  %v7922_v48 = vld [vmem:[#allocation2 + $0x60] sm:$0xff] }
 0x622   : > { %v11921_v19 = vpop.f32.mrb[190].mxu1  ;;  %v7286_v0 = vld [vmem:[#allocation2 + $0x60] sm:$0xff] }
 0x623   : > { %v11925_v39 = vpop.f32.mrb[191].mxu1  ;;  %7858 = vrot.lane.b32.xlu0 %v7824_v18, %s9582_s13  ;;  %7540 = vrot.lane.b32.xlu1 %v7824_v18, %s9583_s14  ;;  %vm7158_vm14 = vcmp.gt.f32.partialorder %v7126_v33, 0.0  ;;  %v7190_v15 = vmul.f32 0.01, %v7126_v33  ;;  %v7127_v24 = vadd.f32 %v11848_v17, %v7090_v58  ;;  %v7923_v41 = vld [vmem:[#allocation2 + $0x68] sm:$0xff] }
 0x624   : > { %v7796_v50 = vld [vmem:[#allocation2 + $0x62] sm:$0xff]  ;;  %v7952_v4 = vpack.c.bf16 %v7923_v41, %v7922_v48  ;;  %v7797_v46 = vld [vmem:[#allocation2 + $0x6a] sm:$0xff] }
 0x625   : > { %v7287_v63 = vld [vmem:[#allocation2 + $0x68] sm:$0xff]  ;;  %v7222_v38 = vsel %vm7158_vm14, %v7126_v33, %v7190_v15  ;;  %vm7159_vm15 = vcmp.gt.f32.partialorder %v7127_v24, 0.0  ;;  %v7191_v1 = vmul.f32 0.01, %v7127_v24  ;;  %v9209_v34 = vpop.f32.mrb[144].mxu0  ;;  %v7825_v44 = vpack.c.bf16 %v7797_v46, %v7796_v50 }
 0x626   : > { %v7733_v12 = vld [vmem:[#allocation2 + $0x69] sm:$0xff]  ;;  %v7732_v7 = vld [vmem:[#allocation2 + $0x61] sm:$0xff]  ;;  %7254 = vst.msk [vmem:[#allocation2 + $0x79] sm:$0xff] %vm253_vm0, %v7222_v38  ;;  %v9210_v51 = vpop.f32.mrb[145].mxu0  ;;  %v7314_v26 = vpack.c.bf16 %v7287_v63, %v7286_v0 }
 0x627   : > { %v8051_v61 = vld [vmem:[#allocation2 + $0x69] sm:$0xff]  ;;  %7986 = vrot.lane.b32.xlu0 %v7952_v4, %s9583_s14  ;;  %7668 = vrot.lane.b32.xlu1 %v7952_v4, %s9584_s15  ;;  %v7761_v36 = vpack.c.bf16 %v7733_v12, %v7732_v7  ;;  %v7223_v52 = vsel %vm7159_vm15, %v7127_v24, %v7191_v1  ;;  %v9211_v49 = vadd.f32 %v9210_v51, %v9209_v34  ;;  %v9212_v57 = vpop.f32.mrb[146].mxu0  ;;  %v8050_v54 = vld [vmem:[#allocation2 + $0x61] sm:$0xff] }
 0x628   : > { %8224 = vst.msk [vmem:[#allocation3 + $0x40] sm:$0xff] %vm253_vm0, %v7825_v44  ;;  %7255 = vst.msk [vmem:[#allocation2 + $0x81] sm:$0xff] %vm253_vm0, %v7223_v52  ;;  %v9213_v10 = vpop.f32.mrb[147].mxu0  ;;  %v8080_v32 = vpack.c.bf16 %v8051_v61, %v8050_v54  ;;  %v11938_v59 = vpop.f32.mrb[192].mxu1 }
 0x629   : > { %7330 = vst.msk [vmem:[#allocation3 + $0x60] sm:$0xff] %vm253_vm0, %v7314_v26  ;;  %7777 = vst.msk [vmem:[#allocation3 + $0x50] sm:$0xff] %vm253_vm0, %v7761_v36  ;;  %v6990_v55 = vadd.f32 %v11803_v37, %v9211_v49  ;;  %v9214_v3 = vadd.f32 %v9213_v10, %v9212_v57  ;;  %v11942_v23 = vpop.f32.mrb[193].mxu1 }
 0x62a   : > { %v11946_v56 = vpop.f32.mrb[194].mxu1 }
 0x62b   : > { %8114 = vrot.lane.b32.xlu0 %v8080_v32, %s9584_s15  ;;  %7414 = vrot.lane.b32.xlu1 %v8080_v32, %s9582_s13  ;;  %v7091_v45 = vmul.f32 %v11842_v62, %v6990_v55  ;;  %v6993_v18 = vadd.f32 %v11807_v11, %v9214_v3  ;;  %v11948_v25 = vpop.f32.mrb[195].mxu1 }
 0x62d   : > { %v7128_v42 = vadd.f32 %v11848_v17, %v7091_v45  ;;  %v7092_v37 = vmul.f32 %v11842_v62, %v6993_v18  ;;  %v7924_v29 = vld [vmem:[#allocation2 + $0x78] sm:$0xff] }
 0x62e   : > { %v7288_v11 = vld [vmem:[#allocation2 + $0x78] sm:$0xff] }
 0x62f   : > { %7860 = vrot.lane.b32.xlu0 %v7825_v44, %s9582_s13  ;;  %7542 = vrot.lane.b32.xlu1 %v7825_v44, %s9583_s14  ;;  %vm7160_vm1 = vcmp.gt.f32.partialorder %v7128_v42, 0.0  ;;  %v7192_v20 = vmul.f32 0.01, %v7128_v42  ;;  %v7129_v53 = vadd.f32 %v11848_v17, %v7092_v37  ;;  %v7925_v28 = vld [vmem:[#allocation2 + $0x80] sm:$0xff] }
 0x630   : > { %v7798_v2 = vld [vmem:[#allocation2 + $0x7a] sm:$0xff]  ;;  %v7953_v35 = vpack.c.bf16 %v7925_v28, %v7924_v29  ;;  %v7799_v47 = vld [vmem:[#allocation2 + $0x82] sm:$0xff] }
 0x631   : > { %v7289_v16 = vld [vmem:[#allocation2 + $0x80] sm:$0xff]  ;;  %v7224_v58 = vsel %vm7160_vm1, %v7128_v42, %v7192_v20  ;;  %vm7161_vm2 = vcmp.gt.f32.partialorder %v7129_v53, 0.0  ;;  %v7193_v48 = vmul.f32 0.01, %v7129_v53  ;;  %v9215_v15 = vpop.f32.mrb[148].mxu0  ;;  %v7826_v41 = vpack.c.bf16 %v7799_v47, %v7798_v2 }
 0x632   : > { %v7735_v33 = vld [vmem:[#allocation2 + $0x81] sm:$0xff]  ;;  %v7734_v50 = vld [vmem:[#allocation2 + $0x79] sm:$0xff]  ;;  %7256 = vst.msk [vmem:[#allocation2 + $0x91] sm:$0xff] %vm253_vm0, %v7224_v58  ;;  %v9216_v0 = vpop.f32.mrb[149].mxu0  ;;  %v7315_v4 = vpack.c.bf16 %v7289_v16, %v7288_v11 }
 0x633   : > { %v8053_v24 = vld [vmem:[#allocation2 + $0x81] sm:$0xff]  ;;  %7988 = vrot.lane.b32.xlu0 %v7953_v35, %s9583_s14  ;;  %7670 = vrot.lane.b32.xlu1 %v7953_v35, %s9584_s15  ;;  %v7762_v46 = vpack.c.bf16 %v7735_v33, %v7734_v50  ;;  %v7225_v63 = vsel %vm7161_vm2, %v7129_v53, %v7193_v48  ;;  %v9217_v12 = vadd.f32 %v9216_v0, %v9215_v15  ;;  %v9218_v38 = vpop.f32.mrb[150].mxu0  ;;  %v8052_v1 = vld [vmem:[#allocation2 + $0x79] sm:$0xff] }
 0x634   : > { %8225 = vst.msk [vmem:[#allocation3 + $0x58] sm:$0xff] %vm253_vm0, %v7826_v41  ;;  %7257 = vst.msk [vmem:[#allocation2 + $0x99] sm:$0xff] %vm253_vm0, %v7225_v63  ;;  %v9219_v34 = vpop.f32.mrb[151].mxu0  ;;  %v8081_v61 = vpack.c.bf16 %v8053_v24, %v8052_v1 }
 0x635   : > { %7331 = vst.msk [vmem:[#allocation3 + $0x78] sm:$0xff] %vm253_vm0, %v7315_v4  ;;  %7778 = vst.msk [vmem:[#allocation3 + $0x68] sm:$0xff] %vm253_vm0, %v7762_v46  ;;  %v6998_v44 = vadd.f32 %v9217_v12, %v11822_v30  ;;  %v9220_v7 = vadd.f32 %v9219_v34, %v9218_v38 }
 0x637   : > { %8116 = vrot.lane.b32.xlu0 %v8081_v61, %s9584_s15  ;;  %7416 = vrot.lane.b32.xlu1 %v8081_v61, %s9582_s13  ;;  %v7093_v51 = vmul.f32 %v11842_v62, %v6998_v44  ;;  %v7001_v26 = vadd.f32 %v9220_v7, %v11827_v5 }
 0x639   : > { %v7130_v36 = vadd.f32 %v11848_v17, %v7093_v51  ;;  %v7094_v52 = vmul.f32 %v11842_v62, %v7001_v26  ;;  %v7926_v49 = vld [vmem:[#allocation2 + $0x90] sm:$0xff] }
 0x63a   : > { %v7290_v10 = vld [vmem:[#allocation2 + $0x90] sm:$0xff] }
 0x63b   : > { %7862 = vrot.lane.b32.xlu0 %v7826_v41, %s9582_s13  ;;  %7544 = vrot.lane.b32.xlu1 %v7826_v41, %s9583_s14  ;;  %vm7162_vm6 = vcmp.gt.f32.partialorder %v7130_v36, 0.0  ;;  %v7194_v30 = vmul.f32 0.01, %v7130_v36  ;;  %v7131_v57 = vadd.f32 %v11848_v17, %v7094_v52  ;;  %v7927_v54 = vld [vmem:[#allocation2 + $0x98] sm:$0xff] }
 0x63c   : > { %v7736_v32 = vld [vmem:[#allocation2 + $0x91] sm:$0xff]  ;;  %v7954_v55 = vpack.c.bf16 %v7927_v54, %v7926_v49  ;;  %v8055_v3 = vld [vmem:[#allocation2 + $0x99] sm:$0xff] }
 0x63d   : > { %v7291_v45 = vld [vmem:[#allocation2 + $0x98] sm:$0xff]  ;;  %v7226_v18 = vsel %vm7162_vm6, %v7130_v36, %v7194_v30  ;;  %vm7163_vm7 = vcmp.gt.f32.partialorder %v7131_v57, 0.0  ;;  %v7195_v42 = vmul.f32 0.01, %v7131_v57  ;;  %v9221_v37 = vpop.f32.mrb[152].mxu0 }
 0x63e   : > { %v7737_v5 = vld [vmem:[#allocation2 + $0x99] sm:$0xff]  ;;  %7258 = vst.msk [vmem:[#allocation2 + $0xa9] sm:$0xff] %vm253_vm0, %v7226_v18  ;;  %v9222_v53 = vpop.f32.mrb[153].mxu0  ;;  %v7316_v28 = vpack.c.bf16 %v7291_v45, %v7290_v10  ;;  %v8054_v33 = vld [vmem:[#allocation2 + $0x91] sm:$0xff] }
 0x63f   : > { %v8182_v29 = vld [vmem:[#allocation2 + $0x92] sm:$0xff]  ;;  %v8183_v20 = vld [vmem:[#allocation2 + $0x9a] sm:$0xff]  ;;  %7990 = vrot.lane.b32.xlu0 %v7954_v55, %s9583_s14  ;;  %7672 = vrot.lane.b32.xlu1 %v7954_v55, %s9584_s15  ;;  %v7763_v2 = vpack.c.bf16 %v7737_v5, %v7736_v32  ;;  %v7227_v35 = vsel %vm7163_vm7, %v7131_v57, %v7195_v42  ;;  %v9223_v47 = vadd.f32 %v9222_v53, %v9221_v37  ;;  %v9224_v16 = vpop.f32.mrb[154].mxu0 }
 0x640   : > { %v8210_v11 = vpack.c.bf16 %v8183_v20, %v8182_v29  ;;  %7259 = vst.msk [vmem:[#allocation2 + $0xb1] sm:$0xff] %vm253_vm0, %v7227_v35  ;;  %v9225_v58 = vpop.f32.mrb[155].mxu0  ;;  %v8082_v48 = vpack.c.bf16 %v8055_v3, %v8054_v33  ;;  %7332 = vst.msk [vmem:[#allocation3 + $0x90] sm:$0xff] %vm253_vm0, %v7316_v28  ;;  %v7800_v41 = vld [vmem:[#allocation2 + $0x92] sm:$0xff]  ;;  %v7801_v50 = vld [vmem:[#allocation2 + $0x9a] sm:$0xff] }
 0x641   : > { %7779 = vst.msk [vmem:[#allocation3 + $0x80] sm:$0xff] %vm253_vm0, %v7763_v2  ;;  %v7006_v15 = vadd.f32 %v11820_v27, %v9223_v47  ;;  %v9226_v24 = vadd.f32 %v9225_v58, %v9224_v16  ;;  %v7827_v46 = vpack.c.bf16 %v7801_v50, %v7800_v41 }
 0x642   : > { %8226 = vst.msk [vmem:[#allocation3 + $0x70] sm:$0xff] %vm253_vm0, %v8210_v11 }
 0x643   : > { %8118 = vrot.lane.b32.xlu0 %v8082_v48, %s9584_s15  ;;  %7418 = vrot.lane.b32.xlu1 %v8082_v48, %s9582_s13  ;;  %v7095_v0 = vmul.f32 %v11842_v62, %v7006_v15  ;;  %v7009_v4 = vadd.f32 %v11825_v31, %v9226_v24 }
 0x645   : > { %v7132_v63 = vadd.f32 %v11848_v17, %v7095_v0  ;;  %v7096_v12 = vmul.f32 %v11842_v62, %v7009_v4  ;;  %v7928_v1 = vld [vmem:[#allocation2 + $0xa8] sm:$0xff] }
 0x646   : > { %v7292_v7 = vld [vmem:[#allocation2 + $0xa8] sm:$0xff] }
 0x647   : > { %7864 = vrot.lane.b32.xlu0 %v7827_v46, %s9582_s13  ;;  %7546 = vrot.lane.b32.xlu1 %v7827_v46, %s9583_s14  ;;  %vm7164_vm8 = vcmp.gt.f32.partialorder %v7132_v63, 0.0  ;;  %v7196_v27 = vmul.f32 0.01, %v7132_v63  ;;  %v7133_v38 = vadd.f32 %v11848_v17, %v7096_v12  ;;  %v7929_v34 = vld [vmem:[#allocation2 + $0xb0] sm:$0xff] }
 0x648   : > { %v7955_v61 = vpack.c.bf16 %v7929_v34, %v7928_v1  ;;  %v8057_v44 = vld [vmem:[#allocation2 + $0xb1] sm:$0xff]  ;;  %v7738_v10 = vld [vmem:[#allocation2 + $0xa9] sm:$0xff] }
 0x649   : > { %v7293_v51 = vld [vmem:[#allocation2 + $0xb0] sm:$0xff]  ;;  %v7228_v31 = vsel %vm7164_vm8, %v7132_v63, %v7196_v27  ;;  %vm7165_vm9 = vcmp.gt.f32.partialorder %v7133_v38, 0.0  ;;  %v7197_v26 = vmul.f32 0.01, %v7133_v38  ;;  %v9227_v36 = vpop.f32.mrb[156].mxu0 }
 0x64a   : > { %v8184_v52 = vld [vmem:[#allocation2 + $0xaa] sm:$0xff]  ;;  %v8185_v49 = vld [vmem:[#allocation2 + $0xb2] sm:$0xff]  ;;  %7260 = vst.msk [vmem:[#allocation2 + $0xc1] sm:$0xff] %vm253_vm0, %v7228_v31  ;;  %v9228_v30 = vpop.f32.mrb[157].mxu0  ;;  %v7317_v57 = vpack.c.bf16 %v7293_v51, %v7292_v7 }
 0x64b   : > { %7992 = vrot.lane.b32.xlu0 %v7955_v61, %s9583_s14  ;;  %7674 = vrot.lane.b32.xlu1 %v7955_v61, %s9584_s15  ;;  %v8211_v54 = vpack.c.bf16 %v8185_v49, %v8184_v52  ;;  %v7739_v32 = vld [vmem:[#allocation2 + $0xb1] sm:$0xff]  ;;  %v7229_v55 = vsel %vm7165_vm9, %v7133_v38, %v7197_v26  ;;  %v9229_v3 = vadd.f32 %v9228_v30, %v9227_v36  ;;  %v9230_v45 = vpop.f32.mrb[158].mxu0  ;;  %v8056_v5 = vld [vmem:[#allocation2 + $0xa9] sm:$0xff] }
 0x64c   : > { %v7764_v18 = vpack.c.bf16 %v7739_v32, %v7738_v10  ;;  %7261 = vst.msk [vmem:[#allocation2 + $0xc9] sm:$0xff] %vm253_vm0, %v7229_v55  ;;  %v9231_v42 = vpop.f32.mrb[159].mxu0  ;;  %v8083_v37 = vpack.c.bf16 %v8057_v44, %v8056_v5  ;;  %7333 = vst.msk [vmem:[#allocation3 + $0xa8] sm:$0xff] %vm253_vm0, %v7317_v57  ;;  %v7802_v53 = vld [vmem:[#allocation2 + $0xaa] sm:$0xff]  ;;  %v7803_v28 = vld [vmem:[#allocation2 + $0xb2] sm:$0xff] }
 0x64d   : > { %8227 = vst.msk [vmem:[#allocation3 + $0x88] sm:$0xff] %vm253_vm0, %v8211_v54  ;;  %v7014_v29 = vadd.f32 %v9229_v3, %v11833_v40  ;;  %v9232_v20 = vadd.f32 %v9231_v42, %v9230_v45  ;;  %v7828_v35 = vpack.c.bf16 %v7803_v28, %v7802_v53 }
 0x64e   : > { %7780 = vst.msk [vmem:[#allocation3 + $0x98] sm:$0xff] %vm253_vm0, %v7764_v18 }
 0x64f   : > { %8120 = vrot.lane.b32.xlu0 %v8083_v37, %s9584_s15  ;;  %7420 = vrot.lane.b32.xlu1 %v8083_v37, %s9582_s13  ;;  %v7097_v2 = vmul.f32 %v11842_v62, %v7014_v29  ;;  %v7017_v11 = vadd.f32 %v9232_v20, %v11837_v14 }
 0x651   : > { %v7134_v47 = vadd.f32 %v11848_v17, %v7097_v2  ;;  %v7098_v16 = vmul.f32 %v11842_v62, %v7017_v11  ;;  %v7930_v58 = vld [vmem:[#allocation2 + $0xc0] sm:$0xff] }
 0x652   : > { %v7294_v50 = vld [vmem:[#allocation2 + $0xc0] sm:$0xff] }
 0x653   : > { %7866 = vrot.lane.b32.xlu0 %v7828_v35, %s9582_s13  ;;  %7548 = vrot.lane.b32.xlu1 %v7828_v35, %s9583_s14  ;;  %vm7166_vm10 = vcmp.gt.f32.partialorder %v7134_v47, 0.0  ;;  %v7198_v40 = vmul.f32 0.01, %v7134_v47  ;;  %v7135_v33 = vadd.f32 %v11848_v17, %v7098_v16  ;;  %v7931_v48 = vld [vmem:[#allocation2 + $0xc8] sm:$0xff] }
 0x654   : > { %v7956_v15 = vpack.c.bf16 %v7931_v48, %v7930_v58  ;;  %v8059_v24 = vld [vmem:[#allocation2 + $0xc9] sm:$0xff]  ;;  %v7740_v1 = vld [vmem:[#allocation2 + $0xc1] sm:$0xff] }
 0x655   : > { %v8186_v41 = vld [vmem:[#allocation2 + $0xc2] sm:$0xff]  ;;  %v7230_v14 = vsel %vm7166_vm10, %v7134_v47, %v7198_v40  ;;  %vm7167_vm11 = vcmp.gt.f32.partialorder %v7135_v33, 0.0  ;;  %v7199_v0 = vmul.f32 0.01, %v7135_v33  ;;  %v9233_v4 = vpop.f32.mrb[160].mxu0  ;;  %v8187_v46 = vld [vmem:[#allocation2 + $0xca] sm:$0xff] }
 0x656   : > { %v7295_v63 = vld [vmem:[#allocation2 + $0xc8] sm:$0xff]  ;;  %7262 = vst.msk [vmem:[#allocation2 + $0xd9] sm:$0xff] %vm253_vm0, %v7230_v14  ;;  %v9234_v12 = vpop.f32.mrb[161].mxu0  ;;  %v8212_v27 = vpack.c.bf16 %v8187_v46, %v8186_v41 }
 0x657   : > { %7994 = vrot.lane.b32.xlu0 %v7956_v15, %s9583_s14  ;;  %7676 = vrot.lane.b32.xlu1 %v7956_v15, %s9584_s15  ;;  %v7318_v38 = vpack.c.bf16 %v7295_v63, %v7294_v50  ;;  %v7741_v34 = vld [vmem:[#allocation2 + $0xc9] sm:$0xff]  ;;  %v7231_v61 = vsel %vm7167_vm11, %v7135_v33, %v7199_v0  ;;  %v9235_v44 = vadd.f32 %v9234_v12, %v9233_v4  ;;  %v9236_v7 = vpop.f32.mrb[162].mxu0  ;;  %v8058_v51 = vld [vmem:[#allocation2 + $0xc1] sm:$0xff] }
 0x658   : > { %v7765_v31 = vpack.c.bf16 %v7741_v34, %v7740_v1  ;;  %7263 = vst.msk [vmem:[#allocation2 + $0xe1] sm:$0xff] %vm253_vm0, %v7231_v61  ;;  %v9237_v26 = vpop.f32.mrb[163].mxu0  ;;  %v8084_v36 = vpack.c.bf16 %v8059_v24, %v8058_v51  ;;  %8228 = vst.msk [vmem:[#allocation3 + $0xa0] sm:$0xff] %vm253_vm0, %v8212_v27  ;;  %v7804_v30 = vld [vmem:[#allocation2 + $0xc2] sm:$0xff]  ;;  %v7805_v57 = vld [vmem:[#allocation2 + $0xca] sm:$0xff] }
 0x659   : > { %7334 = vst.msk [vmem:[#allocation3 + $0xc0] sm:$0xff] %vm253_vm0, %v7318_v38  ;;  %v7022_v52 = vadd.f32 %v11831_v21, %v9235_v44  ;;  %v9238_v49 = vadd.f32 %v9237_v26, %v9236_v7  ;;  %v7829_v32 = vpack.c.bf16 %v7805_v57, %v7804_v30 }
 0x65a   : > { %7781 = vst.msk [vmem:[#allocation3 + $0xb0] sm:$0xff] %vm253_vm0, %v7765_v31 }
 0x65b   : > { %8122 = vrot.lane.b32.xlu0 %v8084_v36, %s9584_s15  ;;  %7422 = vrot.lane.b32.xlu1 %v8084_v36, %s9582_s13  ;;  %v7099_v54 = vmul.f32 %v11842_v62, %v7022_v52  ;;  %v7025_v10 = vadd.f32 %v11835_v13, %v9238_v49 }
 0x65d   : > { %v7136_v55 = vadd.f32 %v11848_v17, %v7099_v54  ;;  %v7100_v3 = vmul.f32 %v11842_v62, %v7025_v10  ;;  %v7932_v5 = vld [vmem:[#allocation2 + $0xd8] sm:$0xff] }
 0x65e   : > { %v7296_v20 = vld [vmem:[#allocation2 + $0xd8] sm:$0xff] }
 0x65f   : > { %7868 = vrot.lane.b32.xlu0 %v7829_v32, %s9582_s13  ;;  %7550 = vrot.lane.b32.xlu1 %v7829_v32, %s9583_s14  ;;  %vm7168_vm12 = vcmp.gt.f32.partialorder %v7136_v55, 0.0  ;;  %v7200_v21 = vmul.f32 0.01, %v7136_v55  ;;  %v7137_v45 = vadd.f32 %v11848_v17, %v7100_v3  ;;  %v7933_v18 = vld [vmem:[#allocation2 + $0xe0] sm:$0xff]  ;;  %v12043_v32 = vpop.permute.xlu0 %8012 }
 0x660   : > { %v7957_v42 = vpack.c.bf16 %v7933_v18, %v7932_v5  ;;  %v8061_v37 = vld [vmem:[#allocation2 + $0xe1] sm:$0xff]  ;;  %v7742_v40 = vld [vmem:[#allocation2 + $0xd9] sm:$0xff] }
 0x661   : > { %v8188_v29 = vld [vmem:[#allocation2 + $0xda] sm:$0xff]  ;;  %v7232_v13 = vsel %vm7168_vm12, %v7136_v55, %v7200_v21  ;;  %vm7169_vm13 = vcmp.gt.f32.partialorder %v7137_v45, 0.0  ;;  %v7201_v53 = vmul.f32 0.01, %v7137_v45  ;;  %v8189_v2 = vld [vmem:[#allocation2 + $0xe2] sm:$0xff] }
 0x662   : > { %v9239_v28 = vpop.f32.mrb[164].mxu0  ;;  %v7297_v11 = vld [vmem:[#allocation2 + $0xe0] sm:$0xff]  ;;  %7264 = vst.msk [vmem:[#allocation2 + $0xf1] sm:$0xff] %vm253_vm0, %v7232_v13  ;;  %v8213_v47 = vpack.c.bf16 %v8189_v2, %v8188_v29 }
 0x663   : > { %v9240_v35 = vpop.f32.mrb[165].mxu0  ;;  %7996 = vrot.lane.b32.xlu0 %v7957_v42, %s9583_s14  ;;  %7678 = vrot.lane.b32.xlu1 %v7957_v42, %s9584_s15  ;;  %v7319_v16 = vpack.c.bf16 %v7297_v11, %v7296_v20  ;;  %v7743_v33 = vld [vmem:[#allocation2 + $0xe1] sm:$0xff]  ;;  %v7233_v58 = vsel %vm7169_vm13, %v7137_v45, %v7201_v53  ;;  %v8060_v24 = vld [vmem:[#allocation2 + $0xd9] sm:$0xff] }
 0x664   : > { %v9241_v48 = vadd.f32 %v9240_v35, %v9239_v28  ;;  %v9242_v15 = vpop.f32.mrb[166].mxu0  ;;  %v7766_v41 = vpack.c.bf16 %v7743_v33, %v7742_v40  ;;  %7265 = vst.msk [vmem:[#allocation2 + $0xf9] sm:$0xff] %vm253_vm0, %v7233_v58  ;;  %v8085_v14 = vpack.c.bf16 %v8061_v37, %v8060_v24  ;;  %8229 = vst.msk [vmem:[#allocation3 + $0xb8] sm:$0xff] %vm253_vm0, %v8213_v47  ;;  %v7806_v46 = vld [vmem:[#allocation2 + $0xda] sm:$0xff]  ;;  %v7807_v63 = vld [vmem:[#allocation2 + $0xe2] sm:$0xff] }
 0x665   : > { %v9243_v50 = vpop.f32.mrb[167].mxu0  ;;  %7335 = vst.msk [vmem:[#allocation3 + $0xd8] sm:$0xff] %vm253_vm0, %v7319_v16  ;;  %v7830_v38 = vpack.c.bf16 %v7807_v63, %v7806_v46  ;;  %v8241_v11 = vld [vmem:[#allocation3 + $0x10] sm:$0xff] }
 0x666   : > { %v7030_v0 = vadd.f32 %v9241_v48, %v11863_v22  ;;  %v9244_v4 = vadd.f32 %v9243_v50, %v9242_v15  ;;  %7782 = vst.msk [vmem:[#allocation3 + $0xc8] sm:$0xff] %vm253_vm0, %v7766_v41  ;;  %v8316_v48 = vsel %vm253_vm0, %v8241_v11, 0 }
 0x667   : > { %8124 = vrot.lane.b32.xlu0 %v8085_v14, %s9584_s15  ;;  %7424 = vrot.lane.b32.xlu1 %v8085_v14, %s9582_s13 }
 0x668   : > { %v7101_v12 = vmul.f32 %v11842_v62, %v7030_v0  ;;  %v7033_v27 = vadd.f32 %v9244_v4, %v11869_v60 }
 0x669   : > { %v7934_v44 = vld [vmem:[#allocation2 + $0xf0] sm:$0xff] }
 0x66a   : > { %v7138_v1 = vadd.f32 %v11848_v17, %v7101_v12  ;;  %v7102_v34 = vmul.f32 %v11842_v62, %v7033_v27  ;;  %v7298_v36 = vld [vmem:[#allocation2 + $0xf0] sm:$0xff] }
 0x66b   : > { %7870 = vrot.lane.b32.xlu0 %v7830_v38, %s9582_s13  ;;  %7552 = vrot.lane.b32.xlu1 %v7830_v38, %s9583_s14  ;;  %v7935_v7 = vld [vmem:[#allocation2 + $0xf8] sm:$0xff] }
 0x66c   : > { %vm7170_vm14 = vcmp.gt.f32.partialorder %v7138_v1, 0.0  ;;  %v7202_v22 = vmul.f32 0.01, %v7138_v1  ;;  %v7139_v61 = vadd.f32 %v11848_v17, %v7102_v34  ;;  %v8190_v51 = vld [vmem:[#allocation2 + $0xf2] sm:$0xff]  ;;  %v7958_v31 = vpack.c.bf16 %v7935_v7, %v7934_v44  ;;  %v8191_v26 = vld [vmem:[#allocation2 + $0xfa] sm:$0xff] }
 0x66d   : > { %v7299_v60 = vld [vmem:[#allocation2 + $0xf8] sm:$0xff]  ;;  %v8214_v57 = vpack.c.bf16 %v8191_v26, %v8190_v51 }
 0x66e   : > { %v7234_v52 = vsel %vm7170_vm14, %v7138_v1, %v7202_v22  ;;  %vm7171_vm15 = vcmp.gt.f32.partialorder %v7139_v61, 0.0  ;;  %v7203_v49 = vmul.f32 0.01, %v7139_v61  ;;  %v8063_v30 = vld [vmem:[#allocation2 + $0xf9] sm:$0xff]  ;;  %v7744_v54 = vld [vmem:[#allocation2 + $0xf1] sm:$0xff]  ;;  %v7320_v55 = vpack.c.bf16 %v7299_v60, %v7298_v36 }
 0x66f   : > { %v7745_v10 = vld [vmem:[#allocation2 + $0xf9] sm:$0xff]  ;;  %7266 = vst.msk [vmem:[#allocation2 + $0x109] sm:$0xff] %vm253_vm0, %v7234_v52  ;;  %7998 = vrot.lane.b32.xlu0 %v7958_v31, %s9583_s14  ;;  %7680 = vrot.lane.b32.xlu1 %v7958_v31, %s9584_s15  ;;  %v8062_v5 = vld [vmem:[#allocation2 + $0xf1] sm:$0xff]  ;;  %8230 = vst.msk [vmem:[#allocation3 + $0xd0] sm:$0xff] %vm253_vm0, %v8214_v57 }
 0x670   : > { %v7767_v3 = vpack.c.bf16 %v7745_v10, %v7744_v54  ;;  %v7235_v21 = vsel %vm7171_vm15, %v7139_v61, %v7203_v49  ;;  %v9245_v45 = vpop.f32.mrb[168].mxu0  ;;  %v8086_v42 = vpack.c.bf16 %v8063_v30, %v8062_v5  ;;  %7336 = vst.msk [vmem:[#allocation3 + $0xf0] sm:$0xff] %vm253_vm0, %v7320_v55  ;;  %v8244_v52 = vld [vmem:[#allocation3 + $0x28] sm:$0xff]  ;;  %v12078_v49 = vld [vmem:[%s12288_s2 + $0x3] ss:$0 sm:$0xff] }
 0x671   : > { %7267 = vst.msk [vmem:[#allocation2 + $0x111] sm:$0xff] %vm253_vm0, %v7235_v21  ;;  %v9246_v18 = vpop.f32.mrb[169].mxu0 }
 0x672   : > { %7783 = vst.msk [vmem:[#allocation3 + $0xe0] sm:$0xff] %vm253_vm0, %v7767_v3  ;;  %v9247_v37 = vadd.f32 %v9246_v18, %v9245_v45  ;;  %v9248_v29 = vpop.f32.mrb[170].mxu0 }
 0x673   : > { %v9249_v20 = vpop.f32.mrb[171].mxu0  ;;  %8126 = vrot.lane.b32.xlu0 %v8086_v42, %s9584_s15  ;;  %7426 = vrot.lane.b32.xlu1 %v8086_v42, %s9582_s13  ;;  %v7855_v28 = vpop.permute.xlu0 %7854 }
 0x674   : > { %v7038_v13 = vadd.f32 %v11860_v43, %v9247_v37  ;;  %v9250_v53 = vadd.f32 %v9249_v20, %v9248_v29  ;;  %v7663_v2 = vpop.permute.xlu1 %7662  ;;  %7902 = vst.msk [vmem:[#allocation3 + $0x8] sm:$0xff] %vm551_vm3, %v7855_v28 }
 0x675   : > { %7710 = vst.msk [vmem:[#allocation3] sm:$0xff] %vm809_vm5, %v7663_v2 }
 0x676   : > { %v7103_v35 = vmul.f32 %v11842_v62, %v7038_v13  ;;  %v7041_v47 = vadd.f32 %v11865_v9, %v9250_v53  ;;  %v8265_v16 = vld [vmem:[#allocation3 + $0xd0] sm:$0xff]  ;;  %v7936_v40 = vld [vmem:[#allocation2 + $0x108] sm:$0xff] }
 0x677   : > { %7872 = vrot.lane.b32.xlu0 %v8214_v57, %s9582_s13  ;;  %7554 = vrot.lane.b32.xlu1 %v8214_v57, %s9583_s14  ;;  %v8064_v33 = vld [vmem:[#allocation2 + $0x109] sm:$0xff] }
 0x678   : > { %v7140_v43 = vadd.f32 %v11848_v17, %v7103_v35  ;;  %v7104_v58 = vmul.f32 %v11842_v62, %v7041_v47  ;;  %9463 = vmatprep.subr.msk.bf16.mxu1 %vm253_vm0, %v8265_v16  ;;  %v7937_v9 = vld [vmem:[#allocation2 + $0x110] sm:$0xff]  ;;  %v7409_v41 = vpop.permute.xlu1 %7408  ;;  %v7300_v12 = vld [vmem:[#allocation2 + $0x108] sm:$0xff] }
 0x679   : > { %v8065_v15 = vld [vmem:[#allocation2 + $0x111] sm:$0xff]  ;;  %9294 = vmatpush3.bf16.xpose.msra.mxu1 %v8316_v48  ;;  %v7959_v50 = vpack.c.bf16 %v7937_v9, %v7936_v40  ;;  %7455 = vst.msk [vmem:[#allocation3 + $0x18] sm:$0xff] %vm551_vm3, %v7409_v41 }
 0x67a   : > { %v8192_v24 = vld [vmem:[#allocation2 + $0x10a] sm:$0xff]  ;;  %v8087_v14 = vpack.c.bf16 %v8065_v15, %v8064_v33  ;;  %v8193_v0 = vld [vmem:[#allocation2 + $0x112] sm:$0xff]  ;;  %vm7172_vm1 = vcmp.gt.f32.partialorder %v7140_v43, 0.0  ;;  %v7204_v46 = vmul.f32 0.01, %v7140_v43  ;;  %v7141_v63 = vadd.f32 %v11848_v17, %v7104_v58 }
 0x67b   : > { %v7301_v4 = vld [vmem:[#allocation2 + $0x110] sm:$0xff]  ;;  %v8215_v62 = vpack.c.bf16 %v8193_v0, %v8192_v24  ;;  %8000 = vrot.lane.b32.xlu0 %v7959_v50, %s9583_s14  ;;  %7682 = vrot.lane.b32.xlu1 %v7959_v50, %s9584_s15 }
 0x67c   : > { %v7321_v27 = vpack.c.bf16 %v7301_v4, %v7300_v12  ;;  %7784 = vst.msk [vmem:[#allocation3 + $0xf8] sm:$0xff] %vm253_vm0, %v8087_v14  ;;  %v7236_v38 = vsel %vm7172_vm1, %v7140_v43, %v7204_v46  ;;  %vm7173_vm2 = vcmp.gt.f32.partialorder %v7141_v63, 0.0  ;;  %v7205_v1 = vmul.f32 0.01, %v7141_v63  ;;  %v9251_v34 = vpop.f32.mrb[172].mxu0  ;;  %v7537_v22 = vpop.permute.xlu1 %7536  ;;  %v8239_v48 = vld [vmem:[#allocation3] sm:$0xff] }
 0x67d   : > { %8231 = vst.msk [vmem:[#allocation3 + $0xe8] sm:$0xff] %vm253_vm0, %v8215_v62  ;;  %7268 = vst.msk [vmem:[#allocation2 + $0x121] sm:$0xff] %vm253_vm0, %v7236_v38  ;;  %v9252_v17 = vpop.f32.mrb[173].mxu0  ;;  %v8247_v9 = vld [vmem:[#allocation3 + $0x40] sm:$0xff] }
 0x67e   : > { %7337 = vst.msk [vmem:[#allocation3 + $0x108] sm:$0xff] %vm253_vm0, %v7321_v27  ;;  %v7237_v61 = vsel %vm7173_vm2, %v7141_v63, %v7205_v1  ;;  %v9253_v44 = vadd.f32 %v9252_v17, %v9251_v34  ;;  %v9254_v7 = vpop.f32.mrb[174].mxu0  ;;  %v8322_v0 = vsel %vm253_vm0, %v8247_v9, 0 }
 0x67f   : > { %7583 = vst.msk [vmem:[#allocation3 + $0x18] sm:$0xff] %vm680_vm4, %v7537_v22  ;;  %v9255_v51 = vpop.f32.mrb[175].mxu0  ;;  %8128 = vrot.lane.b32.xlu0 %v8087_v14, %s9584_s15  ;;  %7428 = vrot.lane.b32.xlu1 %v8087_v14, %s9582_s13 }
 0x680   : > { %7269 = vst.msk [vmem:[#allocation2 + $0x129] sm:$0xff] %vm253_vm0, %v7237_v61  ;;  %v7046_v31 = vadd.f32 %v9253_v44, %v11919_v6  ;;  %v9256_v26 = vadd.f32 %v9255_v51, %v9254_v7  ;;  %v12089_v6 = vld [vmem:[%s12289_s3 + $0x3] ss:$0 sm:$0xff]  ;;  %v8250_v7 = vld [vmem:[#allocation3 + $0x58] sm:$0xff] }
 0x681   : > { %v7983_v36 = vpop.permute.xlu0 %7982  ;;  %v7665_v60 = vpop.permute.xlu1 %7664 }
 0x682   : > { %v7105_v30 = vmul.f32 %v12078_v49, %v7046_v31  ;;  %v7049_v57 = vadd.f32 %v9256_v26, %v11925_v39  ;;  %8030 = vst.msk [vmem:[#allocation3 + $0x8] sm:$0xff] %vm680_vm4, %v7983_v36  ;;  %v8319_v39 = vsel %vm253_vm0, %v8244_v52, 0 }
 0x683   : > { %7711 = vst.msk [vmem:[#allocation3 + $0x18] sm:$0xff] %vm809_vm5, %v7665_v60  ;;  %7874 = vrot.lane.b32.xlu0 %v8215_v62, %s9582_s13  ;;  %7556 = vrot.lane.b32.xlu1 %v8215_v62, %s9583_s14  ;;  %v8325_v60 = vsel %vm253_vm0, %v8250_v7, 0 }
 0x684   : > { %v8268_v54 = vld [vmem:[#allocation3 + $0xe8] sm:$0xff]  ;;  %v7142_v10 = vadd.f32 %v12089_v6, %v7105_v30  ;;  %v7106_v55 = vmul.f32 %v12078_v49, %v7049_v57  ;;  %v7938_v45 = vld [vmem:[#allocation2 + $0x120] sm:$0xff] }
 0x685   : > { %9464 = vmatprep.subr.msk.bf16.mxu1 %vm253_vm0, %v8268_v54  ;;  %v8111_v3 = vpop.permute.xlu0 %8110  ;;  %v7411_v21 = vpop.permute.xlu1 %7410  ;;  %v8066_v5 = vld [vmem:[#allocation2 + $0x121] sm:$0xff] }
 0x686   : > { %9296 = vmatpush3.bf16.xpose.msra.mxu1 %v8319_v39  ;;  %vm7174_vm6 = vcmp.gt.f32.partialorder %v7142_v10, 0.0  ;;  %v7206_v18 = vmul.f32 0.01, %v7142_v10  ;;  %v7143_v42 = vadd.f32 %v12089_v6, %v7106_v55  ;;  %8158 = vst.msk [vmem:[#allocation3 + $0x8] sm:$0xff] %vm809_vm5, %v8111_v3 }
 0x687   : > { %7456 = vst.msk [vmem:[#allocation3 + $0x30] sm:$0xff] %vm551_vm3, %v7411_v21  ;;  %v7939_v37 = vld [vmem:[#allocation2 + $0x128] sm:$0xff] }
 0x688   : > { %v8067_v29 = vld [vmem:[#allocation2 + $0x129] sm:$0xff]  ;;  %v7960_v13 = vpack.c.bf16 %v7939_v37, %v7938_v45  ;;  %v7238_v2 = vsel %vm7174_vm6, %v7142_v10, %v7206_v18  ;;  %vm7175_vm7 = vcmp.gt.f32.partialorder %v7143_v42, 0.0  ;;  %v7207_v11 = vmul.f32 0.01, %v7143_v42 }
 0x689   : > { %v8194_v20 = vld [vmem:[#allocation2 + $0x122] sm:$0xff]  ;;  %v8088_v53 = vpack.c.bf16 %v8067_v29, %v8066_v5  ;;  %v8195_v28 = vld [vmem:[#allocation2 + $0x12a] sm:$0xff]  ;;  %7270 = vst.msk [vmem:[#allocation2 + $0x139] sm:$0xff] %vm253_vm0, %v7238_v2  ;;  %v7857_v47 = vpop.permute.xlu0 %7856  ;;  %v7539_v16 = vpop.permute.xlu1 %7538 }
 0x68a   : > { %v8216_v35 = vpack.c.bf16 %v8195_v28, %v8194_v20  ;;  %8002 = vrot.lane.b32.xlu0 %v7960_v13, %s9583_s14  ;;  %7684 = vrot.lane.b32.xlu1 %v7960_v13, %s9584_s15  ;;  %7338 = vst.msk [vmem:[#allocation3 + $0x120] sm:$0xff] %vm253_vm0, %v7960_v13  ;;  %v7239_v40 = vsel %vm7175_vm7, %v7143_v42, %v7207_v11  ;;  %v8242_v44 = vld [vmem:[#allocation3 + $0x18] sm:$0xff] }
 0x68b   : > { %7785 = vst.msk [vmem:[#allocation3 + $0x110] sm:$0xff] %vm253_vm0, %v8088_v53  ;;  %7271 = vst.msk [vmem:[#allocation2 + $0x141] sm:$0xff] %vm253_vm0, %v7239_v40 }
 0x68c   : > { %7903 = vst.msk [vmem:[#allocation3 + $0x20] sm:$0xff] %vm551_vm3, %v7857_v47 }
 0x68d   : > { %7584 = vst.msk [vmem:[#allocation3 + $0x30] sm:$0xff] %vm680_vm4, %v7539_v16  ;;  %v7985_v33 = vpop.permute.xlu0 %7984  ;;  %v7667_v43 = vpop.permute.xlu1 %7666  ;;  %v8240_v58 = vld [vmem:[#allocation3 + $0x8] sm:$0xff] }
 0x68e   : > { %8232 = vst.msk [vmem:[#allocation3 + $0x100] sm:$0xff] %vm253_vm0, %v8216_v35  ;;  %8130 = vrot.lane.b32.xlu0 %v8088_v53, %s9584_s15  ;;  %7430 = vrot.lane.b32.xlu1 %v8088_v53, %s9582_s13 }
 0x68f   : > { %8031 = vst.msk [vmem:[#allocation3 + $0x20] sm:$0xff] %vm680_vm4, %v7985_v33  ;;  %8363 = vmatprep.subr.bf16.mxu0 %v8240_v58 }
 0x690   : > { %7712 = vst.msk [vmem:[#allocation3 + $0x30] sm:$0xff] %vm809_vm5, %v7667_v43  ;;  %8364 = vmatpush1.bf16.xpose.msra.mxu0 %v8239_v48  ;;  %v7940_v50 = vld [vmem:[#allocation2 + $0x138] sm:$0xff] }
 0x691   : > { %v8113_v24 = vpop.permute.xlu0 %8112  ;;  %v7413_v41 = vpop.permute.xlu1 %7412  ;;  %v8068_v14 = vld [vmem:[#allocation2 + $0x139] sm:$0xff] }
 0x692   : > { %7876 = vrot.lane.b32.xlu0 %v8216_v35, %s9582_s13  ;;  %7558 = vrot.lane.b32.xlu1 %v8216_v35, %s9583_s14  ;;  %8159 = vst.msk [vmem:[#allocation3 + $0x20] sm:$0xff] %vm809_vm5, %v8113_v24  ;;  %v7941_v4 = vld [vmem:[#allocation2 + $0x140] sm:$0xff] }
 0x693   : > { %7457 = vst.msk [vmem:[#allocation3 + $0x48] sm:$0xff] %vm551_vm3, %v7413_v41  ;;  %v8069_v46 = vld [vmem:[#allocation2 + $0x141] sm:$0xff]  ;;  %v7961_v62 = vpack.c.bf16 %v7941_v4, %v7940_v50 }
 0x694   : > { %v8196_v63 = vld [vmem:[#allocation2 + $0x13a] sm:$0xff]  ;;  %v8089_v12 = vpack.c.bf16 %v8069_v46, %v8068_v14  ;;  %v8197_v27 = vld [vmem:[#allocation2 + $0x142] sm:$0xff] }
 0x695   : > { %v8271_v15 = vld [vmem:[#allocation3 + $0x100] sm:$0xff]  ;;  %v8217_v38 = vpack.c.bf16 %v8197_v27, %v8196_v63  ;;  %v7859_v1 = vpop.permute.xlu0 %7858  ;;  %v7541_v34 = vpop.permute.xlu1 %7540  ;;  %7339 = vst.msk [vmem:[#allocation3 + $0x138] sm:$0xff] %vm253_vm0, %v7961_v62 }
 0x696   : > { %9465 = vmatprep.subr.msk.bf16.mxu1 %vm253_vm0, %v8271_v15  ;;  %8004 = vrot.lane.b32.xlu0 %v7961_v62, %s9583_s14  ;;  %7786 = vst.msk [vmem:[#allocation3 + $0x128] sm:$0xff] %vm253_vm0, %v8089_v12 }
 0x697   : > { %9298 = vmatpush3.bf16.xpose.msra.mxu1 %v8322_v0  ;;  %7686 = vrot.lane.b32.xlu1 %v7961_v62, %s9584_s15  ;;  %7904 = vst.msk [vmem:[#allocation3 + $0x38] sm:$0xff] %vm551_vm3, %v7859_v1  ;;  %v8245_v13 = vld [vmem:[#allocation3 + $0x30] sm:$0xff] }
 0x698   : > { %7585 = vst.msk [vmem:[#allocation3 + $0x48] sm:$0xff] %vm680_vm4, %v7541_v34 }
 0x699   : > { %8233 = vst.msk [vmem:[#allocation3 + $0x118] sm:$0xff] %vm253_vm0, %v8217_v38  ;;  %v7987_v17 = vpop.permute.xlu0 %7986  ;;  %v7669_v22 = vpop.permute.xlu1 %7668  ;;  %v8243_v61 = vld [vmem:[#allocation3 + $0x20] sm:$0xff] }
 0x69a   : > { %8132 = vrot.lane.b32.xlu0 %v8089_v12, %s9584_s15  ;;  %8032 = vst.msk [vmem:[#allocation3 + $0x38] sm:$0xff] %vm680_vm4, %v7987_v17  ;;  %8365 = vmatprep.subr.bf16.mxu0 %v8243_v61 }
 0x69b   : > { %7432 = vrot.lane.b32.xlu1 %v8089_v12, %s9582_s13  ;;  %7713 = vst.msk [vmem:[#allocation3 + $0x48] sm:$0xff] %vm809_vm5, %v7669_v22  ;;  %8366 = vmatpush1.bf16.xpose.msra.mxu0 %v8242_v44 }
 0x69d   : > { %v8115_v26 = vpop.permute.xlu0 %8114  ;;  %v7415_v52 = vpop.permute.xlu1 %7414 }
 0x69e   : > { %v9257_v51 = vpop.f32.mrb[176].mxu0  ;;  %7878 = vrot.lane.b32.xlu0 %v8217_v38, %s9582_s13  ;;  %8160 = vst.msk [vmem:[#allocation3 + $0x38] sm:$0xff] %vm809_vm5, %v8115_v26 }
 0x69f   : > { %7560 = vrot.lane.b32.xlu1 %v8217_v38, %s9583_s14  ;;  %v9258_v36 = vpop.f32.mrb[177].mxu0  ;;  %7458 = vst.msk [vmem:[#allocation3 + $0x60] sm:$0xff] %vm551_vm3, %v7415_v52 }
 0x6a0   : > { %v8274_v31 = vld [vmem:[#allocation3 + $0x118] sm:$0xff]  ;;  %v9259_v30 = vadd.f32 %v9258_v36, %v9257_v51  ;;  %v9260_v57 = vpop.f32.mrb[178].mxu0 }
 0x6a1   : > { %9466 = vmatprep.subr.msk.bf16.mxu1 %vm253_vm0, %v8274_v31  ;;  %v9261_v54 = vpop.f32.mrb[179].mxu0  ;;  %v7861_v39 = vpop.permute.xlu0 %7860 }
 0x6a2   : > { %9300 = vmatpush3.bf16.xpose.msra.mxu1 %v8325_v60  ;;  %v7054_v10 = vadd.f32 %v11913_v8, %v9259_v30  ;;  %v9262_v55 = vadd.f32 %v9261_v54, %v9260_v57  ;;  %7905 = vst.msk [vmem:[#allocation3 + $0x50] sm:$0xff] %vm551_vm3, %v7861_v39  ;;  %v7543_v3 = vpop.permute.xlu1 %7542  ;;  %v8248_v22 = vld [vmem:[#allocation3 + $0x48] sm:$0xff] }
 0x6a3   : > { %7586 = vst.msk [vmem:[#allocation3 + $0x60] sm:$0xff] %vm680_vm4, %v7543_v3 }
 0x6a4   : > { %v7107_v21 = vmul.f32 %v12078_v49, %v7054_v10  ;;  %v7057_v45 = vadd.f32 %v11921_v19, %v9262_v55 }
 0x6a5   : > { %v7989_v37 = vpop.permute.xlu0 %7988  ;;  %v8246_v29 = vld [vmem:[#allocation3 + $0x38] sm:$0xff] }
 0x6a6   : > { %v7144_v5 = vadd.f32 %v12089_v6, %v7107_v21  ;;  %v7108_v18 = vmul.f32 %v12078_v49, %v7057_v45  ;;  %v9263_v42 = vpop.f32.mrb[180].mxu0  ;;  %8033 = vst.msk [vmem:[#allocation3 + $0x50] sm:$0xff] %vm680_vm4, %v7989_v37  ;;  %v7671_v8 = vpop.permute.xlu1 %7670  ;;  %8367 = vmatprep.subr.bf16.mxu0 %v8246_v29 }
 0x6a7   : > { %v9264_v20 = vpop.f32.mrb[181].mxu0  ;;  %7714 = vst.msk [vmem:[#allocation3 + $0x60] sm:$0xff] %vm809_vm5, %v7671_v8  ;;  %8368 = vmatpush1.bf16.xpose.msra.mxu0 %v8245_v13 }
 0x6a8   : > { %vm7176_vm8 = vcmp.gt.f32.partialorder %v7144_v5, 0.0  ;;  %v7208_v53 = vmul.f32 0.01, %v7144_v5  ;;  %v7145_v28 = vadd.f32 %v12089_v6, %v7108_v18  ;;  %v9265_v19 = vadd.f32 %v9264_v20, %v9263_v42  ;;  %v9266_v2 = vpop.f32.mrb[182].mxu0  ;;  %v8253_v20 = vld [vmem:[#allocation3 + $0x70] sm:$0xff] }
 0x6a9   : > { %v9267_v11 = vpop.f32.mrb[183].mxu0  ;;  %v8117_v40 = vpop.permute.xlu0 %8116 }
 0x6aa   : > { %v7240_v35 = vsel %vm7176_vm8, %v7144_v5, %v7208_v53  ;;  %vm7177_vm9 = vcmp.gt.f32.partialorder %v7145_v28, 0.0  ;;  %v7209_v47 = vmul.f32 0.01, %v7145_v28  ;;  %v9268_v16 = vadd.f32 %v9267_v11, %v9266_v2  ;;  %8161 = vst.msk [vmem:[#allocation3 + $0x50] sm:$0xff] %vm809_vm5, %v8117_v40  ;;  %v7417_v43 = vpop.permute.xlu1 %7416 }
 0x6ab   : > { %7272 = vst.msk [vmem:[#allocation2 + $0x151] sm:$0xff] %vm253_vm0, %v7240_v35  ;;  %v7062_v33 = vadd.f32 %v9265_v19, %v11942_v23 }
 0x6ac   : > { %v7241_v58 = vsel %vm7177_vm9, %v7145_v28, %v7209_v47  ;;  %v7065_v48 = vadd.f32 %v9268_v16, %v11948_v25  ;;  %7459 = vst.msk [vmem:[#allocation3 + $0x78] sm:$0xff] %vm551_vm3, %v7417_v43  ;;  %v8328_v16 = vsel %vm253_vm0, %v8253_v20, 0  ;;  %v8287_v20 = vld [vmem:[%s12291_s5] sm:$0xf] }
 0x6ad   : > { %7273 = vst.msk [vmem:[#allocation2 + $0x159] sm:$0xff] %vm253_vm0, %v7241_v58  ;;  %v7109_v9 = vmul.f32 %v12078_v49, %v7062_v33  ;;  %v7863_v41 = vpop.permute.xlu0 %7862 }
 0x6ae   : > { %v7110_v15 = vmul.f32 %v12078_v49, %v7065_v48  ;;  %v9269_v24 = vpop.f32.mrb[184].mxu0  ;;  %7906 = vst.msk [vmem:[#allocation3 + $0x68] sm:$0xff] %vm551_vm3, %v7863_v41  ;;  %v7545_v23 = vpop.permute.xlu1 %7544  ;;  %v8251_v40 = vld [vmem:[#allocation3 + $0x60] sm:$0xff] }
 0x6af   : > { %v7146_v50 = vadd.f32 %v12089_v6, %v7109_v9  ;;  %v9270_v14 = vpop.f32.mrb[185].mxu0  ;;  %7587 = vst.msk [vmem:[#allocation3 + $0x78] sm:$0xff] %vm680_vm4, %v7545_v23  ;;  %v8256_v9 = vld [vmem:[#allocation3 + $0x88] sm:$0xff] }
 0x6b0   : > { %v7147_v0 = vadd.f32 %v12089_v6, %v7110_v15  ;;  %v9271_v4 = vadd.f32 %v9270_v14, %v9269_v24  ;;  %v9272_v25 = vpop.f32.mrb[186].mxu0 }
 0x6b1   : > { %vm7178_vm10 = vcmp.gt.f32.partialorder %v7146_v50, 0.0  ;;  %v7210_v46 = vmul.f32 0.01, %v7146_v50  ;;  %v9273_v63 = vpop.f32.mrb[187].mxu0  ;;  %v7991_v38 = vpop.permute.xlu0 %7990  ;;  %v8249_v1 = vld [vmem:[#allocation3 + $0x50] sm:$0xff] }
 0x6b2   : > { %vm7179_vm11 = vcmp.gt.f32.partialorder %v7147_v0, 0.0  ;;  %v7211_v62 = vmul.f32 0.01, %v7147_v0  ;;  %v7070_v12 = vadd.f32 %v11938_v59, %v9271_v4  ;;  %v9274_v27 = vadd.f32 %v9273_v63, %v9272_v25  ;;  %8034 = vst.msk [vmem:[#allocation3 + $0x68] sm:$0xff] %vm680_vm4, %v7991_v38  ;;  %v7673_v17 = vpop.permute.xlu1 %7672  ;;  %8369 = vmatprep.subr.bf16.mxu0 %v8249_v1  ;;  %v7942_v61 = vld [vmem:[#allocation2 + $0x150] sm:$0xff] }
 0x6b3   : > { %v7242_v34 = vsel %vm7178_vm10, %v7146_v50, %v7210_v46  ;;  %v8070_v44 = vld [vmem:[#allocation2 + $0x151] sm:$0xff]  ;;  %7715 = vst.msk [vmem:[#allocation3 + $0x78] sm:$0xff] %vm809_vm5, %v7673_v17  ;;  %8370 = vmatpush1.bf16.xpose.msra.mxu0 %v8248_v22  ;;  %v8331_v4 = vsel %vm253_vm0, %v8256_v9, 0 }
 0x6b4   : > { %7274 = vst.msk [vmem:[#allocation2 + $0x169] sm:$0xff] %vm253_vm0, %v7242_v34  ;;  %v7243_v7 = vsel %vm7179_vm11, %v7147_v0, %v7211_v62  ;;  %v7111_v51 = vmul.f32 %v12078_v49, %v7070_v12  ;;  %v7073_v31 = vadd.f32 %v11946_v56, %v9274_v27  ;;  %v7943_v59 = vld [vmem:[#allocation2 + $0x158] sm:$0xff]  ;;  %v8259_v1 = vld [vmem:[#allocation3 + $0xa0] sm:$0xff] }
 0x6b5   : > { %v8071_v26 = vld [vmem:[#allocation2 + $0x159] sm:$0xff]  ;;  %7275 = vst.msk [vmem:[#allocation2 + $0x171] sm:$0xff] %vm253_vm0, %v7243_v7  ;;  %v7962_v60 = vpack.c.bf16 %v7943_v59, %v7942_v61  ;;  %v8119_v10 = vpop.permute.xlu0 %8118  ;;  %v8286_v61 = vld [vmem:[#allocation3 + $0x178] sm:$0xff] }
 0x6b6   : > { %v8198_v36 = vld [vmem:[#allocation2 + $0x152] sm:$0xff]  ;;  %v8090_v52 = vpack.c.bf16 %v8071_v26, %v8070_v44  ;;  %v8199_v30 = vld [vmem:[#allocation2 + $0x15a] sm:$0xff]  ;;  %v7148_v57 = vadd.f32 %v12089_v6, %v7111_v51  ;;  %v7112_v54 = vmul.f32 %v12078_v49, %v7073_v31  ;;  %8162 = vst.msk [vmem:[#allocation3 + $0x68] sm:$0xff] %vm809_vm5, %v8119_v10  ;;  %v7419_v56 = vpop.permute.xlu1 %7418  ;;  %v8334_v44 = vsel %vm253_vm0, %v8259_v1, 0  ;;  %v8262_v26 = vld [vmem:[#allocation3 + $0xb8] sm:$0xff] }
 0x6b7   : > { %v8218_v55 = vpack.c.bf16 %v8199_v30, %v8198_v36  ;;  %8006 = vrot.lane.b32.xlu0 %v7962_v60, %s9583_s14  ;;  %7688 = vrot.lane.b32.xlu1 %v7962_v60, %s9584_s15  ;;  %7340 = vst.msk [vmem:[#allocation3 + $0x150] sm:$0xff] %vm253_vm0, %v7962_v60  ;;  %v8076_v31 = vld [vmem:[#allocation2 + $0x199] sm:$0xff]  ;;  %v8077_v59 = vld [vmem:[#allocation2 + $0x1a1] sm:$0xff]  ;;  %v9585_v36 = vmov 1983009808  }
 0x6b8   : > { %7787 = vst.msk [vmem:[#allocation3 + $0x140] sm:$0xff] %vm253_vm0, %v8090_v52  ;;  %vm7180_vm12 = vcmp.gt.f32.partialorder %v7148_v57, 0.0  ;;  %v7212_v39 = vmul.f32 0.01, %v7148_v57  ;;  %v7149_v3 = vadd.f32 %v12089_v6, %v7112_v54  ;;  %v8296_v60 = vunpack.c.l.s4 %v9585_v36 }
 0x6b9   : > { %7460 = vst.msk [vmem:[#allocation3 + $0x90] sm:$0xff] %vm551_vm3, %v7419_v56  ;;  %v7865_v45 = vpop.permute.xlu0 %7864  ;;  %v8238_v56 = vld [vmem:[%s12290_s4] sm:$0x3f] }
 0x6ba   : > { %8234 = vst.msk [vmem:[#allocation3 + $0x130] sm:$0xff] %vm253_vm0, %v8218_v55  ;;  %v7244_v49 = vsel %vm7180_vm12, %v7148_v57, %v7212_v39  ;;  %vm7181_vm13 = vcmp.gt.f32.partialorder %v7149_v3, 0.0  ;;  %v7213_v21 = vmul.f32 0.01, %v7149_v3  ;;  %v7547_v5 = vpop.permute.xlu1 %7546  ;;  %v8254_v12 = vld [vmem:[#allocation3 + $0x78] sm:$0xff]  ;;  %v8297_v39 = vunpack.c.0.s8 %v8296_v60 }
 0x6bb   : > { %7276 = vst.msk [vmem:[#allocation2 + $0x181] sm:$0xff] %vm253_vm0, %v7244_v49  ;;  %8134 = vrot.lane.b32.xlu0 %v8090_v52, %s9584_s15  ;;  %7434 = vrot.lane.b32.xlu1 %v8090_v52, %s9582_s13  ;;  %v7944_v18 = vld [vmem:[#allocation2 + $0x168] sm:$0xff]  ;;  %v8298_v52 = vlaneseq  ;;  %v8337_v49 = vsel %vm253_vm0, %v8262_v26, 0 }
 0x6bc   : > { %7907 = vst.msk [vmem:[#allocation3 + $0x80] sm:$0xff] %vm551_vm3, %v7865_v45  ;;  %v7245_v42 = vsel %vm7181_vm13, %v7149_v3, %v7213_v21  ;;  %v7945_v6 = vld [vmem:[#allocation2 + $0x170] sm:$0xff]  ;;  %v8294_v21 = vcombine.high %v8238_v56, %v8238_v56 }
 0x6bd   : > { %7588 = vst.msk [vmem:[#allocation3 + $0x90] sm:$0xff] %vm680_vm4, %v7547_v5  ;;  %v8200_v37 = vld [vmem:[#allocation2 + $0x16a] sm:$0xff]  ;;  %v8201_v29 = vld [vmem:[#allocation2 + $0x172] sm:$0xff]  ;;  %v7963_v8 = vpack.c.bf16 %v7945_v6, %v7944_v18  ;;  %v7993_v19 = vpop.permute.xlu0 %7992  ;;  %v8299_v3 = vshrl.u32 %v8298_v52, 7 }
 0x6be   : > { %7277 = vst.msk [vmem:[#allocation2 + $0x189] sm:$0xff] %vm253_vm0, %v7245_v42  ;;  %v8219_v13 = vpack.c.bf16 %v8201_v29, %v8200_v37  ;;  %v8072_v53 = vld [vmem:[#allocation2 + $0x169] sm:$0xff]  ;;  %v8073_v28 = vld [vmem:[#allocation2 + $0x171] sm:$0xff]  ;;  %v7675_v47 = vpop.permute.xlu1 %7674 }
 0x6bf   : > { %v8252_v2 = vld [vmem:[#allocation3 + $0x68] sm:$0xff]  ;;  %v8091_v11 = vpack.c.bf16 %v8073_v28, %v8072_v53  ;;  %7880 = vrot.lane.b32.xlu0 %v8218_v55, %s9582_s13  ;;  %7562 = vrot.lane.b32.xlu1 %v8218_v55, %s9583_s14  ;;  %8035 = vst.msk [vmem:[#allocation3 + $0x80] sm:$0xff] %vm680_vm4, %v7993_v19  ;;  %v8093_v55 = vpack.c.bf16 %v8077_v59, %v8076_v31 }
 0x6c0   : > { %8235 = vst.msk [vmem:[#allocation3 + $0x148] sm:$0xff] %vm253_vm0, %v8219_v13  ;;  %7341 = vst.msk [vmem:[#allocation3 + $0x168] sm:$0xff] %vm253_vm0, %v7963_v8  ;;  %8371 = vmatprep.subr.bf16.mxu0 %v8252_v2  ;;  %v8300_v45 = vsub.s32 %v8297_v39, %v8299_v3 }
 0x6c1   : > { %v8277_v35 = vld [vmem:[#allocation3 + $0x130] sm:$0xff]  ;;  %7716 = vst.msk [vmem:[#allocation3 + $0x90] sm:$0xff] %vm809_vm5, %v7675_v47  ;;  %8372 = vmatpush1.bf16.xpose.msra.mxu0 %v8251_v40  ;;  %v8121_v33 = vpop.permute.xlu0 %8120 }
 0x6c2   : > { %9467 = vmatprep.subr.msk.bf16.mxu1 %vm253_vm0, %v8277_v35  ;;  %7788 = vst.msk [vmem:[#allocation3 + $0x158] sm:$0xff] %vm253_vm0, %v8091_v11  ;;  %v7421_v43 = vpop.permute.xlu1 %7420  ;;  %v8074_v24 = vld [vmem:[#allocation2 + $0x181] sm:$0xff]  ;;  %v12223_v42 = vrot.slane %v8238_v56, %v8300_v45  ;;  %v8308_v6 = vrot.slane %v8294_v21, %v8300_v45 }
 0x6c3   : > { %9302 = vmatpush3.bf16.xpose.msra.mxu1 %v8328_v16  ;;  %8008 = vrot.lane.b32.xlu0 %v7963_v8, %s9583_s14  ;;  %8163 = vst.msk [vmem:[#allocation3 + $0x80] sm:$0xff] %vm809_vm5, %v8121_v33  ;;  %v7946_v27 = vld [vmem:[#allocation2 + $0x180] sm:$0xff] }
 0x6c4   : > { %7690 = vrot.lane.b32.xlu1 %v7963_v8, %s9584_s15  ;;  %7461 = vst.msk [vmem:[#allocation3 + $0xa8] sm:$0xff] %vm551_vm3, %v7421_v43  ;;  %v8309_v37 = vcombine.high %v12223_v42, %v12223_v42  ;;  %9309 = vmatprep.mubr.msk.bf16.mxu1 %vm253_vm0, %v8308_v6 }
 0x6c5   : > { %v8202_v58 = vld [vmem:[#allocation2 + $0x182] sm:$0xff]  ;;  %v8203_v48 = vld [vmem:[#allocation2 + $0x18a] sm:$0xff]  ;;  %v7867_v14 = vpop.permute.xlu0 %7866 }
 0x6c6   : > { %v8220_v15 = vpack.c.bf16 %v8203_v48, %v8202_v58  ;;  %v8075_v41 = vld [vmem:[#allocation2 + $0x189] sm:$0xff]  ;;  %7908 = vst.msk [vmem:[#allocation3 + $0x98] sm:$0xff] %vm551_vm3, %v7867_v14  ;;  %v7549_v0 = vpop.permute.xlu1 %7548  ;;  %8395 = vmatprep.mubr.bf16.mxu0 %v8309_v37 }
 0x6c7   : > { %v8280_v50 = vld [vmem:[#allocation3 + $0x148] sm:$0xff]  ;;  %v8092_v23 = vpack.c.bf16 %v8075_v41, %v8074_v24  ;;  %8136 = vrot.lane.b32.xlu0 %v8091_v11, %s9584_s15  ;;  %7589 = vst.msk [vmem:[#allocation3 + $0xa8] sm:$0xff] %vm680_vm4, %v7549_v0  ;;  %v7947_v63 = vld [vmem:[#allocation2 + $0x188] sm:$0xff] }
 0x6c8   : > { %9468 = vmatprep.subr.msk.bf16.mxu1 %vm253_vm0, %v8280_v50  ;;  %8236 = vst.msk [vmem:[#allocation3 + $0x160] sm:$0xff] %vm253_vm0, %v8220_v15  ;;  %7436 = vrot.lane.b32.xlu1 %v8091_v11, %s9582_s13  ;;  %v7964_v38 = vpack.c.bf16 %v7947_v63, %v7946_v27  ;;  %v8257_v10 = vld [vmem:[#allocation3 + $0x90] sm:$0xff] }
 0x6c9   : > { %7789 = vst.msk [vmem:[#allocation3 + $0x170] sm:$0xff] %vm253_vm0, %v8092_v23  ;;  %v7995_v25 = vpop.permute.xlu0 %7994 }
 0x6ca   : > { %v8255_v46 = vld [vmem:[#allocation3 + $0x80] sm:$0xff]  ;;  %8036 = vst.msk [vmem:[#allocation3 + $0x98] sm:$0xff] %vm680_vm4, %v7995_v25  ;;  %v7677_v62 = vpop.permute.xlu1 %7676 }
 0x6cb   : > { %9304 = vmatpush3.bf16.xpose.msra.mxu1 %v8331_v4  ;;  %7882 = vrot.lane.b32.xlu0 %v8219_v13, %s9582_s13  ;;  %7717 = vst.msk [vmem:[#allocation3 + $0xa8] sm:$0xff] %vm809_vm5, %v7677_v62 }
 0x6cc   : > { %8373 = vmatprep.subr.bf16.mxu0 %v8255_v46  ;;  %7564 = vrot.lane.b32.xlu1 %v8219_v13, %s9583_s14  ;;  %v9586_v13 = vmov 0  }
 0x6cd   : > { %8374 = vmatpush1.bf16.xpose.msra.mxu0 %v8254_v12  ;;  %v8123_v17 = vpop.permute.xlu0 %8122  ;;  %9485 = vset.pattern.permute.xlu0 %v9586_v13 }
 0x6ce   : > { %8164 = vst.msk [vmem:[#allocation3 + $0x98] sm:$0xff] %vm809_vm5, %v8123_v17  ;;  %v7423_v22 = vpop.permute.xlu1 %7422 }
 0x6cf   : > { %v8283_v34 = vld [vmem:[#allocation3 + $0x160] sm:$0xff]  ;;  %8010 = vrot.lane.b32.xlu0 %v7964_v38, %s9583_s14  ;;  %7462 = vst.msk [vmem:[#allocation3 + $0xc0] sm:$0xff] %vm551_vm3, %v7423_v22 }
 0x6d0   : > { %9469 = vmatprep.subr.msk.bf16.mxu1 %vm253_vm0, %v8283_v34  ;;  %7692 = vrot.lane.b32.xlu1 %v7964_v38, %s9584_s15 }
 0x6d1   : > { %v7869_v7 = vpop.permute.xlu0 %7868 }
 0x6d2   : > { %7909 = vst.msk [vmem:[#allocation3 + $0xb0] sm:$0xff] %vm551_vm3, %v7869_v7  ;;  %v7551_v51 = vpop.permute.xlu1 %7550  ;;  %v8260_v2 = vld [vmem:[#allocation3 + $0xa8] sm:$0xff] }
 0x6d3   : > { %9306 = vmatpush3.bf16.xpose.msra.mxu1 %v8334_v44  ;;  %8138 = vrot.lane.b32.xlu0 %v8092_v23, %s9584_s15  ;;  %7590 = vst.msk [vmem:[#allocation3 + $0xc0] sm:$0xff] %vm680_vm4, %v7551_v51 }
 0x6d4   : > { %9470 = vmatprep.subr.msk.bf16.mxu1 %vm253_vm0, %v8286_v61 }
 0x6d5   : > { %v7997_v30 = vpop.permute.xlu0 %7996  ;;  %v8258_v57 = vld [vmem:[#allocation3 + $0x98] sm:$0xff] }
 0x6d6   : > { %8037 = vst.msk [vmem:[#allocation3 + $0xb0] sm:$0xff] %vm680_vm4, %v7997_v30  ;;  %v7679_v54 = vpop.permute.xlu1 %7678  ;;  %8375 = vmatprep.subr.bf16.mxu0 %v8258_v57 }
 0x6d7   : > { %7884 = vrot.lane.b32.xlu0 %v8220_v15, %s9582_s13  ;;  %7718 = vst.msk [vmem:[#allocation3 + $0xc0] sm:$0xff] %vm809_vm5, %v7679_v54  ;;  %8376 = vmatpush1.bf16.xpose.msra.mxu0 %v8257_v10 }
 0x6d9   : > { %v8125_v5 = vpop.permute.xlu0 %8124 }
 0x6da   : > { %8165 = vst.msk [vmem:[#allocation3 + $0xb0] sm:$0xff] %vm809_vm5, %v8125_v5  ;;  %v7425_v18 = vpop.permute.xlu1 %7424 }
 0x6db   : > { %9308 = vmatpush3.bf16.xpose.msra.mxu1 %v8337_v49  ;;  %8140 = vrot.lane.b32.xlu0 %v8093_v55, %s9584_s15  ;;  %7463 = vst.msk [vmem:[#allocation3 + $0xd8] sm:$0xff] %vm551_vm3, %v7425_v18  ;;  %s8772_s15 = sshll.u32 %s12294_s22, 3 }
 0x6dc   : > { %s251_s20 = scalar_lea.vmem %s12292_s6, %s8772_s15 }
 0x6dd   : > { %v7871_v29 = vpop.permute.xlu0 %7870 }
 0x6de   : > { %7910 = vst.msk [vmem:[#allocation3 + $0xc8] sm:$0xff] %vm551_vm3, %v7871_v29  ;;  %v7553_v8 = vpop.permute.xlu1 %7552  ;;  %v8263_v58 = vld [vmem:[#allocation3 + $0xc0] sm:$0xff] }
 0x6df   : > { %7591 = vst.msk [vmem:[#allocation3 + $0xd8] sm:$0xff] %vm680_vm4, %v7553_v8  ;;  %8290 = vperm.xlu0 %9485, %v8287_v20  }
 0x6e1   : > { %v7999_v53 = vpop.permute.xlu0 %7998  ;;  %v8261_v28 = vld [vmem:[#allocation3 + $0xb0] sm:$0xff] }
 0x6e2   : > { %9310 = vmatmul.mubr.msk.bf16.vlgmr.msra.gmra.mrb[196].mxu1 %vm253_vm0, %v8308_v6  ;;  %8038 = vst.msk [vmem:[#allocation3 + $0xc8] sm:$0xff] %vm680_vm4, %v7999_v53  ;;  %v7681_v19 = vpop.permute.xlu1 %7680  ;;  %8377 = vmatprep.subr.bf16.mxu0 %v8261_v28 }
 0x6e3   : > { %7719 = vst.msk [vmem:[#allocation3 + $0xd8] sm:$0xff] %vm809_vm5, %v7681_v19  ;;  %8378 = vmatpush1.bf16.xpose.msra.mxu0 %v8260_v2 }
 0x6e5   : > { %v8127_v11 = vpop.permute.xlu0 %8126 }
 0x6e6   : > { %8166 = vst.msk [vmem:[#allocation3 + $0xc8] sm:$0xff] %vm809_vm5, %v8127_v11  ;;  %v7427_v35 = vpop.permute.xlu1 %7426 }
 0x6e7   : > { %7464 = vst.msk [vmem:[#allocation3 + $0xf0] sm:$0xff] %vm551_vm3, %v7427_v35 }
 0x6e9   : > { %v7873_v47 = vpop.permute.xlu0 %7872 }
 0x6ea   : > { %7911 = vst.msk [vmem:[#allocation3 + $0xe0] sm:$0xff] %vm551_vm3, %v7873_v47  ;;  %v7555_v16 = vpop.permute.xlu1 %7554  ;;  %v8266_v50 = vld [vmem:[#allocation3 + $0xd8] sm:$0xff] }
 0x6eb   : > { %7592 = vst.msk [vmem:[#allocation3 + $0xf0] sm:$0xff] %vm680_vm4, %v7555_v16 }
 0x6ed   : > { %v8001_v40 = vpop.permute.xlu0 %8000  ;;  %v8264_v33 = vld [vmem:[#allocation3 + $0xc8] sm:$0xff] }
 0x6ee   : > { %8039 = vst.msk [vmem:[#allocation3 + $0xe0] sm:$0xff] %vm680_vm4, %v8001_v40  ;;  %v7683_v43 = vpop.permute.xlu1 %7682  ;;  %8379 = vmatprep.subr.bf16.mxu0 %v8264_v33 }
 0x6ef   : > { %7720 = vst.msk [vmem:[#allocation3 + $0xf0] sm:$0xff] %vm809_vm5, %v7683_v43  ;;  %8380 = vmatpush1.bf16.xpose.msra.mxu0 %v8263_v58 }
 0x6f1   : > { %v8129_v48 = vpop.permute.xlu0 %8128 }
 0x6f2   : > { %8167 = vst.msk [vmem:[#allocation3 + $0xe0] sm:$0xff] %vm809_vm5, %v8129_v48  ;;  %v7429_v9 = vpop.permute.xlu1 %7428 }
 0x6f3   : > { %7465 = vst.msk [vmem:[#allocation3 + $0x108] sm:$0xff] %vm551_vm3, %v7429_v9 }
 0x6f5   : > { %v7875_v15 = vpop.permute.xlu0 %7874 }
 0x6f6   : > { %7912 = vst.msk [vmem:[#allocation3 + $0xf8] sm:$0xff] %vm551_vm3, %v7875_v15  ;;  %v7557_v24 = vpop.permute.xlu1 %7556  ;;  %v8269_v27 = vld [vmem:[#allocation3 + $0xf0] sm:$0xff] }
 0x6f7   : > { %7593 = vst.msk [vmem:[#allocation3 + $0x108] sm:$0xff] %vm680_vm4, %v7557_v24 }
 0x6f9   : > { %v8267_v41 = vld [vmem:[#allocation3 + $0xe0] sm:$0xff] }
 0x6fa   : > { %8381 = vmatprep.subr.bf16.mxu0 %v8267_v41 }
 0x6fb   : > { %8382 = vmatpush1.bf16.xpose.msra.mxu0 %v8266_v50 }
 0x6fc   : > { %v8003_v14 = vpop.permute.xlu0 %8002  ;;  %v7685_v23 = vpop.permute.xlu1 %7684 }
 0x6fd   : > { %8040 = vst.msk [vmem:[#allocation3 + $0xf8] sm:$0xff] %vm680_vm4, %v8003_v14 }
 0x6fe   : > { %7721 = vst.msk [vmem:[#allocation3 + $0x108] sm:$0xff] %vm809_vm5, %v7685_v23 }
 0x700   : > { %v8131_v0 = vpop.permute.xlu0 %8130  ;;  %v7431_v4 = vpop.permute.xlu1 %7430 }
 0x701   : > { %8168 = vst.msk [vmem:[#allocation3 + $0xf8] sm:$0xff] %vm809_vm5, %v8131_v0 }
 0x702   : > { %7466 = vst.msk [vmem:[#allocation3 + $0x120] sm:$0xff] %vm551_vm3, %v7431_v4 }
 0x704   : > { %v7877_v25 = vpop.permute.xlu0 %7876  ;;  %v7559_v46 = vpop.permute.xlu1 %7558 }
 0x705   : > { %7913 = vst.msk [vmem:[#allocation3 + $0x110] sm:$0xff] %vm551_vm3, %v7877_v25  ;;  %v8272_v61 = vld [vmem:[#allocation3 + $0x108] sm:$0xff] }
 0x706   : > { %7594 = vst.msk [vmem:[#allocation3 + $0x120] sm:$0xff] %vm680_vm4, %v7559_v46 }
 0x708   : > { %v8005_v63 = vpop.permute.xlu0 %8004  ;;  %v8270_v12 = vld [vmem:[#allocation3 + $0xf8] sm:$0xff] }
 0x709   : > { %v7687_v62 = vpop.permute.xlu1 %7686  ;;  %8041 = vst.msk [vmem:[#allocation3 + $0x110] sm:$0xff] %vm680_vm4, %v8005_v63  ;;  %8383 = vmatprep.subr.bf16.mxu0 %v8270_v12 }
 0x70a   : > { %7722 = vst.msk [vmem:[#allocation3 + $0x120] sm:$0xff] %vm809_vm5, %v7687_v62  ;;  %8384 = vmatpush1.bf16.xpose.msra.mxu0 %v8269_v27 }
 0x70c   : > { %v8133_v38 = vpop.permute.xlu0 %8132 }
 0x70d   : > { %v7433_v1 = vpop.permute.xlu1 %7432  ;;  %8169 = vst.msk [vmem:[#allocation3 + $0x110] sm:$0xff] %vm809_vm5, %v8133_v38 }
 0x70e   : > { %7467 = vst.msk [vmem:[#allocation3 + $0x138] sm:$0xff] %vm551_vm3, %v7433_v1 }
 0x710   : > { %v7879_v34 = vpop.permute.xlu0 %7878 }
 0x711   : > { %v7561_v17 = vpop.permute.xlu1 %7560  ;;  %7914 = vst.msk [vmem:[#allocation3 + $0x128] sm:$0xff] %vm551_vm3, %v7879_v34  ;;  %v8275_v30 = vld [vmem:[#allocation3 + $0x120] sm:$0xff] }
 0x712   : > { %7595 = vst.msk [vmem:[#allocation3 + $0x138] sm:$0xff] %vm680_vm4, %v7561_v17 }
 0x714   : > { %v8273_v22 = vld [vmem:[#allocation3 + $0x110] sm:$0xff] }
 0x715   : > { %8385 = vmatprep.subr.bf16.mxu0 %v8273_v22 }
 0x716   : > { %8386 = vmatpush1.bf16.xpose.msra.mxu0 %v8272_v61 }
 0x729   : > { %v8007_v44 = vpop.permute.xlu0 %8006  ;;  %v7689_v7 = vpop.permute.xlu1 %7688 }
 0x72a   : > { %8042 = vst.msk [vmem:[#allocation3 + $0x128] sm:$0xff] %vm680_vm4, %v8007_v44 }
 0x72b   : > { %7723 = vst.msk [vmem:[#allocation3 + $0x138] sm:$0xff] %vm809_vm5, %v7689_v7 }
 0x72d   : > { %v8135_v51 = vpop.permute.xlu0 %8134  ;;  %v7435_v31 = vpop.permute.xlu1 %7434 }
 0x72e   : > { %8170 = vst.msk [vmem:[#allocation3 + $0x128] sm:$0xff] %vm809_vm5, %v8135_v51 }
 0x72f   : > { %7468 = vst.msk [vmem:[#allocation3 + $0x150] sm:$0xff] %vm551_vm3, %v7435_v31 }
 0x731   : > { %v7881_v59 = vpop.permute.xlu0 %7880  ;;  %v7563_v26 = vpop.permute.xlu1 %7562 }
 0x732   : > { %7915 = vst.msk [vmem:[#allocation3 + $0x140] sm:$0xff] %vm551_vm3, %v7881_v59  ;;  %v8278_v49 = vld [vmem:[#allocation3 + $0x138] sm:$0xff] }
 0x733   : > { %7596 = vst.msk [vmem:[#allocation3 + $0x150] sm:$0xff] %vm680_vm4, %v7563_v26 }
 0x735   : > { %v8009_v36 = vpop.permute.xlu0 %8008  ;;  %v8276_v52 = vld [vmem:[#allocation3 + $0x128] sm:$0xff] }
 0x736   : > { %v7691_v60 = vpop.permute.xlu1 %7690  ;;  %8043 = vst.msk [vmem:[#allocation3 + $0x140] sm:$0xff] %vm680_vm4, %v8009_v36  ;;  %8387 = vmatprep.subr.bf16.mxu0 %v8276_v52 }
 0x737   : > { %7724 = vst.msk [vmem:[#allocation3 + $0x150] sm:$0xff] %vm809_vm5, %v7691_v60  ;;  %8388 = vmatpush1.bf16.xpose.msra.mxu0 %v8275_v30 }
 0x739   : > { %v8137_v57 = vpop.permute.xlu0 %8136 }
 0x73a   : > { %8171 = vst.msk [vmem:[#allocation3 + $0x140] sm:$0xff] %vm809_vm5, %v8137_v57  ;;  %v7437_v54 = vpop.permute.xlu1 %7436 }
 0x73b   : > { %7469 = vst.msk [vmem:[#allocation3 + $0x168] sm:$0xff] %vm551_vm3, %v7437_v54 }
 0x73d   : > { %v7883_v10 = vpop.permute.xlu0 %7882 }
 0x73e   : > { %7916 = vst.msk [vmem:[#allocation3 + $0x158] sm:$0xff] %vm551_vm3, %v7883_v10  ;;  %v7565_v55 = vpop.permute.xlu1 %7564  ;;  %v8281_v6 = vld [vmem:[#allocation3 + $0x150] sm:$0xff] }
 0x73f   : > { %7597 = vst.msk [vmem:[#allocation3 + $0x168] sm:$0xff] %vm680_vm4, %v7565_v55 }
 0x741   : > { %v8011_v56 = vpop.permute.xlu0 %8010  ;;  %v8279_v39 = vld [vmem:[#allocation3 + $0x140] sm:$0xff] }
 0x742   : > { %8044 = vst.msk [vmem:[#allocation3 + $0x158] sm:$0xff] %vm680_vm4, %v8011_v56  ;;  %v7693_v3 = vpop.permute.xlu1 %7692  ;;  %8389 = vmatprep.subr.bf16.mxu0 %v8279_v39 }
 0x743   : > { %7725 = vst.msk [vmem:[#allocation3 + $0x168] sm:$0xff] %vm809_vm5, %v7693_v3  ;;  %8390 = vmatpush1.bf16.xpose.msra.mxu0 %v8278_v49 }
 0x745   : > { %v8139_v21 = vpop.permute.xlu0 %8138 }
 0x746   : > { %8172 = vst.msk [vmem:[#allocation3 + $0x158] sm:$0xff] %vm809_vm5, %v8139_v21 }
 0x749   : > { %v7885_v45 = vpop.permute.xlu0 %7884 }
 0x74a   : > { %7917 = vst.msk [vmem:[#allocation3 + $0x170] sm:$0xff] %vm551_vm3, %v7885_v45  ;;  %v8284_v29 = vld [vmem:[#allocation3 + $0x168] sm:$0xff] }
 0x74b   : > { %8045 = vst.msk [vmem:[#allocation3 + $0x170] sm:$0xff] %vm680_vm4, %v12043_v32 }
 0x74d   : > { %v8141_v5 = vpop.permute.xlu0 %8140  ;;  %v8282_v18 = vld [vmem:[#allocation3 + $0x158] sm:$0xff] }
 0x74e   : > { %8173 = vst.msk [vmem:[#allocation3 + $0x170] sm:$0xff] %vm809_vm5, %v8141_v5  ;;  %8391 = vmatprep.subr.bf16.mxu0 %v8282_v18 }
 0x74f   : > { %8392 = vmatpush1.bf16.xpose.msra.mxu0 %v8281_v6 }
 0x755   : > { %v8285_v37 = vld [vmem:[#allocation3 + $0x170] sm:$0xff] }
 0x756   : > { %8393 = vmatprep.subr.bf16.mxu0 %v8285_v37 }
 0x757   : > { %8394 = vmatpush1.bf16.xpose.msra.mxu0 %v8284_v29 }
 0x75e   : > { %8396 = vmatmul.mubr.bf16.vlgmr.msra.gmra.mrb[188].mxu0 %v12223_v42  ;;  %v8291_v28 = vpop.permute.xlu0 %8290 }
 0x7b5   : > { %v8438_v20 = vpop.f32.mrb[196].mxu1 }
 0x7b6   : > { %v8440_v8 = vpop.f32.mrb[197].mxu1 }
 0x7b7   : > { %v8442_v13 = vpop.f32.mrb[198].mxu1 }
 0x7b8   : > { %v8443_v53 = vpop.f32.mrb[199].mxu1 }
 0x831   : > { %v8397_v32 = vpop.f32.mrb[188].mxu0 }
 0x832   : > { %v8398_v19 = vadd.f32 %v8397_v32, %v8291_v28  ;;  %v8399_v2 = vpop.f32.mrb[189].mxu0 }
 0x833   : > { %v8400_v11 = vadd.f32 %v8399_v2, %v8291_v28  ;;  %v8401_v35 = vpop.f32.mrb[190].mxu0 }
 0x834   : > { %v8439_v47 = vadd.f32 %v8438_v20, %v8398_v19  ;;  %v8402_v16 = vpop.f32.mrb[191].mxu0 }
 0x835   : > { %v8441_v40 = vadd.f32 %v8440_v8, %v8400_v11 }
 0x836   : > { %9559 = vtanh.f32 %v8439_v47 }
 0x837   : > { %9561 = vtanh.f32 %v8441_v40 }
 0x840   : > { %v9560_v33 = vpop.eup %9559 }
 0x841   : > { %v9562_v43 = vpop.eup %9561 }
 0x842   : > { %v8449_v42 = vcombine.low %v9560_v33, %v9562_v43 }
 0x844   : > { %8451 = vst [vmem:[%s251_s20] sm:$0xff] %v8449_v42 }
 0x845 PF: > { %s16_s21 = sadd.s32 1, %s9579_s21  }
 0x846   : > { %p13_p4 = scmp.ge.s32.totalorder %s16_s21, 4  }
 0x848   :  { %15 = sbr.rel (!%p13_p4) target bundleno = 1 (0x1), region = 79 }

</bundles_post_ra>
